<compile_context>
chip_gen: v5e
topology: v5e:2x2
jax: 0.10.0
libtpu: 0.0.40
codegen_flags: <defaults>
</compile_context>

<pallas_src>
import functools

import numpy as np
import jax
import jax.numpy as jnp
from jax.experimental import pallas as pl
from jax.experimental.pallas import tpu as pltpu


# ---------------------------------------------------------------------------
# Fused whole-network kernel (runs once per batch element, grid-parallel)
# ---------------------------------------------------------------------------
def _make_kernel(plan, n_ops):
    def kernel(*refs):
        x_ref = refs[0]
        o_ref = refs[1 + n_ops]
        im_ref = refs[2 + n_ops]       # shared im2col scratch
        sig_ref = refs[3 + n_ops]      # shared padded / decimated signal scratch
        op_it = iter(refs[1:1 + n_ops])

        def nxt():
            return next(op_it)[...]

        f32, bf16 = jnp.float32, jnp.bfloat16
        act = x_ref[0]                                            # (1, in_dim) f32

        for lyr in plan:
            kind = lyr["kind"]

            # ---- encoder Conv1d(stride 4) + BN + LeakyReLU (PhaseShuffle(0)=id) --
            if kind == "econv":
                d_mat, w2t, shift = nxt(), nxt(), nxt()
                cin, kk, s = lyr["Cin"], lyr["K"], lyr["stride"]
                lo, lo4 = lyr["Lout"], lyr["Lo4"]
                # fold zero-pad + stride-4 selection into one small 0/1 matmul
                decim = jnp.dot(act.astype(bf16), d_mat,
                                preferred_element_type=f32)       # (Cin, s*Lo4)
                sig_ref[:cin, :s * lo4] = decim
                # im2col: every tap is a contiguous lane slice of a phase
                for j in range(kk):
                    b_off, r = j // s, j % s
                    st = r * lo4 + b_off
                    im_ref[j * cin:(j + 1) * cin, :lo] = sig_ref[:cin, st:st + lo]
                y = jnp.dot(w2t, im_ref[:kk * cin, :lo].astype(bf16),
                            preferred_element_type=f32) + shift   # (Cout, Lout)
                act = jnp.where(y > 0, y, 0.01 * y)               # nn.LeakyReLU() default

            # ---- Flatten + encoder fc (Linear + ReLU) on the VPU -----------------
            elif kind == "fc_vpu":
                w1t, b1 = nxt(), nxt()
                # act is (C_last, 1): broadcast-multiply + sublane reduce -> (1, latent)
                act = jnp.maximum(jnp.sum(w1t * act, axis=0, keepdims=True) + b1, 0.0)

            # ---- decoder fc (Linear + BN(1) + ReLU), conv zero-pad folded in -----
            elif kind == "fc_mxu":
                w2, b2 = nxt(), nxt()
                y = jnp.dot(act.astype(bf16), w2, preferred_element_type=f32) + b2
                act = jnp.maximum(y, 0.0)                         # (1, dec_len + 2*padc)

            # ---- decoder: polyphase upsample-conv + BN + ReLU (+ Tanh) -----------
            else:  # "dconv"
                wstk, shift = nxt(), nxt()
                cin, cout = lyr["Cin"], lyr["Cout"]
                lin, aa, padc = lyr["Lin"], lyr["A"], lyr["padc"]
                sig_ref[:cin, :lin + 2 * padc] = act              # compact padded input
                for a in range(aa):                               # 13 contiguous taps
                    im_ref[a * cin:(a + 1) * cin, :lin] = sig_ref[:cin, a:a + lin]
                y = jnp.dot(wstk, im_ref[:aa * cin, :lin].astype(bf16),
                            preferred_element_type=f32) + shift   # (2*Cout, Lin) phases
                y = jnp.maximum(y, 0.0)                           # nn.ReLU()
                if lyr["last"]:
                    o_ref[0] = jnp.tanh(y)                        # (2, Lin) even/odd rows
                else:
                    p_mat = nxt()
                    # interleave even/odd phases + zero-pad for the next block
                    z = jnp.concatenate([y[:cout, :], y[cout:, :]], axis=1)  # (Cout, 2Lin)
                    act = jnp.dot(z.astype(bf16), p_mat,
                                  preferred_element_type=f32)     # (Cout, 2Lin + 2*padc)

    return kernel


def wavegan_generator_v2_forward(packed, x_ncl, *, plan, dims):
    """packed: flat operand list from pack_model. x_ncl: (B, 1, in_dim) PyTorch NCL."""
    batch, _, in_dim = x_ncl.shape
    n_ops = len(packed)
    half = dims["half_out"]

    in_specs = [pl.BlockSpec((1, 1, in_dim), lambda b: (b, 0, 0))]
    in_specs += [pl.BlockSpec(op.shape, lambda b: (0, 0)) for op in packed]

    y = pl.pallas_call(
        _make_kernel(plan, n_ops),
        grid=(batch,),
        in_specs=in_specs,
        out_specs=pl.BlockSpec((1, 2, half), lambda b: (b, 0, 0)),
        out_shape=jax.ShapeDtypeStruct((batch, 2, half), jnp.float32),
        scratch_shapes=[
            pltpu.VMEM((dims["im_rows"], dims["im_cols"]), jnp.float32),
            pltpu.VMEM((dims["sig_rows"], dims["sig_cols"]), jnp.float32),
        ],
        compiler_params=pltpu.CompilerParams(dimension_semantics=("parallel",)),
    )(x_ncl, *packed)

    # interleave the even/odd polyphase halves outside the kernel (pure layout)
    return jnp.transpose(y, (0, 2, 1)).reshape(batch, 1, 2 * half)


# ---------------------------------------------------------------------------
# One-time host-side packing: BN folding, polyphase/decimation construction
# ---------------------------------------------------------------------------
def _round_up(x, m):
    return ((x + m - 1) // m) * m


def pack_model(params, cfg):
    f32, bf16 = jnp.float32, jnp.bfloat16
    k = cfg["kernel_size"]
    se, pe = cfg["enc_stride"], cfg["enc_pad"]
    up, pd = cfg["upsample"], cfg["dec_pad"]
    assert up == 2, "polyphase decoder path assumes nearest x2 upsample"
    assert pd % 2 == 0 and k == 2 * pd + 1, "polyphase assumes l_out == 2*l_in"

    def bn_fold(b, bn):
        b = np.asarray(b, np.float64)
        if bn is None:
            return np.ones_like(b), b
        gamma, beta, mean, var = (np.asarray(t, np.float64) for t in bn)
        g = gamma / np.sqrt(var + 1e-5)
        return g, (b - mean) * g + beta

    plan, ops = [], []
    im_rows = im_cols = sig_rows = sig_cols = 1

    # -------- encoder conv blocks --------
    L = cfg["in_dim"]
    for p in params["enc_conv"]:
        w = np.asarray(p["w"], np.float64)                       # (Cout, Cin, K)
        cout, cin, _ = w.shape
        lo = (L + 2 * pe - k) // se + 1
        lo4 = lo + (k - 1) // se + 1
        # decimation/pad matrix: D[t, r*lo4 + m] = 1  iff  se*m + r == t + pe
        D = np.zeros((L, se * lo4), np.float32)
        for t in range(L):
            q = t + pe
            r, m = q % se, q // se
            if m < lo4:
                D[t, r * lo4 + m] = 1.0
        g, sh = bn_fold(p["b"], p["bn"])
        w2t = w.transpose(0, 2, 1).reshape(cout, k * cin) * g[:, None]
        plan.append(dict(kind="econv", K=k, stride=se, Cin=cin, Cout=cout,
                         Lin=L, Lout=lo, Lo4=lo4))
        ops += [jnp.asarray(D, bf16), jnp.asarray(w2t, bf16),
                jnp.asarray(sh.reshape(cout, 1), f32)]
        im_rows = max(im_rows, k * cin)
        im_cols = max(im_cols, lo)
        sig_rows = max(sig_rows, cin)
        sig_cols = max(sig_cols, se * lo4)
        L = lo
    assert L == 1, "fused flatten assumes the encoder collapses length to 1"

    # -------- encoder fc (Linear + ReLU) on the VPU --------
    p = params["enc_fc"]
    plan.append(dict(kind="fc_vpu"))
    ops += [jnp.asarray(np.asarray(p["w_t"], np.float32)),        # (C_last, latent)
            jnp.asarray(np.asarray(p["b"], np.float32).reshape(1, -1))]

    # -------- decoder fc (Linear + BN(1) + ReLU), zero-pad folded in --------
    p = params["dec_fc"]
    g, sh = bn_fold(p["b"], p["bn"])
    w_t = np.asarray(p["w_t"], np.float64) * g                    # (latent, dec_len)
    dec_len = cfg["dec_fc_length"]
    padc = pd // 2
    w_pad = np.zeros((w_t.shape[0], dec_len + 2 * padc), np.float32)
    w_pad[:, padc:padc + dec_len] = w_t
    b_pad = np.zeros((1, dec_len + 2 * padc), np.float32)
    b_pad[0, padc:padc + dec_len] = sh
    plan.append(dict(kind="fc_mxu"))
    ops += [jnp.asarray(w_pad, bf16), jnp.asarray(b_pad, f32)]

    # -------- decoder conv blocks (polyphase; no explicit upsample) --------
    Lin = dec_len
    n_dec = len(params["dec_conv"])
    A = 2 * padc + 1                                              # taps per phase (13)
    for i, p in enumerate(params["dec_conv"]):
        w = np.asarray(p["w"], np.float64)                        # (Cout, Cin, K)
        cout, cin, _ = w.shape
        g, sh = bn_fold(p["b"], p["bn"])
        # pre-summed polyphase kernels (even / odd output positions)
        wz = np.zeros((cout, cin, k + 2), np.float64)
        wz[:, :, 1:k + 1] = w                                     # wz[.,.,j+1] = w[.,.,j]
        ke = np.zeros((cout, cin, A), np.float64)
        ko = np.zeros((cout, cin, A), np.float64)
        for ai, a in enumerate(range(-padc, padc + 1)):
            ke[:, :, ai] = wz[:, :, 2 * a + pd + 1] + wz[:, :, 2 * a + pd + 2]
            ko[:, :, ai] = wz[:, :, 2 * a + pd] + wz[:, :, 2 * a + pd + 1]
        wstk = np.concatenate([ke, ko], axis=0)                   # (2*Cout, Cin, A)
        wstk = wstk.transpose(0, 2, 1).reshape(2 * cout, A * cin) * np.tile(g, 2)[:, None]
        shift = np.tile(sh, 2).reshape(2 * cout, 1)
        last = i == n_dec - 1
        plan.append(dict(kind="dconv", A=A, padc=padc, Cin=cin, Cout=cout,
                         Lin=Lin, last=last))
        ops += [jnp.asarray(wstk, bf16), jnp.asarray(shift, f32)]
        if not last:
            # interleave-and-pad matrix for the next block's compact padded input
            P = np.zeros((2 * Lin, 2 * Lin + 2 * padc), np.float32)
            for m in range(Lin):
                P[m, padc + 2 * m] = 1.0                          # even phase
                P[Lin + m, padc + 2 * m + 1] = 1.0                # odd phase
            ops.append(jnp.asarray(P, bf16))
        im_rows = max(im_rows, A * cin)
        im_cols = max(im_cols, Lin)
        sig_rows = max(sig_rows, cin)
        sig_cols = max(sig_cols, Lin + 2 * padc)
        Lin *= 2

    dims = dict(
        im_rows=_round_up(im_rows, 8), im_cols=_round_up(im_cols, 128),
        sig_rows=_round_up(sig_rows, 8), sig_cols=_round_up(sig_cols, 128),
        out_len=Lin, half_out=Lin // 2,
    )
    return tuple(plan), ops, dims


# ---------------------------------------------------------------------------
# Deterministic synthetic parameters (no checkpoint)
# ---------------------------------------------------------------------------
def init_params(key, cfg):
    def conv_params(k, c_in, c_out, ksz, use_bn):
        ks = jax.random.split(k, 6)
        w = jax.random.normal(ks[0], (c_out, c_in, ksz), jnp.float32) / jnp.sqrt(c_in * ksz)
        b = jax.random.normal(ks[1], (c_out,), jnp.float32) * 0.01
        bn = None
        if use_bn:
            bn = (jax.random.uniform(ks[2], (c_out,), jnp.float32, 0.8, 1.2),
                  jax.random.normal(ks[3], (c_out,), jnp.float32) * 0.05,
                  jax.random.normal(ks[4], (c_out,), jnp.float32) * 0.05,
                  jax.random.uniform(ks[5], (c_out,), jnp.float32, 0.8, 1.2))
        return {"w": w, "b": b, "bn": bn}

    def linear_params(k, d_in, d_out):
        ks = jax.random.split(k, 2)
        w_t = jax.random.normal(ks[0], (d_in, d_out), jnp.float32) / jnp.sqrt(d_in)
        b = jax.random.normal(ks[1], (d_out,), jnp.float32) * 0.01
        return {"w_t": w_t, "b": b}

    keys = jax.random.split(key, 16)
    ki = iter(keys)
    params = {}

    enc = cfg["enc_channels"]
    params["enc_conv"] = [
        conv_params(next(ki), ci, co, cfg["kernel_size"], cfg["use_bn"])
        for ci, co in zip(enc, enc[1:])
    ]

    fc_in_dim = (cfg["in_dim"] // cfg["enc_stride"] ** (len(enc) - 1)) * enc[-1]
    params["enc_fc"] = linear_params(next(ki), fc_in_dim, cfg["latent_dim"])

    dec = cfg["dec_channels"]
    dec_fc_out_dim = dec[0] * cfg["dec_fc_length"]
    p = linear_params(next(ki), cfg["latent_dim"], dec_fc_out_dim)
    if cfg["use_bn"]:
        ks = jax.random.split(next(ki), 4)
        p["bn"] = (jax.random.uniform(ks[0], (), jnp.float32, 0.8, 1.2),
                   jax.random.normal(ks[1], ()) * 0.05,
                   jax.random.normal(ks[2], ()) * 0.05,
                   jax.random.uniform(ks[3], (), jnp.float32, 0.8, 1.2))
    else:
        p["bn"] = None
    params["dec_fc"] = p

    dec_io = list(zip(dec, dec[1:])) + [(dec[-1], 1)]
    params["dec_conv"] = [
        conv_params(next(ki), ci, co, cfg["kernel_size"], cfg["use_bn"])
        for ci, co in dec_io
    ]
    return params


# ---------------------------------------------------------------------------
if __name__ == "__main__":
    # Small configuration consistent with the module (in_dim a power of 2 with
    # in_dim == enc_stride**4 so the flatten is trivial; channels scaled down).
    cfg = dict(
        in_dim=256,
        latent_dim=32,
        kernel_size=25,
        enc_channels=[1, 16, 32, 32, 64],
        dec_channels=[1, 64, 32, 32, 16],
        enc_stride=4,
        enc_pad=11,
        dec_pad=12,
        upsample=2,     # => decoder stride = 1
        use_bn=True,
    )
    cfg["dec_fc_length"] = cfg["in_dim"] // cfg["upsample"] ** len(cfg["dec_channels"])  # 8

    key = jax.random.PRNGKey(0)
    k_params, k_x = jax.random.split(key)
    params = init_params(k_params, cfg)

    # one-time host-side packing (hoisted out of the jitted forward)
    plan, packed, dims = pack_model(params, cfg)
    assert dims["out_len"] == cfg["in_dim"], (dims["out_len"], cfg["in_dim"])

    # PyTorch-layout input: (batch=2, channels=1, length=in_dim)
    x = jax.random.normal(k_x, (2, 1, cfg["in_dim"]), jnp.float32)

    fwd = jax.jit(functools.partial(wavegan_generator_v2_forward, plan=plan, dims=dims))
    y = fwd(packed, x)
    jax.block_until_ready(y)

    assert y.shape == (2, 1, cfg["in_dim"]), y.shape
    assert bool(jnp.all(jnp.isfinite(y)))
    # reference module ends with BN+ReLU inside the last block, then Tanh
    assert bool(jnp.all(y >= 0.0)) and bool(jnp.all(y < 1.0))
    print("KERNEL_OK")
</pallas_src>

<mosaic_0001>
module attributes {stable_mosaic.version = 11 : i64} {
  func.func @kernel(%arg0: i32, %arg1: memref<1x1x256xf32, #tpu.memory_space<vmem>>, %arg2: memref<256x284xbf16, #tpu.memory_space<vmem>>, %arg3: memref<16x25xbf16, #tpu.memory_space<vmem>>, %arg4: memref<16x1xf32, #tpu.memory_space<vmem>>, %arg5: memref<64x92xbf16, #tpu.memory_space<vmem>>, %arg6: memref<32x400xbf16, #tpu.memory_space<vmem>>, %arg7: memref<32x1xf32, #tpu.memory_space<vmem>>, %arg8: memref<16x44xbf16, #tpu.memory_space<vmem>>, %arg9: memref<32x800xbf16, #tpu.memory_space<vmem>>, %arg10: memref<32x1xf32, #tpu.memory_space<vmem>>, %arg11: memref<4x32xbf16, #tpu.memory_space<vmem>>, %arg12: memref<64x800xbf16, #tpu.memory_space<vmem>>, %arg13: memref<64x1xf32, #tpu.memory_space<vmem>>, %arg14: memref<64x32xf32, #tpu.memory_space<vmem>>, %arg15: memref<1x32xf32, #tpu.memory_space<vmem>>, %arg16: memref<32x20xbf16, #tpu.memory_space<vmem>>, %arg17: memref<1x20xf32, #tpu.memory_space<vmem>>, %arg18: memref<128x13xbf16, #tpu.memory_space<vmem>>, %arg19: memref<128x1xf32, #tpu.memory_space<vmem>>, %arg20: memref<16x28xbf16, #tpu.memory_space<vmem>>, %arg21: memref<64x832xbf16, #tpu.memory_space<vmem>>, %arg22: memref<64x1xf32, #tpu.memory_space<vmem>>, %arg23: memref<32x44xbf16, #tpu.memory_space<vmem>>, %arg24: memref<64x416xbf16, #tpu.memory_space<vmem>>, %arg25: memref<64x1xf32, #tpu.memory_space<vmem>>, %arg26: memref<64x76xbf16, #tpu.memory_space<vmem>>, %arg27: memref<32x416xbf16, #tpu.memory_space<vmem>>, %arg28: memref<32x1xf32, #tpu.memory_space<vmem>>, %arg29: memref<128x140xbf16, #tpu.memory_space<vmem>>, %arg30: memref<2x208xbf16, #tpu.memory_space<vmem>>, %arg31: memref<2x1xf32, #tpu.memory_space<vmem>>, %arg32: memref<1x2x128xf32, #tpu.memory_space<vmem>>, %arg33: memref<832x128xf32, #tpu.memory_space<vmem>>, %arg34: memref<64x384xf32, #tpu.memory_space<vmem>>) attributes {dimension_semantics = [#tpu.dimension_semantics<parallel>], iteration_bounds = array<i64: 2>, scalar_prefetch = 0 : i64, scratch_operands = 2 : i64, tpu.core_type = #tpu.core_type<tc>, window_params = [{transform_indices = @transform_0, window_bounds = array<i64: 1, 1, 256>}, {pipeline_mode = #tpu.pipeline_mode<synchronous>, transform_indices = @transform_1, window_bounds = array<i64: 256, 284>}, {pipeline_mode = #tpu.pipeline_mode<synchronous>, transform_indices = @transform_2, window_bounds = array<i64: 16, 25>}, {pipeline_mode = #tpu.pipeline_mode<synchronous>, transform_indices = @transform_3, window_bounds = array<i64: 16, 1>}, {pipeline_mode = #tpu.pipeline_mode<synchronous>, transform_indices = @transform_4, window_bounds = array<i64: 64, 92>}, {pipeline_mode = #tpu.pipeline_mode<synchronous>, transform_indices = @transform_5, window_bounds = array<i64: 32, 400>}, {pipeline_mode = #tpu.pipeline_mode<synchronous>, transform_indices = @transform_6, window_bounds = array<i64: 32, 1>}, {pipeline_mode = #tpu.pipeline_mode<synchronous>, transform_indices = @transform_7, window_bounds = array<i64: 16, 44>}, {pipeline_mode = #tpu.pipeline_mode<synchronous>, transform_indices = @transform_8, window_bounds = array<i64: 32, 800>}, {pipeline_mode = #tpu.pipeline_mode<synchronous>, transform_indices = @transform_9, window_bounds = array<i64: 32, 1>}, {pipeline_mode = #tpu.pipeline_mode<synchronous>, transform_indices = @transform_10, window_bounds = array<i64: 4, 32>}, {pipeline_mode = #tpu.pipeline_mode<synchronous>, transform_indices = @transform_11, window_bounds = array<i64: 64, 800>}, {pipeline_mode = #tpu.pipeline_mode<synchronous>, transform_indices = @transform_12, window_bounds = array<i64: 64, 1>}, {pipeline_mode = #tpu.pipeline_mode<synchronous>, transform_indices = @transform_13, window_bounds = array<i64: 64, 32>}, {pipeline_mode = #tpu.pipeline_mode<synchronous>, transform_indices = @transform_14, window_bounds = array<i64: 1, 32>}, {pipeline_mode = #tpu.pipeline_mode<synchronous>, transform_indices = @transform_15, window_bounds = array<i64: 32, 20>}, {pipeline_mode = #tpu.pipeline_mode<synchronous>, transform_indices = @transform_16, window_bounds = array<i64: 1, 20>}, {pipeline_mode = #tpu.pipeline_mode<synchronous>, transform_indices = @transform_17, window_bounds = array<i64: 128, 13>}, {pipeline_mode = #tpu.pipeline_mode<synchronous>, transform_indices = @transform_18, window_bounds = array<i64: 128, 1>}, {pipeline_mode = #tpu.pipeline_mode<synchronous>, transform_indices = @transform_19, window_bounds = array<i64: 16, 28>}, {pipeline_mode = #tpu.pipeline_mode<synchronous>, transform_indices = @transform_20, window_bounds = array<i64: 64, 832>}, {pipeline_mode = #tpu.pipeline_mode<synchronous>, transform_indices = @transform_21, window_bounds = array<i64: 64, 1>}, {pipeline_mode = #tpu.pipeline_mode<synchronous>, transform_indices = @transform_22, window_bounds = array<i64: 32, 44>}, {pipeline_mode = #tpu.pipeline_mode<synchronous>, transform_indices = @transform_23, window_bounds = array<i64: 64, 416>}, {pipeline_mode = #tpu.pipeline_mode<synchronous>, transform_indices = @transform_24, window_bounds = array<i64: 64, 1>}, {pipeline_mode = #tpu.pipeline_mode<synchronous>, transform_indices = @transform_25, window_bounds = array<i64: 64, 76>}, {pipeline_mode = #tpu.pipeline_mode<synchronous>, transform_indices = @transform_26, window_bounds = array<i64: 32, 416>}, {pipeline_mode = #tpu.pipeline_mode<synchronous>, transform_indices = @transform_27, window_bounds = array<i64: 32, 1>}, {pipeline_mode = #tpu.pipeline_mode<synchronous>, transform_indices = @transform_28, window_bounds = array<i64: 128, 140>}, {pipeline_mode = #tpu.pipeline_mode<synchronous>, transform_indices = @transform_29, window_bounds = array<i64: 2, 208>}, {pipeline_mode = #tpu.pipeline_mode<synchronous>, transform_indices = @transform_30, window_bounds = array<i64: 2, 1>}, {transform_indices = @transform_31, window_bounds = array<i64: 1, 2, 128>}]} {
    %c0 = arith.constant 0 : index
    %c0_0 = arith.constant 0 : index
    %c0_1 = arith.constant 0 : index
    %0 = vector.load %arg1[%c0, %c0_0, %c0_1] : memref<1x1x256xf32, #tpu.memory_space<vmem>>, vector<1x1x256xf32>
    %1 = vector.shape_cast %0 : vector<1x1x256xf32> to vector<1x256xf32>
    %c0_2 = arith.constant 0 : index
    %c0_3 = arith.constant 0 : index
    %2 = vector.load %arg2[%c0_2, %c0_3] : memref<256x284xbf16, #tpu.memory_space<vmem>>, vector<256x284xbf16>
    %c0_4 = arith.constant 0 : index
    %c0_5 = arith.constant 0 : index
    %3 = vector.load %arg3[%c0_4, %c0_5] : memref<16x25xbf16, #tpu.memory_space<vmem>>, vector<16x25xbf16>
    %c0_6 = arith.constant 0 : index
    %c0_7 = arith.constant 0 : index
    %4 = vector.load %arg4[%c0_6, %c0_7] : memref<16x1xf32, #tpu.memory_space<vmem>>, vector<16x1xf32>
    %5 = arith.truncf %1 : vector<1x256xf32> to vector<1x256xbf16>
    %cst = arith.constant dense<0.000000e+00> : vector<1x284xf32>
    %6 = tpu.matmul %5, %2, %cst {dimension_numbers = #tpu.dot_dimension_numbers<[1], [0], [0], [1], [0, 0, 1, 1], [], []>} : vector<1x256xbf16>, vector<256x284xbf16>, vector<1x284xf32> -> vector<1x284xf32>
    %c0_8 = arith.constant 0 : index
    %c0_9 = arith.constant 0 : index
    %7 = vector.load %arg34[%c0_8, %c0_9] : memref<64x384xf32, #tpu.memory_space<vmem>>, vector<1x284xf32>
    tpu.vector_store %arg34[%c0_8, %c0_9], %6 {strides = array<i32>} : memref<64x384xf32, #tpu.memory_space<vmem>>, vector<1x284xf32>,
    %c0_10 = arith.constant 0 : index
    %c0_11 = arith.constant 0 : index
    %8 = vector.load %arg34[%c0_10, %c0_11] : memref<64x384xf32, #tpu.memory_space<vmem>>, vector<1x64xf32>
    %c0_12 = arith.constant 0 : index
    %c0_13 = arith.constant 0 : index
    %9 = vector.load %arg33[%c0_12, %c0_13] : memref<832x128xf32, #tpu.memory_space<vmem>>, vector<1x64xf32>
    tpu.vector_store %arg33[%c0_12, %c0_13], %8 {strides = array<i32>} : memref<832x128xf32, #tpu.memory_space<vmem>>, vector<1x64xf32>,
    %c0_14 = arith.constant 0 : index
    %c71 = arith.constant 71 : index
    %10 = vector.load %arg34[%c0_14, %c71] : memref<64x384xf32, #tpu.memory_space<vmem>>, vector<1x64xf32>
    %c1 = arith.constant 1 : index
    %c0_15 = arith.constant 0 : index
    %11 = vector.load %arg33[%c1, %c0_15] : memref<832x128xf32, #tpu.memory_space<vmem>>, vector<1x64xf32>
    tpu.vector_store %arg33[%c1, %c0_15], %10 {strides = array<i32>} : memref<832x128xf32, #tpu.memory_space<vmem>>, vector<1x64xf32>,
    %c0_16 = arith.constant 0 : index
    %c142 = arith.constant 142 : index
    %12 = vector.load %arg34[%c0_16, %c142] : memref<64x384xf32, #tpu.memory_space<vmem>>, vector<1x64xf32>
    %c2 = arith.constant 2 : index
    %c0_17 = arith.constant 0 : index
    %13 = vector.load %arg33[%c2, %c0_17] : memref<832x128xf32, #tpu.memory_space<vmem>>, vector<1x64xf32>
    tpu.vector_store %arg33[%c2, %c0_17], %12 {strides = array<i32>} : memref<832x128xf32, #tpu.memory_space<vmem>>, vector<1x64xf32>,
    %c0_18 = arith.constant 0 : index
    %c213 = arith.constant 213 : index
    %14 = vector.load %arg34[%c0_18, %c213] : memref<64x384xf32, #tpu.memory_space<vmem>>, vector<1x64xf32>
    %c3 = arith.constant 3 : index
    %c0_19 = arith.constant 0 : index
    %15 = vector.load %arg33[%c3, %c0_19] : memref<832x128xf32, #tpu.memory_space<vmem>>, vector<1x64xf32>
    tpu.vector_store %arg33[%c3, %c0_19], %14 {strides = array<i32>} : memref<832x128xf32, #tpu.memory_space<vmem>>, vector<1x64xf32>,
    %c0_20 = arith.constant 0 : index
    %c1_21 = arith.constant 1 : index
    %16 = vector.load %arg34[%c0_20, %c1_21] : memref<64x384xf32, #tpu.memory_space<vmem>>, vector<1x64xf32>
    %c4 = arith.constant 4 : index
    %c0_22 = arith.constant 0 : index
    %17 = vector.load %arg33[%c4, %c0_22] : memref<832x128xf32, #tpu.memory_space<vmem>>, vector<1x64xf32>
    tpu.vector_store %arg33[%c4, %c0_22], %16 {strides = array<i32>} : memref<832x128xf32, #tpu.memory_space<vmem>>, vector<1x64xf32>,
    %c0_23 = arith.constant 0 : index
    %c72 = arith.constant 72 : index
    %18 = vector.load %arg34[%c0_23, %c72] : memref<64x384xf32, #tpu.memory_space<vmem>>, vector<1x64xf32>
    %c5 = arith.constant 5 : index
    %c0_24 = arith.constant 0 : index
    %19 = vector.load %arg33[%c5, %c0_24] : memref<832x128xf32, #tpu.memory_space<vmem>>, vector<1x64xf32>
    tpu.vector_store %arg33[%c5, %c0_24], %18 {strides = array<i32>} : memref<832x128xf32, #tpu.memory_space<vmem>>, vector<1x64xf32>,
    %c0_25 = arith.constant 0 : index
    %c143 = arith.constant 143 : index
    %20 = vector.load %arg34[%c0_25, %c143] : memref<64x384xf32, #tpu.memory_space<vmem>>, vector<1x64xf32>
    %c6 = arith.constant 6 : index
    %c0_26 = arith.constant 0 : index
    %21 = vector.load %arg33[%c6, %c0_26] : memref<832x128xf32, #tpu.memory_space<vmem>>, vector<1x64xf32>
    tpu.vector_store %arg33[%c6, %c0_26], %20 {strides = array<i32>} : memref<832x128xf32, #tpu.memory_space<vmem>>, vector<1x64xf32>,
    %c0_27 = arith.constant 0 : index
    %c214 = arith.constant 214 : index
    %22 = vector.load %arg34[%c0_27, %c214] : memref<64x384xf32, #tpu.memory_space<vmem>>, vector<1x64xf32>
    %c7 = arith.constant 7 : index
    %c0_28 = arith.constant 0 : index
    %23 = vector.load %arg33[%c7, %c0_28] : memref<832x128xf32, #tpu.memory_space<vmem>>, vector<1x64xf32>
    tpu.vector_store %arg33[%c7, %c0_28], %22 {strides = array<i32>} : memref<832x128xf32, #tpu.memory_space<vmem>>, vector<1x64xf32>,
    %c0_29 = arith.constant 0 : index
    %c2_30 = arith.constant 2 : index
    %24 = vector.load %arg34[%c0_29, %c2_30] : memref<64x384xf32, #tpu.memory_space<vmem>>, vector<1x64xf32>
    %c8 = arith.constant 8 : index
    %c0_31 = arith.constant 0 : index
    %25 = vector.load %arg33[%c8, %c0_31] : memref<832x128xf32, #tpu.memory_space<vmem>>, vector<1x64xf32>
    tpu.vector_store %arg33[%c8, %c0_31], %24 {strides = array<i32>} : memref<832x128xf32, #tpu.memory_space<vmem>>, vector<1x64xf32>,
    %c0_32 = arith.constant 0 : index
    %c73 = arith.constant 73 : index
    %26 = vector.load %arg34[%c0_32, %c73] : memref<64x384xf32, #tpu.memory_space<vmem>>, vector<1x64xf32>
    %c9 = arith.constant 9 : index
    %c0_33 = arith.constant 0 : index
    %27 = vector.load %arg33[%c9, %c0_33] : memref<832x128xf32, #tpu.memory_space<vmem>>, vector<1x64xf32>
    tpu.vector_store %arg33[%c9, %c0_33], %26 {strides = array<i32>} : memref<832x128xf32, #tpu.memory_space<vmem>>, vector<1x64xf32>,
    %c0_34 = arith.constant 0 : index
    %c144 = arith.constant 144 : index
    %28 = vector.load %arg34[%c0_34, %c144] : memref<64x384xf32, #tpu.memory_space<vmem>>, vector<1x64xf32>
    %c10 = arith.constant 10 : index
    %c0_35 = arith.constant 0 : index
    %29 = vector.load %arg33[%c10, %c0_35] : memref<832x128xf32, #tpu.memory_space<vmem>>, vector<1x64xf32>
    tpu.vector_store %arg33[%c10, %c0_35], %28 {strides = array<i32>} : memref<832x128xf32, #tpu.memory_space<vmem>>, vector<1x64xf32>,
    %c0_36 = arith.constant 0 : index
    %c215 = arith.constant 215 : index
    %30 = vector.load %arg34[%c0_36, %c215] : memref<64x384xf32, #tpu.memory_space<vmem>>, vector<1x64xf32>
    %c11 = arith.constant 11 : index
    %c0_37 = arith.constant 0 : index
    %31 = vector.load %arg33[%c11, %c0_37] : memref<832x128xf32, #tpu.memory_space<vmem>>, vector<1x64xf32>
    tpu.vector_store %arg33[%c11, %c0_37], %30 {strides = array<i32>} : memref<832x128xf32, #tpu.memory_space<vmem>>, vector<1x64xf32>,
    %c0_38 = arith.constant 0 : index
    %c3_39 = arith.constant 3 : index
    %32 = vector.load %arg34[%c0_38, %c3_39] : memref<64x384xf32, #tpu.memory_space<vmem>>, vector<1x64xf32>
    %c12 = arith.constant 12 : index
    %c0_40 = arith.constant 0 : index
    %33 = vector.load %arg33[%c12, %c0_40] : memref<832x128xf32, #tpu.memory_space<vmem>>, vector<1x64xf32>
    tpu.vector_store %arg33[%c12, %c0_40], %32 {strides = array<i32>} : memref<832x128xf32, #tpu.memory_space<vmem>>, vector<1x64xf32>,
    %c0_41 = arith.constant 0 : index
    %c74 = arith.constant 74 : index
    %34 = vector.load %arg34[%c0_41, %c74] : memref<64x384xf32, #tpu.memory_space<vmem>>, vector<1x64xf32>
    %c13 = arith.constant 13 : index
    %c0_42 = arith.constant 0 : index
    %35 = vector.load %arg33[%c13, %c0_42] : memref<832x128xf32, #tpu.memory_space<vmem>>, vector<1x64xf32>
    tpu.vector_store %arg33[%c13, %c0_42], %34 {strides = array<i32>} : memref<832x128xf32, #tpu.memory_space<vmem>>, vector<1x64xf32>,
    %c0_43 = arith.constant 0 : index
    %c145 = arith.constant 145 : index
    %36 = vector.load %arg34[%c0_43, %c145] : memref<64x384xf32, #tpu.memory_space<vmem>>, vector<1x64xf32>
    %c14 = arith.constant 14 : index
    %c0_44 = arith.constant 0 : index
    %37 = vector.load %arg33[%c14, %c0_44] : memref<832x128xf32, #tpu.memory_space<vmem>>, vector<1x64xf32>
    tpu.vector_store %arg33[%c14, %c0_44], %36 {strides = array<i32>} : memref<832x128xf32, #tpu.memory_space<vmem>>, vector<1x64xf32>,
    %c0_45 = arith.constant 0 : index
    %c216 = arith.constant 216 : index
    %38 = vector.load %arg34[%c0_45, %c216] : memref<64x384xf32, #tpu.memory_space<vmem>>, vector<1x64xf32>
    %c15 = arith.constant 15 : index
    %c0_46 = arith.constant 0 : index
    %39 = vector.load %arg33[%c15, %c0_46] : memref<832x128xf32, #tpu.memory_space<vmem>>, vector<1x64xf32>
    tpu.vector_store %arg33[%c15, %c0_46], %38 {strides = array<i32>} : memref<832x128xf32, #tpu.memory_space<vmem>>, vector<1x64xf32>,
    %c0_47 = arith.constant 0 : index
    %c4_48 = arith.constant 4 : index
    %40 = vector.load %arg34[%c0_47, %c4_48] : memref<64x384xf32, #tpu.memory_space<vmem>>, vector<1x64xf32>
    %c16 = arith.constant 16 : index
    %c0_49 = arith.constant 0 : index
    %41 = vector.load %arg33[%c16, %c0_49] : memref<832x128xf32, #tpu.memory_space<vmem>>, vector<1x64xf32>
    tpu.vector_store %arg33[%c16, %c0_49], %40 {strides = array<i32>} : memref<832x128xf32, #tpu.memory_space<vmem>>, vector<1x64xf32>,
    %c0_50 = arith.constant 0 : index
    %c75 = arith.constant 75 : index
    %42 = vector.load %arg34[%c0_50, %c75] : memref<64x384xf32, #tpu.memory_space<vmem>>, vector<1x64xf32>
    %c17 = arith.constant 17 : index
    %c0_51 = arith.constant 0 : index
    %43 = vector.load %arg33[%c17, %c0_51] : memref<832x128xf32, #tpu.memory_space<vmem>>, vector<1x64xf32>
    tpu.vector_store %arg33[%c17, %c0_51], %42 {strides = array<i32>} : memref<832x128xf32, #tpu.memory_space<vmem>>, vector<1x64xf32>,
    %c0_52 = arith.constant 0 : index
    %c146 = arith.constant 146 : index
    %44 = vector.load %arg34[%c0_52, %c146] : memref<64x384xf32, #tpu.memory_space<vmem>>, vector<1x64xf32>
    %c18 = arith.constant 18 : index
    %c0_53 = arith.constant 0 : index
    %45 = vector.load %arg33[%c18, %c0_53] : memref<832x128xf32, #tpu.memory_space<vmem>>, vector<1x64xf32>
    tpu.vector_store %arg33[%c18, %c0_53], %44 {strides = array<i32>} : memref<832x128xf32, #tpu.memory_space<vmem>>, vector<1x64xf32>,
    %c0_54 = arith.constant 0 : index
    %c217 = arith.constant 217 : index
    %46 = vector.load %arg34[%c0_54, %c217] : memref<64x384xf32, #tpu.memory_space<vmem>>, vector<1x64xf32>
    %c19 = arith.constant 19 : index
    %c0_55 = arith.constant 0 : index
    %47 = vector.load %arg33[%c19, %c0_55] : memref<832x128xf32, #tpu.memory_space<vmem>>, vector<1x64xf32>
    tpu.vector_store %arg33[%c19, %c0_55], %46 {strides = array<i32>} : memref<832x128xf32, #tpu.memory_space<vmem>>, vector<1x64xf32>,
    %c0_56 = arith.constant 0 : index
    %c5_57 = arith.constant 5 : index
    %48 = vector.load %arg34[%c0_56, %c5_57] : memref<64x384xf32, #tpu.memory_space<vmem>>, vector<1x64xf32>
    %c20 = arith.constant 20 : index
    %c0_58 = arith.constant 0 : index
    %49 = vector.load %arg33[%c20, %c0_58] : memref<832x128xf32, #tpu.memory_space<vmem>>, vector<1x64xf32>
    tpu.vector_store %arg33[%c20, %c0_58], %48 {strides = array<i32>} : memref<832x128xf32, #tpu.memory_space<vmem>>, vector<1x64xf32>,
    %c0_59 = arith.constant 0 : index
    %c76 = arith.constant 76 : index
    %50 = vector.load %arg34[%c0_59, %c76] : memref<64x384xf32, #tpu.memory_space<vmem>>, vector<1x64xf32>
    %c21 = arith.constant 21 : index
    %c0_60 = arith.constant 0 : index
    %51 = vector.load %arg33[%c21, %c0_60] : memref<832x128xf32, #tpu.memory_space<vmem>>, vector<1x64xf32>
    tpu.vector_store %arg33[%c21, %c0_60], %50 {strides = array<i32>} : memref<832x128xf32, #tpu.memory_space<vmem>>, vector<1x64xf32>,
    %c0_61 = arith.constant 0 : index
    %c147 = arith.constant 147 : index
    %52 = vector.load %arg34[%c0_61, %c147] : memref<64x384xf32, #tpu.memory_space<vmem>>, vector<1x64xf32>
    %c22 = arith.constant 22 : index
    %c0_62 = arith.constant 0 : index
    %53 = vector.load %arg33[%c22, %c0_62] : memref<832x128xf32, #tpu.memory_space<vmem>>, vector<1x64xf32>
    tpu.vector_store %arg33[%c22, %c0_62], %52 {strides = array<i32>} : memref<832x128xf32, #tpu.memory_space<vmem>>, vector<1x64xf32>,
    %c0_63 = arith.constant 0 : index
    %c218 = arith.constant 218 : index
    %54 = vector.load %arg34[%c0_63, %c218] : memref<64x384xf32, #tpu.memory_space<vmem>>, vector<1x64xf32>
    %c23 = arith.constant 23 : index
    %c0_64 = arith.constant 0 : index
    %55 = vector.load %arg33[%c23, %c0_64] : memref<832x128xf32, #tpu.memory_space<vmem>>, vector<1x64xf32>
    tpu.vector_store %arg33[%c23, %c0_64], %54 {strides = array<i32>} : memref<832x128xf32, #tpu.memory_space<vmem>>, vector<1x64xf32>,
    %c0_65 = arith.constant 0 : index
    %c6_66 = arith.constant 6 : index
    %56 = vector.load %arg34[%c0_65, %c6_66] : memref<64x384xf32, #tpu.memory_space<vmem>>, vector<1x64xf32>
    %c24 = arith.constant 24 : index
    %c0_67 = arith.constant 0 : index
    %57 = vector.load %arg33[%c24, %c0_67] : memref<832x128xf32, #tpu.memory_space<vmem>>, vector<1x64xf32>
    tpu.vector_store %arg33[%c24, %c0_67], %56 {strides = array<i32>} : memref<832x128xf32, #tpu.memory_space<vmem>>, vector<1x64xf32>,
    %c0_68 = arith.constant 0 : index
    %c0_69 = arith.constant 0 : index
    %58 = vector.load %arg33[%c0_68, %c0_69] : memref<832x128xf32, #tpu.memory_space<vmem>>, vector<25x64xf32>
    %59 = arith.truncf %58 : vector<25x64xf32> to vector<25x64xbf16>
    %cst_70 = arith.constant dense<0.000000e+00> : vector<16x64xf32>
    %60 = tpu.matmul %3, %59, %cst_70 {dimension_numbers = #tpu.dot_dimension_numbers<[1], [0], [0], [1], [0, 0, 1, 1], [], []>} : vector<16x25xbf16>, vector<25x64xbf16>, vector<16x64xf32> -> vector<16x64xf32>
    %61 = vector.broadcast %4 : vector<16x1xf32> to vector<16x64xf32>
    %62 = arith.addf %60, %61 : vector<16x64xf32>
    %cst_71 = arith.constant 0.000000e+00 : f32
    %63 = vector.broadcast %cst_71 : f32 to vector<16x64xf32>
    %64 = arith.cmpf ogt, %62, %63 : vector<16x64xf32>
    %cst_72 = arith.constant 0.00999999977 : f32
    %65 = vector.broadcast %cst_72 : f32 to vector<16x64xf32>
    %66 = arith.mulf %65, %62 : vector<16x64xf32>
    %67 = arith.select %64, %62, %66 : vector<16x64xi1>, vector<16x64xf32>
    %c0_73 = arith.constant 0 : index
    %c0_74 = arith.constant 0 : index
    %68 = vector.load %arg5[%c0_73, %c0_74] : memref<64x92xbf16, #tpu.memory_space<vmem>>, vector<64x92xbf16>
    %c0_75 = arith.constant 0 : index
    %c0_76 = arith.constant 0 : index
    %69 = vector.load %arg6[%c0_75, %c0_76] : memref<32x400xbf16, #tpu.memory_space<vmem>>, vector<32x400xbf16>
    %c0_77 = arith.constant 0 : index
    %c0_78 = arith.constant 0 : index
    %70 = vector.load %arg7[%c0_77, %c0_78] : memref<32x1xf32, #tpu.memory_space<vmem>>, vector<32x1xf32>
    %71 = arith.truncf %67 : vector<16x64xf32> to vector<16x64xbf16>
    %cst_79 = arith.constant dense<0.000000e+00> : vector<16x92xf32>
    %72 = tpu.matmul %71, %68, %cst_79 {dimension_numbers = #tpu.dot_dimension_numbers<[1], [0], [0], [1], [0, 0, 1, 1], [], []>} : vector<16x64xbf16>, vector<64x92xbf16>, vector<16x92xf32> -> vector<16x92xf32>
    %c0_80 = arith.constant 0 : index
    %c0_81 = arith.constant 0 : index
    %73 = vector.load %arg34[%c0_80, %c0_81] : memref<64x384xf32, #tpu.memory_space<vmem>>, vector<16x92xf32>
    tpu.vector_store %arg34[%c0_80, %c0_81], %72 {strides = array<i32>} : memref<64x384xf32, #tpu.memory_space<vmem>>, vector<16x92xf32>,
    %c0_82 = arith.constant 0 : index
    %c0_83 = arith.constant 0 : index
    %74 = vector.load %arg34[%c0_82, %c0_83] : memref<64x384xf32, #tpu.memory_space<vmem>>, vector<16x16xf32>
    %c0_84 = arith.constant 0 : index
    %c0_85 = arith.constant 0 : index
    %75 = vector.load %arg33[%c0_84, %c0_85] : memref<832x128xf32, #tpu.memory_space<vmem>>, vector<16x16xf32>
    tpu.vector_store %arg33[%c0_84, %c0_85], %74 {strides = array<i32>} : memref<832x128xf32, #tpu.memory_space<vmem>>, vector<16x16xf32>,
    %c0_86 = arith.constant 0 : index
    %c23_87 = arith.constant 23 : index
    %76 = vector.load %arg34[%c0_86, %c23_87] : memref<64x384xf32, #tpu.memory_space<vmem>>, vector<16x16xf32>
    %c16_88 = arith.constant 16 : index
    %c0_89 = arith.constant 0 : index
    %77 = vector.load %arg33[%c16_88, %c0_89] : memref<832x128xf32, #tpu.memory_space<vmem>>, vector<16x16xf32>
    tpu.vector_store %arg33[%c16_88, %c0_89], %76 {strides = array<i32>} : memref<832x128xf32, #tpu.memory_space<vmem>>, vector<16x16xf32>,
    %c0_90 = arith.constant 0 : index
    %c46 = arith.constant 46 : index
    %78 = vector.load %arg34[%c0_90, %c46] : memref<64x384xf32, #tpu.memory_space<vmem>>, vector<16x16xf32>
    %c32 = arith.constant 32 : index
    %c0_91 = arith.constant 0 : index
    %79 = vector.load %arg33[%c32, %c0_91] : memref<832x128xf32, #tpu.memory_space<vmem>>, vector<16x16xf32>
    tpu.vector_store %arg33[%c32, %c0_91], %78 {strides = array<i32>} : memref<832x128xf32, #tpu.memory_space<vmem>>, vector<16x16xf32>,
    %c0_92 = arith.constant 0 : index
    %c69 = arith.constant 69 : index
    %80 = vector.load %arg34[%c0_92, %c69] : memref<64x384xf32, #tpu.memory_space<vmem>>, vector<16x16xf32>
    %c48 = arith.constant 48 : index
    %c0_93 = arith.constant 0 : index
    %81 = vector.load %arg33[%c48, %c0_93] : memref<832x128xf32, #tpu.memory_space<vmem>>, vector<16x16xf32>
    tpu.vector_store %arg33[%c48, %c0_93], %80 {strides = array<i32>} : memref<832x128xf32, #tpu.memory_space<vmem>>, vector<16x16xf32>,
    %c0_94 = arith.constant 0 : index
    %c1_95 = arith.constant 1 : index
    %82 = vector.load %arg34[%c0_94, %c1_95] : memref<64x384xf32, #tpu.memory_space<vmem>>, vector<16x16xf32>
    %c64 = arith.constant 64 : index
    %c0_96 = arith.constant 0 : index
    %83 = vector.load %arg33[%c64, %c0_96] : memref<832x128xf32, #tpu.memory_space<vmem>>, vector<16x16xf32>
    tpu.vector_store %arg33[%c64, %c0_96], %82 {strides = array<i32>} : memref<832x128xf32, #tpu.memory_space<vmem>>, vector<16x16xf32>,
    %c0_97 = arith.constant 0 : index
    %c24_98 = arith.constant 24 : index
    %84 = vector.load %arg34[%c0_97, %c24_98] : memref<64x384xf32, #tpu.memory_space<vmem>>, vector<16x16xf32>
    %c80 = arith.constant 80 : index
    %c0_99 = arith.constant 0 : index
    %85 = vector.load %arg33[%c80, %c0_99] : memref<832x128xf32, #tpu.memory_space<vmem>>, vector<16x16xf32>
    tpu.vector_store %arg33[%c80, %c0_99], %84 {strides = array<i32>} : memref<832x128xf32, #tpu.memory_space<vmem>>, vector<16x16xf32>,
    %c0_100 = arith.constant 0 : index
    %c47 = arith.constant 47 : index
    %86 = vector.load %arg34[%c0_100, %c47] : memref<64x384xf32, #tpu.memory_space<vmem>>, vector<16x16xf32>
    %c96 = arith.constant 96 : index
    %c0_101 = arith.constant 0 : index
    %87 = vector.load %arg33[%c96, %c0_101] : memref<832x128xf32, #tpu.memory_space<vmem>>, vector<16x16xf32>
    tpu.vector_store %arg33[%c96, %c0_101], %86 {strides = array<i32>} : memref<832x128xf32, #tpu.memory_space<vmem>>, vector<16x16xf32>,
    %c0_102 = arith.constant 0 : index
    %c70 = arith.constant 70 : index
    %88 = vector.load %arg34[%c0_102, %c70] : memref<64x384xf32, #tpu.memory_space<vmem>>, vector<16x16xf32>
    %c112 = arith.constant 112 : index
    %c0_103 = arith.constant 0 : index
    %89 = vector.load %arg33[%c112, %c0_103] : memref<832x128xf32, #tpu.memory_space<vmem>>, vector<16x16xf32>
    tpu.vector_store %arg33[%c112, %c0_103], %88 {strides = array<i32>} : memref<832x128xf32, #tpu.memory_space<vmem>>, vector<16x16xf32>,
    %c0_104 = arith.constant 0 : index
    %c2_105 = arith.constant 2 : index
    %90 = vector.load %arg34[%c0_104, %c2_105] : memref<64x384xf32, #tpu.memory_space<vmem>>, vector<16x16xf32>
    %c128 = arith.constant 128 : index
    %c0_106 = arith.constant 0 : index
    %91 = vector.load %arg33[%c128, %c0_106] : memref<832x128xf32, #tpu.memory_space<vmem>>, vector<16x16xf32>
    tpu.vector_store %arg33[%c128, %c0_106], %90 {strides = array<i32>} : memref<832x128xf32, #tpu.memory_space<vmem>>, vector<16x16xf32>,
    %c0_107 = arith.constant 0 : index
    %c25 = arith.constant 25 : index
    %92 = vector.load %arg34[%c0_107, %c25] : memref<64x384xf32, #tpu.memory_space<vmem>>, vector<16x16xf32>
    %c144_108 = arith.constant 144 : index
    %c0_109 = arith.constant 0 : index
    %93 = vector.load %arg33[%c144_108, %c0_109] : memref<832x128xf32, #tpu.memory_space<vmem>>, vector<16x16xf32>
    tpu.vector_store %arg33[%c144_108, %c0_109], %92 {strides = array<i32>} : memref<832x128xf32, #tpu.memory_space<vmem>>, vector<16x16xf32>,
    %c0_110 = arith.constant 0 : index
    %c48_111 = arith.constant 48 : index
    %94 = vector.load %arg34[%c0_110, %c48_111] : memref<64x384xf32, #tpu.memory_space<vmem>>, vector<16x16xf32>
    %c160 = arith.constant 160 : index
    %c0_112 = arith.constant 0 : index
    %95 = vector.load %arg33[%c160, %c0_112] : memref<832x128xf32, #tpu.memory_space<vmem>>, vector<16x16xf32>
    tpu.vector_store %arg33[%c160, %c0_112], %94 {strides = array<i32>} : memref<832x128xf32, #tpu.memory_space<vmem>>, vector<16x16xf32>,
    %c0_113 = arith.constant 0 : index
    %c71_114 = arith.constant 71 : index
    %96 = vector.load %arg34[%c0_113, %c71_114] : memref<64x384xf32, #tpu.memory_space<vmem>>, vector<16x16xf32>
    %c176 = arith.constant 176 : index
    %c0_115 = arith.constant 0 : index
    %97 = vector.load %arg33[%c176, %c0_115] : memref<832x128xf32, #tpu.memory_space<vmem>>, vector<16x16xf32>
    tpu.vector_store %arg33[%c176, %c0_115], %96 {strides = array<i32>} : memref<832x128xf32, #tpu.memory_space<vmem>>, vector<16x16xf32>,
    %c0_116 = arith.constant 0 : index
    %c3_117 = arith.constant 3 : index
    %98 = vector.load %arg34[%c0_116, %c3_117] : memref<64x384xf32, #tpu.memory_space<vmem>>, vector<16x16xf32>
    %c192 = arith.constant 192 : index
    %c0_118 = arith.constant 0 : index
    %99 = vector.load %arg33[%c192, %c0_118] : memref<832x128xf32, #tpu.memory_space<vmem>>, vector<16x16xf32>
    tpu.vector_store %arg33[%c192, %c0_118], %98 {strides = array<i32>} : memref<832x128xf32, #tpu.memory_space<vmem>>, vector<16x16xf32>,
    %c0_119 = arith.constant 0 : index
    %c26 = arith.constant 26 : index
    %100 = vector.load %arg34[%c0_119, %c26] : memref<64x384xf32, #tpu.memory_space<vmem>>, vector<16x16xf32>
    %c208 = arith.constant 208 : index
    %c0_120 = arith.constant 0 : index
    %101 = vector.load %arg33[%c208, %c0_120] : memref<832x128xf32, #tpu.memory_space<vmem>>, vector<16x16xf32>
    tpu.vector_store %arg33[%c208, %c0_120], %100 {strides = array<i32>} : memref<832x128xf32, #tpu.memory_space<vmem>>, vector<16x16xf32>,
    %c0_121 = arith.constant 0 : index
    %c49 = arith.constant 49 : index
    %102 = vector.load %arg34[%c0_121, %c49] : memref<64x384xf32, #tpu.memory_space<vmem>>, vector<16x16xf32>
    %c224 = arith.constant 224 : index
    %c0_122 = arith.constant 0 : index
    %103 = vector.load %arg33[%c224, %c0_122] : memref<832x128xf32, #tpu.memory_space<vmem>>, vector<16x16xf32>
    tpu.vector_store %arg33[%c224, %c0_122], %102 {strides = array<i32>} : memref<832x128xf32, #tpu.memory_space<vmem>>, vector<16x16xf32>,
    %c0_123 = arith.constant 0 : index
    %c72_124 = arith.constant 72 : index
    %104 = vector.load %arg34[%c0_123, %c72_124] : memref<64x384xf32, #tpu.memory_space<vmem>>, vector<16x16xf32>
    %c240 = arith.constant 240 : index
    %c0_125 = arith.constant 0 : index
    %105 = vector.load %arg33[%c240, %c0_125] : memref<832x128xf32, #tpu.memory_space<vmem>>, vector<16x16xf32>
    tpu.vector_store %arg33[%c240, %c0_125], %104 {strides = array<i32>} : memref<832x128xf32, #tpu.memory_space<vmem>>, vector<16x16xf32>,
    %c0_126 = arith.constant 0 : index
    %c4_127 = arith.constant 4 : index
    %106 = vector.load %arg34[%c0_126, %c4_127] : memref<64x384xf32, #tpu.memory_space<vmem>>, vector<16x16xf32>
    %c256 = arith.constant 256 : index
    %c0_128 = arith.constant 0 : index
    %107 = vector.load %arg33[%c256, %c0_128] : memref<832x128xf32, #tpu.memory_space<vmem>>, vector<16x16xf32>
    tpu.vector_store %arg33[%c256, %c0_128], %106 {strides = array<i32>} : memref<832x128xf32, #tpu.memory_space<vmem>>, vector<16x16xf32>,
    %c0_129 = arith.constant 0 : index
    %c27 = arith.constant 27 : index
    %108 = vector.load %arg34[%c0_129, %c27] : memref<64x384xf32, #tpu.memory_space<vmem>>, vector<16x16xf32>
    %c272 = arith.constant 272 : index
    %c0_130 = arith.constant 0 : index
    %109 = vector.load %arg33[%c272, %c0_130] : memref<832x128xf32, #tpu.memory_space<vmem>>, vector<16x16xf32>
    tpu.vector_store %arg33[%c272, %c0_130], %108 {strides = array<i32>} : memref<832x128xf32, #tpu.memory_space<vmem>>, vector<16x16xf32>,
    %c0_131 = arith.constant 0 : index
    %c50 = arith.constant 50 : index
    %110 = vector.load %arg34[%c0_131, %c50] : memref<64x384xf32, #tpu.memory_space<vmem>>, vector<16x16xf32>
    %c288 = arith.constant 288 : index
    %c0_132 = arith.constant 0 : index
    %111 = vector.load %arg33[%c288, %c0_132] : memref<832x128xf32, #tpu.memory_space<vmem>>, vector<16x16xf32>
    tpu.vector_store %arg33[%c288, %c0_132], %110 {strides = array<i32>} : memref<832x128xf32, #tpu.memory_space<vmem>>, vector<16x16xf32>,
    %c0_133 = arith.constant 0 : index
    %c73_134 = arith.constant 73 : index
    %112 = vector.load %arg34[%c0_133, %c73_134] : memref<64x384xf32, #tpu.memory_space<vmem>>, vector<16x16xf32>
    %c304 = arith.constant 304 : index
    %c0_135 = arith.constant 0 : index
    %113 = vector.load %arg33[%c304, %c0_135] : memref<832x128xf32, #tpu.memory_space<vmem>>, vector<16x16xf32>
    tpu.vector_store %arg33[%c304, %c0_135], %112 {strides = array<i32>} : memref<832x128xf32, #tpu.memory_space<vmem>>, vector<16x16xf32>,
    %c0_136 = arith.constant 0 : index
    %c5_137 = arith.constant 5 : index
    %114 = vector.load %arg34[%c0_136, %c5_137] : memref<64x384xf32, #tpu.memory_space<vmem>>, vector<16x16xf32>
    %c320 = arith.constant 320 : index
    %c0_138 = arith.constant 0 : index
    %115 = vector.load %arg33[%c320, %c0_138] : memref<832x128xf32, #tpu.memory_space<vmem>>, vector<16x16xf32>
    tpu.vector_store %arg33[%c320, %c0_138], %114 {strides = array<i32>} : memref<832x128xf32, #tpu.memory_space<vmem>>, vector<16x16xf32>,
    %c0_139 = arith.constant 0 : index
    %c28 = arith.constant 28 : index
    %116 = vector.load %arg34[%c0_139, %c28] : memref<64x384xf32, #tpu.memory_space<vmem>>, vector<16x16xf32>
    %c336 = arith.constant 336 : index
    %c0_140 = arith.constant 0 : index
    %117 = vector.load %arg33[%c336, %c0_140] : memref<832x128xf32, #tpu.memory_space<vmem>>, vector<16x16xf32>
    tpu.vector_store %arg33[%c336, %c0_140], %116 {strides = array<i32>} : memref<832x128xf32, #tpu.memory_space<vmem>>, vector<16x16xf32>,
    %c0_141 = arith.constant 0 : index
    %c51 = arith.constant 51 : index
    %118 = vector.load %arg34[%c0_141, %c51] : memref<64x384xf32, #tpu.memory_space<vmem>>, vector<16x16xf32>
    %c352 = arith.constant 352 : index
    %c0_142 = arith.constant 0 : index
    %119 = vector.load %arg33[%c352, %c0_142] : memref<832x128xf32, #tpu.memory_space<vmem>>, vector<16x16xf32>
    tpu.vector_store %arg33[%c352, %c0_142], %118 {strides = array<i32>} : memref<832x128xf32, #tpu.memory_space<vmem>>, vector<16x16xf32>,
    %c0_143 = arith.constant 0 : index
    %c74_144 = arith.constant 74 : index
    %120 = vector.load %arg34[%c0_143, %c74_144] : memref<64x384xf32, #tpu.memory_space<vmem>>, vector<16x16xf32>
    %c368 = arith.constant 368 : index
    %c0_145 = arith.constant 0 : index
    %121 = vector.load %arg33[%c368, %c0_145] : memref<832x128xf32, #tpu.memory_space<vmem>>, vector<16x16xf32>
    tpu.vector_store %arg33[%c368, %c0_145], %120 {strides = array<i32>} : memref<832x128xf32, #tpu.memory_space<vmem>>, vector<16x16xf32>,
    %c0_146 = arith.constant 0 : index
    %c6_147 = arith.constant 6 : index
    %122 = vector.load %arg34[%c0_146, %c6_147] : memref<64x384xf32, #tpu.memory_space<vmem>>, vector<16x16xf32>
    %c384 = arith.constant 384 : index
    %c0_148 = arith.constant 0 : index
    %123 = vector.load %arg33[%c384, %c0_148] : memref<832x128xf32, #tpu.memory_space<vmem>>, vector<16x16xf32>
    tpu.vector_store %arg33[%c384, %c0_148], %122 {strides = array<i32>} : memref<832x128xf32, #tpu.memory_space<vmem>>, vector<16x16xf32>,
    %c0_149 = arith.constant 0 : index
    %c0_150 = arith.constant 0 : index
    %124 = vector.load %arg33[%c0_149, %c0_150] : memref<832x128xf32, #tpu.memory_space<vmem>>, vector<400x16xf32>
    %125 = arith.truncf %124 : vector<400x16xf32> to vector<400x16xbf16>
    %cst_151 = arith.constant dense<0.000000e+00> : vector<32x16xf32>
    %126 = tpu.matmul %69, %125, %cst_151 {dimension_numbers = #tpu.dot_dimension_numbers<[1], [0], [0], [1], [0, 0, 1, 1], [], []>} : vector<32x400xbf16>, vector<400x16xbf16>, vector<32x16xf32> -> vector<32x16xf32>
    %127 = vector.broadcast %70 : vector<32x1xf32> to vector<32x16xf32>
    %128 = arith.addf %126, %127 : vector<32x16xf32>
    %cst_152 = arith.constant 0.000000e+00 : f32
    %129 = vector.broadcast %cst_152 : f32 to vector<32x16xf32>
    %130 = arith.cmpf ogt, %128, %129 : vector<32x16xf32>
    %cst_153 = arith.constant 0.00999999977 : f32
    %131 = vector.broadcast %cst_153 : f32 to vector<32x16xf32>
    %132 = arith.mulf %131, %128 : vector<32x16xf32>
    %133 = arith.select %130, %128, %132 : vector<32x16xi1>, vector<32x16xf32>
    %c0_154 = arith.constant 0 : index
    %c0_155 = arith.constant 0 : index
    %134 = vector.load %arg8[%c0_154, %c0_155] : memref<16x44xbf16, #tpu.memory_space<vmem>>, vector<16x44xbf16>
    %c0_156 = arith.constant 0 : index
    %c0_157 = arith.constant 0 : index
    %135 = vector.load %arg9[%c0_156, %c0_157] : memref<32x800xbf16, #tpu.memory_space<vmem>>, vector<32x800xbf16>
    %c0_158 = arith.constant 0 : index
    %c0_159 = arith.constant 0 : index
    %136 = vector.load %arg10[%c0_158, %c0_159] : memref<32x1xf32, #tpu.memory_space<vmem>>, vector<32x1xf32>
    %137 = arith.truncf %133 : vector<32x16xf32> to vector<32x16xbf16>
    %cst_160 = arith.constant dense<0.000000e+00> : vector<32x44xf32>
    %138 = tpu.matmul %137, %134, %cst_160 {dimension_numbers = #tpu.dot_dimension_numbers<[1], [0], [0], [1], [0, 0, 1, 1], [], []>} : vector<32x16xbf16>, vector<16x44xbf16>, vector<32x44xf32> -> vector<32x44xf32>
    %c0_161 = arith.constant 0 : index
    %c0_162 = arith.constant 0 : index
    %139 = vector.load %arg34[%c0_161, %c0_162] : memref<64x384xf32, #tpu.memory_space<vmem>>, vector<32x44xf32>
    tpu.vector_store %arg34[%c0_161, %c0_162], %138 {strides = array<i32>} : memref<64x384xf32, #tpu.memory_space<vmem>>, vector<32x44xf32>,
    %c0_163 = arith.constant 0 : index
    %c0_164 = arith.constant 0 : index
    %140 = vector.load %arg34[%c0_163, %c0_164] : memref<64x384xf32, #tpu.memory_space<vmem>>, vector<32x4xf32>
    %c0_165 = arith.constant 0 : index
    %c0_166 = arith.constant 0 : index
    %141 = vector.load %arg33[%c0_165, %c0_166] : memref<832x128xf32, #tpu.memory_space<vmem>>, vector<32x4xf32>
    tpu.vector_store %arg33[%c0_165, %c0_166], %140 {strides = array<i32>} : memref<832x128xf32, #tpu.memory_space<vmem>>, vector<32x4xf32>,
    %c0_167 = arith.constant 0 : index
    %c11_168 = arith.constant 11 : index
    %142 = vector.load %arg34[%c0_167, %c11_168] : memref<64x384xf32, #tpu.memory_space<vmem>>, vector<32x4xf32>
    %c32_169 = arith.constant 32 : index
    %c0_170 = arith.constant 0 : index
    %143 = vector.load %arg33[%c32_169, %c0_170] : memref<832x128xf32, #tpu.memory_space<vmem>>, vector<32x4xf32>
    tpu.vector_store %arg33[%c32_169, %c0_170], %142 {strides = array<i32>} : memref<832x128xf32, #tpu.memory_space<vmem>>, vector<32x4xf32>,
    %c0_171 = arith.constant 0 : index
    %c22_172 = arith.constant 22 : index
    %144 = vector.load %arg34[%c0_171, %c22_172] : memref<64x384xf32, #tpu.memory_space<vmem>>, vector<32x4xf32>
    %c64_173 = arith.constant 64 : index
    %c0_174 = arith.constant 0 : index
    %145 = vector.load %arg33[%c64_173, %c0_174] : memref<832x128xf32, #tpu.memory_space<vmem>>, vector<32x4xf32>
    tpu.vector_store %arg33[%c64_173, %c0_174], %144 {strides = array<i32>} : memref<832x128xf32, #tpu.memory_space<vmem>>, vector<32x4xf32>,
    %c0_175 = arith.constant 0 : index
    %c33 = arith.constant 33 : index
    %146 = vector.load %arg34[%c0_175, %c33] : memref<64x384xf32, #tpu.memory_space<vmem>>, vector<32x4xf32>
    %c96_176 = arith.constant 96 : index
    %c0_177 = arith.constant 0 : index
    %147 = vector.load %arg33[%c96_176, %c0_177] : memref<832x128xf32, #tpu.memory_space<vmem>>, vector<32x4xf32>
    tpu.vector_store %arg33[%c96_176, %c0_177], %146 {strides = array<i32>} : memref<832x128xf32, #tpu.memory_space<vmem>>, vector<32x4xf32>,
    %c0_178 = arith.constant 0 : index
    %c1_179 = arith.constant 1 : index
    %148 = vector.load %arg34[%c0_178, %c1_179] : memref<64x384xf32, #tpu.memory_space<vmem>>, vector<32x4xf32>
    %c128_180 = arith.constant 128 : index
    %c0_181 = arith.constant 0 : index
    %149 = vector.load %arg33[%c128_180, %c0_181] : memref<832x128xf32, #tpu.memory_space<vmem>>, vector<32x4xf32>
    tpu.vector_store %arg33[%c128_180, %c0_181], %148 {strides = array<i32>} : memref<832x128xf32, #tpu.memory_space<vmem>>, vector<32x4xf32>,
    %c0_182 = arith.constant 0 : index
    %c12_183 = arith.constant 12 : index
    %150 = vector.load %arg34[%c0_182, %c12_183] : memref<64x384xf32, #tpu.memory_space<vmem>>, vector<32x4xf32>
    %c160_184 = arith.constant 160 : index
    %c0_185 = arith.constant 0 : index
    %151 = vector.load %arg33[%c160_184, %c0_185] : memref<832x128xf32, #tpu.memory_space<vmem>>, vector<32x4xf32>
    tpu.vector_store %arg33[%c160_184, %c0_185], %150 {strides = array<i32>} : memref<832x128xf32, #tpu.memory_space<vmem>>, vector<32x4xf32>,
    %c0_186 = arith.constant 0 : index
    %c23_187 = arith.constant 23 : index
    %152 = vector.load %arg34[%c0_186, %c23_187] : memref<64x384xf32, #tpu.memory_space<vmem>>, vector<32x4xf32>
    %c192_188 = arith.constant 192 : index
    %c0_189 = arith.constant 0 : index
    %153 = vector.load %arg33[%c192_188, %c0_189] : memref<832x128xf32, #tpu.memory_space<vmem>>, vector<32x4xf32>
    tpu.vector_store %arg33[%c192_188, %c0_189], %152 {strides = array<i32>} : memref<832x128xf32, #tpu.memory_space<vmem>>, vector<32x4xf32>,
    %c0_190 = arith.constant 0 : index
    %c34 = arith.constant 34 : index
    %154 = vector.load %arg34[%c0_190, %c34] : memref<64x384xf32, #tpu.memory_space<vmem>>, vector<32x4xf32>
    %c224_191 = arith.constant 224 : index
    %c0_192 = arith.constant 0 : index
    %155 = vector.load %arg33[%c224_191, %c0_192] : memref<832x128xf32, #tpu.memory_space<vmem>>, vector<32x4xf32>
    tpu.vector_store %arg33[%c224_191, %c0_192], %154 {strides = array<i32>} : memref<832x128xf32, #tpu.memory_space<vmem>>, vector<32x4xf32>,
    %c0_193 = arith.constant 0 : index
    %c2_194 = arith.constant 2 : index
    %156 = vector.load %arg34[%c0_193, %c2_194] : memref<64x384xf32, #tpu.memory_space<vmem>>, vector<32x4xf32>
    %c256_195 = arith.constant 256 : index
    %c0_196 = arith.constant 0 : index
    %157 = vector.load %arg33[%c256_195, %c0_196] : memref<832x128xf32, #tpu.memory_space<vmem>>, vector<32x4xf32>
    tpu.vector_store %arg33[%c256_195, %c0_196], %156 {strides = array<i32>} : memref<832x128xf32, #tpu.memory_space<vmem>>, vector<32x4xf32>,
    %c0_197 = arith.constant 0 : index
    %c13_198 = arith.constant 13 : index
    %158 = vector.load %arg34[%c0_197, %c13_198] : memref<64x384xf32, #tpu.memory_space<vmem>>, vector<32x4xf32>
    %c288_199 = arith.constant 288 : index
    %c0_200 = arith.constant 0 : index
    %159 = vector.load %arg33[%c288_199, %c0_200] : memref<832x128xf32, #tpu.memory_space<vmem>>, vector<32x4xf32>
    tpu.vector_store %arg33[%c288_199, %c0_200], %158 {strides = array<i32>} : memref<832x128xf32, #tpu.memory_space<vmem>>, vector<32x4xf32>,
    %c0_201 = arith.constant 0 : index
    %c24_202 = arith.constant 24 : index
    %160 = vector.load %arg34[%c0_201, %c24_202] : memref<64x384xf32, #tpu.memory_space<vmem>>, vector<32x4xf32>
    %c320_203 = arith.constant 320 : index
    %c0_204 = arith.constant 0 : index
    %161 = vector.load %arg33[%c320_203, %c0_204] : memref<832x128xf32, #tpu.memory_space<vmem>>, vector<32x4xf32>
    tpu.vector_store %arg33[%c320_203, %c0_204], %160 {strides = array<i32>} : memref<832x128xf32, #tpu.memory_space<vmem>>, vector<32x4xf32>,
    %c0_205 = arith.constant 0 : index
    %c35 = arith.constant 35 : index
    %162 = vector.load %arg34[%c0_205, %c35] : memref<64x384xf32, #tpu.memory_space<vmem>>, vector<32x4xf32>
    %c352_206 = arith.constant 352 : index
    %c0_207 = arith.constant 0 : index
    %163 = vector.load %arg33[%c352_206, %c0_207] : memref<832x128xf32, #tpu.memory_space<vmem>>, vector<32x4xf32>
    tpu.vector_store %arg33[%c352_206, %c0_207], %162 {strides = array<i32>} : memref<832x128xf32, #tpu.memory_space<vmem>>, vector<32x4xf32>,
    %c0_208 = arith.constant 0 : index
    %c3_209 = arith.constant 3 : index
    %164 = vector.load %arg34[%c0_208, %c3_209] : memref<64x384xf32, #tpu.memory_space<vmem>>, vector<32x4xf32>
    %c384_210 = arith.constant 384 : index
    %c0_211 = arith.constant 0 : index
    %165 = vector.load %arg33[%c384_210, %c0_211] : memref<832x128xf32, #tpu.memory_space<vmem>>, vector<32x4xf32>
    tpu.vector_store %arg33[%c384_210, %c0_211], %164 {strides = array<i32>} : memref<832x128xf32, #tpu.memory_space<vmem>>, vector<32x4xf32>,
    %c0_212 = arith.constant 0 : index
    %c14_213 = arith.constant 14 : index
    %166 = vector.load %arg34[%c0_212, %c14_213] : memref<64x384xf32, #tpu.memory_space<vmem>>, vector<32x4xf32>
    %c416 = arith.constant 416 : index
    %c0_214 = arith.constant 0 : index
    %167 = vector.load %arg33[%c416, %c0_214] : memref<832x128xf32, #tpu.memory_space<vmem>>, vector<32x4xf32>
    tpu.vector_store %arg33[%c416, %c0_214], %166 {strides = array<i32>} : memref<832x128xf32, #tpu.memory_space<vmem>>, vector<32x4xf32>,
    %c0_215 = arith.constant 0 : index
    %c25_216 = arith.constant 25 : index
    %168 = vector.load %arg34[%c0_215, %c25_216] : memref<64x384xf32, #tpu.memory_space<vmem>>, vector<32x4xf32>
    %c448 = arith.constant 448 : index
    %c0_217 = arith.constant 0 : index
    %169 = vector.load %arg33[%c448, %c0_217] : memref<832x128xf32, #tpu.memory_space<vmem>>, vector<32x4xf32>
    tpu.vector_store %arg33[%c448, %c0_217], %168 {strides = array<i32>} : memref<832x128xf32, #tpu.memory_space<vmem>>, vector<32x4xf32>,
    %c0_218 = arith.constant 0 : index
    %c36 = arith.constant 36 : index
    %170 = vector.load %arg34[%c0_218, %c36] : memref<64x384xf32, #tpu.memory_space<vmem>>, vector<32x4xf32>
    %c480 = arith.constant 480 : index
    %c0_219 = arith.constant 0 : index
    %171 = vector.load %arg33[%c480, %c0_219] : memref<832x128xf32, #tpu.memory_space<vmem>>, vector<32x4xf32>
    tpu.vector_store %arg33[%c480, %c0_219], %170 {strides = array<i32>} : memref<832x128xf32, #tpu.memory_space<vmem>>, vector<32x4xf32>,
    %c0_220 = arith.constant 0 : index
    %c4_221 = arith.constant 4 : index
    %172 = vector.load %arg34[%c0_220, %c4_221] : memref<64x384xf32, #tpu.memory_space<vmem>>, vector<32x4xf32>
    %c512 = arith.constant 512 : index
    %c0_222 = arith.constant 0 : index
    %173 = vector.load %arg33[%c512, %c0_222] : memref<832x128xf32, #tpu.memory_space<vmem>>, vector<32x4xf32>
    tpu.vector_store %arg33[%c512, %c0_222], %172 {strides = array<i32>} : memref<832x128xf32, #tpu.memory_space<vmem>>, vector<32x4xf32>,
    %c0_223 = arith.constant 0 : index
    %c15_224 = arith.constant 15 : index
    %174 = vector.load %arg34[%c0_223, %c15_224] : memref<64x384xf32, #tpu.memory_space<vmem>>, vector<32x4xf32>
    %c544 = arith.constant 544 : index
    %c0_225 = arith.constant 0 : index
    %175 = vector.load %arg33[%c544, %c0_225] : memref<832x128xf32, #tpu.memory_space<vmem>>, vector<32x4xf32>
    tpu.vector_store %arg33[%c544, %c0_225], %174 {strides = array<i32>} : memref<832x128xf32, #tpu.memory_space<vmem>>, vector<32x4xf32>,
    %c0_226 = arith.constant 0 : index
    %c26_227 = arith.constant 26 : index
    %176 = vector.load %arg34[%c0_226, %c26_227] : memref<64x384xf32, #tpu.memory_space<vmem>>, vector<32x4xf32>
    %c576 = arith.constant 576 : index
    %c0_228 = arith.constant 0 : index
    %177 = vector.load %arg33[%c576, %c0_228] : memref<832x128xf32, #tpu.memory_space<vmem>>, vector<32x4xf32>
    tpu.vector_store %arg33[%c576, %c0_228], %176 {strides = array<i32>} : memref<832x128xf32, #tpu.memory_space<vmem>>, vector<32x4xf32>,
    %c0_229 = arith.constant 0 : index
    %c37 = arith.constant 37 : index
    %178 = vector.load %arg34[%c0_229, %c37] : memref<64x384xf32, #tpu.memory_space<vmem>>, vector<32x4xf32>
    %c608 = arith.constant 608 : index
    %c0_230 = arith.constant 0 : index
    %179 = vector.load %arg33[%c608, %c0_230] : memref<832x128xf32, #tpu.memory_space<vmem>>, vector<32x4xf32>
    tpu.vector_store %arg33[%c608, %c0_230], %178 {strides = array<i32>} : memref<832x128xf32, #tpu.memory_space<vmem>>, vector<32x4xf32>,
    %c0_231 = arith.constant 0 : index
    %c5_232 = arith.constant 5 : index
    %180 = vector.load %arg34[%c0_231, %c5_232] : memref<64x384xf32, #tpu.memory_space<vmem>>, vector<32x4xf32>
    %c640 = arith.constant 640 : index
    %c0_233 = arith.constant 0 : index
    %181 = vector.load %arg33[%c640, %c0_233] : memref<832x128xf32, #tpu.memory_space<vmem>>, vector<32x4xf32>
    tpu.vector_store %arg33[%c640, %c0_233], %180 {strides = array<i32>} : memref<832x128xf32, #tpu.memory_space<vmem>>, vector<32x4xf32>,
    %c0_234 = arith.constant 0 : index
    %c16_235 = arith.constant 16 : index
    %182 = vector.load %arg34[%c0_234, %c16_235] : memref<64x384xf32, #tpu.memory_space<vmem>>, vector<32x4xf32>
    %c672 = arith.constant 672 : index
    %c0_236 = arith.constant 0 : index
    %183 = vector.load %arg33[%c672, %c0_236] : memref<832x128xf32, #tpu.memory_space<vmem>>, vector<32x4xf32>
    tpu.vector_store %arg33[%c672, %c0_236], %182 {strides = array<i32>} : memref<832x128xf32, #tpu.memory_space<vmem>>, vector<32x4xf32>,
    %c0_237 = arith.constant 0 : index
    %c27_238 = arith.constant 27 : index
    %184 = vector.load %arg34[%c0_237, %c27_238] : memref<64x384xf32, #tpu.memory_space<vmem>>, vector<32x4xf32>
    %c704 = arith.constant 704 : index
    %c0_239 = arith.constant 0 : index
    %185 = vector.load %arg33[%c704, %c0_239] : memref<832x128xf32, #tpu.memory_space<vmem>>, vector<32x4xf32>
    tpu.vector_store %arg33[%c704, %c0_239], %184 {strides = array<i32>} : memref<832x128xf32, #tpu.memory_space<vmem>>, vector<32x4xf32>,
    %c0_240 = arith.constant 0 : index
    %c38 = arith.constant 38 : index
    %186 = vector.load %arg34[%c0_240, %c38] : memref<64x384xf32, #tpu.memory_space<vmem>>, vector<32x4xf32>
    %c736 = arith.constant 736 : index
    %c0_241 = arith.constant 0 : index
    %187 = vector.load %arg33[%c736, %c0_241] : memref<832x128xf32, #tpu.memory_space<vmem>>, vector<32x4xf32>
    tpu.vector_store %arg33[%c736, %c0_241], %186 {strides = array<i32>} : memref<832x128xf32, #tpu.memory_space<vmem>>, vector<32x4xf32>,
    %c0_242 = arith.constant 0 : index
    %c6_243 = arith.constant 6 : index
    %188 = vector.load %arg34[%c0_242, %c6_243] : memref<64x384xf32, #tpu.memory_space<vmem>>, vector<32x4xf32>
    %c768 = arith.constant 768 : index
    %c0_244 = arith.constant 0 : index
    %189 = vector.load %arg33[%c768, %c0_244] : memref<832x128xf32, #tpu.memory_space<vmem>>, vector<32x4xf32>
    tpu.vector_store %arg33[%c768, %c0_244], %188 {strides = array<i32>} : memref<832x128xf32, #tpu.memory_space<vmem>>, vector<32x4xf32>,
    %c0_245 = arith.constant 0 : index
    %c0_246 = arith.constant 0 : index
    %190 = vector.load %arg33[%c0_245, %c0_246] : memref<832x128xf32, #tpu.memory_space<vmem>>, vector<800x4xf32>
    %191 = arith.truncf %190 : vector<800x4xf32> to vector<800x4xbf16>
    %cst_247 = arith.constant dense<0.000000e+00> : vector<32x4xf32>
    %192 = tpu.matmul %135, %191, %cst_247 {dimension_numbers = #tpu.dot_dimension_numbers<[1], [0], [0], [1], [0, 0, 1, 1], [], []>} : vector<32x800xbf16>, vector<800x4xbf16>, vector<32x4xf32> -> vector<32x4xf32>
    %193 = vector.broadcast %136 : vector<32x1xf32> to vector<32x4xf32>
    %194 = arith.addf %192, %193 : vector<32x4xf32>
    %cst_248 = arith.constant 0.000000e+00 : f32
    %195 = vector.broadcast %cst_248 : f32 to vector<32x4xf32>
    %196 = arith.cmpf ogt, %194, %195 : vector<32x4xf32>
    %cst_249 = arith.constant 0.00999999977 : f32
    %197 = vector.broadcast %cst_249 : f32 to vector<32x4xf32>
    %198 = arith.mulf %197, %194 : vector<32x4xf32>
    %199 = arith.select %196, %194, %198 : vector<32x4xi1>, vector<32x4xf32>
    %c0_250 = arith.constant 0 : index
    %c0_251 = arith.constant 0 : index
    %200 = vector.load %arg11[%c0_250, %c0_251] : memref<4x32xbf16, #tpu.memory_space<vmem>>, vector<4x32xbf16>
    %c0_252 = arith.constant 0 : index
    %c0_253 = arith.constant 0 : index
    %201 = vector.load %arg12[%c0_252, %c0_253] : memref<64x800xbf16, #tpu.memory_space<vmem>>, vector<64x800xbf16>
    %c0_254 = arith.constant 0 : index
    %c0_255 = arith.constant 0 : index
    %202 = vector.load %arg13[%c0_254, %c0_255] : memref<64x1xf32, #tpu.memory_space<vmem>>, vector<64x1xf32>
    %203 = arith.truncf %199 : vector<32x4xf32> to vector<32x4xbf16>
    %cst_256 = arith.constant dense<0.000000e+00> : vector<32x32xf32>
    %204 = tpu.matmul %203, %200, %cst_256 {dimension_numbers = #tpu.dot_dimension_numbers<[1], [0], [0], [1], [0, 0, 1, 1], [], []>} : vector<32x4xbf16>, vector<4x32xbf16>, vector<32x32xf32> -> vector<32x32xf32>
    %c0_257 = arith.constant 0 : index
    %c0_258 = arith.constant 0 : index
    %205 = vector.load %arg34[%c0_257, %c0_258] : memref<64x384xf32, #tpu.memory_space<vmem>>, vector<32x32xf32>
    tpu.vector_store %arg34[%c0_257, %c0_258], %204 {strides = array<i32>} : memref<64x384xf32, #tpu.memory_space<vmem>>, vector<32x32xf32>,
    %c0_259 = arith.constant 0 : index
    %c0_260 = arith.constant 0 : index
    %206 = vector.load %arg34[%c0_259, %c0_260] : memref<64x384xf32, #tpu.memory_space<vmem>>, vector<32x1xf32>
    %c0_261 = arith.constant 0 : index
    %c0_262 = arith.constant 0 : index
    %207 = vector.load %arg33[%c0_261, %c0_262] : memref<832x128xf32, #tpu.memory_space<vmem>>, vector<32x1xf32>
    tpu.vector_store %arg33[%c0_261, %c0_262], %206 {strides = array<i32>} : memref<832x128xf32, #tpu.memory_space<vmem>>, vector<32x1xf32>,
    %c0_263 = arith.constant 0 : index
    %c8_264 = arith.constant 8 : index
    %208 = vector.load %arg34[%c0_263, %c8_264] : memref<64x384xf32, #tpu.memory_space<vmem>>, vector<32x1xf32>
    %c32_265 = arith.constant 32 : index
    %c0_266 = arith.constant 0 : index
    %209 = vector.load %arg33[%c32_265, %c0_266] : memref<832x128xf32, #tpu.memory_space<vmem>>, vector<32x1xf32>
    tpu.vector_store %arg33[%c32_265, %c0_266], %208 {strides = array<i32>} : memref<832x128xf32, #tpu.memory_space<vmem>>, vector<32x1xf32>,
    %c0_267 = arith.constant 0 : index
    %c16_268 = arith.constant 16 : index
    %210 = vector.load %arg34[%c0_267, %c16_268] : memref<64x384xf32, #tpu.memory_space<vmem>>, vector<32x1xf32>
    %c64_269 = arith.constant 64 : index
    %c0_270 = arith.constant 0 : index
    %211 = vector.load %arg33[%c64_269, %c0_270] : memref<832x128xf32, #tpu.memory_space<vmem>>, vector<32x1xf32>
    tpu.vector_store %arg33[%c64_269, %c0_270], %210 {strides = array<i32>} : memref<832x128xf32, #tpu.memory_space<vmem>>, vector<32x1xf32>,
    %c0_271 = arith.constant 0 : index
    %c24_272 = arith.constant 24 : index
    %212 = vector.load %arg34[%c0_271, %c24_272] : memref<64x384xf32, #tpu.memory_space<vmem>>, vector<32x1xf32>
    %c96_273 = arith.constant 96 : index
    %c0_274 = arith.constant 0 : index
    %213 = vector.load %arg33[%c96_273, %c0_274] : memref<832x128xf32, #tpu.memory_space<vmem>>, vector<32x1xf32>
    tpu.vector_store %arg33[%c96_273, %c0_274], %212 {strides = array<i32>} : memref<832x128xf32, #tpu.memory_space<vmem>>, vector<32x1xf32>,
    %c0_275 = arith.constant 0 : index
    %c1_276 = arith.constant 1 : index
    %214 = vector.load %arg34[%c0_275, %c1_276] : memref<64x384xf32, #tpu.memory_space<vmem>>, vector<32x1xf32>
    %c128_277 = arith.constant 128 : index
    %c0_278 = arith.constant 0 : index
    %215 = vector.load %arg33[%c128_277, %c0_278] : memref<832x128xf32, #tpu.memory_space<vmem>>, vector<32x1xf32>
    tpu.vector_store %arg33[%c128_277, %c0_278], %214 {strides = array<i32>} : memref<832x128xf32, #tpu.memory_space<vmem>>, vector<32x1xf32>,
    %c0_279 = arith.constant 0 : index
    %c9_280 = arith.constant 9 : index
    %216 = vector.load %arg34[%c0_279, %c9_280] : memref<64x384xf32, #tpu.memory_space<vmem>>, vector<32x1xf32>
    %c160_281 = arith.constant 160 : index
    %c0_282 = arith.constant 0 : index
    %217 = vector.load %arg33[%c160_281, %c0_282] : memref<832x128xf32, #tpu.memory_space<vmem>>, vector<32x1xf32>
    tpu.vector_store %arg33[%c160_281, %c0_282], %216 {strides = array<i32>} : memref<832x128xf32, #tpu.memory_space<vmem>>, vector<32x1xf32>,
    %c0_283 = arith.constant 0 : index
    %c17_284 = arith.constant 17 : index
    %218 = vector.load %arg34[%c0_283, %c17_284] : memref<64x384xf32, #tpu.memory_space<vmem>>, vector<32x1xf32>
    %c192_285 = arith.constant 192 : index
    %c0_286 = arith.constant 0 : index
    %219 = vector.load %arg33[%c192_285, %c0_286] : memref<832x128xf32, #tpu.memory_space<vmem>>, vector<32x1xf32>
    tpu.vector_store %arg33[%c192_285, %c0_286], %218 {strides = array<i32>} : memref<832x128xf32, #tpu.memory_space<vmem>>, vector<32x1xf32>,
    %c0_287 = arith.constant 0 : index
    %c25_288 = arith.constant 25 : index
    %220 = vector.load %arg34[%c0_287, %c25_288] : memref<64x384xf32, #tpu.memory_space<vmem>>, vector<32x1xf32>
    %c224_289 = arith.constant 224 : index
    %c0_290 = arith.constant 0 : index
    %221 = vector.load %arg33[%c224_289, %c0_290] : memref<832x128xf32, #tpu.memory_space<vmem>>, vector<32x1xf32>
    tpu.vector_store %arg33[%c224_289, %c0_290], %220 {strides = array<i32>} : memref<832x128xf32, #tpu.memory_space<vmem>>, vector<32x1xf32>,
    %c0_291 = arith.constant 0 : index
    %c2_292 = arith.constant 2 : index
    %222 = vector.load %arg34[%c0_291, %c2_292] : memref<64x384xf32, #tpu.memory_space<vmem>>, vector<32x1xf32>
    %c256_293 = arith.constant 256 : index
    %c0_294 = arith.constant 0 : index
    %223 = vector.load %arg33[%c256_293, %c0_294] : memref<832x128xf32, #tpu.memory_space<vmem>>, vector<32x1xf32>
    tpu.vector_store %arg33[%c256_293, %c0_294], %222 {strides = array<i32>} : memref<832x128xf32, #tpu.memory_space<vmem>>, vector<32x1xf32>,
    %c0_295 = arith.constant 0 : index
    %c10_296 = arith.constant 10 : index
    %224 = vector.load %arg34[%c0_295, %c10_296] : memref<64x384xf32, #tpu.memory_space<vmem>>, vector<32x1xf32>
    %c288_297 = arith.constant 288 : index
    %c0_298 = arith.constant 0 : index
    %225 = vector.load %arg33[%c288_297, %c0_298] : memref<832x128xf32, #tpu.memory_space<vmem>>, vector<32x1xf32>
    tpu.vector_store %arg33[%c288_297, %c0_298], %224 {strides = array<i32>} : memref<832x128xf32, #tpu.memory_space<vmem>>, vector<32x1xf32>,
    %c0_299 = arith.constant 0 : index
    %c18_300 = arith.constant 18 : index
    %226 = vector.load %arg34[%c0_299, %c18_300] : memref<64x384xf32, #tpu.memory_space<vmem>>, vector<32x1xf32>
    %c320_301 = arith.constant 320 : index
    %c0_302 = arith.constant 0 : index
    %227 = vector.load %arg33[%c320_301, %c0_302] : memref<832x128xf32, #tpu.memory_space<vmem>>, vector<32x1xf32>
    tpu.vector_store %arg33[%c320_301, %c0_302], %226 {strides = array<i32>} : memref<832x128xf32, #tpu.memory_space<vmem>>, vector<32x1xf32>,
    %c0_303 = arith.constant 0 : index
    %c26_304 = arith.constant 26 : index
    %228 = vector.load %arg34[%c0_303, %c26_304] : memref<64x384xf32, #tpu.memory_space<vmem>>, vector<32x1xf32>
    %c352_305 = arith.constant 352 : index
    %c0_306 = arith.constant 0 : index
    %229 = vector.load %arg33[%c352_305, %c0_306] : memref<832x128xf32, #tpu.memory_space<vmem>>, vector<32x1xf32>
    tpu.vector_store %arg33[%c352_305, %c0_306], %228 {strides = array<i32>} : memref<832x128xf32, #tpu.memory_space<vmem>>, vector<32x1xf32>,
    %c0_307 = arith.constant 0 : index
    %c3_308 = arith.constant 3 : index
    %230 = vector.load %arg34[%c0_307, %c3_308] : memref<64x384xf32, #tpu.memory_space<vmem>>, vector<32x1xf32>
    %c384_309 = arith.constant 384 : index
    %c0_310 = arith.constant 0 : index
    %231 = vector.load %arg33[%c384_309, %c0_310] : memref<832x128xf32, #tpu.memory_space<vmem>>, vector<32x1xf32>
    tpu.vector_store %arg33[%c384_309, %c0_310], %230 {strides = array<i32>} : memref<832x128xf32, #tpu.memory_space<vmem>>, vector<32x1xf32>,
    %c0_311 = arith.constant 0 : index
    %c11_312 = arith.constant 11 : index
    %232 = vector.load %arg34[%c0_311, %c11_312] : memref<64x384xf32, #tpu.memory_space<vmem>>, vector<32x1xf32>
    %c416_313 = arith.constant 416 : index
    %c0_314 = arith.constant 0 : index
    %233 = vector.load %arg33[%c416_313, %c0_314] : memref<832x128xf32, #tpu.memory_space<vmem>>, vector<32x1xf32>
    tpu.vector_store %arg33[%c416_313, %c0_314], %232 {strides = array<i32>} : memref<832x128xf32, #tpu.memory_space<vmem>>, vector<32x1xf32>,
    %c0_315 = arith.constant 0 : index
    %c19_316 = arith.constant 19 : index
    %234 = vector.load %arg34[%c0_315, %c19_316] : memref<64x384xf32, #tpu.memory_space<vmem>>, vector<32x1xf32>
    %c448_317 = arith.constant 448 : index
    %c0_318 = arith.constant 0 : index
    %235 = vector.load %arg33[%c448_317, %c0_318] : memref<832x128xf32, #tpu.memory_space<vmem>>, vector<32x1xf32>
    tpu.vector_store %arg33[%c448_317, %c0_318], %234 {strides = array<i32>} : memref<832x128xf32, #tpu.memory_space<vmem>>, vector<32x1xf32>,
    %c0_319 = arith.constant 0 : index
    %c27_320 = arith.constant 27 : index
    %236 = vector.load %arg34[%c0_319, %c27_320] : memref<64x384xf32, #tpu.memory_space<vmem>>, vector<32x1xf32>
    %c480_321 = arith.constant 480 : index
    %c0_322 = arith.constant 0 : index
    %237 = vector.load %arg33[%c480_321, %c0_322] : memref<832x128xf32, #tpu.memory_space<vmem>>, vector<32x1xf32>
    tpu.vector_store %arg33[%c480_321, %c0_322], %236 {strides = array<i32>} : memref<832x128xf32, #tpu.memory_space<vmem>>, vector<32x1xf32>,
    %c0_323 = arith.constant 0 : index
    %c4_324 = arith.constant 4 : index
    %238 = vector.load %arg34[%c0_323, %c4_324] : memref<64x384xf32, #tpu.memory_space<vmem>>, vector<32x1xf32>
    %c512_325 = arith.constant 512 : index
    %c0_326 = arith.constant 0 : index
    %239 = vector.load %arg33[%c512_325, %c0_326] : memref<832x128xf32, #tpu.memory_space<vmem>>, vector<32x1xf32>
    tpu.vector_store %arg33[%c512_325, %c0_326], %238 {strides = array<i32>} : memref<832x128xf32, #tpu.memory_space<vmem>>, vector<32x1xf32>,
    %c0_327 = arith.constant 0 : index
    %c12_328 = arith.constant 12 : index
    %240 = vector.load %arg34[%c0_327, %c12_328] : memref<64x384xf32, #tpu.memory_space<vmem>>, vector<32x1xf32>
    %c544_329 = arith.constant 544 : index
    %c0_330 = arith.constant 0 : index
    %241 = vector.load %arg33[%c544_329, %c0_330] : memref<832x128xf32, #tpu.memory_space<vmem>>, vector<32x1xf32>
    tpu.vector_store %arg33[%c544_329, %c0_330], %240 {strides = array<i32>} : memref<832x128xf32, #tpu.memory_space<vmem>>, vector<32x1xf32>,
    %c0_331 = arith.constant 0 : index
    %c20_332 = arith.constant 20 : index
    %242 = vector.load %arg34[%c0_331, %c20_332] : memref<64x384xf32, #tpu.memory_space<vmem>>, vector<32x1xf32>
    %c576_333 = arith.constant 576 : index
    %c0_334 = arith.constant 0 : index
    %243 = vector.load %arg33[%c576_333, %c0_334] : memref<832x128xf32, #tpu.memory_space<vmem>>, vector<32x1xf32>
    tpu.vector_store %arg33[%c576_333, %c0_334], %242 {strides = array<i32>} : memref<832x128xf32, #tpu.memory_space<vmem>>, vector<32x1xf32>,
    %c0_335 = arith.constant 0 : index
    %c28_336 = arith.constant 28 : index
    %244 = vector.load %arg34[%c0_335, %c28_336] : memref<64x384xf32, #tpu.memory_space<vmem>>, vector<32x1xf32>
    %c608_337 = arith.constant 608 : index
    %c0_338 = arith.constant 0 : index
    %245 = vector.load %arg33[%c608_337, %c0_338] : memref<832x128xf32, #tpu.memory_space<vmem>>, vector<32x1xf32>
    tpu.vector_store %arg33[%c608_337, %c0_338], %244 {strides = array<i32>} : memref<832x128xf32, #tpu.memory_space<vmem>>, vector<32x1xf32>,
    %c0_339 = arith.constant 0 : index
    %c5_340 = arith.constant 5 : index
    %246 = vector.load %arg34[%c0_339, %c5_340] : memref<64x384xf32, #tpu.memory_space<vmem>>, vector<32x1xf32>
    %c640_341 = arith.constant 640 : index
    %c0_342 = arith.constant 0 : index
    %247 = vector.load %arg33[%c640_341, %c0_342] : memref<832x128xf32, #tpu.memory_space<vmem>>, vector<32x1xf32>
    tpu.vector_store %arg33[%c640_341, %c0_342], %246 {strides = array<i32>} : memref<832x128xf32, #tpu.memory_space<vmem>>, vector<32x1xf32>,
    %c0_343 = arith.constant 0 : index
    %c13_344 = arith.constant 13 : index
    %248 = vector.load %arg34[%c0_343, %c13_344] : memref<64x384xf32, #tpu.memory_space<vmem>>, vector<32x1xf32>
    %c672_345 = arith.constant 672 : index
    %c0_346 = arith.constant 0 : index
    %249 = vector.load %arg33[%c672_345, %c0_346] : memref<832x128xf32, #tpu.memory_space<vmem>>, vector<32x1xf32>
    tpu.vector_store %arg33[%c672_345, %c0_346], %248 {strides = array<i32>} : memref<832x128xf32, #tpu.memory_space<vmem>>, vector<32x1xf32>,
    %c0_347 = arith.constant 0 : index
    %c21_348 = arith.constant 21 : index
    %250 = vector.load %arg34[%c0_347, %c21_348] : memref<64x384xf32, #tpu.memory_space<vmem>>, vector<32x1xf32>
    %c704_349 = arith.constant 704 : index
    %c0_350 = arith.constant 0 : index
    %251 = vector.load %arg33[%c704_349, %c0_350] : memref<832x128xf32, #tpu.memory_space<vmem>>, vector<32x1xf32>
    tpu.vector_store %arg33[%c704_349, %c0_350], %250 {strides = array<i32>} : memref<832x128xf32, #tpu.memory_space<vmem>>, vector<32x1xf32>,
    %c0_351 = arith.constant 0 : index
    %c29 = arith.constant 29 : index
    %252 = vector.load %arg34[%c0_351, %c29] : memref<64x384xf32, #tpu.memory_space<vmem>>, vector<32x1xf32>
    %c736_352 = arith.constant 736 : index
    %c0_353 = arith.constant 0 : index
    %253 = vector.load %arg33[%c736_352, %c0_353] : memref<832x128xf32, #tpu.memory_space<vmem>>, vector<32x1xf32>
    tpu.vector_store %arg33[%c736_352, %c0_353], %252 {strides = array<i32>} : memref<832x128xf32, #tpu.memory_space<vmem>>, vector<32x1xf32>,
    %c0_354 = arith.constant 0 : index
    %c6_355 = arith.constant 6 : index
    %254 = vector.load %arg34[%c0_354, %c6_355] : memref<64x384xf32, #tpu.memory_space<vmem>>, vector<32x1xf32>
    %c768_356 = arith.constant 768 : index
    %c0_357 = arith.constant 0 : index
    %255 = vector.load %arg33[%c768_356, %c0_357] : memref<832x128xf32, #tpu.memory_space<vmem>>, vector<32x1xf32>
    tpu.vector_store %arg33[%c768_356, %c0_357], %254 {strides = array<i32>} : memref<832x128xf32, #tpu.memory_space<vmem>>, vector<32x1xf32>,
    %c0_358 = arith.constant 0 : index
    %c0_359 = arith.constant 0 : index
    %256 = vector.load %arg33[%c0_358, %c0_359] : memref<832x128xf32, #tpu.memory_space<vmem>>, vector<800x1xf32>
    %257 = arith.truncf %256 : vector<800x1xf32> to vector<800x1xbf16>
    %cst_360 = arith.constant dense<0.000000e+00> : vector<64x1xf32>
    %258 = tpu.matmul %201, %257, %cst_360 {dimension_numbers = #tpu.dot_dimension_numbers<[1], [0], [0], [1], [0, 0, 1, 1], [], []>} : vector<64x800xbf16>, vector<800x1xbf16>, vector<64x1xf32> -> vector<64x1xf32>
    %259 = arith.addf %258, %202 : vector<64x1xf32>
    %cst_361 = arith.constant 0.000000e+00 : f32
    %260 = vector.broadcast %cst_361 : f32 to vector<64x1xf32>
    %261 = arith.cmpf ogt, %259, %260 : vector<64x1xf32>
    %cst_362 = arith.constant 0.00999999977 : f32
    %262 = vector.broadcast %cst_362 : f32 to vector<64x1xf32>
    %263 = arith.mulf %262, %259 : vector<64x1xf32>
    %264 = arith.select %261, %259, %263 : vector<64x1xi1>, vector<64x1xf32>
    %c0_363 = arith.constant 0 : index
    %c0_364 = arith.constant 0 : index
    %265 = vector.load %arg14[%c0_363, %c0_364] : memref<64x32xf32, #tpu.memory_space<vmem>>, vector<64x32xf32>
    %c0_365 = arith.constant 0 : index
    %c0_366 = arith.constant 0 : index
    %266 = vector.load %arg15[%c0_365, %c0_366] : memref<1x32xf32, #tpu.memory_space<vmem>>, vector<1x32xf32>
    %267 = vector.broadcast %264 : vector<64x1xf32> to vector<64x32xf32>
    %268 = arith.mulf %265, %267 : vector<64x32xf32>
    %cst_367 = arith.constant dense<0.000000e+00> : vector<32xf32>
    %269 = vector.multi_reduction <add>, %268, %cst_367 [0] : vector<64x32xf32> to vector<32xf32>
    %270 = vector.shape_cast %269 : vector<32xf32> to vector<1x32xf32>
    %271 = arith.addf %270, %266 : vector<1x32xf32>
    %cst_368 = arith.constant 0.000000e+00 : f32
    %272 = vector.broadcast %cst_368 : f32 to vector<1x32xf32>
    %273 = arith.maximumf %271, %272 : vector<1x32xf32>
    %c0_369 = arith.constant 0 : index
    %c0_370 = arith.constant 0 : index
    %274 = vector.load %arg16[%c0_369, %c0_370] : memref<32x20xbf16, #tpu.memory_space<vmem>>, vector<32x20xbf16>
    %c0_371 = arith.constant 0 : index
    %c0_372 = arith.constant 0 : index
    %275 = vector.load %arg17[%c0_371, %c0_372] : memref<1x20xf32, #tpu.memory_space<vmem>>, vector<1x20xf32>
    %276 = arith.truncf %273 : vector<1x32xf32> to vector<1x32xbf16>
    %cst_373 = arith.constant dense<0.000000e+00> : vector<1x20xf32>
    %277 = tpu.matmul %276, %274, %cst_373 {dimension_numbers = #tpu.dot_dimension_numbers<[1], [0], [0], [1], [0, 0, 1, 1], [], []>} : vector<1x32xbf16>, vector<32x20xbf16>, vector<1x20xf32> -> vector<1x20xf32>
    %278 = arith.addf %277, %275 : vector<1x20xf32>
    %cst_374 = arith.constant 0.000000e+00 : f32
    %279 = vector.broadcast %cst_374 : f32 to vector<1x20xf32>
    %280 = arith.maximumf %278, %279 : vector<1x20xf32>
    %c0_375 = arith.constant 0 : index
    %c0_376 = arith.constant 0 : index
    %281 = vector.load %arg18[%c0_375, %c0_376] : memref<128x13xbf16, #tpu.memory_space<vmem>>, vector<128x13xbf16>
    %c0_377 = arith.constant 0 : index
    %c0_378 = arith.constant 0 : index
    %282 = vector.load %arg19[%c0_377, %c0_378] : memref<128x1xf32, #tpu.memory_space<vmem>>, vector<128x1xf32>
    %c0_379 = arith.constant 0 : index
    %c0_380 = arith.constant 0 : index
    %283 = vector.load %arg34[%c0_379, %c0_380] : memref<64x384xf32, #tpu.memory_space<vmem>>, vector<1x20xf32>
    tpu.vector_store %arg34[%c0_379, %c0_380], %280 {strides = array<i32>} : memref<64x384xf32, #tpu.memory_space<vmem>>, vector<1x20xf32>,
    %c0_381 = arith.constant 0 : index
    %c0_382 = arith.constant 0 : index
    %284 = vector.load %arg34[%c0_381, %c0_382] : memref<64x384xf32, #tpu.memory_space<vmem>>, vector<1x8xf32>
    %c0_383 = arith.constant 0 : index
    %c0_384 = arith.constant 0 : index
    %285 = vector.load %arg33[%c0_383, %c0_384] : memref<832x128xf32, #tpu.memory_space<vmem>>, vector<1x8xf32>
    tpu.vector_store %arg33[%c0_383, %c0_384], %284 {strides = array<i32>} : memref<832x128xf32, #tpu.memory_space<vmem>>, vector<1x8xf32>,
    %c0_385 = arith.constant 0 : index
    %c1_386 = arith.constant 1 : index
    %286 = vector.load %arg34[%c0_385, %c1_386] : memref<64x384xf32, #tpu.memory_space<vmem>>, vector<1x8xf32>
    %c1_387 = arith.constant 1 : index
    %c0_388 = arith.constant 0 : index
    %287 = vector.load %arg33[%c1_387, %c0_388] : memref<832x128xf32, #tpu.memory_space<vmem>>, vector<1x8xf32>
    tpu.vector_store %arg33[%c1_387, %c0_388], %286 {strides = array<i32>} : memref<832x128xf32, #tpu.memory_space<vmem>>, vector<1x8xf32>,
    %c0_389 = arith.constant 0 : index
    %c2_390 = arith.constant 2 : index
    %288 = vector.load %arg34[%c0_389, %c2_390] : memref<64x384xf32, #tpu.memory_space<vmem>>, vector<1x8xf32>
    %c2_391 = arith.constant 2 : index
    %c0_392 = arith.constant 0 : index
    %289 = vector.load %arg33[%c2_391, %c0_392] : memref<832x128xf32, #tpu.memory_space<vmem>>, vector<1x8xf32>
    tpu.vector_store %arg33[%c2_391, %c0_392], %288 {strides = array<i32>} : memref<832x128xf32, #tpu.memory_space<vmem>>, vector<1x8xf32>,
    %c0_393 = arith.constant 0 : index
    %c3_394 = arith.constant 3 : index
    %290 = vector.load %arg34[%c0_393, %c3_394] : memref<64x384xf32, #tpu.memory_space<vmem>>, vector<1x8xf32>
    %c3_395 = arith.constant 3 : index
    %c0_396 = arith.constant 0 : index
    %291 = vector.load %arg33[%c3_395, %c0_396] : memref<832x128xf32, #tpu.memory_space<vmem>>, vector<1x8xf32>
    tpu.vector_store %arg33[%c3_395, %c0_396], %290 {strides = array<i32>} : memref<832x128xf32, #tpu.memory_space<vmem>>, vector<1x8xf32>,
    %c0_397 = arith.constant 0 : index
    %c4_398 = arith.constant 4 : index
    %292 = vector.load %arg34[%c0_397, %c4_398] : memref<64x384xf32, #tpu.memory_space<vmem>>, vector<1x8xf32>
    %c4_399 = arith.constant 4 : index
    %c0_400 = arith.constant 0 : index
    %293 = vector.load %arg33[%c4_399, %c0_400] : memref<832x128xf32, #tpu.memory_space<vmem>>, vector<1x8xf32>
    tpu.vector_store %arg33[%c4_399, %c0_400], %292 {strides = array<i32>} : memref<832x128xf32, #tpu.memory_space<vmem>>, vector<1x8xf32>,
    %c0_401 = arith.constant 0 : index
    %c5_402 = arith.constant 5 : index
    %294 = vector.load %arg34[%c0_401, %c5_402] : memref<64x384xf32, #tpu.memory_space<vmem>>, vector<1x8xf32>
    %c5_403 = arith.constant 5 : index
    %c0_404 = arith.constant 0 : index
    %295 = vector.load %arg33[%c5_403, %c0_404] : memref<832x128xf32, #tpu.memory_space<vmem>>, vector<1x8xf32>
    tpu.vector_store %arg33[%c5_403, %c0_404], %294 {strides = array<i32>} : memref<832x128xf32, #tpu.memory_space<vmem>>, vector<1x8xf32>,
    %c0_405 = arith.constant 0 : index
    %c6_406 = arith.constant 6 : index
    %296 = vector.load %arg34[%c0_405, %c6_406] : memref<64x384xf32, #tpu.memory_space<vmem>>, vector<1x8xf32>
    %c6_407 = arith.constant 6 : index
    %c0_408 = arith.constant 0 : index
    %297 = vector.load %arg33[%c6_407, %c0_408] : memref<832x128xf32, #tpu.memory_space<vmem>>, vector<1x8xf32>
    tpu.vector_store %arg33[%c6_407, %c0_408], %296 {strides = array<i32>} : memref<832x128xf32, #tpu.memory_space<vmem>>, vector<1x8xf32>,
    %c0_409 = arith.constant 0 : index
    %c7_410 = arith.constant 7 : index
    %298 = vector.load %arg34[%c0_409, %c7_410] : memref<64x384xf32, #tpu.memory_space<vmem>>, vector<1x8xf32>
    %c7_411 = arith.constant 7 : index
    %c0_412 = arith.constant 0 : index
    %299 = vector.load %arg33[%c7_411, %c0_412] : memref<832x128xf32, #tpu.memory_space<vmem>>, vector<1x8xf32>
    tpu.vector_store %arg33[%c7_411, %c0_412], %298 {strides = array<i32>} : memref<832x128xf32, #tpu.memory_space<vmem>>, vector<1x8xf32>,
    %c0_413 = arith.constant 0 : index
    %c8_414 = arith.constant 8 : index
    %300 = vector.load %arg34[%c0_413, %c8_414] : memref<64x384xf32, #tpu.memory_space<vmem>>, vector<1x8xf32>
    %c8_415 = arith.constant 8 : index
    %c0_416 = arith.constant 0 : index
    %301 = vector.load %arg33[%c8_415, %c0_416] : memref<832x128xf32, #tpu.memory_space<vmem>>, vector<1x8xf32>
    tpu.vector_store %arg33[%c8_415, %c0_416], %300 {strides = array<i32>} : memref<832x128xf32, #tpu.memory_space<vmem>>, vector<1x8xf32>,
    %c0_417 = arith.constant 0 : index
    %c9_418 = arith.constant 9 : index
    %302 = vector.load %arg34[%c0_417, %c9_418] : memref<64x384xf32, #tpu.memory_space<vmem>>, vector<1x8xf32>
    %c9_419 = arith.constant 9 : index
    %c0_420 = arith.constant 0 : index
    %303 = vector.load %arg33[%c9_419, %c0_420] : memref<832x128xf32, #tpu.memory_space<vmem>>, vector<1x8xf32>
    tpu.vector_store %arg33[%c9_419, %c0_420], %302 {strides = array<i32>} : memref<832x128xf32, #tpu.memory_space<vmem>>, vector<1x8xf32>,
    %c0_421 = arith.constant 0 : index
    %c10_422 = arith.constant 10 : index
    %304 = vector.load %arg34[%c0_421, %c10_422] : memref<64x384xf32, #tpu.memory_space<vmem>>, vector<1x8xf32>
    %c10_423 = arith.constant 10 : index
    %c0_424 = arith.constant 0 : index
    %305 = vector.load %arg33[%c10_423, %c0_424] : memref<832x128xf32, #tpu.memory_space<vmem>>, vector<1x8xf32>
    tpu.vector_store %arg33[%c10_423, %c0_424], %304 {strides = array<i32>} : memref<832x128xf32, #tpu.memory_space<vmem>>, vector<1x8xf32>,
    %c0_425 = arith.constant 0 : index
    %c11_426 = arith.constant 11 : index
    %306 = vector.load %arg34[%c0_425, %c11_426] : memref<64x384xf32, #tpu.memory_space<vmem>>, vector<1x8xf32>
    %c11_427 = arith.constant 11 : index
    %c0_428 = arith.constant 0 : index
    %307 = vector.load %arg33[%c11_427, %c0_428] : memref<832x128xf32, #tpu.memory_space<vmem>>, vector<1x8xf32>
    tpu.vector_store %arg33[%c11_427, %c0_428], %306 {strides = array<i32>} : memref<832x128xf32, #tpu.memory_space<vmem>>, vector<1x8xf32>,
    %c0_429 = arith.constant 0 : index
    %c12_430 = arith.constant 12 : index
    %308 = vector.load %arg34[%c0_429, %c12_430] : memref<64x384xf32, #tpu.memory_space<vmem>>, vector<1x8xf32>
    %c12_431 = arith.constant 12 : index
    %c0_432 = arith.constant 0 : index
    %309 = vector.load %arg33[%c12_431, %c0_432] : memref<832x128xf32, #tpu.memory_space<vmem>>, vector<1x8xf32>
    tpu.vector_store %arg33[%c12_431, %c0_432], %308 {strides = array<i32>} : memref<832x128xf32, #tpu.memory_space<vmem>>, vector<1x8xf32>,
    %c0_433 = arith.constant 0 : index
    %c0_434 = arith.constant 0 : index
    %310 = vector.load %arg33[%c0_433, %c0_434] : memref<832x128xf32, #tpu.memory_space<vmem>>, vector<13x8xf32>
    %311 = arith.truncf %310 : vector<13x8xf32> to vector<13x8xbf16>
    %cst_435 = arith.constant dense<0.000000e+00> : vector<128x8xf32>
    %312 = tpu.matmul %281, %311, %cst_435 {dimension_numbers = #tpu.dot_dimension_numbers<[1], [0], [0], [1], [0, 0, 1, 1], [], []>} : vector<128x13xbf16>, vector<13x8xbf16>, vector<128x8xf32> -> vector<128x8xf32>
    %313 = vector.broadcast %282 : vector<128x1xf32> to vector<128x8xf32>
    %314 = arith.addf %312, %313 : vector<128x8xf32>
    %cst_436 = arith.constant 0.000000e+00 : f32
    %315 = vector.broadcast %cst_436 : f32 to vector<128x8xf32>
    %316 = arith.maximumf %314, %315 : vector<128x8xf32>
    %c0_437 = arith.constant 0 : index
    %c0_438 = arith.constant 0 : index
    %317 = vector.load %arg20[%c0_437, %c0_438] : memref<16x28xbf16, #tpu.memory_space<vmem>>, vector<16x28xbf16>
    %318 = vector.extract_strided_slice %316 {offsets = [0, 0], sizes = [64, 8], strides = [1, 1]} : vector<128x8xf32> to vector<64x8xf32>
    %319 = vector.extract_strided_slice %316 {offsets = [64, 0], sizes = [64, 8], strides = [1, 1]} : vector<128x8xf32> to vector<64x8xf32>
    %320 = tpu.concatenate %318, %319 in 1 : vector<64x8xf32>, vector<64x8xf32> -> vector<64x16xf32>
    %321 = arith.truncf %320 : vector<64x16xf32> to vector<64x16xbf16>
    %cst_439 = arith.constant dense<0.000000e+00> : vector<64x28xf32>
    %322 = tpu.matmul %321, %317, %cst_439 {dimension_numbers = #tpu.dot_dimension_numbers<[1], [0], [0], [1], [0, 0, 1, 1], [], []>} : vector<64x16xbf16>, vector<16x28xbf16>, vector<64x28xf32> -> vector<64x28xf32>
    %c0_440 = arith.constant 0 : index
    %c0_441 = arith.constant 0 : index
    %323 = vector.load %arg21[%c0_440, %c0_441] : memref<64x832xbf16, #tpu.memory_space<vmem>>, vector<64x832xbf16>
    %c0_442 = arith.constant 0 : index
    %c0_443 = arith.constant 0 : index
    %324 = vector.load %arg22[%c0_442, %c0_443] : memref<64x1xf32, #tpu.memory_space<vmem>>, vector<64x1xf32>
    %c0_444 = arith.constant 0 : index
    %c0_445 = arith.constant 0 : index
    %325 = vector.load %arg34[%c0_444, %c0_445] : memref<64x384xf32, #tpu.memory_space<vmem>>, vector<64x28xf32>
    tpu.vector_store %arg34[%c0_444, %c0_445], %322 {strides = array<i32>} : memref<64x384xf32, #tpu.memory_space<vmem>>, vector<64x28xf32>,
    %c0_446 = arith.constant 0 : index
    %c0_447 = arith.constant 0 : index
    %326 = vector.load %arg34[%c0_446, %c0_447] : memref<64x384xf32, #tpu.memory_space<vmem>>, vector<64x16xf32>
    %c0_448 = arith.constant 0 : index
    %c0_449 = arith.constant 0 : index
    %327 = vector.load %arg33[%c0_448, %c0_449] : memref<832x128xf32, #tpu.memory_space<vmem>>, vector<64x16xf32>
    tpu.vector_store %arg33[%c0_448, %c0_449], %326 {strides = array<i32>} : memref<832x128xf32, #tpu.memory_space<vmem>>, vector<64x16xf32>,
    %c0_450 = arith.constant 0 : index
    %c1_451 = arith.constant 1 : index
    %328 = vector.load %arg34[%c0_450, %c1_451] : memref<64x384xf32, #tpu.memory_space<vmem>>, vector<64x16xf32>
    %c64_452 = arith.constant 64 : index
    %c0_453 = arith.constant 0 : index
    %329 = vector.load %arg33[%c64_452, %c0_453] : memref<832x128xf32, #tpu.memory_space<vmem>>, vector<64x16xf32>
    tpu.vector_store %arg33[%c64_452, %c0_453], %328 {strides = array<i32>} : memref<832x128xf32, #tpu.memory_space<vmem>>, vector<64x16xf32>,
    %c0_454 = arith.constant 0 : index
    %c2_455 = arith.constant 2 : index
    %330 = vector.load %arg34[%c0_454, %c2_455] : memref<64x384xf32, #tpu.memory_space<vmem>>, vector<64x16xf32>
    %c128_456 = arith.constant 128 : index
    %c0_457 = arith.constant 0 : index
    %331 = vector.load %arg33[%c128_456, %c0_457] : memref<832x128xf32, #tpu.memory_space<vmem>>, vector<64x16xf32>
    tpu.vector_store %arg33[%c128_456, %c0_457], %330 {strides = array<i32>} : memref<832x128xf32, #tpu.memory_space<vmem>>, vector<64x16xf32>,
    %c0_458 = arith.constant 0 : index
    %c3_459 = arith.constant 3 : index
    %332 = vector.load %arg34[%c0_458, %c3_459] : memref<64x384xf32, #tpu.memory_space<vmem>>, vector<64x16xf32>
    %c192_460 = arith.constant 192 : index
    %c0_461 = arith.constant 0 : index
    %333 = vector.load %arg33[%c192_460, %c0_461] : memref<832x128xf32, #tpu.memory_space<vmem>>, vector<64x16xf32>
    tpu.vector_store %arg33[%c192_460, %c0_461], %332 {strides = array<i32>} : memref<832x128xf32, #tpu.memory_space<vmem>>, vector<64x16xf32>,
    %c0_462 = arith.constant 0 : index
    %c4_463 = arith.constant 4 : index
    %334 = vector.load %arg34[%c0_462, %c4_463] : memref<64x384xf32, #tpu.memory_space<vmem>>, vector<64x16xf32>
    %c256_464 = arith.constant 256 : index
    %c0_465 = arith.constant 0 : index
    %335 = vector.load %arg33[%c256_464, %c0_465] : memref<832x128xf32, #tpu.memory_space<vmem>>, vector<64x16xf32>
    tpu.vector_store %arg33[%c256_464, %c0_465], %334 {strides = array<i32>} : memref<832x128xf32, #tpu.memory_space<vmem>>, vector<64x16xf32>,
    %c0_466 = arith.constant 0 : index
    %c5_467 = arith.constant 5 : index
    %336 = vector.load %arg34[%c0_466, %c5_467] : memref<64x384xf32, #tpu.memory_space<vmem>>, vector<64x16xf32>
    %c320_468 = arith.constant 320 : index
    %c0_469 = arith.constant 0 : index
    %337 = vector.load %arg33[%c320_468, %c0_469] : memref<832x128xf32, #tpu.memory_space<vmem>>, vector<64x16xf32>
    tpu.vector_store %arg33[%c320_468, %c0_469], %336 {strides = array<i32>} : memref<832x128xf32, #tpu.memory_space<vmem>>, vector<64x16xf32>,
    %c0_470 = arith.constant 0 : index
    %c6_471 = arith.constant 6 : index
    %338 = vector.load %arg34[%c0_470, %c6_471] : memref<64x384xf32, #tpu.memory_space<vmem>>, vector<64x16xf32>
    %c384_472 = arith.constant 384 : index
    %c0_473 = arith.constant 0 : index
    %339 = vector.load %arg33[%c384_472, %c0_473] : memref<832x128xf32, #tpu.memory_space<vmem>>, vector<64x16xf32>
    tpu.vector_store %arg33[%c384_472, %c0_473], %338 {strides = array<i32>} : memref<832x128xf32, #tpu.memory_space<vmem>>, vector<64x16xf32>,
    %c0_474 = arith.constant 0 : index
    %c7_475 = arith.constant 7 : index
    %340 = vector.load %arg34[%c0_474, %c7_475] : memref<64x384xf32, #tpu.memory_space<vmem>>, vector<64x16xf32>
    %c448_476 = arith.constant 448 : index
    %c0_477 = arith.constant 0 : index
    %341 = vector.load %arg33[%c448_476, %c0_477] : memref<832x128xf32, #tpu.memory_space<vmem>>, vector<64x16xf32>
    tpu.vector_store %arg33[%c448_476, %c0_477], %340 {strides = array<i32>} : memref<832x128xf32, #tpu.memory_space<vmem>>, vector<64x16xf32>,
    %c0_478 = arith.constant 0 : index
    %c8_479 = arith.constant 8 : index
    %342 = vector.load %arg34[%c0_478, %c8_479] : memref<64x384xf32, #tpu.memory_space<vmem>>, vector<64x16xf32>
    %c512_480 = arith.constant 512 : index
    %c0_481 = arith.constant 0 : index
    %343 = vector.load %arg33[%c512_480, %c0_481] : memref<832x128xf32, #tpu.memory_space<vmem>>, vector<64x16xf32>
    tpu.vector_store %arg33[%c512_480, %c0_481], %342 {strides = array<i32>} : memref<832x128xf32, #tpu.memory_space<vmem>>, vector<64x16xf32>,
    %c0_482 = arith.constant 0 : index
    %c9_483 = arith.constant 9 : index
    %344 = vector.load %arg34[%c0_482, %c9_483] : memref<64x384xf32, #tpu.memory_space<vmem>>, vector<64x16xf32>
    %c576_484 = arith.constant 576 : index
    %c0_485 = arith.constant 0 : index
    %345 = vector.load %arg33[%c576_484, %c0_485] : memref<832x128xf32, #tpu.memory_space<vmem>>, vector<64x16xf32>
    tpu.vector_store %arg33[%c576_484, %c0_485], %344 {strides = array<i32>} : memref<832x128xf32, #tpu.memory_space<vmem>>, vector<64x16xf32>,
    %c0_486 = arith.constant 0 : index
    %c10_487 = arith.constant 10 : index
    %346 = vector.load %arg34[%c0_486, %c10_487] : memref<64x384xf32, #tpu.memory_space<vmem>>, vector<64x16xf32>
    %c640_488 = arith.constant 640 : index
    %c0_489 = arith.constant 0 : index
    %347 = vector.load %arg33[%c640_488, %c0_489] : memref<832x128xf32, #tpu.memory_space<vmem>>, vector<64x16xf32>
    tpu.vector_store %arg33[%c640_488, %c0_489], %346 {strides = array<i32>} : memref<832x128xf32, #tpu.memory_space<vmem>>, vector<64x16xf32>,
    %c0_490 = arith.constant 0 : index
    %c11_491 = arith.constant 11 : index
    %348 = vector.load %arg34[%c0_490, %c11_491] : memref<64x384xf32, #tpu.memory_space<vmem>>, vector<64x16xf32>
    %c704_492 = arith.constant 704 : index
    %c0_493 = arith.constant 0 : index
    %349 = vector.load %arg33[%c704_492, %c0_493] : memref<832x128xf32, #tpu.memory_space<vmem>>, vector<64x16xf32>
    tpu.vector_store %arg33[%c704_492, %c0_493], %348 {strides = array<i32>} : memref<832x128xf32, #tpu.memory_space<vmem>>, vector<64x16xf32>,
    %c0_494 = arith.constant 0 : index
    %c12_495 = arith.constant 12 : index
    %350 = vector.load %arg34[%c0_494, %c12_495] : memref<64x384xf32, #tpu.memory_space<vmem>>, vector<64x16xf32>
    %c768_496 = arith.constant 768 : index
    %c0_497 = arith.constant 0 : index
    %351 = vector.load %arg33[%c768_496, %c0_497] : memref<832x128xf32, #tpu.memory_space<vmem>>, vector<64x16xf32>
    tpu.vector_store %arg33[%c768_496, %c0_497], %350 {strides = array<i32>} : memref<832x128xf32, #tpu.memory_space<vmem>>, vector<64x16xf32>,
    %c0_498 = arith.constant 0 : index
    %c0_499 = arith.constant 0 : index
    %352 = vector.load %arg33[%c0_498, %c0_499] : memref<832x128xf32, #tpu.memory_space<vmem>>, vector<832x16xf32>
    %353 = arith.truncf %352 : vector<832x16xf32> to vector<832x16xbf16>
    %cst_500 = arith.constant dense<0.000000e+00> : vector<64x16xf32>
    %354 = tpu.matmul %323, %353, %cst_500 {dimension_numbers = #tpu.dot_dimension_numbers<[1], [0], [0], [1], [0, 0, 1, 1], [], []>} : vector<64x832xbf16>, vector<832x16xbf16>, vector<64x16xf32> -> vector<64x16xf32>
    %355 = vector.broadcast %324 : vector<64x1xf32> to vector<64x16xf32>
    %356 = arith.addf %354, %355 : vector<64x16xf32>
    %cst_501 = arith.constant 0.000000e+00 : f32
    %357 = vector.broadcast %cst_501 : f32 to vector<64x16xf32>
    %358 = arith.maximumf %356, %357 : vector<64x16xf32>
    %c0_502 = arith.constant 0 : index
    %c0_503 = arith.constant 0 : index
    %359 = vector.load %arg23[%c0_502, %c0_503] : memref<32x44xbf16, #tpu.memory_space<vmem>>, vector<32x44xbf16>
    %360 = vector.extract_strided_slice %358 {offsets = [0, 0], sizes = [32, 16], strides = [1, 1]} : vector<64x16xf32> to vector<32x16xf32>
    %361 = vector.extract_strided_slice %358 {offsets = [32, 0], sizes = [32, 16], strides = [1, 1]} : vector<64x16xf32> to vector<32x16xf32>
    %362 = tpu.concatenate %360, %361 in 1 : vector<32x16xf32>, vector<32x16xf32> -> vector<32x32xf32>
    %363 = arith.truncf %362 : vector<32x32xf32> to vector<32x32xbf16>
    %cst_504 = arith.constant dense<0.000000e+00> : vector<32x44xf32>
    %364 = tpu.matmul %363, %359, %cst_504 {dimension_numbers = #tpu.dot_dimension_numbers<[1], [0], [0], [1], [0, 0, 1, 1], [], []>} : vector<32x32xbf16>, vector<32x44xbf16>, vector<32x44xf32> -> vector<32x44xf32>
    %c0_505 = arith.constant 0 : index
    %c0_506 = arith.constant 0 : index
    %365 = vector.load %arg24[%c0_505, %c0_506] : memref<64x416xbf16, #tpu.memory_space<vmem>>, vector<64x416xbf16>
    %c0_507 = arith.constant 0 : index
    %c0_508 = arith.constant 0 : index
    %366 = vector.load %arg25[%c0_507, %c0_508] : memref<64x1xf32, #tpu.memory_space<vmem>>, vector<64x1xf32>
    %c0_509 = arith.constant 0 : index
    %c0_510 = arith.constant 0 : index
    %367 = vector.load %arg34[%c0_509, %c0_510] : memref<64x384xf32, #tpu.memory_space<vmem>>, vector<32x44xf32>
    tpu.vector_store %arg34[%c0_509, %c0_510], %364 {strides = array<i32>} : memref<64x384xf32, #tpu.memory_space<vmem>>, vector<32x44xf32>,
    %c0_511 = arith.constant 0 : index
    %c0_512 = arith.constant 0 : index
    %368 = vector.load %arg34[%c0_511, %c0_512] : memref<64x384xf32, #tpu.memory_space<vmem>>, vector<32x32xf32>
    %c0_513 = arith.constant 0 : index
    %c0_514 = arith.constant 0 : index
    %369 = vector.load %arg33[%c0_513, %c0_514] : memref<832x128xf32, #tpu.memory_space<vmem>>, vector<32x32xf32>
    tpu.vector_store %arg33[%c0_513, %c0_514], %368 {strides = array<i32>} : memref<832x128xf32, #tpu.memory_space<vmem>>, vector<32x32xf32>,
    %c0_515 = arith.constant 0 : index
    %c1_516 = arith.constant 1 : index
    %370 = vector.load %arg34[%c0_515, %c1_516] : memref<64x384xf32, #tpu.memory_space<vmem>>, vector<32x32xf32>
    %c32_517 = arith.constant 32 : index
    %c0_518 = arith.constant 0 : index
    %371 = vector.load %arg33[%c32_517, %c0_518] : memref<832x128xf32, #tpu.memory_space<vmem>>, vector<32x32xf32>
    tpu.vector_store %arg33[%c32_517, %c0_518], %370 {strides = array<i32>} : memref<832x128xf32, #tpu.memory_space<vmem>>, vector<32x32xf32>,
    %c0_519 = arith.constant 0 : index
    %c2_520 = arith.constant 2 : index
    %372 = vector.load %arg34[%c0_519, %c2_520] : memref<64x384xf32, #tpu.memory_space<vmem>>, vector<32x32xf32>
    %c64_521 = arith.constant 64 : index
    %c0_522 = arith.constant 0 : index
    %373 = vector.load %arg33[%c64_521, %c0_522] : memref<832x128xf32, #tpu.memory_space<vmem>>, vector<32x32xf32>
    tpu.vector_store %arg33[%c64_521, %c0_522], %372 {strides = array<i32>} : memref<832x128xf32, #tpu.memory_space<vmem>>, vector<32x32xf32>,
    %c0_523 = arith.constant 0 : index
    %c3_524 = arith.constant 3 : index
    %374 = vector.load %arg34[%c0_523, %c3_524] : memref<64x384xf32, #tpu.memory_space<vmem>>, vector<32x32xf32>
    %c96_525 = arith.constant 96 : index
    %c0_526 = arith.constant 0 : index
    %375 = vector.load %arg33[%c96_525, %c0_526] : memref<832x128xf32, #tpu.memory_space<vmem>>, vector<32x32xf32>
    tpu.vector_store %arg33[%c96_525, %c0_526], %374 {strides = array<i32>} : memref<832x128xf32, #tpu.memory_space<vmem>>, vector<32x32xf32>,
    %c0_527 = arith.constant 0 : index
    %c4_528 = arith.constant 4 : index
    %376 = vector.load %arg34[%c0_527, %c4_528] : memref<64x384xf32, #tpu.memory_space<vmem>>, vector<32x32xf32>
    %c128_529 = arith.constant 128 : index
    %c0_530 = arith.constant 0 : index
    %377 = vector.load %arg33[%c128_529, %c0_530] : memref<832x128xf32, #tpu.memory_space<vmem>>, vector<32x32xf32>
    tpu.vector_store %arg33[%c128_529, %c0_530], %376 {strides = array<i32>} : memref<832x128xf32, #tpu.memory_space<vmem>>, vector<32x32xf32>,
    %c0_531 = arith.constant 0 : index
    %c5_532 = arith.constant 5 : index
    %378 = vector.load %arg34[%c0_531, %c5_532] : memref<64x384xf32, #tpu.memory_space<vmem>>, vector<32x32xf32>
    %c160_533 = arith.constant 160 : index
    %c0_534 = arith.constant 0 : index
    %379 = vector.load %arg33[%c160_533, %c0_534] : memref<832x128xf32, #tpu.memory_space<vmem>>, vector<32x32xf32>
    tpu.vector_store %arg33[%c160_533, %c0_534], %378 {strides = array<i32>} : memref<832x128xf32, #tpu.memory_space<vmem>>, vector<32x32xf32>,
    %c0_535 = arith.constant 0 : index
    %c6_536 = arith.constant 6 : index
    %380 = vector.load %arg34[%c0_535, %c6_536] : memref<64x384xf32, #tpu.memory_space<vmem>>, vector<32x32xf32>
    %c192_537 = arith.constant 192 : index
    %c0_538 = arith.constant 0 : index
    %381 = vector.load %arg33[%c192_537, %c0_538] : memref<832x128xf32, #tpu.memory_space<vmem>>, vector<32x32xf32>
    tpu.vector_store %arg33[%c192_537, %c0_538], %380 {strides = array<i32>} : memref<832x128xf32, #tpu.memory_space<vmem>>, vector<32x32xf32>,
    %c0_539 = arith.constant 0 : index
    %c7_540 = arith.constant 7 : index
    %382 = vector.load %arg34[%c0_539, %c7_540] : memref<64x384xf32, #tpu.memory_space<vmem>>, vector<32x32xf32>
    %c224_541 = arith.constant 224 : index
    %c0_542 = arith.constant 0 : index
    %383 = vector.load %arg33[%c224_541, %c0_542] : memref<832x128xf32, #tpu.memory_space<vmem>>, vector<32x32xf32>
    tpu.vector_store %arg33[%c224_541, %c0_542], %382 {strides = array<i32>} : memref<832x128xf32, #tpu.memory_space<vmem>>, vector<32x32xf32>,
    %c0_543 = arith.constant 0 : index
    %c8_544 = arith.constant 8 : index
    %384 = vector.load %arg34[%c0_543, %c8_544] : memref<64x384xf32, #tpu.memory_space<vmem>>, vector<32x32xf32>
    %c256_545 = arith.constant 256 : index
    %c0_546 = arith.constant 0 : index
    %385 = vector.load %arg33[%c256_545, %c0_546] : memref<832x128xf32, #tpu.memory_space<vmem>>, vector<32x32xf32>
    tpu.vector_store %arg33[%c256_545, %c0_546], %384 {strides = array<i32>} : memref<832x128xf32, #tpu.memory_space<vmem>>, vector<32x32xf32>,
    %c0_547 = arith.constant 0 : index
    %c9_548 = arith.constant 9 : index
    %386 = vector.load %arg34[%c0_547, %c9_548] : memref<64x384xf32, #tpu.memory_space<vmem>>, vector<32x32xf32>
    %c288_549 = arith.constant 288 : index
    %c0_550 = arith.constant 0 : index
    %387 = vector.load %arg33[%c288_549, %c0_550] : memref<832x128xf32, #tpu.memory_space<vmem>>, vector<32x32xf32>
    tpu.vector_store %arg33[%c288_549, %c0_550], %386 {strides = array<i32>} : memref<832x128xf32, #tpu.memory_space<vmem>>, vector<32x32xf32>,
    %c0_551 = arith.constant 0 : index
    %c10_552 = arith.constant 10 : index
    %388 = vector.load %arg34[%c0_551, %c10_552] : memref<64x384xf32, #tpu.memory_space<vmem>>, vector<32x32xf32>
    %c320_553 = arith.constant 320 : index
    %c0_554 = arith.constant 0 : index
    %389 = vector.load %arg33[%c320_553, %c0_554] : memref<832x128xf32, #tpu.memory_space<vmem>>, vector<32x32xf32>
    tpu.vector_store %arg33[%c320_553, %c0_554], %388 {strides = array<i32>} : memref<832x128xf32, #tpu.memory_space<vmem>>, vector<32x32xf32>,
    %c0_555 = arith.constant 0 : index
    %c11_556 = arith.constant 11 : index
    %390 = vector.load %arg34[%c0_555, %c11_556] : memref<64x384xf32, #tpu.memory_space<vmem>>, vector<32x32xf32>
    %c352_557 = arith.constant 352 : index
    %c0_558 = arith.constant 0 : index
    %391 = vector.load %arg33[%c352_557, %c0_558] : memref<832x128xf32, #tpu.memory_space<vmem>>, vector<32x32xf32>
    tpu.vector_store %arg33[%c352_557, %c0_558], %390 {strides = array<i32>} : memref<832x128xf32, #tpu.memory_space<vmem>>, vector<32x32xf32>,
    %c0_559 = arith.constant 0 : index
    %c12_560 = arith.constant 12 : index
    %392 = vector.load %arg34[%c0_559, %c12_560] : memref<64x384xf32, #tpu.memory_space<vmem>>, vector<32x32xf32>
    %c384_561 = arith.constant 384 : index
    %c0_562 = arith.constant 0 : index
    %393 = vector.load %arg33[%c384_561, %c0_562] : memref<832x128xf32, #tpu.memory_space<vmem>>, vector<32x32xf32>
    tpu.vector_store %arg33[%c384_561, %c0_562], %392 {strides = array<i32>} : memref<832x128xf32, #tpu.memory_space<vmem>>, vector<32x32xf32>,
    %c0_563 = arith.constant 0 : index
    %c0_564 = arith.constant 0 : index
    %394 = vector.load %arg33[%c0_563, %c0_564] : memref<832x128xf32, #tpu.memory_space<vmem>>, vector<416x32xf32>
    %395 = arith.truncf %394 : vector<416x32xf32> to vector<416x32xbf16>
    %cst_565 = arith.constant dense<0.000000e+00> : vector<64x32xf32>
    %396 = tpu.matmul %365, %395, %cst_565 {dimension_numbers = #tpu.dot_dimension_numbers<[1], [0], [0], [1], [0, 0, 1, 1], [], []>} : vector<64x416xbf16>, vector<416x32xbf16>, vector<64x32xf32> -> vector<64x32xf32>
    %397 = vector.broadcast %366 : vector<64x1xf32> to vector<64x32xf32>
    %398 = arith.addf %396, %397 : vector<64x32xf32>
    %cst_566 = arith.constant 0.000000e+00 : f32
    %399 = vector.broadcast %cst_566 : f32 to vector<64x32xf32>
    %400 = arith.maximumf %398, %399 : vector<64x32xf32>
    %c0_567 = arith.constant 0 : index
    %c0_568 = arith.constant 0 : index
    %401 = vector.load %arg26[%c0_567, %c0_568] : memref<64x76xbf16, #tpu.memory_space<vmem>>, vector<64x76xbf16>
    %402 = vector.extract_strided_slice %400 {offsets = [0, 0], sizes = [32, 32], strides = [1, 1]} : vector<64x32xf32> to vector<32x32xf32>
    %403 = vector.extract_strided_slice %400 {offsets = [32, 0], sizes = [32, 32], strides = [1, 1]} : vector<64x32xf32> to vector<32x32xf32>
    %404 = tpu.concatenate %402, %403 in 1 : vector<32x32xf32>, vector<32x32xf32> -> vector<32x64xf32>
    %405 = arith.truncf %404 : vector<32x64xf32> to vector<32x64xbf16>
    %cst_569 = arith.constant dense<0.000000e+00> : vector<32x76xf32>
    %406 = tpu.matmul %405, %401, %cst_569 {dimension_numbers = #tpu.dot_dimension_numbers<[1], [0], [0], [1], [0, 0, 1, 1], [], []>} : vector<32x64xbf16>, vector<64x76xbf16>, vector<32x76xf32> -> vector<32x76xf32>
    %c0_570 = arith.constant 0 : index
    %c0_571 = arith.constant 0 : index
    %407 = vector.load %arg27[%c0_570, %c0_571] : memref<32x416xbf16, #tpu.memory_space<vmem>>, vector<32x416xbf16>
    %c0_572 = arith.constant 0 : index
    %c0_573 = arith.constant 0 : index
    %408 = vector.load %arg28[%c0_572, %c0_573] : memref<32x1xf32, #tpu.memory_space<vmem>>, vector<32x1xf32>
    %c0_574 = arith.constant 0 : index
    %c0_575 = arith.constant 0 : index
    %409 = vector.load %arg34[%c0_574, %c0_575] : memref<64x384xf32, #tpu.memory_space<vmem>>, vector<32x76xf32>
    tpu.vector_store %arg34[%c0_574, %c0_575], %406 {strides = array<i32>} : memref<64x384xf32, #tpu.memory_space<vmem>>, vector<32x76xf32>,
    %c0_576 = arith.constant 0 : index
    %c0_577 = arith.constant 0 : index
    %410 = vector.load %arg34[%c0_576, %c0_577] : memref<64x384xf32, #tpu.memory_space<vmem>>, vector<32x64xf32>
    %c0_578 = arith.constant 0 : index
    %c0_579 = arith.constant 0 : index
    %411 = vector.load %arg33[%c0_578, %c0_579] : memref<832x128xf32, #tpu.memory_space<vmem>>, vector<32x64xf32>
    tpu.vector_store %arg33[%c0_578, %c0_579], %410 {strides = array<i32>} : memref<832x128xf32, #tpu.memory_space<vmem>>, vector<32x64xf32>,
    %c0_580 = arith.constant 0 : index
    %c1_581 = arith.constant 1 : index
    %412 = vector.load %arg34[%c0_580, %c1_581] : memref<64x384xf32, #tpu.memory_space<vmem>>, vector<32x64xf32>
    %c32_582 = arith.constant 32 : index
    %c0_583 = arith.constant 0 : index
    %413 = vector.load %arg33[%c32_582, %c0_583] : memref<832x128xf32, #tpu.memory_space<vmem>>, vector<32x64xf32>
    tpu.vector_store %arg33[%c32_582, %c0_583], %412 {strides = array<i32>} : memref<832x128xf32, #tpu.memory_space<vmem>>, vector<32x64xf32>,
    %c0_584 = arith.constant 0 : index
    %c2_585 = arith.constant 2 : index
    %414 = vector.load %arg34[%c0_584, %c2_585] : memref<64x384xf32, #tpu.memory_space<vmem>>, vector<32x64xf32>
    %c64_586 = arith.constant 64 : index
    %c0_587 = arith.constant 0 : index
    %415 = vector.load %arg33[%c64_586, %c0_587] : memref<832x128xf32, #tpu.memory_space<vmem>>, vector<32x64xf32>
    tpu.vector_store %arg33[%c64_586, %c0_587], %414 {strides = array<i32>} : memref<832x128xf32, #tpu.memory_space<vmem>>, vector<32x64xf32>,
    %c0_588 = arith.constant 0 : index
    %c3_589 = arith.constant 3 : index
    %416 = vector.load %arg34[%c0_588, %c3_589] : memref<64x384xf32, #tpu.memory_space<vmem>>, vector<32x64xf32>
    %c96_590 = arith.constant 96 : index
    %c0_591 = arith.constant 0 : index
    %417 = vector.load %arg33[%c96_590, %c0_591] : memref<832x128xf32, #tpu.memory_space<vmem>>, vector<32x64xf32>
    tpu.vector_store %arg33[%c96_590, %c0_591], %416 {strides = array<i32>} : memref<832x128xf32, #tpu.memory_space<vmem>>, vector<32x64xf32>,
    %c0_592 = arith.constant 0 : index
    %c4_593 = arith.constant 4 : index
    %418 = vector.load %arg34[%c0_592, %c4_593] : memref<64x384xf32, #tpu.memory_space<vmem>>, vector<32x64xf32>
    %c128_594 = arith.constant 128 : index
    %c0_595 = arith.constant 0 : index
    %419 = vector.load %arg33[%c128_594, %c0_595] : memref<832x128xf32, #tpu.memory_space<vmem>>, vector<32x64xf32>
    tpu.vector_store %arg33[%c128_594, %c0_595], %418 {strides = array<i32>} : memref<832x128xf32, #tpu.memory_space<vmem>>, vector<32x64xf32>,
    %c0_596 = arith.constant 0 : index
    %c5_597 = arith.constant 5 : index
    %420 = vector.load %arg34[%c0_596, %c5_597] : memref<64x384xf32, #tpu.memory_space<vmem>>, vector<32x64xf32>
    %c160_598 = arith.constant 160 : index
    %c0_599 = arith.constant 0 : index
    %421 = vector.load %arg33[%c160_598, %c0_599] : memref<832x128xf32, #tpu.memory_space<vmem>>, vector<32x64xf32>
    tpu.vector_store %arg33[%c160_598, %c0_599], %420 {strides = array<i32>} : memref<832x128xf32, #tpu.memory_space<vmem>>, vector<32x64xf32>,
    %c0_600 = arith.constant 0 : index
    %c6_601 = arith.constant 6 : index
    %422 = vector.load %arg34[%c0_600, %c6_601] : memref<64x384xf32, #tpu.memory_space<vmem>>, vector<32x64xf32>
    %c192_602 = arith.constant 192 : index
    %c0_603 = arith.constant 0 : index
    %423 = vector.load %arg33[%c192_602, %c0_603] : memref<832x128xf32, #tpu.memory_space<vmem>>, vector<32x64xf32>
    tpu.vector_store %arg33[%c192_602, %c0_603], %422 {strides = array<i32>} : memref<832x128xf32, #tpu.memory_space<vmem>>, vector<32x64xf32>,
    %c0_604 = arith.constant 0 : index
    %c7_605 = arith.constant 7 : index
    %424 = vector.load %arg34[%c0_604, %c7_605] : memref<64x384xf32, #tpu.memory_space<vmem>>, vector<32x64xf32>
    %c224_606 = arith.constant 224 : index
    %c0_607 = arith.constant 0 : index
    %425 = vector.load %arg33[%c224_606, %c0_607] : memref<832x128xf32, #tpu.memory_space<vmem>>, vector<32x64xf32>
    tpu.vector_store %arg33[%c224_606, %c0_607], %424 {strides = array<i32>} : memref<832x128xf32, #tpu.memory_space<vmem>>, vector<32x64xf32>,
    %c0_608 = arith.constant 0 : index
    %c8_609 = arith.constant 8 : index
    %426 = vector.load %arg34[%c0_608, %c8_609] : memref<64x384xf32, #tpu.memory_space<vmem>>, vector<32x64xf32>
    %c256_610 = arith.constant 256 : index
    %c0_611 = arith.constant 0 : index
    %427 = vector.load %arg33[%c256_610, %c0_611] : memref<832x128xf32, #tpu.memory_space<vmem>>, vector<32x64xf32>
    tpu.vector_store %arg33[%c256_610, %c0_611], %426 {strides = array<i32>} : memref<832x128xf32, #tpu.memory_space<vmem>>, vector<32x64xf32>,
    %c0_612 = arith.constant 0 : index
    %c9_613 = arith.constant 9 : index
    %428 = vector.load %arg34[%c0_612, %c9_613] : memref<64x384xf32, #tpu.memory_space<vmem>>, vector<32x64xf32>
    %c288_614 = arith.constant 288 : index
    %c0_615 = arith.constant 0 : index
    %429 = vector.load %arg33[%c288_614, %c0_615] : memref<832x128xf32, #tpu.memory_space<vmem>>, vector<32x64xf32>
    tpu.vector_store %arg33[%c288_614, %c0_615], %428 {strides = array<i32>} : memref<832x128xf32, #tpu.memory_space<vmem>>, vector<32x64xf32>,
    %c0_616 = arith.constant 0 : index
    %c10_617 = arith.constant 10 : index
    %430 = vector.load %arg34[%c0_616, %c10_617] : memref<64x384xf32, #tpu.memory_space<vmem>>, vector<32x64xf32>
    %c320_618 = arith.constant 320 : index
    %c0_619 = arith.constant 0 : index
    %431 = vector.load %arg33[%c320_618, %c0_619] : memref<832x128xf32, #tpu.memory_space<vmem>>, vector<32x64xf32>
    tpu.vector_store %arg33[%c320_618, %c0_619], %430 {strides = array<i32>} : memref<832x128xf32, #tpu.memory_space<vmem>>, vector<32x64xf32>,
    %c0_620 = arith.constant 0 : index
    %c11_621 = arith.constant 11 : index
    %432 = vector.load %arg34[%c0_620, %c11_621] : memref<64x384xf32, #tpu.memory_space<vmem>>, vector<32x64xf32>
    %c352_622 = arith.constant 352 : index
    %c0_623 = arith.constant 0 : index
    %433 = vector.load %arg33[%c352_622, %c0_623] : memref<832x128xf32, #tpu.memory_space<vmem>>, vector<32x64xf32>
    tpu.vector_store %arg33[%c352_622, %c0_623], %432 {strides = array<i32>} : memref<832x128xf32, #tpu.memory_space<vmem>>, vector<32x64xf32>,
    %c0_624 = arith.constant 0 : index
    %c12_625 = arith.constant 12 : index
    %434 = vector.load %arg34[%c0_624, %c12_625] : memref<64x384xf32, #tpu.memory_space<vmem>>, vector<32x64xf32>
    %c384_626 = arith.constant 384 : index
    %c0_627 = arith.constant 0 : index
    %435 = vector.load %arg33[%c384_626, %c0_627] : memref<832x128xf32, #tpu.memory_space<vmem>>, vector<32x64xf32>
    tpu.vector_store %arg33[%c384_626, %c0_627], %434 {strides = array<i32>} : memref<832x128xf32, #tpu.memory_space<vmem>>, vector<32x64xf32>,
    %c0_628 = arith.constant 0 : index
    %c0_629 = arith.constant 0 : index
    %436 = vector.load %arg33[%c0_628, %c0_629] : memref<832x128xf32, #tpu.memory_space<vmem>>, vector<416x64xf32>
    %437 = arith.truncf %436 : vector<416x64xf32> to vector<416x64xbf16>
    %cst_630 = arith.constant dense<0.000000e+00> : vector<32x64xf32>
    %438 = tpu.matmul %407, %437, %cst_630 {dimension_numbers = #tpu.dot_dimension_numbers<[1], [0], [0], [1], [0, 0, 1, 1], [], []>} : vector<32x416xbf16>, vector<416x64xbf16>, vector<32x64xf32> -> vector<32x64xf32>
    %439 = vector.broadcast %408 : vector<32x1xf32> to vector<32x64xf32>
    %440 = arith.addf %438, %439 : vector<32x64xf32>
    %cst_631 = arith.constant 0.000000e+00 : f32
    %441 = vector.broadcast %cst_631 : f32 to vector<32x64xf32>
    %442 = arith.maximumf %440, %441 : vector<32x64xf32>
    %c0_632 = arith.constant 0 : index
    %c0_633 = arith.constant 0 : index
    %443 = vector.load %arg29[%c0_632, %c0_633] : memref<128x140xbf16, #tpu.memory_space<vmem>>, vector<128x140xbf16>
    %444 = vector.extract_strided_slice %442 {offsets = [0, 0], sizes = [16, 64], strides = [1, 1]} : vector<32x64xf32> to vector<16x64xf32>
    %445 = vector.extract_strided_slice %442 {offsets = [16, 0], sizes = [16, 64], strides = [1, 1]} : vector<32x64xf32> to vector<16x64xf32>
    %446 = tpu.concatenate %444, %445 in 1 : vector<16x64xf32>, vector<16x64xf32> -> vector<16x128xf32>
    %447 = arith.truncf %446 : vector<16x128xf32> to vector<16x128xbf16>
    %cst_634 = arith.constant dense<0.000000e+00> : vector<16x140xf32>
    %448 = tpu.matmul %447, %443, %cst_634 {dimension_numbers = #tpu.dot_dimension_numbers<[1], [0], [0], [1], [0, 0, 1, 1], [], []>} : vector<16x128xbf16>, vector<128x140xbf16>, vector<16x140xf32> -> vector<16x140xf32>
    %c0_635 = arith.constant 0 : index
    %c0_636 = arith.constant 0 : index
    %449 = vector.load %arg30[%c0_635, %c0_636] : memref<2x208xbf16, #tpu.memory_space<vmem>>, vector<2x208xbf16>
    %c0_637 = arith.constant 0 : index
    %c0_638 = arith.constant 0 : index
    %450 = vector.load %arg31[%c0_637, %c0_638] : memref<2x1xf32, #tpu.memory_space<vmem>>, vector<2x1xf32>
    %c0_639 = arith.constant 0 : index
    %c0_640 = arith.constant 0 : index
    %451 = vector.load %arg34[%c0_639, %c0_640] : memref<64x384xf32, #tpu.memory_space<vmem>>, vector<16x140xf32>
    tpu.vector_store %arg34[%c0_639, %c0_640], %448 {strides = array<i32>} : memref<64x384xf32, #tpu.memory_space<vmem>>, vector<16x140xf32>,
    %c0_641 = arith.constant 0 : index
    %c0_642 = arith.constant 0 : index
    %452 = vector.load %arg34[%c0_641, %c0_642] : memref<64x384xf32, #tpu.memory_space<vmem>>, vector<16x128xf32>
    %c0_643 = arith.constant 0 : index
    %c0_644 = arith.constant 0 : index
    %453 = vector.load %arg33[%c0_643, %c0_644] : memref<832x128xf32, #tpu.memory_space<vmem>>, vector<16x128xf32>
    tpu.vector_store %arg33[%c0_643, %c0_644], %452 {strides = array<i32>} : memref<832x128xf32, #tpu.memory_space<vmem>>, vector<16x128xf32>,
    %c0_645 = arith.constant 0 : index
    %c1_646 = arith.constant 1 : index
    %454 = vector.load %arg34[%c0_645, %c1_646] : memref<64x384xf32, #tpu.memory_space<vmem>>, vector<16x128xf32>
    %c16_647 = arith.constant 16 : index
    %c0_648 = arith.constant 0 : index
    %455 = vector.load %arg33[%c16_647, %c0_648] : memref<832x128xf32, #tpu.memory_space<vmem>>, vector<16x128xf32>
    tpu.vector_store %arg33[%c16_647, %c0_648], %454 {strides = array<i32>} : memref<832x128xf32, #tpu.memory_space<vmem>>, vector<16x128xf32>,
    %c0_649 = arith.constant 0 : index
    %c2_650 = arith.constant 2 : index
    %456 = vector.load %arg34[%c0_649, %c2_650] : memref<64x384xf32, #tpu.memory_space<vmem>>, vector<16x128xf32>
    %c32_651 = arith.constant 32 : index
    %c0_652 = arith.constant 0 : index
    %457 = vector.load %arg33[%c32_651, %c0_652] : memref<832x128xf32, #tpu.memory_space<vmem>>, vector<16x128xf32>
    tpu.vector_store %arg33[%c32_651, %c0_652], %456 {strides = array<i32>} : memref<832x128xf32, #tpu.memory_space<vmem>>, vector<16x128xf32>,
    %c0_653 = arith.constant 0 : index
    %c3_654 = arith.constant 3 : index
    %458 = vector.load %arg34[%c0_653, %c3_654] : memref<64x384xf32, #tpu.memory_space<vmem>>, vector<16x128xf32>
    %c48_655 = arith.constant 48 : index
    %c0_656 = arith.constant 0 : index
    %459 = vector.load %arg33[%c48_655, %c0_656] : memref<832x128xf32, #tpu.memory_space<vmem>>, vector<16x128xf32>
    tpu.vector_store %arg33[%c48_655, %c0_656], %458 {strides = array<i32>} : memref<832x128xf32, #tpu.memory_space<vmem>>, vector<16x128xf32>,
    %c0_657 = arith.constant 0 : index
    %c4_658 = arith.constant 4 : index
    %460 = vector.load %arg34[%c0_657, %c4_658] : memref<64x384xf32, #tpu.memory_space<vmem>>, vector<16x128xf32>
    %c64_659 = arith.constant 64 : index
    %c0_660 = arith.constant 0 : index
    %461 = vector.load %arg33[%c64_659, %c0_660] : memref<832x128xf32, #tpu.memory_space<vmem>>, vector<16x128xf32>
    tpu.vector_store %arg33[%c64_659, %c0_660], %460 {strides = array<i32>} : memref<832x128xf32, #tpu.memory_space<vmem>>, vector<16x128xf32>,
    %c0_661 = arith.constant 0 : index
    %c5_662 = arith.constant 5 : index
    %462 = vector.load %arg34[%c0_661, %c5_662] : memref<64x384xf32, #tpu.memory_space<vmem>>, vector<16x128xf32>
    %c80_663 = arith.constant 80 : index
    %c0_664 = arith.constant 0 : index
    %463 = vector.load %arg33[%c80_663, %c0_664] : memref<832x128xf32, #tpu.memory_space<vmem>>, vector<16x128xf32>
    tpu.vector_store %arg33[%c80_663, %c0_664], %462 {strides = array<i32>} : memref<832x128xf32, #tpu.memory_space<vmem>>, vector<16x128xf32>,
    %c0_665 = arith.constant 0 : index
    %c6_666 = arith.constant 6 : index
    %464 = vector.load %arg34[%c0_665, %c6_666] : memref<64x384xf32, #tpu.memory_space<vmem>>, vector<16x128xf32>
    %c96_667 = arith.constant 96 : index
    %c0_668 = arith.constant 0 : index
    %465 = vector.load %arg33[%c96_667, %c0_668] : memref<832x128xf32, #tpu.memory_space<vmem>>, vector<16x128xf32>
    tpu.vector_store %arg33[%c96_667, %c0_668], %464 {strides = array<i32>} : memref<832x128xf32, #tpu.memory_space<vmem>>, vector<16x128xf32>,
    %c0_669 = arith.constant 0 : index
    %c7_670 = arith.constant 7 : index
    %466 = vector.load %arg34[%c0_669, %c7_670] : memref<64x384xf32, #tpu.memory_space<vmem>>, vector<16x128xf32>
    %c112_671 = arith.constant 112 : index
    %c0_672 = arith.constant 0 : index
    %467 = vector.load %arg33[%c112_671, %c0_672] : memref<832x128xf32, #tpu.memory_space<vmem>>, vector<16x128xf32>
    tpu.vector_store %arg33[%c112_671, %c0_672], %466 {strides = array<i32>} : memref<832x128xf32, #tpu.memory_space<vmem>>, vector<16x128xf32>,
    %c0_673 = arith.constant 0 : index
    %c8_674 = arith.constant 8 : index
    %468 = vector.load %arg34[%c0_673, %c8_674] : memref<64x384xf32, #tpu.memory_space<vmem>>, vector<16x128xf32>
    %c128_675 = arith.constant 128 : index
    %c0_676 = arith.constant 0 : index
    %469 = vector.load %arg33[%c128_675, %c0_676] : memref<832x128xf32, #tpu.memory_space<vmem>>, vector<16x128xf32>
    tpu.vector_store %arg33[%c128_675, %c0_676], %468 {strides = array<i32>} : memref<832x128xf32, #tpu.memory_space<vmem>>, vector<16x128xf32>,
    %c0_677 = arith.constant 0 : index
    %c9_678 = arith.constant 9 : index
    %470 = vector.load %arg34[%c0_677, %c9_678] : memref<64x384xf32, #tpu.memory_space<vmem>>, vector<16x128xf32>
    %c144_679 = arith.constant 144 : index
    %c0_680 = arith.constant 0 : index
    %471 = vector.load %arg33[%c144_679, %c0_680] : memref<832x128xf32, #tpu.memory_space<vmem>>, vector<16x128xf32>
    tpu.vector_store %arg33[%c144_679, %c0_680], %470 {strides = array<i32>} : memref<832x128xf32, #tpu.memory_space<vmem>>, vector<16x128xf32>,
    %c0_681 = arith.constant 0 : index
    %c10_682 = arith.constant 10 : index
    %472 = vector.load %arg34[%c0_681, %c10_682] : memref<64x384xf32, #tpu.memory_space<vmem>>, vector<16x128xf32>
    %c160_683 = arith.constant 160 : index
    %c0_684 = arith.constant 0 : index
    %473 = vector.load %arg33[%c160_683, %c0_684] : memref<832x128xf32, #tpu.memory_space<vmem>>, vector<16x128xf32>
    tpu.vector_store %arg33[%c160_683, %c0_684], %472 {strides = array<i32>} : memref<832x128xf32, #tpu.memory_space<vmem>>, vector<16x128xf32>,
    %c0_685 = arith.constant 0 : index
    %c11_686 = arith.constant 11 : index
    %474 = vector.load %arg34[%c0_685, %c11_686] : memref<64x384xf32, #tpu.memory_space<vmem>>, vector<16x128xf32>
    %c176_687 = arith.constant 176 : index
    %c0_688 = arith.constant 0 : index
    %475 = vector.load %arg33[%c176_687, %c0_688] : memref<832x128xf32, #tpu.memory_space<vmem>>, vector<16x128xf32>
    tpu.vector_store %arg33[%c176_687, %c0_688], %474 {strides = array<i32>} : memref<832x128xf32, #tpu.memory_space<vmem>>, vector<16x128xf32>,
    %c0_689 = arith.constant 0 : index
    %c12_690 = arith.constant 12 : index
    %476 = vector.load %arg34[%c0_689, %c12_690] : memref<64x384xf32, #tpu.memory_space<vmem>>, vector<16x128xf32>
    %c192_691 = arith.constant 192 : index
    %c0_692 = arith.constant 0 : index
    %477 = vector.load %arg33[%c192_691, %c0_692] : memref<832x128xf32, #tpu.memory_space<vmem>>, vector<16x128xf32>
    tpu.vector_store %arg33[%c192_691, %c0_692], %476 {strides = array<i32>} : memref<832x128xf32, #tpu.memory_space<vmem>>, vector<16x128xf32>,
    %c0_693 = arith.constant 0 : index
    %c0_694 = arith.constant 0 : index
    %478 = vector.load %arg33[%c0_693, %c0_694] : memref<832x128xf32, #tpu.memory_space<vmem>>, vector<208x128xf32>
    %479 = arith.truncf %478 : vector<208x128xf32> to vector<208x128xbf16>
    %cst_695 = arith.constant dense<0.000000e+00> : vector<2x128xf32>
    %480 = tpu.matmul %449, %479, %cst_695 {dimension_numbers = #tpu.dot_dimension_numbers<[1], [0], [0], [1], [0, 0, 1, 1], [], []>} : vector<2x208xbf16>, vector<208x128xbf16>, vector<2x128xf32> -> vector<2x128xf32>
    %481 = vector.broadcast %450 : vector<2x1xf32> to vector<2x128xf32>
    %482 = arith.addf %480, %481 : vector<2x128xf32>
    %cst_696 = arith.constant 0.000000e+00 : f32
    %483 = vector.broadcast %cst_696 : f32 to vector<2x128xf32>
    %484 = arith.maximumf %482, %483 : vector<2x128xf32>
    %485 = math.tanh %484 : vector<2x128xf32>
    %c0_697 = arith.constant 0 : index
    %c0_698 = arith.constant 0 : index
    %c0_699 = arith.constant 0 : index
    %486 = vector.load %arg32[%c0_697, %c0_698, %c0_699] : memref<1x2x128xf32, #tpu.memory_space<vmem>>, vector<1x2x128xf32>
    %487 = vector.shape_cast %486 : vector<1x2x128xf32> to vector<2x128xf32>
    %488 = vector.shape_cast %485 : vector<2x128xf32> to vector<1x2x128xf32>
    tpu.vector_store %arg32[%c0_697, %c0_698, %c0_699], %488 {strides = array<i32>} : memref<1x2x128xf32, #tpu.memory_space<vmem>>, vector<1x2x128xf32>,
    return
  }
  func.func @transform_0(%arg0: i32) -> (i32, i32, i32) {
    %c0_i32 = arith.constant 0 : i32
    %c0_i32_0 = arith.constant 0 : i32
    %c0_i32_1 = arith.constant 0 : i32
    return %arg0, %c0_i32, %c0_i32_0 : i32, i32, i32
  }
  func.func @transform_1(%arg0: i32) -> (i32, i32) {
    %c0_i32 = arith.constant 0 : i32
    %c0_i32_0 = arith.constant 0 : i32
    %c0_i32_1 = arith.constant 0 : i32
    return %c0_i32, %c0_i32_0 : i32, i32
  }
  func.func @transform_2(%arg0: i32) -> (i32, i32) {
    %c0_i32 = arith.constant 0 : i32
    %c0_i32_0 = arith.constant 0 : i32
    %c0_i32_1 = arith.constant 0 : i32
    return %c0_i32, %c0_i32_0 : i32, i32
  }
  func.func @transform_3(%arg0: i32) -> (i32, i32) {
    %c0_i32 = arith.constant 0 : i32
    %c0_i32_0 = arith.constant 0 : i32
    %c0_i32_1 = arith.constant 0 : i32
    return %c0_i32, %c0_i32_0 : i32, i32
  }
  func.func @transform_4(%arg0: i32) -> (i32, i32) {
    %c0_i32 = arith.constant 0 : i32
    %c0_i32_0 = arith.constant 0 : i32
    %c0_i32_1 = arith.constant 0 : i32
    return %c0_i32, %c0_i32_0 : i32, i32
  }
  func.func @transform_5(%arg0: i32) -> (i32, i32) {
    %c0_i32 = arith.constant 0 : i32
    %c0_i32_0 = arith.constant 0 : i32
    %c0_i32_1 = arith.constant 0 : i32
    return %c0_i32, %c0_i32_0 : i32, i32
  }
  func.func @transform_6(%arg0: i32) -> (i32, i32) {
    %c0_i32 = arith.constant 0 : i32
    %c0_i32_0 = arith.constant 0 : i32
    %c0_i32_1 = arith.constant 0 : i32
    return %c0_i32, %c0_i32_0 : i32, i32
  }
  func.func @transform_7(%arg0: i32) -> (i32, i32) {
    %c0_i32 = arith.constant 0 : i32
    %c0_i32_0 = arith.constant 0 : i32
    %c0_i32_1 = arith.constant 0 : i32
    return %c0_i32, %c0_i32_0 : i32, i32
  }
  func.func @transform_8(%arg0: i32) -> (i32, i32) {
    %c0_i32 = arith.constant 0 : i32
    %c0_i32_0 = arith.constant 0 : i32
    %c0_i32_1 = arith.constant 0 : i32
    return %c0_i32, %c0_i32_0 : i32, i32
  }
  func.func @transform_9(%arg0: i32) -> (i32, i32) {
    %c0_i32 = arith.constant 0 : i32
    %c0_i32_0 = arith.constant 0 : i32
    %c0_i32_1 = arith.constant 0 : i32
    return %c0_i32, %c0_i32_0 : i32, i32
  }
  func.func @transform_10(%arg0: i32) -> (i32, i32) {
    %c0_i32 = arith.constant 0 : i32
    %c0_i32_0 = arith.constant 0 : i32
    %c0_i32_1 = arith.constant 0 : i32
    return %c0_i32, %c0_i32_0 : i32, i32
  }
  func.func @transform_11(%arg0: i32) -> (i32, i32) {
    %c0_i32 = arith.constant 0 : i32
    %c0_i32_0 = arith.constant 0 : i32
    %c0_i32_1 = arith.constant 0 : i32
    return %c0_i32, %c0_i32_0 : i32, i32
  }
  func.func @transform_12(%arg0: i32) -> (i32, i32) {
    %c0_i32 = arith.constant 0 : i32
    %c0_i32_0 = arith.constant 0 : i32
    %c0_i32_1 = arith.constant 0 : i32
    return %c0_i32, %c0_i32_0 : i32, i32
  }
  func.func @transform_13(%arg0: i32) -> (i32, i32) {
    %c0_i32 = arith.constant 0 : i32
    %c0_i32_0 = arith.constant 0 : i32
    %c0_i32_1 = arith.constant 0 : i32
    return %c0_i32, %c0_i32_0 : i32, i32
  }
  func.func @transform_14(%arg0: i32) -> (i32, i32) {
    %c0_i32 = arith.constant 0 : i32
    %c0_i32_0 = arith.constant 0 : i32
    %c0_i32_1 = arith.constant 0 : i32
    return %c0_i32, %c0_i32_0 : i32, i32
  }
  func.func @transform_15(%arg0: i32) -> (i32, i32) {
    %c0_i32 = arith.constant 0 : i32
    %c0_i32_0 = arith.constant 0 : i32
    %c0_i32_1 = arith.constant 0 : i32
    return %c0_i32, %c0_i32_0 : i32, i32
  }
  func.func @transform_16(%arg0: i32) -> (i32, i32) {
    %c0_i32 = arith.constant 0 : i32
    %c0_i32_0 = arith.constant 0 : i32
    %c0_i32_1 = arith.constant 0 : i32
    return %c0_i32, %c0_i32_0 : i32, i32
  }
  func.func @transform_17(%arg0: i32) -> (i32, i32) {
    %c0_i32 = arith.constant 0 : i32
    %c0_i32_0 = arith.constant 0 : i32
    %c0_i32_1 = arith.constant 0 : i32
    return %c0_i32, %c0_i32_0 : i32, i32
  }
  func.func @transform_18(%arg0: i32) -> (i32, i32) {
    %c0_i32 = arith.constant 0 : i32
    %c0_i32_0 = arith.constant 0 : i32
    %c0_i32_1 = arith.constant 0 : i32
    return %c0_i32, %c0_i32_0 : i32, i32
  }
  func.func @transform_19(%arg0: i32) -> (i32, i32) {
    %c0_i32 = arith.constant 0 : i32
    %c0_i32_0 = arith.constant 0 : i32
    %c0_i32_1 = arith.constant 0 : i32
    return %c0_i32, %c0_i32_0 : i32, i32
  }
  func.func @transform_20(%arg0: i32) -> (i32, i32) {
    %c0_i32 = arith.constant 0 : i32
    %c0_i32_0 = arith.constant 0 : i32
    %c0_i32_1 = arith.constant 0 : i32
    return %c0_i32, %c0_i32_0 : i32, i32
  }
  func.func @transform_21(%arg0: i32) -> (i32, i32) {
    %c0_i32 = arith.constant 0 : i32
    %c0_i32_0 = arith.constant 0 : i32
    %c0_i32_1 = arith.constant 0 : i32
    return %c0_i32, %c0_i32_0 : i32, i32
  }
  func.func @transform_22(%arg0: i32) -> (i32, i32) {
    %c0_i32 = arith.constant 0 : i32
    %c0_i32_0 = arith.constant 0 : i32
    %c0_i32_1 = arith.constant 0 : i32
    return %c0_i32, %c0_i32_0 : i32, i32
  }
  func.func @transform_23(%arg0: i32) -> (i32, i32) {
    %c0_i32 = arith.constant 0 : i32
    %c0_i32_0 = arith.constant 0 : i32
    %c0_i32_1 = arith.constant 0 : i32
    return %c0_i32, %c0_i32_0 : i32, i32
  }
  func.func @transform_24(%arg0: i32) -> (i32, i32) {
    %c0_i32 = arith.constant 0 : i32
    %c0_i32_0 = arith.constant 0 : i32
    %c0_i32_1 = arith.constant 0 : i32
    return %c0_i32, %c0_i32_0 : i32, i32
  }
  func.func @transform_25(%arg0: i32) -> (i32, i32) {
    %c0_i32 = arith.constant 0 : i32
    %c0_i32_0 = arith.constant 0 : i32
    %c0_i32_1 = arith.constant 0 : i32
    return %c0_i32, %c0_i32_0 : i32, i32
  }
  func.func @transform_26(%arg0: i32) -> (i32, i32) {
    %c0_i32 = arith.constant 0 : i32
    %c0_i32_0 = arith.constant 0 : i32
    %c0_i32_1 = arith.constant 0 : i32
    return %c0_i32, %c0_i32_0 : i32, i32
  }
  func.func @transform_27(%arg0: i32) -> (i32, i32) {
    %c0_i32 = arith.constant 0 : i32
    %c0_i32_0 = arith.constant 0 : i32
    %c0_i32_1 = arith.constant 0 : i32
    return %c0_i32, %c0_i32_0 : i32, i32
  }
  func.func @transform_28(%arg0: i32) -> (i32, i32) {
    %c0_i32 = arith.constant 0 : i32
    %c0_i32_0 = arith.constant 0 : i32
    %c0_i32_1 = arith.constant 0 : i32
    return %c0_i32, %c0_i32_0 : i32, i32
  }
  func.func @transform_29(%arg0: i32) -> (i32, i32) {
    %c0_i32 = arith.constant 0 : i32
    %c0_i32_0 = arith.constant 0 : i32
    %c0_i32_1 = arith.constant 0 : i32
    return %c0_i32, %c0_i32_0 : i32, i32
  }
  func.func @transform_30(%arg0: i32) -> (i32, i32) {
    %c0_i32 = arith.constant 0 : i32
    %c0_i32_0 = arith.constant 0 : i32
    %c0_i32_1 = arith.constant 0 : i32
    return %c0_i32, %c0_i32_0 : i32, i32
  }
  func.func @transform_31(%arg0: i32) -> (i32, i32, i32) {
    %c0_i32 = arith.constant 0 : i32
    %c0_i32_0 = arith.constant 0 : i32
    %c0_i32_1 = arith.constant 0 : i32
    return %arg0, %c0_i32, %c0_i32_0 : i32, i32, i32
  }
}

</mosaic_0001>

<bundles_post_ra>
// kernel: wavegan_generator_v2_forward.1
= control target key start
LH: loop header
LB: loop body
LE: loop exit
PB: predicated region body
PF: predicated region fallthrough
CT: control target
= control target key end

     0   :  { %s9274_s6 = smov 1   ;;  %s9275_s10 = smov 2   ;;  %s11706_s0 = inlined_call_operand.smem [shape: u32[32], index: -1, kind: input, shape index: {}] }
   0x1   :  { %s9374_s5 = sld [smem:[%s11706_s0]]   ;;  %s9276_s14 = smov 3  }
   0x2   :  { %s9379_s9 = sld [smem:[%s11706_s0 + %s9274_s6]]   ;;  %s9277_s18 = smov 4  }
   0x3   :  { %s9384_s13 = sld [smem:[%s11706_s0 + %s9275_s10]]   ;;  %s9278_s22 = smov 5  }
   0x4   :  { %s9389_s17 = sld [smem:[%s11706_s0 + %s9276_s14]]   ;;  %s9279_s26 = smov 6  }
   0x5   :  { %s9394_s21 = sld [smem:[%s11706_s0 + %s9277_s18]]   ;;  %s9280_s30 = smov 7  }
   0x6   :  { %s9399_s25 = sld [smem:[%s11706_s0 + %s9278_s22]]   ;;  %s9281_s4 = smov 8  }
   0x7   :  { %11791 = sst [smem:[#allocation4_spill]] %s9374_s5  ;;  %s9282_s10 = smov 9  }
   0x8   :  { %11792 = sst [smem:[#allocation5_spill]] %s9379_s9  ;;  %s9283_s15 = smov 10  }
   0x9   :  { %11793 = sst [smem:[#allocation6_spill]] %s9384_s13  ;;  %s9284_s20 = smov 11  }
   0xa   :  { %11794 = sst [smem:[#allocation7_spill]] %s9389_s17  ;;  %s9286_s1 = smov 13  }
   0xb   :  { %11795 = sst [smem:[#allocation8_spill]] %s9394_s21  ;;  %s9287_s7 = smov 14  }
   0xc   :  { %11796 = sst [smem:[#allocation9_spill]] %s9399_s25  ;;  %s9289_s22 = smov 16  }
   0xd   :  { %s9404_s29 = sld [smem:[%s11706_s0 + %s9279_s26]]   ;;  %s9285_s26 = smov 12  }
   0xe   :  { %s9409_s3 = sld [smem:[%s11706_s0 + %s9280_s30]]   ;;  %s9290_s28 = smov 17  }
   0xf   :  { %s9414_s8 = sld [smem:[%s11706_s0 + %s9281_s4]]  }
  0x10   :  { %s9419_s14 = sld [smem:[%s11706_s0 + %s9282_s10]]  }
  0x11   :  { %s9424_s19 = sld [smem:[%s11706_s0 + %s9283_s15]]   ;;  %s9288_s15 = smov 15  }
  0x12   :  { %s9429_s24 = sld [smem:[%s11706_s0 + %s9284_s20]]  }
  0x13   :  { %11797 = sst [smem:[#allocation10_spill]] %s9404_s29 }
  0x14   :  { %11798 = sst [smem:[#allocation11_spill]] %s9409_s3 }
  0x15   :  { %s9434_s30 = sld [smem:[%s11706_s0 + %s9285_s26]]  }
  0x16   :  { %s9439_s6 = sld [smem:[%s11706_s0 + %s9286_s1]]  }
  0x17   :  { %s9444_s12 = sld [smem:[%s11706_s0 + %s9287_s7]]   ;;  %s9291_s7 = smov 18  }
  0x18   :  { %s9449_s20 = sld [smem:[%s11706_s0 + %s9288_s15]]   ;;  %s9292_s15 = smov 19  }
  0x19   :  { %s9454_s27 = sld [smem:[%s11706_s0 + %s9289_s22]]   ;;  %s9293_s22 = smov 20  }
  0x1a   :  { %s9459_s4 = sld [smem:[%s11706_s0 + %s9290_s28]]   ;;  %s9294_s28 = smov 21  }
  0x1d   :  { %11799 = sst [smem:[#allocation12_spill]] %s9444_s12 }
  0x1e   :  { %11800 = sst [smem:[#allocation13_spill]] %s9449_s20 }
  0x1f   :  { %11801 = sst [smem:[#allocation14_spill]] %s9454_s27 }
  0x20   :  { %11802 = sst [smem:[#allocation15_spill]] %s9459_s4 }
  0x21   :  { %s9464_s12 = sld [smem:[%s11706_s0 + %s9291_s7]]   ;;  %s9295_s7 = smov 22  }
  0x22   :  { %s9469_s20 = sld [smem:[%s11706_s0 + %s9292_s15]]   ;;  %s9296_s15 = smov 23  }
  0x23   :  { %s9474_s27 = sld [smem:[%s11706_s0 + %s9293_s22]]   ;;  %s9297_s22 = smov 24  }
  0x24   :  { %s9479_s4 = sld [smem:[%s11706_s0 + %s9294_s28]]   ;;  %s9298_s28 = smov 25  }
  0x27   :  { %11803 = sst [smem:[#allocation16_spill]] %s9464_s12 }
  0x28   :  { %11804 = sst [smem:[#allocation17_spill]] %s9469_s20 }
  0x29   :  { %11805 = sst [smem:[#allocation18_spill]] %s9474_s27 }
  0x2a   :  { %11806 = sst [smem:[#allocation19_spill]] %s9479_s4 }
  0x2b   :  { %s9484_s12 = sld [smem:[%s11706_s0 + %s9295_s7]]   ;;  %s9299_s7 = smov 26  }
  0x2c   :  { %s9489_s20 = sld [smem:[%s11706_s0 + %s9296_s15]]   ;;  %s9300_s15 = smov 27  }
  0x2d   :  { %s9494_s27 = sld [smem:[%s11706_s0 + %s9297_s22]]   ;;  %s9301_s22 = smov 28  }
  0x2e   :  { %s9499_s4 = sld [smem:[%s11706_s0 + %s9298_s28]]   ;;  %s9302_s28 = smov 29  }
  0x31   :  { %11807 = sst [smem:[#allocation20_spill]] %s9484_s12 }
  0x32   :  { %11808 = sst [smem:[#allocation21_spill]] %s9489_s20 }
  0x33   :  { %11809 = sst [smem:[#allocation22_spill]] %s9494_s27 }
  0x34   :  { %11810 = sst [smem:[#allocation23_spill]] %s9499_s4 }
  0x35   :  { %s9504_s12 = sld [smem:[%s11706_s0 + %s9299_s7]]   ;;  %s9303_s7 = smov 30  }
  0x36   :  { %s9509_s20 = sld [smem:[%s11706_s0 + %s9300_s15]]   ;;  %s9304_s15 = smov 31  }
  0x37   :  { %s9514_s27 = sld [smem:[%s11706_s0 + %s9301_s22]]   ;;  %s9531_s22 = smov 0  }
  0x38   :  { %s9519_s4 = sld [smem:[%s11706_s0 + %s9302_s28]]  }
  0x3b   :  { %11811 = sst [smem:[#allocation24_spill]] %s9504_s12 }
  0x3c   :  { %11812 = sst [smem:[#allocation25_spill]] %s9509_s20 }
  0x3d   :  { %11813 = sst [smem:[#allocation26_spill]] %s9514_s27 }
  0x3e   :  { %11814 = sst [smem:[#allocation27_spill]] %s9519_s4 }
  0x3f   :  { %s9524_s12 = sld [smem:[%s11706_s0 + %s9303_s7]]  }
  0x40   :  { %s9529_s20 = sld [smem:[%s11706_s0 + %s9304_s15]]  }
  0x45   :  { %11815 = sst [smem:[#allocation28_spill]] %s9524_s12 }
  0x46   :  { %11816 = sst [smem:[#allocation29_spill]] %s9529_s20 }
  0x47 LB: > { %s11817_s29 = sld [smem:[#allocation10_spill]]  ;;  %s8120_s23 = sadd.s32 4294967295, %s9272_s22   ;;  %s9272_s22 = sphi %s9531_s22, %s73_s22  }
  0x48   : > { %s11818_s25 = sld [smem:[#allocation9_spill]]  ;;  %p8124_p0 = scmp.ge.s32.totalorder %s9272_s22, 1 }
  0x49   : > { %s11819_s21 = sld [smem:[#allocation8_spill]]  ;;  %p868_p1 = scmp.lt.s32.totalorder %s9272_s22, 3 }
  0x4a   : > { %s11820_s17 = sld [smem:[#allocation7_spill]] }
  0x4b   : > { %s11821_s9 = sld [smem:[#allocation5_spill]]  ;;  %p869_p2 = pnand %p8124_p0, %p868_p1 }
  0x4c   : > { %11822 = sst [smem:[#allocation30_spill]] %s9272_s22 }
  0x4d   : > { %872 = sbr.rel (%p869_p2) target bundleno = 5947 (0x173b), region = 144 }
  0x52   : > { %v8213_v0 = vld [vmem:[%s11821_s9 + $0xa8] sm:$0xf]  ;;  %v8949_v1 = vld [vmem:[%s11821_s9 + $0xb0] sm:$0xf0]  ;;  %v8201_v5 = vld [vmem:[%s11821_s9 + $0x90] sm:$0xf] }
  0x53   : > { %v8309_v2 = vld [vmem:[%s11821_s9 + $0x168] sm:$0xf]  ;;  %v8214_v3 = vor.u32 %v8949_v1, %v8213_v0  ;;  %v8973_v4 = vld [vmem:[%s11821_s9 + $0x170] sm:$0xf0]  ;;  %v8946_v6 = vld [vmem:[%s11821_s9 + $0x98] sm:$0xf0] }
  0x54   : > { %v8310_v7 = vor.u32 %v8973_v4, %v8309_v2  ;;  %v8297_v8 = vld [vmem:[%s11821_s9 + $0x150] sm:$0xf]  ;;  %v8970_v9 = vld [vmem:[%s11821_s9 + $0x158] sm:$0xf0]  ;;  %v8948_v10 = vld [vmem:[%s11821_s9 + $0xac] sm:$0xf]  ;;  %v8202_v11 = vor.u32 %v8946_v6, %v8201_v5 }
  0x55   : > { %1287 = vmatpush.bf16.msra.mxu0 %v8214_v3  ;;  %v8215_v12 = vld [vmem:[%s11821_s9 + $0xb4] sm:$0xf0]  ;;  %v8972_v13 = vld [vmem:[%s11821_s9 + $0x16c] sm:$0xf]  ;;  %v8298_v15 = vor.u32 %v8970_v9, %v8297_v8  ;;  %v8943_v19 = vld [vmem:[%s11821_s9 + $0x80] sm:$0xf0] }
  0x56   : > { %v8311_v14 = vld [vmem:[%s11821_s9 + $0x174] sm:$0xf0]  ;;  %1300 = vmatpush.bf16.msra.mxu1 %v8310_v7  ;;  %v8218_v16 = vor.u32 %v8948_v10, %v8215_v12  ;;  %v8967_v21 = vld [vmem:[%s11821_s9 + $0x140] sm:$0xf0]  ;;  %v8945_v22 = vld [vmem:[%s11821_s9 + $0x94] sm:$0xf] }
  0x57   : > { %v8314_v17 = vor.u32 %v8972_v13, %v8311_v14  ;;  %v8189_v18 = vld [vmem:[%s11821_s9 + $0x78] sm:$0xf]  ;;  %v8203_v23 = vld [vmem:[%s11821_s9 + $0x9c] sm:$0xf0]  ;;  %v8969_v25 = vld [vmem:[%s11821_s9 + $0x154] sm:$0xf] }
  0x58   : > { %v8285_v20 = vld [vmem:[%s11821_s9 + $0x138] sm:$0xf]  ;;  %1313 = vmatpush.bf16.msra.mxu2 %v8218_v16  ;;  %v8206_v24 = vor.u32 %v8945_v22, %v8203_v23  ;;  %v8299_v26 = vld [vmem:[%s11821_s9 + $0x15c] sm:$0xf0]  ;;  %v8190_v27 = vor.u32 %v8943_v19, %v8189_v18  ;;  %v8940_v30 = vld [vmem:[%s11821_s9 + $0x68] sm:$0xf0] }
  0x59   : > { %1326 = vmatpush.bf16.msra.mxu3 %v8314_v17  ;;  %1288 = vmatpush.bf16.msra.mxu0 %v8202_v11  ;;  %v8302_v28 = vor.u32 %v8969_v25, %v8299_v26  ;;  %v8177_v29 = vld [vmem:[%s11821_s9 + $0x60] sm:$0xf]  ;;  %v8286_v31 = vor.u32 %v8967_v21, %v8285_v20  ;;  %v8942_v32 = vld [vmem:[%s11821_s9 + $0x7c] sm:$0xf]  ;;  %v8191_v33 = vld [vmem:[%s11821_s9 + $0x84] sm:$0xf0] }
  0x5a   : > { %1301 = vmatpush.bf16.msra.mxu1 %v8298_v15  ;;  %v8966_v34 = vld [vmem:[%s11821_s9 + $0x13c] sm:$0xf]  ;;  %v8273_v35 = vld [vmem:[%s11821_s9 + $0x120] sm:$0xf]  ;;  %v8964_v36 = vld [vmem:[%s11821_s9 + $0x128] sm:$0xf0]  ;;  %v8194_v38 = vor.u32 %v8942_v32, %v8191_v33  ;;  %v8178_v41 = vor.u32 %v8940_v30, %v8177_v29 }
  0x5b   : > { %v8287_v37 = vld [vmem:[%s11821_s9 + $0x144] sm:$0xf0]  ;;  %v8939_v40 = vld [vmem:[%s11821_s9 + $0x64] sm:$0xf]  ;;  %v8179_v42 = vld [vmem:[%s11821_s9 + $0x6c] sm:$0xf0]  ;;  %v8274_v45 = vor.u32 %v8964_v36, %v8273_v35 }
  0x5c   : > { %1314 = vmatpush.bf16.msra.mxu2 %v8206_v24  ;;  %v8290_v39 = vor.u32 %v8966_v34, %v8287_v37  ;;  %v8963_v43 = vld [vmem:[%s11821_s9 + $0x124] sm:$0xf]  ;;  %v8275_v44 = vld [vmem:[%s11821_s9 + $0x12c] sm:$0xf0]  ;;  %v8165_v46 = vld [vmem:[%s11821_s9 + $0x48] sm:$0xf]  ;;  %v8182_v50 = vor.u32 %v8939_v40, %v8179_v42 }
  0x5d   : > { %1327 = vmatpush.bf16.msra.mxu3 %v8302_v28  ;;  %1289 = vmatpush.bf16.msra.mxu0 %v8190_v27  ;;  %v8937_v47 = vld [vmem:[%s11821_s9 + $0x50] sm:$0xf0]  ;;  %v8261_v48 = vld [vmem:[%s11821_s9 + $0x108] sm:$0xf]  ;;  %v8278_v51 = vor.u32 %v8963_v43, %v8275_v44  ;;  %v8936_v52 = vld [vmem:[%s11821_s9 + $0x4c] sm:$0xf] }
  0x5e   : > { %1302 = vmatpush.bf16.msra.mxu1 %v8286_v31  ;;  %v8961_v49 = vld [vmem:[%s11821_s9 + $0x110] sm:$0xf0]  ;;  %v8166_v53 = vor.u32 %v8937_v47, %v8165_v46  ;;  %v8167_v54 = vld [vmem:[%s11821_s9 + $0x54] sm:$0xf0]  ;;  %v8960_v55 = vld [vmem:[%s11821_s9 + $0x10c] sm:$0xf] }
  0x5f   : > { %v8263_v56 = vld [vmem:[%s11821_s9 + $0x114] sm:$0xf0]  ;;  %v8262_v57 = vor.u32 %v8961_v49, %v8261_v48  ;;  %v8153_v58 = vld [vmem:[%s11821_s9 + $0x30] sm:$0xf]  ;;  %v8934_v59 = vld [vmem:[%s11821_s9 + $0x38] sm:$0xf0]  ;;  %v8170_v62 = vor.u32 %v8936_v52, %v8167_v54 }
  0x60   : > { %1315 = vmatpush.bf16.msra.mxu2 %v8194_v38  ;;  %v8249_v60 = vld [vmem:[%s11821_s9 + $0xf0] sm:$0xf]  ;;  %v8958_v61 = vld [vmem:[%s11821_s9 + $0xf8] sm:$0xf0]  ;;  %v8266_v63 = vor.u32 %v8960_v55, %v8263_v56  ;;  %v8933_v0 = vld [vmem:[%s11821_s9 + $0x34] sm:$0xf]  ;;  %v8154_v1 = vor.u32 %v8934_v59, %v8153_v58 }
  0x61   : > { %1328 = vmatpush.bf16.msra.mxu3 %v8290_v39  ;;  %1290 = vmatpush.bf16.msra.mxu0 %v8178_v41  ;;  %v8155_v2 = vld [vmem:[%s11821_s9 + $0x3c] sm:$0xf0]  ;;  %v8957_v3 = vld [vmem:[%s11821_s9 + $0xf4] sm:$0xf]  ;;  %v8250_v5 = vor.u32 %v8958_v61, %v8249_v60  ;;  %v8141_v6 = vld [vmem:[%s11821_s9 + $0x18] sm:$0xf] }
  0x62   : > { %1303 = vmatpush.bf16.msra.mxu1 %v8274_v45  ;;  %v8251_v4 = vld [vmem:[%s11821_s9 + $0xfc] sm:$0xf0]  ;;  %v8931_v7 = vld [vmem:[%s11821_s9 + $0x20] sm:$0xf0]  ;;  %v8237_v8 = vld [vmem:[%s11821_s9 + $0xd8] sm:$0xf]  ;;  %v8158_v10 = vor.u32 %v8933_v0, %v8155_v2 }
  0x63   : > { %v8955_v9 = vld [vmem:[%s11821_s9 + $0xe0] sm:$0xf0]  ;;  %v8254_v11 = vor.u32 %v8957_v3, %v8251_v4  ;;  %v8129_v12 = vld [vmem:[%s11821_s9] sm:$0xf]  ;;  %v8928_v13 = vld [vmem:[%s11821_s9 + $0x8] sm:$0xf0]  ;;  %v8142_v15 = vor.u32 %v8931_v7, %v8141_v6 }
  0x64   : > { %1316 = vmatpush.bf16.msra.mxu2 %v8182_v50  ;;  %v8930_v14 = vld [vmem:[%s11821_s9 + $0x1c] sm:$0xf]  ;;  %v8143_v16 = vld [vmem:[%s11821_s9 + $0x24] sm:$0xf0]  ;;  %v8238_v19 = vor.u32 %v8955_v9, %v8237_v8  ;;  %v8225_v20 = vld [vmem:[%s11821_s9 + $0xc0] sm:$0xf]  ;;  %v8130_v29 = vor.u32 %v8928_v13, %v8129_v12 }
  0x65   : > { %1329 = vmatpush.bf16.msra.mxu3 %v8278_v51  ;;  %1291 = vmatpush.bf16.msra.mxu0 %v8166_v53  ;;  %v8954_v17 = vld [vmem:[%s11821_s9 + $0xdc] sm:$0xf]  ;;  %v8239_v18 = vld [vmem:[%s11821_s9 + $0xe4] sm:$0xf0]  ;;  %v8952_v21 = vld [vmem:[%s11821_s9 + $0xc8] sm:$0xf0]  ;;  %v8146_v25 = vor.u32 %v8930_v14, %v8143_v16 }
  0x66   : > { %1304 = vmatpush.bf16.msra.mxu1 %v8262_v57  ;;  %p946_p3 = scmp.lt.s32.totalorder %s8120_s23, 1  ;;  %v8221_v22 = vld [vmem:[%s11821_s9 + $0xb0] sm:$0xf]  ;;  %v8950_v23 = vld [vmem:[%s11821_s9 + $0xb8] sm:$0xf0]  ;;  %v8242_v26 = vor.u32 %v8954_v17, %v8239_v18  ;;  %s11823_s5 = sld [smem:[#allocation4_spill]]  ;;  %v8226_v33 = vor.u32 %v8952_v21, %v8225_v20 }
  0x67   : > { %v8317_v24 = vld [vmem:[%s11821_s9 + $0x170] sm:$0xf]  ;;  %v8974_v27 = vld [vmem:[%s11821_s9 + $0x178] sm:$0xf0]  ;;  %v8927_v28 = vld [vmem:[%s11821_s9 + $0x4] sm:$0xf]  ;;  %v8222_v34 = vor.u32 %v8950_v23, %v8221_v22 }
  0x68   : > { %1317 = vmatpush.bf16.msra.mxu2 %v8170_v62  ;;  %s11884_s23 = smov (!%p946_p3, %s8120_s23), 1  ;;  %v8131_v30 = vld [vmem:[%s11821_s9 + $0xc] sm:$0xf0]  ;;  %v8951_v31 = vld [vmem:[%s11821_s9 + $0xc4] sm:$0xf]  ;;  %v8318_v35 = vor.u32 %v8974_v27, %v8317_v24  ;;  %vm1370_vm0 = vcmask 1040384  }
  0x69   : > { %1330 = vmatpush.bf16.msra.mxu3 %v8266_v63  ;;  %1292 = vmatpush.bf16.msra.mxu0 %v8154_v1  ;;  %11824 = sst [smem:[#allocation31_spill]] %s11884_s23  ;;  %v8227_v32 = vld [vmem:[%s11821_s9 + $0xcc] sm:$0xf0]  ;;  %s11718_s0 = sshll.u32 %s11884_s23, 1  ;;  %v8209_v36 = vld [vmem:[%s11821_s9 + $0x98] sm:$0xf]  ;;  %v8134_v38 = vor.u32 %v8927_v28, %v8131_v30 }
  0x6a   : > { %1305 = vmatpush.bf16.msra.mxu1 %v8250_v5  ;;  %v8947_v37 = vld [vmem:[%s11821_s9 + $0xa0] sm:$0xf0]  ;;  %v8230_v39 = vor.u32 %v8951_v31, %v8227_v32  ;;  %v8305_v40 = vld [vmem:[%s11821_s9 + $0x158] sm:$0xf]  ;;  %v8197_v49 = vld [vmem:[%s11821_s9 + $0x80] sm:$0xf]  ;;  %v1375_v31 = vlaneseq }
  0x6b   : > { %v8971_v41 = vld [vmem:[%s11821_s9 + $0x160] sm:$0xf0]  ;;  %v8210_v45 = vor.u32 %v8947_v37, %v8209_v36  ;;  %v8944_v50 = vld [vmem:[%s11821_s9 + $0x88] sm:$0xf0]  ;;  %v8293_v51 = vld [vmem:[%s11821_s9 + $0x140] sm:$0xf] }
  0x6c   : > { %1318 = vmatpush.bf16.msra.mxu2 %v8158_v10  ;;  %s949_s26 = scalar_lea.vmem %s11823_s5, %s11718_s0  ;;  %v8306_v46 = vor.u32 %v8971_v41, %v8305_v40  ;;  %v8968_v52 = vld [vmem:[%s11821_s9 + $0x148] sm:$0xf0]  ;;  %v8198_v53 = vor.u32 %v8944_v50, %v8197_v49  ;;  %v8185_v55 = vld [vmem:[%s11821_s9 + $0x68] sm:$0xf]  ;;  %v8941_v56 = vld [vmem:[%s11821_s9 + $0x70] sm:$0xf0] }
  0x6d   : > { %1331 = vmatpush.bf16.msra.mxu3 %v8254_v11  ;;  %1293 = vmatpush.bf16.msra.mxu0 %v8142_v15  ;;  %v955_v42 = vld [vmem:[%s949_s26] sm:$0x3]  ;;  %v8294_v54 = vor.u32 %v8968_v52, %v8293_v51  ;;  %v8281_v57 = vld [vmem:[%s11821_s9 + $0x128] sm:$0xf]  ;;  %v8965_v58 = vld [vmem:[%s11821_s9 + $0x130] sm:$0xf0]  ;;  %v8186_v59 = vor.u32 %v8941_v56, %v8185_v55 }
  0x6e   : > { %1306 = vmatpush.bf16.msra.mxu1 %v8238_v19  ;;  %v1025_v43 = vperm.slane %v955_v42, 0  ;;  %v1026_v44 = vperm.slane %v955_v42, 1  ;;  %v8282_v60 = vor.u32 %v8965_v58, %v8281_v57  ;;  %v8173_v61 = vld [vmem:[%s11821_s9 + $0x50] sm:$0xf]  ;;  %v8938_v62 = vld [vmem:[%s11821_s9 + $0x58] sm:$0xf0] }
  0x6f   : > { %v8269_v63 = vld [vmem:[%s11821_s9 + $0x110] sm:$0xf]  ;;  %v8962_v0 = vld [vmem:[%s11821_s9 + $0x118] sm:$0xf0]  ;;  %v8174_v1 = vor.u32 %v8938_v62, %v8173_v61  ;;  %v8161_v3 = vld [vmem:[%s11821_s9 + $0x38] sm:$0xf] }
  0x70   : > { %1319 = vmatpush.bf16.msra.mxu2 %v8146_v25  ;;  %v1029_v47 = vpack.c.bf16 %v1025_v43, %v1025_v43  ;;  %v1030_v48 = vpack.c.bf16 %v1026_v44, %v1026_v44  ;;  %v8270_v2 = vor.u32 %v8962_v0, %v8269_v63  ;;  %v8935_v4 = vld [vmem:[%s11821_s9 + $0x40] sm:$0xf0]  ;;  %v8257_v5 = vld [vmem:[%s11821_s9 + $0xf8] sm:$0xf]  ;;  %v8149_v9 = vld [vmem:[%s11821_s9 + $0x20] sm:$0xf] }
  0x71   : > { %1332 = vmatpush.bf16.msra.mxu3 %v8242_v26  ;;  %1294 = vmatpush.bf16.msra.mxu0 %v8130_v29  ;;  %v8959_v6 = vld [vmem:[%s11821_s9 + $0x100] sm:$0xf0]  ;;  %v8162_v7 = vor.u32 %v8935_v4, %v8161_v3  ;;  %v8932_v10 = vld [vmem:[%s11821_s9 + $0x28] sm:$0xf0]  ;;  %v8245_v11 = vld [vmem:[%s11821_s9 + $0xe0] sm:$0xf] }
  0x72   : > { %1307 = vmatpush.bf16.msra.mxu1 %v8226_v33  ;;  %v8258_v8 = vor.u32 %v8959_v6, %v8257_v5  ;;  %v8956_v12 = vld [vmem:[%s11821_s9 + $0xe8] sm:$0xf0]  ;;  %v8150_v13 = vor.u32 %v8932_v10, %v8149_v9  ;;  %v8137_v15 = vld [vmem:[%s11821_s9 + $0x8] sm:$0xf]  ;;  %v8929_v16 = vld [vmem:[%s11821_s9 + $0x10] sm:$0xf0] }
  0x73   : > { %v8246_v14 = vor.u32 %v8956_v12, %v8245_v11  ;;  %v8233_v17 = vld [vmem:[%s11821_s9 + $0xc8] sm:$0xf]  ;;  %v8953_v18 = vld [vmem:[%s11821_s9 + $0xd0] sm:$0xf0]  ;;  %v8138_v19 = vor.u32 %v8929_v16, %v8137_v15  ;;  %vm1372_vm1 = vcmask 1041408   ;;  %vm1377_vm2 = vcmp.lt.s32.totalorder %v1375_v31, 284 }
  0x74   : > { %1320 = vmatpush.bf16.msra.mxu2 %v8134_v38  ;;  %1295 = vmatmul.bf16.vlgmr.msra.gmra.mxu0 %v1029_v47  ;;  %v8234_v20 = vor.u32 %v8953_v18, %v8233_v17  ;;  %vm1382_vm3 = vcmask 516096   ;;  %s9305_s28 = smov 52   ;;  %s9306_s1 = smov 39   ;;  %vm1572_vm4 = vcmask 424960   ;;  %vm1554_vm5 = vcmask 318464  }
  0x75   : > { %1339 = vmatpush.bf16.msrb.mxu0 %v8222_v34  ;;  %1333 = vmatpush.bf16.msra.mxu3 %v8230_v39  ;;  %s9307_s2 = smov 53   ;;  %s9308_s7 = smov 38   ;;  %vm1536_vm6 = vcmask 433152   ;;  %vm1590_vm7 = vcmask 310272   ;;  %vm1392_vm8 = vcmask 465920   ;;  %vm1625_vm9 = vcmask 1043456  }
  0x76   : > { %1352 = vmatpush.bf16.msrb.mxu1 %v8318_v35  ;;  %s11725_s10 = smov 124   ;;  %s11729_s11 = smov 123   ;;  %vm1626_vm10 = vcmask 1044480   ;;  %v9329_v3 = vmov 65535   ;;  %vm1410_vm11 = vcmask 351232   ;;  %vm1446_vm12 = vcmask 343040  }
  0x77   : > { %1308 = vmatmul.bf16.vlgmr.msra.gmra.mxu1 %v1030_v48  ;;  %1321 = vmatmul.bf16.vlgmr.msra.gmra.mxu2 %v1029_v47  ;;  %s11719_s15 = smov 109   ;;  %s11721_s16 = smov 110   ;;  %v1627_v4 = vsel %vm1625_vm9, 4294967295, %v9329_v3  ;;  %vm1428_vm13 = vcmask 457728   ;;  %vm1464_vm14 = vcmask 449536   ;;  %vm1500_vm15 = vcmask 441344  }
  0x78   : > { %1334 = vmatmul.bf16.vlgmr.msra.gmra.mxu3 %v1030_v48  ;;  %s11751_s18 = smov 57   ;;  %s11723_s26 = smov 122   ;;  %v1628_v10 = vsel %vm1626_vm10, %v1627_v4, 0  ;;  %v9330_v31 = vmov 0   ;;  %v1668_v4 = vld [vmem:[%s11817_s29] sm:$0xff] }
  0x79   : > { %1340 = vmatpush.bf16.msrb.mxu0 %v8210_v45  ;;  %s11727_s0 = smov 55   ;;  %9216 = vset.pattern.permute.xlu0 %v9330_v31  ;;  %s11825_s13 = sld [smem:[#allocation6_spill]] }
  0x7a   : > { %1353 = vmatpush.bf16.msrb.mxu1 %v8306_v46  ;;  %9217 = vset.pattern.permute.xlu1 %v9330_v31  ;;  %s11828_s5 = smov 58   ;;  %s11831_s9 = smov 79  }
  0x7b   : > { %9218 = vset.pattern.permute.xlu2 %v9330_v31  ;;  %s11845_s3 = sld [smem:[#allocation11_spill]]  ;;  %s11853_s22 = smov 117  }
  0x7c   : > { %s11854_s20 = smov 116   ;;  %s11855_s23 = smov 91  }
  0x7d   : > { %1341 = vmatpush.bf16.msrb.mxu0 %v8198_v53  ;;  %s11856_s4 = smov 115   ;;  %s11857_s12 = smov 90  }
  0x7e   : > { %1354 = vmatpush.bf16.msrb.mxu1 %v8294_v54  ;;  %s11858_s27 = smov 92  }
  0x81   : > { %1342 = vmatpush.bf16.msrb.mxu0 %v8186_v59 }
  0x82   : > { %1355 = vmatpush.bf16.msrb.mxu1 %v8282_v60 }
  0x85   : > { %1343 = vmatpush.bf16.msrb.mxu0 %v8174_v1 }
  0x86   : > { %1356 = vmatpush.bf16.msrb.mxu1 %v8270_v2 }
  0x89   : > { %1344 = vmatpush.bf16.msrb.mxu0 %v8162_v7 }
  0x8a   : > { %1357 = vmatpush.bf16.msrb.mxu1 %v8258_v8 }
  0x8d   : > { %1345 = vmatpush.bf16.msrb.mxu0 %v8150_v13 }
  0x8e   : > { %1358 = vmatpush.bf16.msrb.mxu1 %v8246_v14 }
  0x91   : > { %1346 = vmatpush.bf16.msrb.mxu0 %v8138_v19 }
  0x92   : > { %1359 = vmatpush.bf16.msrb.mxu1 %v8234_v20 }
  0x94   : > { %1347 = vmatmul.bf16.vlgmr.msrb.gmra.mxu0 %v1029_v47 }
  0x95   : > { %1360 = vmatmul.bf16.vlgmr.msrb.gmra.mxu1 %v1030_v48 }
  0xf1   : > { %v1296_v21 = vpop.f32.mrf.mxu0 }
  0xf4   : > { %v1309_v22 = vpop.f32.mrf.mxu1 }
  0xf5   : > { %v1310_v32 = vadd.f32 %v1309_v22, %v1296_v21 }
  0xf9   : > { %v1298_v24 = vpop.f32.mrf.mxu0 }
  0xfa   : > { %v1322_v23 = vpop.f32.mrf.mxu2 }
  0xfb   : > { %v1335_v25 = vpop.f32.mrf.mxu3 }
  0xfc   : > { %v1311_v26 = vpop.f32.mrf.mxu1  ;;  %v1336_v29 = vadd.f32 %v1335_v25, %v1322_v23 }
  0xfe   : > { %v1368_v33 = vrot.slane %v1336_v29, 7  ;;  %v1023_v29 = vld [vmem:[%s11820_s17 + $0x8] sm:$0xff] }
 0x100   : > { %v1371_v37 = vsel %vm1370_vm0, %v1310_v32, %v1368_v33  ;;  %vm1482_vm0 = vcmask 334848  }
 0x102   : > { %v1324_v27 = vpop.f32.mrf.mxu2 }
 0x103   : > { %v1337_v28 = vpop.f32.mrf.mxu3 }
 0x104   : > { %v1022_v28 = vld [vmem:[%s11820_s17] sm:$0xff]  ;;  %s11769_s17 = smov 93  }
 0x111   : > { %v1348_v30 = vpop.f32.mrf.mxu0 }
 0x112   : > { %v1361_v34 = vpop.f32.mrf.mxu1 }
 0x113   : > { %v1362_v35 = vadd.f32 %v1361_v34, %v1348_v30 }
 0x115   : > { %v1369_v36 = vrot.slane %v1362_v35, 6 }
 0x117   : > { %v1373_v38 = vsel %vm1372_vm1, %v1371_v37, %v1369_v36 }
 0x118   : > { %1379 = vst.msk [vmem:[#allocation3] ss:$8 sm:$0x7] %vm1377_vm2, %v1373_v38  ;;  %vm1518_vm2 = vcmask 326656  }
 0x119   : > { %v1350_v39 = vpop.f32.mrf.mxu0 }
 0x11a   : > { %v1363_v40 = vpop.f32.mrf.mxu1 }
 0x11f   : > { %v1564_v41 = vld [vmem:[#allocation3] ss:$0 sm:$0xff]  ;;  %v1546_v42 = vld [vmem:[#allocation3 + $0x8] ss:$0 sm:$0xff]  ;;  %v1547_v43 = vld [vmem:[#allocation3 + $0x10] ss:$0 sm:$0xff] }
 0x120   : > { %1568 = vrot.lane.b32.xlu2 %v1564_v41, %s9305_s28  ;;  %1550 = vrot.lane.b32.xlu1 %v1546_v42, %s9306_s1  ;;  %1383 = vst.msk [vmem:[#allocation2] sm:$0x1] %vm1382_vm3, %v1564_v41 }
 0x121   : > { %1532 = vrot.lane.b32.xlu0 %v1564_v41, %s9307_s2 }
 0x128   : > { %1570 = vrot.lane.b32.xlu2 %v1546_v42, %s9305_s28  ;;  %1552 = vrot.lane.b32.xlu1 %v1547_v43, %s9306_s1  ;;  %s9315_s28 = smov 56   ;;  %s9316_s1 = smov 43  }
 0x129   : > { %1534 = vrot.lane.b32.xlu0 %v1546_v42, %s9307_s2  ;;  %s9317_s2 = smov 42  }
 0x130   : > { %1588 = vrot.lane.b32.xlu1 %v1547_v43, %s9308_s7  ;;  %1524 = vrot.lane.b32.xlu2 %v1564_v41, %s11725_s10  ;;  %s11752_s10 = smov 127  }
 0x131   : > { %1586 = vrot.lane.b32.xlu0 %v1546_v42, %s9308_s7  ;;  %s9318_s7 = smov 41  }
 0x138   : > { %1560 = vrot.lane.b32.xlu1 %v1564_v41, %s11729_s11  ;;  %1578 = vrot.lane.b32.xlu2 %v1546_v42, %s11719_s15  ;;  %s11740_s15 = smov 54   ;;  %s11746_s11 = smov 125  }
 0x139   : > { %1542 = vrot.lane.b32.xlu0 %v1546_v42, %s11721_s16  ;;  %s11733_s16 = smov 114  }
 0x140   : > { %1390 = vrot.lane.b32.xlu2 %v1546_v42, %s11751_s18  ;;  %1388 = vrot.lane.b32.xlu1 %v1564_v41, %s11751_s18 }
 0x141   : > { %1596 = vrot.lane.b32.xlu0 %v1564_v41, %s11723_s26  ;;  %s11735_s26 = smov 113  }
 0x148   : > { %1424 = vrot.lane.b32.xlu2 %v1564_v41, %s9315_s28  ;;  %1408 = vrot.lane.b32.xlu1 %v1547_v43, %s9316_s1 }
 0x149   : > { %1406 = vrot.lane.b32.xlu0 %v1546_v42, %s9316_s1  ;;  %s9322_s1 = smov 40  }
 0x150   : > { %1444 = vrot.lane.b32.xlu2 %v1547_v43, %s9317_s2  ;;  %1442 = vrot.lane.b32.xlu1 %v1546_v42, %s9317_s2  ;;  %s11762_s2 = smov 126  }
 0x151   : > { %1426 = vrot.lane.b32.xlu0 %v1546_v42, %s9315_s28 }
 0x158   : > { %1478 = vrot.lane.b32.xlu2 %v1546_v42, %s9318_s7  ;;  %1462 = vrot.lane.b32.xlu1 %v1546_v42, %s11727_s0 }
 0x159   : > { %1460 = vrot.lane.b32.xlu0 %v1564_v41, %s11727_s0  ;;  %s11731_s0 = smov 111  }
 0x160   : > { %1498 = vrot.lane.b32.xlu2 %v1546_v42, %s11740_s15  ;;  %1496 = vrot.lane.b32.xlu1 %v1564_v41, %s11740_s15 }
 0x161   : > { %1480 = vrot.lane.b32.xlu0 %v1547_v43, %s9318_s7  ;;  %s11737_s7 = smov 112  }
 0x168   : > { %1398 = vrot.lane.b32.xlu2 %v1546_v42, %s11733_s16  ;;  %1516 = vrot.lane.b32.xlu1 %v1547_v43, %s9322_s1  ;;  %v8978_v43 = vld [vmem:[%s11819_s21 + $0x10] sm:$0xff]  ;;  %s11748_s16 = smov 81  }
 0x169   : > { %1514 = vrot.lane.b32.xlu0 %v1546_v42, %s9322_s1  ;;  %s11739_s1 = smov 79  }
 0x170   : > { %1452 = vrot.lane.b32.xlu2 %v1564_v41, %s11762_s2  ;;  %1434 = vrot.lane.b32.xlu1 %v1546_v42, %s11735_s26  ;;  %s11741_s26 = smov 102  }
 0x171   : > { %1416 = vrot.lane.b32.xlu0 %v1564_v41, %s11752_s10 }
 0x178   : > { %1506 = vrot.lane.b32.xlu2 %v1546_v42, %s11731_s0  ;;  %1488 = vrot.lane.b32.xlu1 %v1564_v41, %s11746_s11  ;;  %v8975_v41 = vld [vmem:[%s11825_s13] sm:$0xff]  ;;  %s11754_s0 = smov 58   ;;  %s11833_s13 = smov 127  }
 0x179   : > { %1470 = vrot.lane.b32.xlu0 %v1546_v42, %s11737_s7  ;;  %v8979_v42 = vld [vmem:[%s11819_s21 + $0x18] sm:$0xff]  ;;  %s11743_s7 = smov 77  }
 0x17a   : > { %v1569_v44 = vpop.permute.xlu2 %1568  ;;  %1705 = vmatpush.bf16.msrb.mxu3 %v8979_v42 }
 0x17e   : > { %1706 = vmatpush.bf16.msrb.mxu3 %v8978_v43 }
 0x180   : > { %1613 = vperm.xlu1 %9217, %v1023_v29  }
 0x181   : > { %1608 = vperm.xlu0 %9216, %v1022_v28  }
 0x182   : > { %v1571_v45 = vpop.permute.xlu2 %1570 }
 0x183   : > { %v1573_v46 = vsel %vm1572_vm4, %v1569_v44, %v1571_v45  ;;  %vm1621_vm4 = vcmask 203776   ;;  %v8977_v44 = vld [vmem:[%s11819_s21 + $0x8] sm:$0xff]  ;;  %v8976_v45 = vld [vmem:[%s11819_s21] sm:$0xff]  ;;  %s11849_s21 = smov 114  }
 0x184   : > { %1575 = vst.msk [vmem:[#allocation2 + $0x15] sm:$0x1] %vm1382_vm3, %v1573_v46  ;;  %1707 = vmatpush.bf16.msrb.mxu3 %v8977_v44 }
 0x188   : > { %1708 = vmatpush.bf16.msrb.mxu3 %v8976_v45 }
 0x18a   : > { %v1525_v47 = vpop.permute.xlu2 %1524 }
 0x18b   : > { %1527 = vst.msk [vmem:[#allocation2 + $0x10] sm:$0x1] %vm1382_vm3, %v1525_v47 }
 0x192   : > { %v1551_v48 = vpop.permute.xlu1 %1550  ;;  %v1579_v49 = vpop.permute.xlu2 %1578 }
 0x193   : > { %v1533_v50 = vpop.permute.xlu0 %1532  ;;  %1581 = vst.msk [vmem:[#allocation2 + $0x16] sm:$0x1] %vm1382_vm3, %v1579_v49 }
 0x19a   : > { %v1553_v51 = vpop.permute.xlu1 %1552  ;;  %v1391_v52 = vpop.permute.xlu2 %1390 }
 0x19b   : > { %v1555_v53 = vsel %vm1554_vm5, %v1551_v48, %v1553_v51  ;;  %v1535_v54 = vpop.permute.xlu0 %1534 }
 0x19c   : > { %1557 = vst.msk [vmem:[#allocation2 + $0x13] sm:$0x1] %vm1382_vm3, %v1555_v53  ;;  %v1537_v55 = vsel %vm1536_vm6, %v1533_v50, %v1535_v54  ;;  %vm1697_vm6 = vcmask 523264  }
 0x19d   : > { %1539 = vst.msk [vmem:[#allocation2 + $0x11] sm:$0x1] %vm1382_vm3, %v1537_v55 }
 0x1a2   : > { %v1589_v56 = vpop.permute.xlu1 %1588  ;;  %v1425_v57 = vpop.permute.xlu2 %1424 }
 0x1a3   : > { %v1587_v58 = vpop.permute.xlu0 %1586 }
 0x1a4   : > { %v1591_v59 = vsel %vm1590_vm7, %v1587_v58, %v1589_v56  ;;  %vm1715_vm7 = vcmask 752640  }
 0x1a5   : > { %1593 = vst.msk [vmem:[#allocation2 + $0x17] sm:$0x1] %vm1382_vm3, %v1591_v59 }
 0x1aa   : > { %v1561_v60 = vpop.permute.xlu1 %1560  ;;  %v1445_v61 = vpop.permute.xlu2 %1444 }
 0x1ab   : > { %1563 = vst.msk [vmem:[#allocation2 + $0x14] sm:$0x1] %vm1382_vm3, %v1561_v60  ;;  %v1543_v62 = vpop.permute.xlu0 %1542 }
 0x1ac   : > { %1545 = vst.msk [vmem:[#allocation2 + $0x12] sm:$0x1] %vm1382_vm3, %v1543_v62 }
 0x1b2   : > { %v1479_v63 = vpop.permute.xlu2 %1478  ;;  %v1389_v0 = vpop.permute.xlu1 %1388 }
 0x1b3   : > { %v1597_v1 = vpop.permute.xlu0 %1596  ;;  %v1393_v2 = vsel %vm1392_vm8, %v1389_v0, %v1391_v52  ;;  %v1602_v8 = vld [vmem:[#allocation2 + $0x10] sm:$0xff]  ;;  %vm1720_vm8 = vcmask 130048  }
 0x1b4   : > { %1599 = vst.msk [vmem:[#allocation2 + $0x18] sm:$0x1] %vm1382_vm3, %v1597_v1 }
 0x1b5   : > { %1395 = vst.msk [vmem:[#allocation2 + $0x1] sm:$0x1] %vm1382_vm3, %v1393_v2 }
 0x1ba   : > { %v1499_v5 = vpop.permute.xlu2 %1498  ;;  %v1409_v6 = vpop.permute.xlu1 %1408 }
 0x1bb   : > { %v1407_v7 = vpop.permute.xlu0 %1406  ;;  %v1603_v9 = vld [vmem:[#allocation2 + $0x18] sm:$0x1] }
 0x1bc   : > { %v1411_v11 = vsel %vm1410_vm11, %v1407_v7, %v1409_v6  ;;  %v1605_v12 = vpack.c.bf16 %v1603_v9, %v1602_v8  ;;  %v1671_v8 = vld [vmem:[%s11817_s29 + $0x18] sm:$0xff]  ;;  %v1669_v9 = vld [vmem:[%s11817_s29 + $0x8] sm:$0xff] }
 0x1bd   : > { %1413 = vst.msk [vmem:[#allocation2 + $0x3] sm:$0x1] %vm1382_vm3, %v1411_v11 }
 0x1be   : > { %v1630_v13 = vand.u32 %v1628_v10, %v1605_v12 }
 0x1c0   : > { %1638 = vmatpush.bf16.msrb.mxu2 %v1630_v13 }
 0x1c2   : > { %v1399_v14 = vpop.permute.xlu2 %1398  ;;  %v1443_v15 = vpop.permute.xlu1 %1442 }
 0x1c3   : > { %v1427_v16 = vpop.permute.xlu0 %1426  ;;  %1401 = vst.msk [vmem:[#allocation2 + $0x2] sm:$0x1] %vm1382_vm3, %v1399_v14  ;;  %v1447_v17 = vsel %vm1446_vm12, %v1443_v15, %v1445_v61 }
 0x1c4   : > { %v1429_v18 = vsel %vm1428_vm13, %v1425_v57, %v1427_v16  ;;  %1449 = vst.msk [vmem:[#allocation2 + $0x7] sm:$0x1] %vm1382_vm3, %v1447_v17  ;;  %vm2293_vm13 = vcmask 359424  }
 0x1c5   : > { %1431 = vst.msk [vmem:[#allocation2 + $0x5] sm:$0x1] %vm1382_vm3, %v1429_v18 }
 0x1ca   : > { %v1453_v19 = vpop.permute.xlu2 %1452  ;;  %v1463_v20 = vpop.permute.xlu1 %1462 }
 0x1cb   : > { %v1461_v21 = vpop.permute.xlu0 %1460  ;;  %1455 = vst.msk [vmem:[#allocation2 + $0x8] sm:$0x1] %vm1382_vm3, %v1453_v19 }
 0x1cc   : > { %v1465_v22 = vsel %vm1464_vm14, %v1461_v21, %v1463_v20  ;;  %vm2302_vm14 = vcmask 31744  }
 0x1cd   : > { %1467 = vst.msk [vmem:[#allocation2 + $0x9] sm:$0x1] %vm1382_vm3, %v1465_v22 }
 0x1d2   : > { %v1507_v23 = vpop.permute.xlu2 %1506  ;;  %v1497_v24 = vpop.permute.xlu1 %1496 }
 0x1d3   : > { %v1481_v25 = vpop.permute.xlu0 %1480  ;;  %1509 = vst.msk [vmem:[#allocation2 + $0xe] sm:$0x1] %vm1382_vm3, %v1507_v23  ;;  %v1501_v26 = vsel %vm1500_vm15, %v1497_v24, %v1499_v5  ;;  %vm3123_vm15 = vcmask 261120  }
 0x1d4   : > { %v1483_v27 = vsel %vm1482_vm0, %v1479_v63, %v1481_v25  ;;  %1503 = vst.msk [vmem:[#allocation2 + $0xd] sm:$0x1] %vm1382_vm3, %v1501_v26 }
 0x1d5   : > { %1485 = vst.msk [vmem:[#allocation2 + $0xb] sm:$0x1] %vm1382_vm3, %v1483_v27 }
 0x1da   : > { %v1517_v30 = vpop.permute.xlu1 %1516 }
 0x1db   : > { %v1515_v32 = vpop.permute.xlu0 %1514 }
 0x1dc   : > { %v1519_v33 = vsel %vm1518_vm2, %v1515_v32, %v1517_v30 }
 0x1dd   : > { %1521 = vst.msk [vmem:[#allocation2 + $0xf] sm:$0x1] %vm1382_vm3, %v1519_v33 }
 0x1e2   : > { %v1435_v34 = vpop.permute.xlu1 %1434 }
 0x1e3   : > { %v1417_v35 = vpop.permute.xlu0 %1416  ;;  %1437 = vst.msk [vmem:[#allocation2 + $0x6] sm:$0x1] %vm1382_vm3, %v1435_v34 }
 0x1e4   : > { %1419 = vst.msk [vmem:[#allocation2 + $0x4] sm:$0x1] %vm1382_vm3, %v1417_v35 }
 0x1ea   : > { %v1489_v36 = vpop.permute.xlu1 %1488 }
 0x1eb   : > { %v1471_v37 = vpop.permute.xlu0 %1470  ;;  %1491 = vst.msk [vmem:[#allocation2 + $0xc] sm:$0x1] %vm1382_vm3, %v1489_v36  ;;  %v1600_v38 = vld [vmem:[#allocation2] sm:$0xff] }
 0x1ec   : > { %1473 = vst.msk [vmem:[#allocation2 + $0xa] sm:$0x1] %vm1382_vm3, %v1471_v37 }
 0x1f2   : > { %v1614_v49 = vpop.permute.xlu1 %1613 }
 0x1f3   : > { %v1601_v39 = vld [vmem:[#allocation2 + $0x8] sm:$0xff]  ;;  %v1609_v47 = vpop.permute.xlu0 %1608 }
 0x1f4   : > { %v1604_v40 = vpack.c.bf16 %v1601_v39, %v1600_v38 }
 0x1f6   : > { %1639 = vmatpush.bf16.msrb.mxu2 %v1604_v40 }
 0x1f9   : > { %8323 = vmatmul.msk.bf16.vlgmr.msrb.gmra.mxu2 %vm1621_vm4, %v8975_v41 }
 0x27c   : > { %v1641_v46 = vpop.f32.mrf.mxu2 }
 0x27d   : > { %v1642_v48 = vadd.f32 %v1641_v46, %v1609_v47 }
 0x27f   : > { %v1648_v51 = vmul.f32 0.01, %v1642_v48  ;;  %vm1646_vm3 = vcmp.gt.f32.partialorder %v1642_v48, 0.0 }
 0x281   : > { %v1650_v54 = vsel %vm1646_vm3, %v1642_v48, %v1648_v51  ;;  %vm3354_vm3 = vcmask 7168  }
 0x284   : > { %v1643_v50 = vpop.f32.mrf.mxu2 }
 0x285   : > { %v1644_v52 = vadd.f32 %v1643_v50, %v1614_v49 }
 0x287   : > { %vm1647_vm5 = vcmp.gt.f32.partialorder %v1644_v52, 0.0  ;;  %v1649_v53 = vmul.f32 0.01, %v1644_v52 }
 0x289   : > { %v1651_v55 = vsel %vm1647_vm5, %v1644_v52, %v1649_v53 }
 0x28a   : > { %v1672_v56 = vpack.c.bf16 %v1651_v55, %v1650_v54 }
 0x28c   : > { %8340 = vmatmul.msk.bf16.vlgmr.msrb.gmra.mxu3 %vm1697_vm6, %v1672_v56 }
 0x30f   : > { %v1710_v57 = vpop.f32.mrf.mxu3 }
 0x310   : > { %1716 = vst.msk [vmem:[#allocation3] sm:$0xff] %vm1715_vm7, %v1710_v57 }
 0x317   : > { %v1712_v58 = vpop.f32.mrf.mxu3  ;;  %v9700_v59 = vld [vmem:[#allocation3] sm:$0xff] }
 0x318   : > { %1717 = vst.msk [vmem:[#allocation3 + $0x18] sm:$0xff] %vm1715_vm7, %v1712_v58  ;;  %1883 = vrot.lane.b32.xlu0 %v9700_v59, %s11739_s1  ;;  %1799 = vrot.lane.b32.xlu2 %v9700_v59, %s11754_s0  ;;  %s11744_s1 = smov 104   ;;  %s9344_s0 = smov 78  }
 0x319   : > { %1787 = vrot.lane.b32.xlu1 %v9700_v59, %s11748_s16  ;;  %1721 = vst.msk [vmem:[#allocation2] sm:$0xff] %vm1720_vm8, %v9700_v59  ;;  %s9340_s16 = smov 82  }
 0x31f   : > { %v9710_v60 = vld [vmem:[#allocation3 + $0x18] sm:$0xff] }
 0x320   : > { %1991 = vrot.lane.b32.xlu0 %v9700_v59, %s11740_s15  ;;  %1895 = vrot.lane.b32.xlu2 %v9700_v59, %s9315_s28  ;;  %1722 = vst.msk [vmem:[#allocation2 + $0x8] sm:$0xff] %vm1720_vm8, %v9710_v60  ;;  %s11749_s15 = smov 100  }
 0x321   : > { %1871 = vrot.lane.b32.xlu1 %v9700_v59, %s11741_s26  ;;  %s11826_s26 = smov 123  }
 0x328   : > { %1979 = vrot.lane.b32.xlu0 %v9700_v59, %s11743_s7  ;;  %1775 = vrot.lane.b32.xlu2 %v9700_v59, %s11744_s1  ;;  %s9338_s7 = smov 59   ;;  %s9339_s1 = smov 80  }
 0x329   : > { %1859 = vrot.lane.b32.xlu1 %v9700_v59, %s11746_s11  ;;  %s11827_s11 = smov 55  }
 0x330   : > { %1967 = vrot.lane.b32.xlu0 %v9700_v59, %s11749_s15  ;;  %1763 = vrot.lane.b32.xlu2 %v9700_v59, %s11752_s10  ;;  %s11755_s15 = smov 103   ;;  %s11760_s10 = smov 105  }
 0x331   : > { %1847 = vrot.lane.b32.xlu1 %v9700_v59, %s11751_s18  ;;  %s11757_s18 = smov 101  }
 0x338   : > { %1955 = vrot.lane.b32.xlu0 %v9700_v59, %s11826_s26  ;;  %1751 = vrot.lane.b32.xlu2 %v9700_v59, %s9338_s7 }
 0x339   : > { %1835 = vrot.lane.b32.xlu1 %v9700_v59, %s9339_s1 }
 0x340   : > { %1943 = vrot.lane.b32.xlu0 %v9700_v59, %s11827_s11  ;;  %1739 = vrot.lane.b32.xlu2 %v9700_v59, %s9340_s16 }
 0x341   : > { %1823 = vrot.lane.b32.xlu1 %v9700_v59, %s11755_s15  ;;  %s11829_s15 = smov 81  }
 0x348   : > { %1919 = vrot.lane.b32.xlu0 %v9700_v59, %s11757_s18  ;;  %1727 = vrot.lane.b32.xlu2 %v9700_v59, %s11760_s10  ;;  %s11830_s18 = smov 104   ;;  %s11832_s10 = smov 102  }
 0x349   : > { %1931 = vrot.lane.b32.xlu1 %v9700_v59, %s9344_s0 }
 0x350   : > { %1811 = vrot.lane.b32.xlu2 %v9700_v59, %s11762_s2  ;;  %1897 = vrot.lane.b32.xlu0 %v9710_v60, %s9315_s28  ;;  %s11834_s2 = smov 54   ;;  %s11835_s28 = smov 125  }
 0x351   : > { %1801 = vrot.lane.b32.xlu1 %v9710_v60, %s11828_s5  ;;  %s11836_s5 = smov 77  }
 0x358   : > { %1789 = vrot.lane.b32.xlu2 %v9710_v60, %s11829_s15  ;;  %1777 = vrot.lane.b32.xlu0 %v9710_v60, %s11830_s18  ;;  %s11837_s15 = smov 57  }
 0x359   : > { %1885 = vrot.lane.b32.xlu1 %v9710_v60, %s11831_s9  ;;  %s11838_s9 = smov 100  }
 0x360   : > { %1873 = vrot.lane.b32.xlu2 %v9710_v60, %s11832_s10  ;;  %1765 = vrot.lane.b32.xlu0 %v9710_v60, %s11833_s13 }
 0x361   : > { %1993 = vrot.lane.b32.xlu1 %v9710_v60, %s11834_s2  ;;  %s11839_s2 = smov 105  }
 0x368   : > { %1861 = vrot.lane.b32.xlu2 %v9710_v60, %s11835_s28  ;;  %1753 = vrot.lane.b32.xlu0 %v9710_v60, %s9338_s7  ;;  %s11840_s7 = smov 103  }
 0x369   : > { %1981 = vrot.lane.b32.xlu1 %v9710_v60, %s11836_s5  ;;  %s11843_s5 = smov 101  }
 0x370   : > { %1849 = vrot.lane.b32.xlu2 %v9710_v60, %s11837_s15  ;;  %1741 = vrot.lane.b32.xlu0 %v9710_v60, %s9340_s16  ;;  %s11841_s16 = smov 126   ;;  %s11765_s15 = smov 95  }
 0x371   : > { %1969 = vrot.lane.b32.xlu1 %v9710_v60, %s11838_s9 }
 0x372   : > { %v1800_v61 = vpop.permute.xlu2 %1799 }
 0x373   : > { %1805 = vst.msk [vmem:[#allocation2 + $0x70] sm:$0xff] %vm1720_vm8, %v1800_v61 }
 0x378   : > { %1837 = vrot.lane.b32.xlu2 %v9710_v60, %s9339_s1  ;;  %1729 = vrot.lane.b32.xlu0 %v9710_v60, %s11839_s2  ;;  %s11842_s1 = smov 124  }
 0x379   : > { %1957 = vrot.lane.b32.xlu1 %v9710_v60, %s11826_s26 }
 0x37a   : > { %v1896_v62 = vpop.permute.xlu2 %1895  ;;  %v2025_v33 = vld [vmem:[#allocation2 + $0x70] sm:$0xff] }
 0x37b   : > { %1901 = vst.msk [vmem:[#allocation2 + $0xf0] sm:$0xff] %vm1720_vm8, %v1896_v62 }
 0x380   : > { %1825 = vrot.lane.b32.xlu2 %v9710_v60, %s11840_s7  ;;  %1813 = vrot.lane.b32.xlu0 %v9710_v60, %s11841_s16 }
 0x381   : > { %1945 = vrot.lane.b32.xlu1 %v9710_v60, %s11827_s11  ;;  %s11779_s11 = smov 94  }
 0x382   : > { %v1776_v63 = vpop.permute.xlu2 %1775  ;;  %v2041_v30 = vld [vmem:[#allocation2 + $0xf0] sm:$0xff] }
 0x383   : > { %1781 = vst.msk [vmem:[#allocation2 + $0x50] sm:$0xff] %vm1720_vm8, %v1776_v63 }
 0x388   : > { %1933 = vrot.lane.b32.xlu2 %v9710_v60, %s9344_s0  ;;  %1909 = vrot.lane.b32.xlu0 %v9710_v60, %s11842_s1  ;;  %s11844_s0 = smov 122  }
 0x389   : > { %1921 = vrot.lane.b32.xlu1 %v9710_v60, %s11843_s5 }
 0x38a   : > { %v1884_v0 = vpop.permute.xlu0 %1883  ;;  %v1764_v1 = vpop.permute.xlu2 %1763  ;;  %v2021_v45 = vld [vmem:[#allocation2 + $0x50] sm:$0xff] }
 0x38b   : > { %1889 = vst.msk [vmem:[#allocation2 + $0xe0] sm:$0xff] %vm1720_vm8, %v1884_v0  ;;  %v1788_v2 = vpop.permute.xlu1 %1787 }
 0x38c   : > { %1793 = vst.msk [vmem:[#allocation2 + $0x60] sm:$0xff] %vm1720_vm8, %v1788_v2 }
 0x38d   : > { %1769 = vst.msk [vmem:[#allocation2 + $0x40] sm:$0xff] %vm1720_vm8, %v1764_v1 }
 0x390   : > { %1907 = vrot.lane.b32.xlu2 %v9700_v59, %s11842_s1  ;;  %2088 = vperm.xlu0 %9216, %v1668_v4  }
 0x391   : > { %2003 = vrot.lane.b32.xlu1 %v9700_v59, %s11844_s0 }
 0x392   : > { %v1992_v5 = vpop.permute.xlu0 %1991  ;;  %v1752_v6 = vpop.permute.xlu2 %1751  ;;  %v2039_v43 = vld [vmem:[#allocation2 + $0xe0] sm:$0xff] }
 0x393   : > { %1997 = vst.msk [vmem:[#allocation2 + $0x170] sm:$0xff] %vm1720_vm8, %v1992_v5  ;;  %v1872_v7 = vpop.permute.xlu1 %1871  ;;  %v2023_v38 = vld [vmem:[#allocation2 + $0x60] sm:$0xff] }
 0x394   : > { %1877 = vst.msk [vmem:[#allocation2 + $0xd0] sm:$0xff] %vm1720_vm8, %v1872_v7  ;;  %v2019_v59 = vld [vmem:[#allocation2 + $0x40] sm:$0xff] }
 0x395   : > { %1757 = vst.msk [vmem:[#allocation2 + $0x30] sm:$0xff] %vm1720_vm8, %v1752_v6 }
 0x398   : > { %2005 = vrot.lane.b32.xlu2 %v9710_v60, %s11844_s0  ;;  %2103 = vperm.xlu0 %9216, %v1671_v8  }
 0x399   : > { %2093 = vperm.xlu1 %9217, %v1669_v9  }
 0x39a   : > { %v1980_v10 = vpop.permute.xlu0 %1979  ;;  %v1740_v11 = vpop.permute.xlu2 %1739  ;;  %v2057_v57 = vld [vmem:[#allocation2 + $0x170] sm:$0xff] }
 0x39b   : > { %1985 = vst.msk [vmem:[#allocation2 + $0x160] sm:$0xff] %vm1720_vm8, %v1980_v10  ;;  %v1860_v12 = vpop.permute.xlu1 %1859  ;;  %v2037_v50 = vld [vmem:[#allocation2 + $0xd0] sm:$0xff] }
 0x39c   : > { %1865 = vst.msk [vmem:[#allocation2 + $0xc0] sm:$0xff] %vm1720_vm8, %v1860_v12 }
 0x39d   : > { %1745 = vst.msk [vmem:[#allocation2 + $0x20] sm:$0xff] %vm1720_vm8, %v1740_v11  ;;  %v2017_v11 = vld [vmem:[#allocation2 + $0x30] sm:$0xff] }
 0x3a2   : > { %v1968_v13 = vpop.permute.xlu0 %1967  ;;  %v1728_v14 = vpop.permute.xlu2 %1727  ;;  %v2055_v9 = vld [vmem:[#allocation2 + $0x160] sm:$0xff] }
 0x3a3   : > { %1973 = vst.msk [vmem:[#allocation2 + $0x150] sm:$0xff] %vm1720_vm8, %v1968_v13  ;;  %v1848_v15 = vpop.permute.xlu1 %1847  ;;  %v2035_v56 = vld [vmem:[#allocation2 + $0xc0] sm:$0xff] }
 0x3a4   : > { %1853 = vst.msk [vmem:[#allocation2 + $0xb0] sm:$0xff] %vm1720_vm8, %v1848_v15 }
 0x3a5   : > { %1733 = vst.msk [vmem:[#allocation2 + $0x10] sm:$0xff] %vm1720_vm8, %v1728_v14 }
 0x3aa   : > { %v1956_v16 = vpop.permute.xlu0 %1955  ;;  %v1812_v17 = vpop.permute.xlu2 %1811 }
 0x3ab   : > { %1961 = vst.msk [vmem:[#allocation2 + $0x140] sm:$0xff] %vm1720_vm8, %v1956_v16  ;;  %v1836_v18 = vpop.permute.xlu1 %1835  ;;  %v2033_v1 = vld [vmem:[#allocation2 + $0xb0] sm:$0xff] }
 0x3ac   : > { %1841 = vst.msk [vmem:[#allocation2 + $0xa0] sm:$0xff] %vm1720_vm8, %v1836_v18 }
 0x3ad   : > { %1817 = vst.msk [vmem:[#allocation2 + $0x80] sm:$0xff] %vm1720_vm8, %v1812_v17 }
 0x3b2   : > { %v1944_v19 = vpop.permute.xlu0 %1943  ;;  %v1790_v20 = vpop.permute.xlu2 %1789 }
 0x3b3   : > { %1949 = vst.msk [vmem:[#allocation2 + $0x130] sm:$0xff] %vm1720_vm8, %v1944_v19  ;;  %v1824_v21 = vpop.permute.xlu1 %1823  ;;  %v2031_v8 = vld [vmem:[#allocation2 + $0xa0] sm:$0xff] }
 0x3b4   : > { %1829 = vst.msk [vmem:[#allocation2 + $0x90] sm:$0xff] %vm1720_vm8, %v1824_v21 }
 0x3b5   : > { %1794 = vst.msk [vmem:[#allocation2 + $0x68] sm:$0xff] %vm1720_vm8, %v1790_v20 }
 0x3ba   : > { %v1920_v22 = vpop.permute.xlu0 %1919  ;;  %v1874_v23 = vpop.permute.xlu2 %1873 }
 0x3bb   : > { %1925 = vst.msk [vmem:[#allocation2 + $0x110] sm:$0xff] %vm1720_vm8, %v1920_v22  ;;  %v1932_v24 = vpop.permute.xlu1 %1931  ;;  %v2029_v17 = vld [vmem:[#allocation2 + $0x90] sm:$0xff] }
 0x3bc   : > { %1937 = vst.msk [vmem:[#allocation2 + $0x120] sm:$0xff] %vm1720_vm8, %v1932_v24  ;;  %v2024_v37 = vld [vmem:[#allocation2 + $0x68] sm:$0xff]  ;;  %v2053_v22 = vld [vmem:[#allocation2 + $0x150] sm:$0xff]  ;;  %v2015_v24 = vld [vmem:[#allocation2 + $0x20] sm:$0xff] }
 0x3bd   : > { %1878 = vst.msk [vmem:[#allocation2 + $0xd8] sm:$0xff] %vm1720_vm8, %v1874_v23  ;;  %v2067_v39 = vpack.c.bf16 %v2024_v37, %v2023_v38  ;;  %v2012_v37 = vld [vmem:[#allocation2 + $0x8] sm:$0xff]  ;;  %v8343_v38 = vld [vmem:[%s11818_s25] sm:$0xf] }
 0x3c2   : > { %v1898_v25 = vpop.permute.xlu0 %1897  ;;  %v1862_v26 = vpop.permute.xlu2 %1861 }
 0x3c3   : > { %1902 = vst.msk [vmem:[#allocation2 + $0xf8] sm:$0xff] %vm1720_vm8, %v1898_v25  ;;  %v1802_v27 = vpop.permute.xlu1 %1801 }
 0x3c4   : > { %1806 = vst.msk [vmem:[#allocation2 + $0x78] sm:$0xff] %vm1720_vm8, %v1802_v27  ;;  %v2038_v49 = vld [vmem:[#allocation2 + $0xd8] sm:$0xff] }
 0x3c5   : > { %1866 = vst.msk [vmem:[#allocation2 + $0xc8] sm:$0xff] %vm1720_vm8, %v1862_v26  ;;  %v2074_v51 = vpack.c.bf16 %v2038_v49, %v2037_v50  ;;  %v2027_v49 = vld [vmem:[#allocation2 + $0x80] sm:$0xff] }
 0x3ca   : > { %v1850_v28 = vpop.permute.xlu2 %1849  ;;  %v1778_v29 = vpop.permute.xlu0 %1777  ;;  %v2042_v31 = vld [vmem:[#allocation2 + $0xf8] sm:$0xff] }
 0x3cb   : > { %v1886_v32 = vpop.permute.xlu1 %1885  ;;  %1854 = vst.msk [vmem:[#allocation2 + $0xb8] sm:$0xff] %vm1720_vm8, %v1850_v28  ;;  %v2026_v34 = vld [vmem:[#allocation2 + $0x78] sm:$0xff]  ;;  %v2076_v35 = vpack.c.bf16 %v2042_v31, %v2041_v30  ;;  %v2051_v31 = vld [vmem:[#allocation2 + $0x140] sm:$0xff] }
 0x3cc   : > { %1890 = vst.msk [vmem:[#allocation2 + $0xe8] sm:$0xff] %vm1720_vm8, %v1886_v32  ;;  %v2068_v36 = vpack.c.bf16 %v2026_v34, %v2025_v33  ;;  %v2036_v52 = vld [vmem:[#allocation2 + $0xc8] sm:$0xff]  ;;  %v2013_v33 = vld [vmem:[#allocation2 + $0x10] sm:$0xff] }
 0x3cd   : > { %1782 = vst.msk [vmem:[#allocation2 + $0x58] sm:$0xff] %vm1720_vm8, %v1778_v29  ;;  %2169 = vmatpush.bf16.msra.mxu3 %v2076_v35  ;;  %v2073_v61 = vpack.c.bf16 %v2036_v52, %v2035_v56 }
 0x3ce   : > { %2150 = vmatpush.bf16.msra.mxu2 %v2068_v36 }
 0x3d2   : > { %2151 = vmatpush.bf16.msra.mxu2 %v2067_v39  ;;  %v1838_v40 = vpop.permute.xlu2 %1837  ;;  %v1766_v41 = vpop.permute.xlu0 %1765  ;;  %v2034_v0 = vld [vmem:[#allocation2 + $0xb8] sm:$0xff]  ;;  %v8982_v39 = vld [vmem:[%s11818_s25 + $0xc] sm:$0xf0] }
 0x3d3   : > { %v1994_v42 = vpop.permute.xlu1 %1993  ;;  %1842 = vst.msk [vmem:[#allocation2 + $0xa8] sm:$0xff] %vm1720_vm8, %v1838_v40  ;;  %v2040_v44 = vld [vmem:[#allocation2 + $0xe8] sm:$0xff]  ;;  %v2072_v2 = vpack.c.bf16 %v2034_v0, %v2033_v1  ;;  %v2011_v40 = vld [vmem:[#allocation2] sm:$0xff]  ;;  %v8983_v0 = vld [vmem:[%s11818_s25 + $0x14] sm:$0xf0] }
 0x3d4   : > { %1998 = vst.msk [vmem:[#allocation2 + $0x178] sm:$0xff] %vm1720_vm8, %v1994_v42  ;;  %v2022_v46 = vld [vmem:[#allocation2 + $0x58] sm:$0xff]  ;;  %v2075_v47 = vpack.c.bf16 %v2040_v44, %v2039_v43  ;;  %v8344_v43 = vor.u32 %v8982_v39, %v8343_v38  ;;  %v2049_v44 = vld [vmem:[#allocation2 + $0x130] sm:$0xff] }
 0x3d5   : > { %1770 = vst.msk [vmem:[#allocation2 + $0x48] sm:$0xff] %vm1720_vm8, %v1766_v41  ;;  %v2066_v48 = vpack.c.bf16 %v2022_v46, %v2021_v45  ;;  %v2061_v41 = vpack.c.bf16 %v2012_v37, %v2011_v40 }
 0x3d6   : > { %2170 = vmatpush.bf16.msra.mxu3 %v2075_v47  ;;  %v8980_v47 = vld [vmem:[%s11818_s25 + $0x4] sm:$0xf] }
 0x3d7   : > { %2152 = vmatpush.bf16.msra.mxu2 %v2066_v48  ;;  %v8345_v48 = vld [vmem:[%s11818_s25 + $0x10] sm:$0xf0] }
 0x3da   : > { %2171 = vmatpush.bf16.msra.mxu3 %v2074_v51  ;;  %v1826_v53 = vpop.permute.xlu2 %1825  ;;  %v1754_v54 = vpop.permute.xlu0 %1753  ;;  %v2032_v4 = vld [vmem:[#allocation2 + $0xa8] sm:$0xff] }
 0x3db   : > { %v1982_v55 = vpop.permute.xlu1 %1981  ;;  %1830 = vst.msk [vmem:[#allocation2 + $0x98] sm:$0xff] %vm1720_vm8, %v1826_v53  ;;  %v2058_v58 = vld [vmem:[#allocation2 + $0x178] sm:$0xff]  ;;  %v2071_v13 = vpack.c.bf16 %v2032_v4, %v2031_v8  ;;  %v8986_v4 = vld [vmem:[%s11818_s25 + $0x2c] sm:$0xf0] }
 0x3dc   : > { %1986 = vst.msk [vmem:[#allocation2 + $0x168] sm:$0xff] %vm1720_vm8, %v1982_v55  ;;  %v2020_v60 = vld [vmem:[#allocation2 + $0x48] sm:$0xff]  ;;  %v2084_v62 = vpack.c.bf16 %v2058_v58, %v2057_v57  ;;  %v2047_v55 = vld [vmem:[#allocation2 + $0x120] sm:$0xff]  ;;  %v8984_v8 = vld [vmem:[%s11818_s25 + $0x24] sm:$0xf] }
 0x3dd   : > { %1758 = vst.msk [vmem:[#allocation2 + $0x38] sm:$0xff] %vm1720_vm8, %v1754_v54  ;;  %v2065_v63 = vpack.c.bf16 %v2020_v60, %v2019_v59  ;;  %v8348_v54 = vor.u32 %v8980_v47, %v8345_v48  ;;  %v1670_v57 = vld [vmem:[%s11817_s29 + $0x10] sm:$0xff]  ;;  %v2045_v59 = vld [vmem:[#allocation2 + $0x110] sm:$0xff]  ;;  %s11852_s29 = smov 106  }
 0x3de   : > { %2172 = vmatpush.bf16.msra.mxu3 %v2073_v61  ;;  %2188 = vmatpush.bf16.msra.mxu0 %v2084_v62 }
 0x3df   : > { %2153 = vmatpush.bf16.msra.mxu2 %v2065_v63  ;;  %2098 = vperm.xlu2 %9218, %v1670_v57   ;;  %v8351_v63 = vld [vmem:[%s11818_s25 + $0x8] sm:$0xf] }
 0x3e2   : > { %2173 = vmatpush.bf16.msra.mxu3 %v2072_v2  ;;  %v1934_v5 = vpop.permute.xlu2 %1933  ;;  %v1742_v6 = vpop.permute.xlu0 %1741  ;;  %v2030_v16 = vld [vmem:[#allocation2 + $0x98] sm:$0xff] }
 0x3e3   : > { %v1970_v7 = vpop.permute.xlu1 %1969  ;;  %1938 = vst.msk [vmem:[#allocation2 + $0x128] sm:$0xff] %vm1720_vm8, %v1934_v5  ;;  %v2056_v10 = vld [vmem:[#allocation2 + $0x168] sm:$0xff]  ;;  %v2070_v18 = vpack.c.bf16 %v2030_v16, %v2029_v17  ;;  %v8359_v2 = vld [vmem:[%s11818_s25 + $0x20] sm:$0xf]  ;;  %v8367_v17 = vld [vmem:[%s11818_s25 + $0x28] sm:$0xf] }
 0x3e4   : > { %1974 = vst.msk [vmem:[#allocation2 + $0x158] sm:$0xff] %vm1720_vm8, %v1970_v7  ;;  %v2018_v12 = vld [vmem:[#allocation2 + $0x38] sm:$0xff]  ;;  %v2083_v14 = vpack.c.bf16 %v2056_v10, %v2055_v9  ;;  %v8360_v7 = vor.u32 %v8986_v4, %v8359_v2  ;;  %v8981_v9 = vld [vmem:[%s11818_s25 + $0xc] sm:$0xf]  ;;  %v8353_v10 = vld [vmem:[%s11818_s25 + $0x18] sm:$0xf0] }
 0x3e5   : > { %1746 = vst.msk [vmem:[#allocation2 + $0x28] sm:$0xff] %vm1720_vm8, %v1742_v6  ;;  %v2064_v15 = vpack.c.bf16 %v2018_v12, %v2017_v11  ;;  %v8352_v6 = vor.u32 %v8983_v0, %v8351_v63 }
 0x3e6   : > { %2174 = vmatpush.bf16.msra.mxu3 %v2071_v13  ;;  %2189 = vmatpush.bf16.msra.mxu0 %v2083_v14  ;;  %v8361_v13 = vld [vmem:[%s11818_s25 + $0x30] sm:$0xf0] }
 0x3e7   : > { %2154 = vmatpush.bf16.msra.mxu2 %v2064_v15  ;;  %v8356_v15 = vor.u32 %v8981_v9, %v8353_v10  ;;  %v8364_v16 = vor.u32 %v8984_v8, %v8361_v13 }
 0x3ea   : > { %2175 = vmatpush.bf16.msra.mxu3 %v2070_v18  ;;  %v1908_v19 = vpop.permute.xlu2 %1907  ;;  %v1730_v20 = vpop.permute.xlu0 %1729  ;;  %v2048_v53 = vld [vmem:[#allocation2 + $0x128] sm:$0xff]  ;;  %v8987_v18 = vld [vmem:[%s11818_s25 + $0x34] sm:$0xf0] }
 0x3eb   : > { %v1958_v21 = vpop.permute.xlu1 %1957  ;;  %1913 = vst.msk [vmem:[#allocation2 + $0x100] sm:$0xff] %vm1720_vm8, %v1908_v19  ;;  %v2054_v23 = vld [vmem:[#allocation2 + $0x158] sm:$0xff]  ;;  %v2079_v56 = vpack.c.bf16 %v2048_v53, %v2047_v55  ;;  %v8368_v19 = vor.u32 %v8987_v18, %v8367_v17 }
 0x3ec   : > { %1962 = vst.msk [vmem:[#allocation2 + $0x148] sm:$0xff] %vm1720_vm8, %v1958_v21  ;;  %v2016_v25 = vld [vmem:[#allocation2 + $0x28] sm:$0xff]  ;;  %v2082_v26 = vpack.c.bf16 %v2054_v23, %v2053_v22  ;;  %v8369_v21 = vld [vmem:[%s11818_s25 + $0x38] sm:$0xf0]  ;;  %v8988_v23 = vld [vmem:[%s11845_s3] sm:$0xff]  ;;  %s11767_s3 = smov 106  }
 0x3ed   : > { %1734 = vst.msk [vmem:[#allocation2 + $0x18] sm:$0xff] %vm1720_vm8, %v1730_v20  ;;  %v2063_v27 = vpack.c.bf16 %v2016_v25, %v2015_v24  ;;  %v8985_v20 = vld [vmem:[%s11818_s25 + $0x2c] sm:$0xf]  ;;  %s11850_s25 = smov 93  }
 0x3ee   : > { %2190 = vmatpush.bf16.msra.mxu0 %v2082_v26  ;;  %v8372_v22 = vor.u32 %v8985_v20, %v8369_v21 }
 0x3ef   : > { %2155 = vmatpush.bf16.msra.mxu2 %v2063_v27 }
 0x3f2   : > { %v2006_v28 = vpop.permute.xlu2 %2005  ;;  %v1814_v29 = vpop.permute.xlu0 %1813  ;;  %v2043_v1 = vld [vmem:[#allocation2 + $0x100] sm:$0xff] }
 0x3f3   : > { %v1946_v30 = vpop.permute.xlu1 %1945  ;;  %2010 = vst.msk [vmem:[#allocation2 + $0x188] sm:$0xff] %vm1720_vm8, %v2006_v28  ;;  %v2052_v32 = vld [vmem:[#allocation2 + $0x148] sm:$0xff] }
 0x3f4   : > { %1950 = vst.msk [vmem:[#allocation2 + $0x138] sm:$0xff] %vm1720_vm8, %v1946_v30  ;;  %v2014_v34 = vld [vmem:[#allocation2 + $0x18] sm:$0xff]  ;;  %v2081_v35 = vpack.c.bf16 %v2052_v32, %v2051_v31 }
 0x3f5   : > { %1818 = vst.msk [vmem:[#allocation2 + $0x88] sm:$0xff] %vm1720_vm8, %v1814_v29  ;;  %v2062_v36 = vpack.c.bf16 %v2014_v34, %v2013_v33 }
 0x3f6   : > { %2191 = vmatpush.bf16.msra.mxu0 %v2081_v35 }
 0x3f7   : > { %2156 = vmatpush.bf16.msra.mxu2 %v2062_v36 }
 0x3fa   : > { %v1910_v42 = vpop.permute.xlu0 %1909  ;;  %v2060_v12 = vld [vmem:[#allocation2 + $0x188] sm:$0xff] }
 0x3fb   : > { %2157 = vmatpush.bf16.msra.mxu2 %v2061_v41  ;;  %v1922_v45 = vpop.permute.xlu1 %1921  ;;  %1914 = vst.msk [vmem:[#allocation2 + $0x108] sm:$0xff] %vm1720_vm8, %v1910_v42  ;;  %v2050_v46 = vld [vmem:[#allocation2 + $0x138] sm:$0xff] }
 0x3fc   : > { %1926 = vst.msk [vmem:[#allocation2 + $0x118] sm:$0xff] %vm1720_vm8, %v1922_v45  ;;  %v2028_v50 = vld [vmem:[#allocation2 + $0x88] sm:$0xff]  ;;  %v2080_v51 = vpack.c.bf16 %v2050_v46, %v2049_v44 }
 0x3fd   : > { %v2069_v52 = vpack.c.bf16 %v2028_v50, %v2027_v49 }
 0x3fe   : > { %2158 = vmatmul.bf16.vlgmr.msra.gmra.mxu2 %v8344_v43  ;;  %2192 = vmatpush.bf16.msra.mxu0 %v2080_v51 }
 0x3ff   : > { %2176 = vmatpush.bf16.msra.mxu3 %v2069_v52 }
 0x402   : > { %2177 = vmatmul.bf16.vlgmr.msra.gmra.mxu3 %v8348_v54  ;;  %2193 = vmatpush.bf16.msra.mxu0 %v2079_v56  ;;  %v2044_v62 = vld [vmem:[#allocation2 + $0x108] sm:$0xff]  ;;  %v2089_v28 = vpop.permute.xlu0 %2088 }
 0x403   : > { %v2004_v58 = vpop.permute.xlu1 %2003  ;;  %v2046_v60 = vld [vmem:[#allocation2 + $0x118] sm:$0xff]  ;;  %v2077_v5 = vpack.c.bf16 %v2044_v62, %v2043_v1 }
 0x404   : > { %2009 = vst.msk [vmem:[#allocation2 + $0x180] sm:$0xff] %vm1720_vm8, %v2004_v58  ;;  %v2078_v61 = vpack.c.bf16 %v2046_v60, %v2045_v59 }
 0x406   : > { %2194 = vmatpush.bf16.msra.mxu0 %v2078_v61 }
 0x40a   : > { %2195 = vmatpush.bf16.msra.mxu0 %v2077_v5  ;;  %v2104_v56 = vpop.permute.xlu0 %2103 }
 0x40b   : > { %v2059_v11 = vld [vmem:[#allocation2 + $0x180] sm:$0xff]  ;;  %v2094_v33 = vpop.permute.xlu1 %2093 }
 0x40c   : > { %v2085_v14 = vpack.c.bf16 %v2060_v12, %v2059_v11 }
 0x40d   : > { %2196 = vmatmul.bf16.vlgmr.msra.gmra.mxu0 %v8352_v6 }
 0x40e   : > { %2163 = vmatmul.bf16.gmra.mxu2 %v8360_v7  ;;  %2214 = vmatpush.bf16.msra.mxu1 %v2085_v14 }
 0x411   : > { %8373 = vmatmul.msk.bf16.vlgmr.msra.gmra.mxu1 %vm1720_vm8, %v8356_v15 }
 0x412   : > { %2182 = vmatmul.bf16.gmra.mxu3 %v8364_v16  ;;  %2281 = vmatpush.bf16.msrb.mxu1 %v8988_v23 }
 0x41d   : > { %2201 = vmatmul.bf16.gmra.mxu0 %v8368_v19 }
 0x421   : > { %8374 = vmatmul.msk.bf16.gmra.mxu1 %vm1720_vm8, %v8372_v22 }
 0x439   : > { %v2099_v37 = vpop.permute.xlu2 %2098 }
 0x481   : > { %v2159_v24 = vpop.f32.mrf.mxu2 }
 0x482   : > { %v2160_v29 = vadd.f32 %v2159_v24, %v2089_v28 }
 0x485   : > { %v2178_v25 = vpop.f32.mrf.mxu3 }
 0x486   : > { %v2179_v32 = vadd.f32 %v2178_v25, %v2160_v29 }
 0x489   : > { %v2161_v26 = vpop.f32.mrf.mxu2 }
 0x48a   : > { %v2197_v27 = vpop.f32.mrf.mxu0  ;;  %v2162_v34 = vadd.f32 %v2161_v26, %v2094_v33 }
 0x48b   : > { %v2198_v35 = vadd.f32 %v2197_v27, %v2179_v32 }
 0x48d   : > { %v2180_v30 = vpop.f32.mrf.mxu3 }
 0x48e   : > { %v2216_v31 = vpop.f32.mrf.mxu1  ;;  %v2181_v38 = vadd.f32 %v2180_v30, %v2162_v34 }
 0x48f   : > { %v2217_v39 = vadd.f32 %v2216_v31, %v2198_v35 }
 0x491   : > { %v2164_v40 = vpop.f32.mrf.mxu2  ;;  %v2230_v45 = vmul.f32 0.01, %v2217_v39  ;;  %vm2226_vm9 = vcmp.gt.f32.partialorder %v2217_v39, 0.0 }
 0x492   : > { %v2199_v36 = vpop.f32.mrf.mxu0  ;;  %v2165_v42 = vadd.f32 %v2164_v40, %v2099_v37 }
 0x493   : > { %v2200_v41 = vadd.f32 %v2199_v36, %v2181_v38  ;;  %v2234_v50 = vsel %vm2226_vm9, %v2217_v39, %v2230_v45 }
 0x495   : > { %v2183_v43 = vpop.f32.mrf.mxu3 }
 0x496   : > { %v2218_v44 = vpop.f32.mrf.mxu1  ;;  %v2184_v48 = vadd.f32 %v2183_v43, %v2165_v42 }
 0x497   : > { %v2219_v46 = vadd.f32 %v2218_v44, %v2200_v41 }
 0x499   : > { %vm2227_vm10 = vcmp.gt.f32.partialorder %v2219_v46, 0.0  ;;  %v2231_v47 = vmul.f32 0.01, %v2219_v46  ;;  %v2166_v54 = vpop.f32.mrf.mxu2 }
 0x49a   : > { %v2202_v49 = vpop.f32.mrf.mxu0  ;;  %v2167_v58 = vadd.f32 %v2166_v54, %v2104_v56 }
 0x49b   : > { %v2235_v51 = vsel %vm2227_vm10, %v2219_v46, %v2231_v47  ;;  %v2203_v53 = vadd.f32 %v2202_v49, %v2184_v48 }
 0x49c   : > { %v2260_v52 = vpack.c.bf16 %v2235_v51, %v2234_v50 }
 0x49d   : > { %v2185_v57 = vpop.f32.mrf.mxu3 }
 0x49e   : > { %v2221_v55 = vpop.f32.mrf.mxu1  ;;  %8379 = vmatmul.msk.bf16.vlgmr.msrb.gmra.mxu1 %vm1720_vm8, %v2260_v52  ;;  %v2186_v61 = vadd.f32 %v2185_v57, %v2167_v58 }
 0x49f   : > { %v2222_v59 = vadd.f32 %v2221_v55, %v2203_v53 }
 0x4a1   : > { %v2232_v63 = vmul.f32 0.01, %v2222_v59  ;;  %vm2228_vm11 = vcmp.gt.f32.partialorder %v2222_v59, 0.0 }
 0x4a2   : > { %v2204_v60 = vpop.f32.mrf.mxu0 }
 0x4a3   : > { %v2205_v62 = vadd.f32 %v2204_v60, %v2186_v61  ;;  %v2236_v4 = vsel %vm2228_vm11, %v2222_v59, %v2232_v63 }
 0x4a6   : > { %v2223_v0 = vpop.f32.mrf.mxu1 }
 0x4a7   : > { %v2224_v1 = vadd.f32 %v2223_v0, %v2205_v62 }
 0x4a9   : > { %vm2229_vm12 = vcmp.gt.f32.partialorder %v2224_v1, 0.0  ;;  %v2233_v2 = vmul.f32 0.01, %v2224_v1 }
 0x4ab   : > { %v2237_v5 = vsel %vm2229_vm12, %v2224_v1, %v2233_v2 }
 0x4ac   : > { %v2261_v6 = vpack.c.bf16 %v2237_v5, %v2236_v4 }
 0x4ae   : > { %8380 = vmatmul.msk.bf16.gmra.mxu1 %vm1720_vm8, %v2261_v6 }
 0x51b   : > { %v2283_v7 = vpop.f32.mrf.mxu1 }
 0x51c   : > { %2294 = vst.msk [vmem:[#allocation3] sm:$0xff] %vm2293_vm13, %v2283_v7 }
 0x523   : > { %v2285_v8 = vpop.f32.mrf.mxu1  ;;  %v9870_v9 = vld [vmem:[#allocation3] sm:$0xff] }
 0x524   : > { %2459 = vrot.lane.b32.xlu1 %v9870_v9, %s11779_s11  ;;  %2295 = vst.msk [vmem:[#allocation3 + $0x18] sm:$0xff] %vm2293_vm13, %v2285_v8  ;;  %2363 = vrot.lane.b32.xlu2 %v9870_v9, %s11765_s15  ;;  %s11771_s15 = smov 117   ;;  %s11847_s11 = smov 113  }
 0x525   : > { %2339 = vrot.lane.b32.xlu0 %v9870_v9, %s11767_s3  ;;  %2303 = vst.msk [vmem:[#allocation2] sm:$0xff] %vm2302_vm14, %v9870_v9  ;;  %s11773_s3 = smov 116  }
 0x52b   : > { %v2288_v10 = vpop.f32.mrf.mxu1  ;;  %v9881_v11 = vld [vmem:[#allocation3 + $0x18] sm:$0xff] }
 0x52c   : > { %2296 = vst.msk [vmem:[#allocation3 + $0x30] sm:$0xff] %vm2293_vm13, %v2288_v10  ;;  %2555 = vrot.lane.b32.xlu1 %v9870_v9, %s11769_s17  ;;  %2435 = vrot.lane.b32.xlu2 %v9870_v9, %s11839_s2  ;;  %s11775_s17 = smov 115   ;;  %v2257_v10 = vld [vmem:[%s9419_s14 + $0x8] sm:$0xff] }
 0x52d   : > { %2315 = vrot.lane.b32.xlu0 %v9870_v9, %s11771_s15  ;;  %2304 = vst.msk [vmem:[#allocation2 + $0x8] sm:$0xff] %vm2302_vm14, %v9881_v11  ;;  %s11777_s15 = smov 90  }
 0x533   : > { %v9892_v12 = vld [vmem:[#allocation3 + $0x30] sm:$0xff]  ;;  %v2290_v13 = vpop.f32.mrf.mxu1 }
 0x534   : > { %2305 = vst.msk [vmem:[#allocation2 + $0x10] sm:$0xff] %vm2302_vm14, %v9892_v12  ;;  %2531 = vrot.lane.b32.xlu1 %v9870_v9, %s11830_s18  ;;  %2411 = vrot.lane.b32.xlu2 %v9870_v9, %s11773_s3  ;;  %s11781_s3 = smov 91  }
 0x535   : > { %2297 = vst.msk [vmem:[#allocation3 + $0x48] sm:$0xff] %vm2293_vm13, %v2290_v13  ;;  %2507 = vrot.lane.b32.xlu0 %v9870_v9, %s11775_s17  ;;  %s11785_s17 = smov 92   ;;  %v2258_v13 = vld [vmem:[%s9419_s14 + $0x10] sm:$0xff] }
 0x53c   : > { %v9903_v14 = vld [vmem:[#allocation3 + $0x48] sm:$0xff]  ;;  %2387 = vrot.lane.b32.xlu1 %v9870_v9, %s11833_s13  ;;  %2843 = vrot.lane.b32.xlu2 %v9870_v9, %s11777_s15  ;;  %s11846_s15 = smov 112  }
 0x53d   : > { %2306 = vst.msk [vmem:[#allocation2 + $0x18] sm:$0xff] %vm2302_vm14, %v9903_v14  ;;  %2483 = vrot.lane.b32.xlu0 %v9870_v9, %s11841_s16 }
 0x544   : > { %2747 = vrot.lane.b32.xlu1 %v9870_v9, %s11781_s3  ;;  %2819 = vrot.lane.b32.xlu2 %v9870_v9, %s11843_s5  ;;  %s11848_s3 = smov 94  }
 0x545   : > { %2723 = vrot.lane.b32.xlu0 %v9870_v9, %s11832_s10 }
 0x54c   : > { %2651 = vrot.lane.b32.xlu1 %v9870_v9, %s11785_s17  ;;  %2795 = vrot.lane.b32.xlu2 %v9870_v9, %s11846_s15  ;;  %s11851_s17 = smov 95  }
 0x54d   : > { %2699 = vrot.lane.b32.xlu0 %v9870_v9, %s11847_s11 }
 0x554   : > { %2627 = vrot.lane.b32.xlu1 %v9870_v9, %s11840_s7  ;;  %2461 = vrot.lane.b32.xlu2 %v9881_v11, %s11848_s3 }
 0x555   : > { %2675 = vrot.lane.b32.xlu0 %v9870_v9, %s11842_s1 }
 0x55c   : > { %2603 = vrot.lane.b32.xlu1 %v9870_v9, %s11849_s21  ;;  %2557 = vrot.lane.b32.xlu2 %v9881_v11, %s11850_s25 }
 0x55d   : > { %2365 = vrot.lane.b32.xlu0 %v9881_v11, %s11851_s17 }
 0x564   : > { %2533 = vrot.lane.b32.xlu2 %v9881_v11, %s11830_s18  ;;  %2341 = vrot.lane.b32.xlu1 %v9881_v11, %s11852_s29 }
 0x565   : > { %2437 = vrot.lane.b32.xlu0 %v9881_v11, %s11839_s2 }
 0x56c   : > { %2389 = vrot.lane.b32.xlu2 %v9881_v11, %s11833_s13  ;;  %2317 = vrot.lane.b32.xlu1 %v9881_v11, %s11853_s22 }
 0x56d   : > { %2413 = vrot.lane.b32.xlu0 %v9881_v11, %s11854_s20 }
 0x574   : > { %2749 = vrot.lane.b32.xlu2 %v9881_v11, %s11855_s23  ;;  %2509 = vrot.lane.b32.xlu1 %v9881_v11, %s11856_s4 }
 0x575   : > { %2845 = vrot.lane.b32.xlu0 %v9881_v11, %s11857_s12 }
 0x57c   : > { %2653 = vrot.lane.b32.xlu2 %v9881_v11, %s11858_s27  ;;  %2485 = vrot.lane.b32.xlu1 %v9881_v11, %s11841_s16 }
 0x57d   : > { %2821 = vrot.lane.b32.xlu0 %v9881_v11, %s11843_s5 }
 0x57e   : > { %v2364_v15 = vpop.permute.xlu2 %2363 }
 0x57f   : > { %2375 = vst.msk [vmem:[#allocation2 + $0x60] sm:$0xff] %vm2302_vm14, %v2364_v15  ;;  %v2259_v15 = vld [vmem:[%s9419_s14 + $0x18] sm:$0xff] }
 0x584   : > { %2629 = vrot.lane.b32.xlu2 %v9881_v11, %s11840_s7  ;;  %2725 = vrot.lane.b32.xlu1 %v9881_v11, %s11832_s10 }
 0x585   : > { %2797 = vrot.lane.b32.xlu0 %v9881_v11, %s11846_s15 }
 0x586   : > { %v2436_v16 = vpop.permute.xlu2 %2435 }
 0x587   : > { %2447 = vst.msk [vmem:[#allocation2 + $0xc0] sm:$0xff] %vm2302_vm14, %v2436_v16 }
 0x58c   : > { %2605 = vrot.lane.b32.xlu2 %v9881_v11, %s11849_s21  ;;  %2701 = vrot.lane.b32.xlu1 %v9881_v11, %s11847_s11 }
 0x58d   : > { %2463 = vrot.lane.b32.xlu0 %v9892_v12, %s11848_s3 }
 0x58e   : > { %v2412_v17 = vpop.permute.xlu2 %2411 }
 0x58f   : > { %2423 = vst.msk [vmem:[#allocation2 + $0xa0] sm:$0xff] %vm2302_vm14, %v2412_v17 }
 0x594   : > { %2677 = vrot.lane.b32.xlu1 %v9881_v11, %s11842_s1  ;;  %2439 = vrot.lane.b32.xlu2 %v9892_v12, %s11839_s2 }
 0x595   : > { %2343 = vrot.lane.b32.xlu0 %v9892_v12, %s11852_s29 }
 0x596   : > { %v2460_v18 = vpop.permute.xlu1 %2459  ;;  %v2844_v19 = vpop.permute.xlu2 %2843 }
 0x597   : > { %2471 = vst.msk [vmem:[#allocation2 + $0xe0] sm:$0xff] %vm2302_vm14, %v2460_v18  ;;  %v2340_v20 = vpop.permute.xlu0 %2339 }
 0x598   : > { %2855 = vst.msk [vmem:[#allocation2 + $0x2e0] sm:$0xff] %vm2302_vm14, %v2844_v19 }
 0x599   : > { %2351 = vst.msk [vmem:[#allocation2 + $0x40] sm:$0xff] %vm2302_vm14, %v2340_v20 }
 0x59c   : > { %2415 = vrot.lane.b32.xlu2 %v9892_v12, %s11854_s20  ;;  %2367 = vrot.lane.b32.xlu1 %v9892_v12, %s11851_s17 }
 0x59d   : > { %2319 = vrot.lane.b32.xlu0 %v9892_v12, %s11853_s22 }
 0x59e   : > { %v2556_v21 = vpop.permute.xlu1 %2555  ;;  %v2820_v22 = vpop.permute.xlu2 %2819 }
 0x59f   : > { %2567 = vst.msk [vmem:[#allocation2 + $0x160] sm:$0xff] %vm2302_vm14, %v2556_v21  ;;  %v2316_v23 = vpop.permute.xlu0 %2315 }
 0x5a0   : > { %2831 = vst.msk [vmem:[#allocation2 + $0x2c0] sm:$0xff] %vm2302_vm14, %v2820_v22 }
 0x5a1   : > { %2327 = vst.msk [vmem:[#allocation2 + $0x20] sm:$0xff] %vm2302_vm14, %v2316_v23 }
 0x5a4   : > { %2511 = vrot.lane.b32.xlu2 %v9892_v12, %s11856_s4  ;;  %2559 = vrot.lane.b32.xlu1 %v9892_v12, %s11850_s25 }
 0x5a5   : > { %2391 = vrot.lane.b32.xlu0 %v9892_v12, %s11833_s13 }
 0x5a6   : > { %v2532_v24 = vpop.permute.xlu1 %2531  ;;  %v2796_v25 = vpop.permute.xlu2 %2795 }
 0x5a7   : > { %2543 = vst.msk [vmem:[#allocation2 + $0x140] sm:$0xff] %vm2302_vm14, %v2532_v24  ;;  %v2508_v26 = vpop.permute.xlu0 %2507 }
 0x5a8   : > { %2807 = vst.msk [vmem:[#allocation2 + $0x2a0] sm:$0xff] %vm2302_vm14, %v2796_v25 }
 0x5a9   : > { %2519 = vst.msk [vmem:[#allocation2 + $0x120] sm:$0xff] %vm2302_vm14, %v2508_v26  ;;  %v2895_v26 = vld [vmem:[#allocation2 + $0x60] sm:$0xff] }
 0x5ac   : > { %2751 = vrot.lane.b32.xlu2 %v9892_v12, %s11855_s23  ;;  %2535 = vrot.lane.b32.xlu1 %v9892_v12, %s11830_s18 }
 0x5ad   : > { %2847 = vrot.lane.b32.xlu0 %v9892_v12, %s11857_s12 }
 0x5ae   : > { %v2388_v27 = vpop.permute.xlu1 %2387  ;;  %v2462_v28 = vpop.permute.xlu2 %2461 }
 0x5af   : > { %2399 = vst.msk [vmem:[#allocation2 + $0x80] sm:$0xff] %vm2302_vm14, %v2388_v27  ;;  %v2484_v29 = vpop.permute.xlu0 %2483 }
 0x5b0   : > { %2495 = vst.msk [vmem:[#allocation2 + $0x100] sm:$0xff] %vm2302_vm14, %v2484_v29 }
 0x5b1   : > { %2472 = vst.msk [vmem:[#allocation2 + $0xe8] sm:$0xff] %vm2302_vm14, %v2462_v28 }
 0x5b4   : > { %2655 = vrot.lane.b32.xlu2 %v9892_v12, %s11858_s27  ;;  %2487 = vrot.lane.b32.xlu1 %v9892_v12, %s11841_s16 }
 0x5b5   : > { %2727 = vrot.lane.b32.xlu0 %v9892_v12, %s11832_s10 }
 0x5b6   : > { %v2748_v30 = vpop.permute.xlu1 %2747  ;;  %v2558_v31 = vpop.permute.xlu2 %2557 }
 0x5b7   : > { %2759 = vst.msk [vmem:[#allocation2 + $0x260] sm:$0xff] %vm2302_vm14, %v2748_v30  ;;  %v2724_v32 = vpop.permute.xlu0 %2723 }
 0x5b8   : > { %2735 = vst.msk [vmem:[#allocation2 + $0x240] sm:$0xff] %vm2302_vm14, %v2724_v32 }
 0x5b9   : > { %2568 = vst.msk [vmem:[#allocation2 + $0x168] sm:$0xff] %vm2302_vm14, %v2558_v31 }
 0x5bc   : > { %2823 = vrot.lane.b32.xlu2 %v9892_v12, %s11843_s5  ;;  %2631 = vrot.lane.b32.xlu1 %v9892_v12, %s11840_s7 }
 0x5bd   : > { %2703 = vrot.lane.b32.xlu0 %v9892_v12, %s11847_s11 }
 0x5be   : > { %v2652_v33 = vpop.permute.xlu1 %2651  ;;  %v2534_v34 = vpop.permute.xlu2 %2533 }
 0x5bf   : > { %2663 = vst.msk [vmem:[#allocation2 + $0x1e0] sm:$0xff] %vm2302_vm14, %v2652_v33  ;;  %v2700_v35 = vpop.permute.xlu0 %2699 }
 0x5c0   : > { %2711 = vst.msk [vmem:[#allocation2 + $0x220] sm:$0xff] %vm2302_vm14, %v2700_v35  ;;  %v2927_v35 = vld [vmem:[#allocation2 + $0x160] sm:$0xff] }
 0x5c1   : > { %2544 = vst.msk [vmem:[#allocation2 + $0x148] sm:$0xff] %vm2302_vm14, %v2534_v34  ;;  %v2928_v34 = vld [vmem:[#allocation2 + $0x168] sm:$0xff] }
 0x5c4   : > { %2799 = vrot.lane.b32.xlu2 %v9892_v12, %s11846_s15  ;;  %2607 = vrot.lane.b32.xlu1 %v9892_v12, %s11849_s21 }
 0x5c5   : > { %2679 = vrot.lane.b32.xlu0 %v9892_v12, %s11842_s1 }
 0x5c6   : > { %v2628_v36 = vpop.permute.xlu1 %2627  ;;  %v2390_v37 = vpop.permute.xlu2 %2389 }
 0x5c7   : > { %2639 = vst.msk [vmem:[#allocation2 + $0x1c0] sm:$0xff] %vm2302_vm14, %v2628_v36  ;;  %v2676_v38 = vpop.permute.xlu0 %2675  ;;  %v3005_v36 = vpack.c.bf16 %v2928_v34, %v2927_v35  ;;  %v2885_v34 = vld [vmem:[#allocation2 + $0x10] sm:$0xff] }
 0x5c8   : > { %2687 = vst.msk [vmem:[#allocation2 + $0x200] sm:$0xff] %vm2302_vm14, %v2676_v38 }
 0x5c9   : > { %2400 = vst.msk [vmem:[#allocation2 + $0x88] sm:$0xff] %vm2302_vm14, %v2390_v37 }
 0x5cc   : > { %2775 = vrot.lane.b32.xlu2 %v9892_v12, %s11826_s26  ;;  %2583 = vrot.lane.b32.xlu1 %v9892_v12, %s11835_s28 }
 0x5cd   : > { %2441 = vrot.lane.b32.xlu0 %v9903_v14, %s11839_s2  ;;  %s11861_s2 = smov 109  }
 0x5ce   : > { %v2604_v39 = vpop.permute.xlu1 %2603  ;;  %v2750_v40 = vpop.permute.xlu2 %2749 }
 0x5cf   : > { %2615 = vst.msk [vmem:[#allocation2 + $0x1a0] sm:$0xff] %vm2302_vm14, %v2604_v39  ;;  %v2366_v41 = vpop.permute.xlu0 %2365 }
 0x5d0   : > { %2760 = vst.msk [vmem:[#allocation2 + $0x268] sm:$0xff] %vm2302_vm14, %v2750_v40 }
 0x5d1   : > { %2376 = vst.msk [vmem:[#allocation2 + $0x68] sm:$0xff] %vm2302_vm14, %v2366_v41 }
 0x5d4   : > { %2465 = vrot.lane.b32.xlu1 %v9903_v14, %s11848_s3  ;;  %2369 = vrot.lane.b32.xlu2 %v9903_v14, %s11851_s17  ;;  %s11859_s17 = smov 111   ;;  %s9357_s3 = smov 118  }
 0x5d5   : > { %2417 = vrot.lane.b32.xlu0 %v9903_v14, %s11854_s20 }
 0x5d6   : > { %v2654_v42 = vpop.permute.xlu2 %2653  ;;  %v2342_v43 = vpop.permute.xlu1 %2341 }
 0x5d7   : > { %2664 = vst.msk [vmem:[#allocation2 + $0x1e8] sm:$0xff] %vm2302_vm14, %v2654_v42  ;;  %v2438_v44 = vpop.permute.xlu0 %2437 }
 0x5d8   : > { %2448 = vst.msk [vmem:[#allocation2 + $0xc8] sm:$0xff] %vm2302_vm14, %v2438_v44  ;;  %v2896_v25 = vld [vmem:[#allocation2 + $0x68] sm:$0xff]  ;;  %v2923_v44 = vld [vmem:[#allocation2 + $0x140] sm:$0xff] }
 0x5d9   : > { %2352 = vst.msk [vmem:[#allocation2 + $0x48] sm:$0xff] %vm2302_vm14, %v2342_v43  ;;  %v2989_v27 = vpack.c.bf16 %v2896_v25, %v2895_v26  ;;  %v2924_v43 = vld [vmem:[#allocation2 + $0x148] sm:$0xff]  ;;  %v2887_v25 = vld [vmem:[#allocation2 + $0x20] sm:$0xff] }
 0x5dc   : > { %2561 = vrot.lane.b32.xlu2 %v9903_v14, %s11850_s25  ;;  %2345 = vrot.lane.b32.xlu1 %v9903_v14, %s11852_s29  ;;  %s11860_s25 = smov 110   ;;  %s9356_s29 = smov 119  }
 0x5dd   : > { %2773 = vrot.lane.b32.xlu0 %v9881_v11, %s11826_s26 }
 0x5de   : > { %v2630_v45 = vpop.permute.xlu2 %2629  ;;  %v2318_v46 = vpop.permute.xlu1 %2317 }
 0x5df   : > { %2640 = vst.msk [vmem:[#allocation2 + $0x1c8] sm:$0xff] %vm2302_vm14, %v2630_v45  ;;  %v2414_v47 = vpop.permute.xlu0 %2413  ;;  %v3003_v45 = vpack.c.bf16 %v2924_v43, %v2923_v44  ;;  %v8383_v44 = vld [vmem:[%s9414_s8] sm:$0xf] }
 0x5e0   : > { %2424 = vst.msk [vmem:[#allocation2 + $0xa8] sm:$0xff] %vm2302_vm14, %v2414_v47 }
 0x5e1   : > { %2328 = vst.msk [vmem:[#allocation2 + $0x28] sm:$0xff] %vm2302_vm14, %v2318_v46 }
 0x5e4   : > { %2537 = vrot.lane.b32.xlu2 %v9903_v14, %s11830_s18  ;;  %2321 = vrot.lane.b32.xlu1 %v9903_v14, %s11853_s22 }
 0x5e5   : > { %2513 = vrot.lane.b32.xlu0 %v9903_v14, %s11856_s4 }
 0x5e6   : > { %v2606_v48 = vpop.permute.xlu2 %2605  ;;  %v2510_v49 = vpop.permute.xlu1 %2509 }
 0x5e7   : > { %2616 = vst.msk [vmem:[#allocation2 + $0x1a8] sm:$0xff] %vm2302_vm14, %v2606_v48  ;;  %v2846_v50 = vpop.permute.xlu0 %2845 }
 0x5e8   : > { %2856 = vst.msk [vmem:[#allocation2 + $0x2e8] sm:$0xff] %vm2302_vm14, %v2846_v50 }
 0x5e9   : > { %2520 = vst.msk [vmem:[#allocation2 + $0x128] sm:$0xff] %vm2302_vm14, %v2510_v49 }
 0x5ec   : > { %2771 = vrot.lane.b32.xlu2 %v9870_v9, %s11826_s26  ;;  %2393 = vrot.lane.b32.xlu1 %v9903_v14, %s11833_s13 }
 0x5ed   : > { %2753 = vrot.lane.b32.xlu0 %v9903_v14, %s11855_s23  ;;  %s9360_s23 = smov 108  }
 0x5ee   : > { %v2486_v51 = vpop.permute.xlu1 %2485  ;;  %v2440_v52 = vpop.permute.xlu2 %2439 }
 0x5ef   : > { %v2822_v53 = vpop.permute.xlu0 %2821  ;;  %2496 = vst.msk [vmem:[#allocation2 + $0x108] sm:$0xff] %vm2302_vm14, %v2486_v51 }
 0x5f0   : > { %2832 = vst.msk [vmem:[#allocation2 + $0x2c8] sm:$0xff] %vm2302_vm14, %v2822_v53  ;;  %v2911_v53 = vld [vmem:[#allocation2 + $0xe0] sm:$0xff] }
 0x5f1   : > { %2449 = vst.msk [vmem:[#allocation2 + $0xd0] sm:$0xff] %vm2302_vm14, %v2440_v52  ;;  %v2912_v52 = vld [vmem:[#allocation2 + $0xe8] sm:$0xff] }
 0x5f4   : > { %2489 = vrot.lane.b32.xlu2 %v9903_v14, %s11841_s16  ;;  %2849 = vrot.lane.b32.xlu1 %v9903_v14, %s11857_s12  ;;  %s9358_s12 = smov 99  }
 0x5f5   : > { %2657 = vrot.lane.b32.xlu0 %v9903_v14, %s11858_s27  ;;  %s9359_s27 = smov 107  }
 0x5f6   : > { %v2726_v54 = vpop.permute.xlu1 %2725  ;;  %v2416_v55 = vpop.permute.xlu2 %2415  ;;  %v2916_v43 = vld [vmem:[#allocation2 + $0x108] sm:$0xff] }
 0x5f7   : > { %v2798_v56 = vpop.permute.xlu0 %2797  ;;  %2736 = vst.msk [vmem:[#allocation2 + $0x248] sm:$0xff] %vm2302_vm14, %v2726_v54  ;;  %v2997_v54 = vpack.c.bf16 %v2912_v52, %v2911_v53  ;;  %v2899_v52 = vld [vmem:[#allocation2 + $0x80] sm:$0xff] }
 0x5f8   : > { %2808 = vst.msk [vmem:[#allocation2 + $0x2a8] sm:$0xff] %vm2302_vm14, %v2798_v56 }
 0x5f9   : > { %2425 = vst.msk [vmem:[#allocation2 + $0xb0] sm:$0xff] %vm2302_vm14, %v2416_v55 }
 0x5fc   : > { %2633 = vrot.lane.b32.xlu2 %v9903_v14, %s11840_s7  ;;  %2729 = vrot.lane.b32.xlu1 %v9903_v14, %s11832_s10 }
 0x5fd   : > { %2825 = vrot.lane.b32.xlu0 %v9903_v14, %s11843_s5 }
 0x5fe   : > { %v2702_v57 = vpop.permute.xlu1 %2701  ;;  %v2512_v58 = vpop.permute.xlu2 %2511 }
 0x5ff   : > { %2712 = vst.msk [vmem:[#allocation2 + $0x228] sm:$0xff] %vm2302_vm14, %v2702_v57  ;;  %v2464_v59 = vpop.permute.xlu0 %2463 }
 0x600   : > { %2473 = vst.msk [vmem:[#allocation2 + $0xf0] sm:$0xff] %vm2302_vm14, %v2464_v59 }
 0x601   : > { %2521 = vst.msk [vmem:[#allocation2 + $0x130] sm:$0xff] %vm2302_vm14, %v2512_v58  ;;  %v2909_v58 = vld [vmem:[#allocation2 + $0xd0] sm:$0xff] }
 0x604   : > { %2609 = vrot.lane.b32.xlu2 %v9903_v14, %s11849_s21  ;;  %2705 = vrot.lane.b32.xlu1 %v9903_v14, %s11847_s11  ;;  %s9355_s21 = smov 120   ;;  %s9362_s11 = smov 8  }
 0x605   : > { %2801 = vrot.lane.b32.xlu0 %v9903_v14, %s11846_s15 }
 0x606   : > { %v2678_v60 = vpop.permute.xlu1 %2677  ;;  %v2752_v61 = vpop.permute.xlu2 %2751 }
 0x607   : > { %2688 = vst.msk [vmem:[#allocation2 + $0x208] sm:$0xff] %vm2302_vm14, %v2678_v60  ;;  %v2344_v62 = vpop.permute.xlu0 %2343  ;;  %v2913_v48 = vld [vmem:[#allocation2 + $0xf0] sm:$0xff] }
 0x608   : > { %2761 = vst.msk [vmem:[#allocation2 + $0x270] sm:$0xff] %vm2302_vm14, %v2752_v61 }
 0x609   : > { %2353 = vst.msk [vmem:[#allocation2 + $0x50] sm:$0xff] %vm2302_vm14, %v2344_v62 }
 0x60c   : > { %2585 = vrot.lane.b32.xlu2 %v9903_v14, %s11835_s28  ;;  %2681 = vrot.lane.b32.xlu1 %v9903_v14, %s11842_s1 }
 0x60d   : > { %2777 = vrot.lane.b32.xlu0 %v9903_v14, %s11826_s26 }
 0x60e   : > { %v2656_v63 = vpop.permute.xlu2 %2655  ;;  %v2368_v0 = vpop.permute.xlu1 %2367 }
 0x60f   : > { %2665 = vst.msk [vmem:[#allocation2 + $0x1f0] sm:$0xff] %vm2302_vm14, %v2656_v63  ;;  %v2320_v1 = vpop.permute.xlu0 %2319  ;;  %v2908_v63 = vld [vmem:[#allocation2 + $0xc8] sm:$0xff] }
 0x610   : > { %2377 = vst.msk [vmem:[#allocation2 + $0x70] sm:$0xff] %vm2302_vm14, %v2368_v0  ;;  %v2893_v61 = vld [vmem:[#allocation2 + $0x50] sm:$0xff] }
 0x611   : > { %2329 = vst.msk [vmem:[#allocation2 + $0x30] sm:$0xff] %vm2302_vm14, %v2320_v1  ;;  %v2892_v1 = vld [vmem:[#allocation2 + $0x48] sm:$0xff] }
 0x614   : > { %2581 = vrot.lane.b32.xlu2 %v9881_v11, %s11835_s28  ;;  %2579 = vrot.lane.b32.xlu1 %v9870_v9, %s11835_s28 }
 0x615   : > { %2871 = vrot.lane.b32.xlu0 %v9892_v12, %s11844_s0  ;;  %v2256_v12 = vld [vmem:[%s9419_s14] sm:$0xff] }
 0x616   : > { %v2824_v2 = vpop.permute.xlu2 %2823  ;;  %v2560_v4 = vpop.permute.xlu1 %2559 }
 0x617   : > { %2833 = vst.msk [vmem:[#allocation2 + $0x2d0] sm:$0xff] %vm2302_vm14, %v2824_v2  ;;  %v2392_v5 = vpop.permute.xlu0 %2391  ;;  %v2897_v22 = vld [vmem:[#allocation2 + $0x70] sm:$0xff]  ;;  %v2907_v2 = vld [vmem:[#allocation2 + $0xc0] sm:$0xff] }
 0x618   : > { %2569 = vst.msk [vmem:[#allocation2 + $0x170] sm:$0xff] %vm2302_vm14, %v2560_v4  ;;  %v2995_v4 = vpack.c.bf16 %v2908_v63, %v2907_v2  ;;  %v2960_v2 = vld [vmem:[#allocation2 + $0x268] sm:$0xff] }
 0x619   : > { %2401 = vst.msk [vmem:[#allocation2 + $0x90] sm:$0xff] %vm2302_vm14, %v2392_v5  ;;  %v2891_v5 = vld [vmem:[#allocation2 + $0x40] sm:$0xff] }
 0x61c   : > { %2867 = vrot.lane.b32.xlu2 %v9870_v9, %s11844_s0  ;;  %2873 = vrot.lane.b32.xlu1 %v9903_v14, %s11844_s0 }
 0x61d   : > { %2869 = vrot.lane.b32.xlu0 %v9881_v11, %s11844_s0 }
 0x61e   : > { %v2800_v6 = vpop.permute.xlu2 %2799  ;;  %v2536_v7 = vpop.permute.xlu1 %2535 }
 0x61f   : > { %2809 = vst.msk [vmem:[#allocation2 + $0x2b0] sm:$0xff] %vm2302_vm14, %v2800_v6  ;;  %v2848_v8 = vpop.permute.xlu0 %2847  ;;  %v2929_v31 = vld [vmem:[#allocation2 + $0x170] sm:$0xff] }
 0x620   : > { %2545 = vst.msk [vmem:[#allocation2 + $0x150] sm:$0xff] %vm2302_vm14, %v2536_v7  ;;  %v2987_v7 = vpack.c.bf16 %v2892_v1, %v2891_v5  ;;  %v2901_v35 = vld [vmem:[#allocation2 + $0x90] sm:$0xff] }
 0x621   : > { %2857 = vst.msk [vmem:[#allocation2 + $0x2f0] sm:$0xff] %vm2302_vm14, %v2848_v8 }
 0x624   : > { %3040 = vperm.xlu2 %9218, %v2257_v10   ;;  %3035 = vperm.xlu1 %9217, %v2256_v12   ;;  %v2905_v12 = vld [vmem:[#allocation2 + $0xb0] sm:$0xff] }
 0x625   : > { %3045 = vperm.xlu0 %9216, %v2258_v13  }
 0x626   : > { %v2776_v9 = vpop.permute.xlu2 %2775  ;;  %v2488_v14 = vpop.permute.xlu1 %2487 }
 0x627   : > { %2785 = vst.msk [vmem:[#allocation2 + $0x290] sm:$0xff] %vm2302_vm14, %v2776_v9  ;;  %v2728_v11 = vpop.permute.xlu0 %2727  ;;  %v2925_v40 = vld [vmem:[#allocation2 + $0x150] sm:$0xff] }
 0x628   : > { %2497 = vst.msk [vmem:[#allocation2 + $0x110] sm:$0xff] %vm2302_vm14, %v2488_v14  ;;  %v2921_v14 = vld [vmem:[#allocation2 + $0x130] sm:$0xff] }
 0x629   : > { %2737 = vst.msk [vmem:[#allocation2 + $0x250] sm:$0xff] %vm2302_vm14, %v2728_v11  ;;  %v2977_v5 = vld [vmem:[#allocation2 + $0x2f0] sm:$0xff] }
 0x62c   : > { %3050 = vperm.xlu1 %9217, %v2259_v15   ;;  %v2889_v15 = vld [vmem:[#allocation2 + $0x30] sm:$0xff] }
 0x62e   : > { %v2632_v16 = vpop.permute.xlu1 %2631  ;;  %v2370_v17 = vpop.permute.xlu2 %2369 }
 0x62f   : > { %2641 = vst.msk [vmem:[#allocation2 + $0x1d0] sm:$0xff] %vm2302_vm14, %v2632_v16  ;;  %v2704_v18 = vpop.permute.xlu0 %2703 }
 0x630   : > { %2713 = vst.msk [vmem:[#allocation2 + $0x230] sm:$0xff] %vm2302_vm14, %v2704_v18  ;;  %v2904_v18 = vld [vmem:[#allocation2 + $0xa8] sm:$0xff] }
 0x631   : > { %2378 = vst.msk [vmem:[#allocation2 + $0x78] sm:$0xff] %vm2302_vm14, %v2370_v17 }
 0x636   : > { %v2608_v19 = vpop.permute.xlu1 %2607  ;;  %v2562_v20 = vpop.permute.xlu2 %2561 }
 0x637   : > { %2617 = vst.msk [vmem:[#allocation2 + $0x1b0] sm:$0xff] %vm2302_vm14, %v2608_v19  ;;  %v2680_v21 = vpop.permute.xlu0 %2679 }
 0x638   : > { %2689 = vst.msk [vmem:[#allocation2 + $0x210] sm:$0xff] %vm2302_vm14, %v2680_v21  ;;  %v2898_v23 = vld [vmem:[#allocation2 + $0x78] sm:$0xff]  ;;  %v2888_v21 = vld [vmem:[#allocation2 + $0x28] sm:$0xff] }
 0x639   : > { %2570 = vst.msk [vmem:[#allocation2 + $0x178] sm:$0xff] %vm2302_vm14, %v2562_v20  ;;  %v2990_v24 = vpack.c.bf16 %v2898_v23, %v2897_v22  ;;  %v2920_v20 = vld [vmem:[#allocation2 + $0x128] sm:$0xff]  ;;  %v2903_v22 = vld [vmem:[#allocation2 + $0xa0] sm:$0xff] }
 0x63a   : > { %v2993_v23 = vpack.c.bf16 %v2904_v18, %v2903_v22  ;;  %v2941_v22 = vld [vmem:[#allocation2 + $0x1d0] sm:$0xff] }
 0x63b   : > { %3130 = vmatpush.bf16.msrb.mxu2 %v2990_v24  ;;  %v2919_v24 = vld [vmem:[#allocation2 + $0x120] sm:$0xff] }
 0x63c   : > { %v3001_v26 = vpack.c.bf16 %v2920_v20, %v2919_v24  ;;  %v2973_v20 = vld [vmem:[#allocation2 + $0x2d0] sm:$0xff] }
 0x63e   : > { %v2584_v28 = vpop.permute.xlu1 %2583  ;;  %v2538_v29 = vpop.permute.xlu2 %2537 }
 0x63f   : > { %3131 = vmatpush.bf16.msrb.mxu2 %v2989_v27  ;;  %2593 = vst.msk [vmem:[#allocation2 + $0x190] sm:$0xff] %vm2302_vm14, %v2584_v28  ;;  %v2442_v30 = vpop.permute.xlu0 %2441  ;;  %v2985_v27 = vpack.c.bf16 %v2888_v21, %v2887_v25 }
 0x640   : > { %2450 = vst.msk [vmem:[#allocation2 + $0xd8] sm:$0xff] %vm2302_vm14, %v2442_v30  ;;  %v2930_v32 = vld [vmem:[#allocation2 + $0x178] sm:$0xff] }
 0x641   : > { %2546 = vst.msk [vmem:[#allocation2 + $0x158] sm:$0xff] %vm2302_vm14, %v2538_v29  ;;  %v3006_v33 = vpack.c.bf16 %v2930_v32, %v2929_v31  ;;  %v2886_v31 = vld [vmem:[#allocation2 + $0x18] sm:$0xff] }
 0x643   : > { %3168 = vmatpush.bf16.msrb.mxu0 %v3006_v33  ;;  %v2917_v33 = vld [vmem:[#allocation2 + $0x110] sm:$0xff] }
 0x646   : > { %v2466_v37 = vpop.permute.xlu1 %2465  ;;  %v2772_v38 = vpop.permute.xlu2 %2771 }
 0x647   : > { %3169 = vmatpush.bf16.msrb.mxu0 %v3005_v36  ;;  %2474 = vst.msk [vmem:[#allocation2 + $0xf8] sm:$0xff] %vm2302_vm14, %v2466_v37  ;;  %v2418_v39 = vpop.permute.xlu0 %2417  ;;  %v2910_v55 = vld [vmem:[#allocation2 + $0xd8] sm:$0xff] }
 0x648   : > { %2426 = vst.msk [vmem:[#allocation2 + $0xb8] sm:$0xff] %vm2302_vm14, %v2418_v39  ;;  %v2926_v41 = vld [vmem:[#allocation2 + $0x158] sm:$0xff]  ;;  %v2996_v60 = vpack.c.bf16 %v2910_v55, %v2909_v58  ;;  %v2984_v39 = vpack.c.bf16 %v2886_v31, %v2885_v34  ;;  %v8411_v31 = vld [vmem:[%s9414_s8 + $0x38] sm:$0xf]  ;;  %v8999_v34 = vld [vmem:[%s9414_s8 + $0x50] sm:$0xf0] }
 0x649   : > { %2783 = vst.msk [vmem:[#allocation2 + $0x280] sm:$0xff] %vm2302_vm14, %v2772_v38  ;;  %v3004_v42 = vpack.c.bf16 %v2926_v41, %v2925_v40  ;;  %v2884_v38 = vld [vmem:[#allocation2 + $0x8] sm:$0xff] }
 0x64a   : > { %v2900_v41 = vld [vmem:[#allocation2 + $0x88] sm:$0xff] }
 0x64b   : > { %3170 = vmatpush.bf16.msrb.mxu0 %v3004_v42  ;;  %v2915_v42 = vld [vmem:[#allocation2 + $0x100] sm:$0xff]  ;;  %v2991_v55 = vpack.c.bf16 %v2900_v41, %v2899_v52  ;;  %v2953_v52 = vld [vmem:[#allocation2 + $0x230] sm:$0xff] }
 0x64c   : > { %v2999_v53 = vpack.c.bf16 %v2916_v43, %v2915_v42  ;;  %v2971_v41 = vld [vmem:[#allocation2 + $0x2c0] sm:$0xff] }
 0x64e   : > { %v2490_v46 = vpop.permute.xlu2 %2489  ;;  %v2346_v47 = vpop.permute.xlu1 %2345  ;;  %v2914_v49 = vld [vmem:[#allocation2 + $0xf8] sm:$0xff] }
 0x64f   : > { %3171 = vmatpush.bf16.msrb.mxu0 %v3003_v45  ;;  %v2774_v50 = vpop.permute.xlu0 %2773  ;;  %2498 = vst.msk [vmem:[#allocation2 + $0x118] sm:$0xff] %vm2302_vm14, %v2490_v46  ;;  %v2998_v51 = vpack.c.bf16 %v2914_v49, %v2913_v48  ;;  %v2906_v6 = vld [vmem:[#allocation2 + $0xb8] sm:$0xff]  ;;  %v8992_v45 = vld [vmem:[%s9414_s8 + $0x18] sm:$0xf0]  ;;  %v8391_v46 = vld [vmem:[%s9414_s8 + $0x8] sm:$0xf] }
 0x650   : > { %2784 = vst.msk [vmem:[#allocation2 + $0x288] sm:$0xff] %vm2302_vm14, %v2774_v50  ;;  %v2994_v9 = vpack.c.bf16 %v2906_v6, %v2905_v12  ;;  %v8989_v49 = vld [vmem:[%s9414_s8 + $0x4] sm:$0xf]  ;;  %v8385_v50 = vld [vmem:[%s9414_s8 + $0x1c] sm:$0xf0]  ;;  %v2944_v12 = vld [vmem:[#allocation2 + $0x1e8] sm:$0xff] }
 0x651   : > { %2354 = vst.msk [vmem:[#allocation2 + $0x58] sm:$0xff] %vm2302_vm14, %v2346_v47  ;;  %3149 = vmatpush.bf16.msrb.mxu3 %v2998_v51  ;;  %v8993_v47 = vld [vmem:[%s9414_s8 + $0x20] sm:$0xf0]  ;;  %v2883_v51 = vld [vmem:[#allocation2] sm:$0xff] }
 0x655   : > { %3150 = vmatpush.bf16.msrb.mxu3 %v2997_v54  ;;  %v2983_v54 = vpack.c.bf16 %v2884_v38, %v2883_v51  ;;  %v2955_v38 = vld [vmem:[#allocation2 + $0x240] sm:$0xff]  ;;  %v2937_v51 = vld [vmem:[#allocation2 + $0x1b0] sm:$0xff] }
 0x656   : > { %v2634_v56 = vpop.permute.xlu2 %2633  ;;  %v2322_v57 = vpop.permute.xlu1 %2321  ;;  %v2918_v28 = vld [vmem:[#allocation2 + $0x118] sm:$0xff] }
 0x657   : > { %v2514_v59 = vpop.permute.xlu0 %2513  ;;  %2642 = vst.msk [vmem:[#allocation2 + $0x1d8] sm:$0xff] %vm2302_vm14, %v2634_v56  ;;  %v3000_v37 = vpack.c.bf16 %v2918_v28, %v2917_v33  ;;  %v2961_v56 = vld [vmem:[#allocation2 + $0x270] sm:$0xff]  ;;  %v2940_v28 = vld [vmem:[#allocation2 + $0x1c8] sm:$0xff] }
 0x658   : > { %2522 = vst.msk [vmem:[#allocation2 + $0x138] sm:$0xff] %vm2302_vm14, %v2514_v59  ;;  %v2894_v62 = vld [vmem:[#allocation2 + $0x58] sm:$0xff]  ;;  %v9000_v33 = vld [vmem:[%s9414_s8 + $0x58] sm:$0xf0] }
 0x659   : > { %2330 = vst.msk [vmem:[#allocation2 + $0x38] sm:$0xff] %vm2302_vm14, %v2322_v57  ;;  %v2988_v0 = vpack.c.bf16 %v2894_v62, %v2893_v61  ;;  %3151 = vmatpush.bf16.msrb.mxu3 %v2996_v60  ;;  %v8392_v57 = vor.u32 %v8993_v47, %v8391_v46  ;;  %v8384_v61 = vor.u32 %v8992_v45, %v8383_v44 }
 0x65a   : > { %v8388_v62 = vor.u32 %v8989_v49, %v8385_v50  ;;  %v8412_v45 = vor.u32 %v8999_v34, %v8411_v31  ;;  %v2969_v49 = vld [vmem:[#allocation2 + $0x2b0] sm:$0xff] }
 0x65b   : > { %3132 = vmatpush.bf16.msrb.mxu2 %v2988_v0  ;;  %v2945_v0 = vld [vmem:[#allocation2 + $0x1f0] sm:$0xff] }
 0x65d   : > { %3152 = vmatpush.bf16.msrb.mxu3 %v2995_v4 }
 0x65e   : > { %v2610_v8 = vpop.permute.xlu2 %2609  ;;  %v2394_v10 = vpop.permute.xlu1 %2393  ;;  %v2942_v18 = vld [vmem:[#allocation2 + $0x1d8] sm:$0xff] }
 0x65f   : > { %3133 = vmatpush.bf16.msrb.mxu2 %v2987_v7  ;;  %v2754_v13 = vpop.permute.xlu0 %2753  ;;  %2618 = vst.msk [vmem:[#allocation2 + $0x1b8] sm:$0xff] %vm2302_vm14, %v2610_v8  ;;  %v2922_v11 = vld [vmem:[#allocation2 + $0x138] sm:$0xff]  ;;  %v2959_v8 = vld [vmem:[#allocation2 + $0x260] sm:$0xff] }
 0x660   : > { %2762 = vst.msk [vmem:[#allocation2 + $0x278] sm:$0xff] %vm2302_vm14, %v2754_v13  ;;  %v2890_v16 = vld [vmem:[#allocation2 + $0x38] sm:$0xff]  ;;  %v3002_v17 = vpack.c.bf16 %v2922_v11, %v2921_v14  ;;  %v2976_v13 = vld [vmem:[#allocation2 + $0x2e8] sm:$0xff]  ;;  %v2975_v14 = vld [vmem:[#allocation2 + $0x2e0] sm:$0xff] }
 0x661   : > { %2402 = vst.msk [vmem:[#allocation2 + $0x98] sm:$0xff] %vm2302_vm14, %v2394_v10  ;;  %v2986_v19 = vpack.c.bf16 %v2890_v16, %v2889_v15  ;;  %3153 = vmatpush.bf16.msrb.mxu3 %v2994_v9  ;;  %v3021_v10 = vpack.c.bf16 %v2960_v2, %v2959_v8  ;;  %v2943_v9 = vld [vmem:[#allocation2 + $0x1e0] sm:$0xff]  ;;  %v3029_v15 = vpack.c.bf16 %v2976_v13, %v2975_v14  ;;  %v2933_v13 = vld [vmem:[#allocation2 + $0x190] sm:$0xff] }
 0x662   : > { %3172 = vmatpush.bf16.msrb.mxu0 %v3002_v17  ;;  %v3013_v11 = vpack.c.bf16 %v2944_v12, %v2943_v9 }
 0x663   : > { %3134 = vmatpush.bf16.msrb.mxu2 %v2986_v19 }
 0x665   : > { %3154 = vmatpush.bf16.msrb.mxu3 %v2993_v23  ;;  %v2957_v23 = vld [vmem:[#allocation2 + $0x250] sm:$0xff] }
 0x666   : > { %3173 = vmatpush.bf16.msrb.mxu0 %v3001_v26  ;;  %v2586_v29 = vpop.permute.xlu2 %2585  ;;  %v2850_v30 = vpop.permute.xlu1 %2849  ;;  %v3012_v26 = vpack.c.bf16 %v2942_v18, %v2941_v22  ;;  %v2938_v47 = vld [vmem:[#allocation2 + $0x1b8] sm:$0xff]  ;;  %v2947_v18 = vld [vmem:[#allocation2 + $0x200] sm:$0xff] }
 0x667   : > { %3135 = vmatpush.bf16.msrb.mxu2 %v2985_v27  ;;  %v2658_v32 = vpop.permute.xlu0 %2657  ;;  %2594 = vst.msk [vmem:[#allocation2 + $0x198] sm:$0xff] %vm2302_vm14, %v2586_v29  ;;  %v2962_v48 = vld [vmem:[#allocation2 + $0x278] sm:$0xff]  ;;  %v2956_v29 = vld [vmem:[#allocation2 + $0x248] sm:$0xff]  ;;  %v2963_v22 = vld [vmem:[#allocation2 + $0x280] sm:$0xff] }
 0x668   : > { %2666 = vst.msk [vmem:[#allocation2 + $0x1f8] sm:$0xff] %vm2302_vm14, %v2658_v32  ;;  %v2902_v36 = vld [vmem:[#allocation2 + $0x98] sm:$0xff]  ;;  %v3022_v60 = vpack.c.bf16 %v2962_v48, %v2961_v56 }
 0x669   : > { %2858 = vst.msk [vmem:[#allocation2 + $0x2f8] sm:$0xff] %vm2302_vm14, %v2850_v30  ;;  %v2992_v40 = vpack.c.bf16 %v2902_v36, %v2901_v35  ;;  %v2972_v30 = vld [vmem:[#allocation2 + $0x2c8] sm:$0xff]  ;;  %v8419_v32 = vld [vmem:[%s9414_s8 + $0x40] sm:$0xf]  ;;  %v8996_v35 = vld [vmem:[%s9414_s8 + $0x3c] sm:$0xf] }
 0x66a   : > { %3174 = vmatpush.bf16.msrb.mxu0 %v3000_v37  ;;  %v8413_v36 = vld [vmem:[%s9414_s8 + $0x54] sm:$0xf0]  ;;  %v2939_v37 = vld [vmem:[#allocation2 + $0x1c0] sm:$0xff]  ;;  %v8420_v42 = vor.u32 %v9000_v33, %v8419_v32  ;;  %v3027_v43 = vpack.c.bf16 %v2972_v30, %v2971_v41 }
 0x66b   : > { %3136 = vmatpush.bf16.msrb.mxu2 %v2984_v39  ;;  %3155 = vmatpush.bf16.msrb.mxu3 %v2992_v40  ;;  %v3011_v39 = vpack.c.bf16 %v2940_v28, %v2939_v37  ;;  %v3019_v40 = vpack.c.bf16 %v2956_v29, %v2955_v38  ;;  %v8416_v46 = vor.u32 %v8996_v35, %v8413_v36  ;;  %v8407_v38 = vld [vmem:[%s9414_s8 + $0x18] sm:$0xf] }
 0x66e   : > { %3175 = vmatpush.bf16.msrb.mxu0 %v2999_v53  ;;  %v2582_v58 = vpop.permute.xlu2 %2581  ;;  %v2730_v59 = vpop.permute.xlu1 %2729 }
 0x66f   : > { %3137 = vmatpush.bf16.msrb.mxu2 %v2983_v54  ;;  %3156 = vmatpush.bf16.msrb.mxu3 %v2991_v55  ;;  %v2826_v63 = vpop.permute.xlu0 %2825  ;;  %2592 = vst.msk [vmem:[#allocation2 + $0x188] sm:$0xff] %vm2302_vm14, %v2582_v58  ;;  %v2946_v1 = vld [vmem:[#allocation2 + $0x1f8] sm:$0xff]  ;;  %v3010_v55 = vpack.c.bf16 %v2938_v47, %v2937_v51  ;;  %v2952_v58 = vld [vmem:[#allocation2 + $0x228] sm:$0xff] }
 0x670   : > { %2834 = vst.msk [vmem:[#allocation2 + $0x2d8] sm:$0xff] %vm2302_vm14, %v2826_v63  ;;  %v3014_v4 = vpack.c.bf16 %v2946_v1, %v2945_v0  ;;  %v2978_v6 = vld [vmem:[#allocation2 + $0x2f8] sm:$0xff]  ;;  %v2967_v0 = vld [vmem:[#allocation2 + $0x2a0] sm:$0xff] }
 0x671   : > { %2738 = vst.msk [vmem:[#allocation2 + $0x258] sm:$0xff] %vm2302_vm14, %v2730_v59  ;;  %v3030_v7 = vpack.c.bf16 %v2978_v6, %v2977_v5  ;;  %3176 = vmatmul.bf16.vlgmr.msrb.gmra.mxu0 %v8392_v57  ;;  %v2936_v57 = vld [vmem:[#allocation2 + $0x1a8] sm:$0xff]  ;;  %v2949_v5 = vld [vmem:[#allocation2 + $0x210] sm:$0xff]  ;;  %v8997_v47 = vld [vmem:[%s9414_s8 + $0x44] sm:$0xf] }
 0x672   : > { %3138 = vmatmul.bf16.vlgmr.msrb.gmra.mxu2 %v8384_v61  ;;  %3157 = vmatmul.bf16.vlgmr.msrb.gmra.mxu3 %v8388_v62  ;;  %v2968_v59 = vld [vmem:[#allocation2 + $0x2a8] sm:$0xff]  ;;  %v2951_v61 = vld [vmem:[#allocation2 + $0x220] sm:$0xff] }
 0x673   : > { %3206 = vmatpush.bf16.msra.mxu2 %v3022_v60  ;;  %3187 = vmatpush.bf16.msra.mxu1 %v3014_v4  ;;  %v2935_v60 = vld [vmem:[#allocation2 + $0x1a0] sm:$0xff]  ;;  %v3017_v63 = vpack.c.bf16 %v2952_v58, %v2951_v61  ;;  %v3025_v1 = vpack.c.bf16 %v2968_v59, %v2967_v0  ;;  %v2934_v4 = vld [vmem:[#allocation2 + $0x198] sm:$0xff] }
 0x674   : > { %3225 = vmatpush.bf16.msra.mxu3 %v3030_v7  ;;  %v3009_v62 = vpack.c.bf16 %v2936_v57, %v2935_v60  ;;  %v3008_v14 = vpack.c.bf16 %v2934_v4, %v2933_v13  ;;  %v3275_v0 = vld [vmem:[%s9424_s19] sm:$0x3] }
 0x676   : > { %v2868_v16 = vpop.permute.xlu2 %2867  ;;  %v2706_v17 = vpop.permute.xlu1 %2705  ;;  %v2932_v29 = vld [vmem:[#allocation2 + $0x188] sm:$0xff] }
 0x677   : > { %3207 = vmatpush.bf16.msra.mxu2 %v3021_v10  ;;  %3188 = vmatpush.bf16.msra.mxu1 %v3013_v11  ;;  %v2802_v19 = vpop.permute.xlu0 %2801  ;;  %2879 = vst.msk [vmem:[#allocation2 + $0x300] sm:$0xff] %vm2302_vm14, %v2868_v16  ;;  %v2974_v21 = vld [vmem:[#allocation2 + $0x2d8] sm:$0xff]  ;;  %v2965_v10 = vld [vmem:[#allocation2 + $0x290] sm:$0xff]  ;;  %v2948_v11 = vld [vmem:[#allocation2 + $0x208] sm:$0xff] }
 0x678   : > { %3226 = vmatpush.bf16.msra.mxu3 %v3029_v15  ;;  %2810 = vst.msk [vmem:[#allocation2 + $0x2b8] sm:$0xff] %vm2302_vm14, %v2802_v19  ;;  %v2958_v24 = vld [vmem:[#allocation2 + $0x258] sm:$0xff]  ;;  %v3028_v25 = vpack.c.bf16 %v2974_v21, %v2973_v20  ;;  %v2964_v15 = vld [vmem:[#allocation2 + $0x288] sm:$0xff]  ;;  %v3015_v21 = vpack.c.bf16 %v2948_v11, %v2947_v18 }
 0x679   : > { %2714 = vst.msk [vmem:[#allocation2 + $0x238] sm:$0xff] %vm2302_vm14, %v2706_v17  ;;  %v3020_v27 = vpack.c.bf16 %v2958_v24, %v2957_v23  ;;  %v8399_v16 = vld [vmem:[%s9414_s8 + $0x10] sm:$0xf]  ;;  %v8994_v17 = vld [vmem:[%s9414_s8 + $0x28] sm:$0xf0] }
 0x67a   : > { %v8991_v19 = vld [vmem:[%s9414_s8 + $0x14] sm:$0xf]  ;;  %v8401_v20 = vld [vmem:[%s9414_s8 + $0x2c] sm:$0xf0]  ;;  %v8990_v23 = vld [vmem:[%s9414_s8 + $0xc] sm:$0xf] }
 0x67b   : > { %3189 = vmatpush.bf16.msra.mxu1 %v3012_v26  ;;  %3208 = vmatpush.bf16.msra.mxu2 %v3020_v27  ;;  %v8393_v24 = vld [vmem:[%s9414_s8 + $0x24] sm:$0xf0]  ;;  %v8400_v27 = vor.u32 %v8994_v17, %v8399_v16  ;;  %v8404_v31 = vor.u32 %v8991_v19, %v8401_v20 }
 0x67c   : > { %3227 = vmatpush.bf16.msra.mxu3 %v3028_v25  ;;  %v3023_v25 = vpack.c.bf16 %v2964_v15, %v2963_v22  ;;  %v8396_v33 = vor.u32 %v8990_v23, %v8393_v24 }
 0x67e   : > { %v2682_v44 = vpop.permute.xlu1 %2681 }
 0x67f   : > { %3190 = vmatpush.bf16.msra.mxu1 %v3011_v39  ;;  %3209 = vmatpush.bf16.msra.mxu2 %v3019_v40  ;;  %v2778_v48 = vpop.permute.xlu0 %2777  ;;  %2690 = vst.msk [vmem:[#allocation2 + $0x218] sm:$0xff] %vm2302_vm14, %v2682_v44  ;;  %v2970_v50 = vld [vmem:[#allocation2 + $0x2b8] sm:$0xff]  ;;  %v8995_v39 = vld [vmem:[%s9414_s8 + $0x30] sm:$0xf0]  ;;  %v2979_v40 = vld [vmem:[#allocation2 + $0x300] sm:$0xff] }
 0x680   : > { %3228 = vmatpush.bf16.msra.mxu3 %v3027_v43  ;;  %2786 = vst.msk [vmem:[#allocation2 + $0x298] sm:$0xff] %vm2302_vm14, %v2778_v48  ;;  %v2954_v53 = vld [vmem:[#allocation2 + $0x238] sm:$0xff]  ;;  %v3026_v54 = vpack.c.bf16 %v2970_v50, %v2969_v49  ;;  %v8408_v44 = vor.u32 %v8995_v39, %v8407_v38 }
 0x681   : > { %v3018_v56 = vpack.c.bf16 %v2954_v53, %v2953_v52  ;;  %3181 = vmatmul.bf16.gmra.mxu0 %v8420_v42  ;;  %v8427_v42 = vld [vmem:[%s9414_s8 + $0x48] sm:$0xf]  ;;  %v9001_v43 = vld [vmem:[%s9414_s8 + $0x60] sm:$0xf0]  ;;  %v8421_v48 = vld [vmem:[%s9414_s8 + $0x5c] sm:$0xf0] }
 0x682   : > { %3143 = vmatmul.bf16.gmra.mxu2 %v8412_v45  ;;  %3162 = vmatmul.bf16.gmra.mxu3 %v8416_v46  ;;  %v8998_v45 = vld [vmem:[%s9414_s8 + $0x4c] sm:$0xf]  ;;  %v8429_v46 = vld [vmem:[%s9414_s8 + $0x64] sm:$0xf0]  ;;  %v8428_v49 = vor.u32 %v9001_v43, %v8427_v42  ;;  %v8424_v51 = vor.u32 %v8997_v47, %v8421_v48  ;;  %v8435_v52 = vld [vmem:[%s9414_s8 + $0x50] sm:$0xf] }
 0x683   : > { %3191 = vmatpush.bf16.msra.mxu1 %v3010_v55  ;;  %3210 = vmatpush.bf16.msra.mxu2 %v3018_v56  ;;  %v8432_v50 = vor.u32 %v8998_v45, %v8429_v46  ;;  %v9002_v53 = vld [vmem:[%s9414_s8 + $0x68] sm:$0xf0] }
 0x684   : > { %3229 = vmatpush.bf16.msra.mxu3 %v3026_v54  ;;  %v8436_v54 = vor.u32 %v9002_v53, %v8435_v52 }
 0x686   : > { %v2580_v2 = vpop.permute.xlu1 %2579  ;;  %v2950_v6 = vld [vmem:[#allocation2 + $0x218] sm:$0xff] }
 0x687   : > { %3192 = vmatpush.bf16.msra.mxu1 %v3009_v62  ;;  %3211 = vmatpush.bf16.msra.mxu2 %v3017_v63  ;;  %v2872_v7 = vpop.permute.xlu0 %2871  ;;  %2591 = vst.msk [vmem:[#allocation2 + $0x180] sm:$0xff] %vm2302_vm14, %v2580_v2  ;;  %v3016_v8 = vpack.c.bf16 %v2950_v6, %v2949_v5  ;;  %v2966_v12 = vld [vmem:[#allocation2 + $0x298] sm:$0xff]  ;;  %v3325_v2 = vsel %vm1372_vm1, %v3275_v0, 0 }
 0x688   : > { %3230 = vmatpush.bf16.msra.mxu3 %v3025_v1  ;;  %2881 = vst.msk [vmem:[#allocation2 + $0x310] sm:$0xff] %vm2302_vm14, %v2872_v7  ;;  %v3024_v9 = vpack.c.bf16 %v2966_v12, %v2965_v10  ;;  %v3041_v7 = vpop.permute.xlu2 %3040 }
 0x68b   : > { %3193 = vmatpush.bf16.msra.mxu1 %v3008_v14  ;;  %3212 = vmatpush.bf16.msra.mxu2 %v3016_v8 }
 0x68c   : > { %3231 = vmatpush.bf16.msra.mxu3 %v3024_v9 }
 0x68e   : > { %v2874_v26 = vpop.permute.xlu1 %2873  ;;  %v2931_v28 = vld [vmem:[#allocation2 + $0x180] sm:$0xff] }
 0x68f   : > { %3213 = vmatpush.bf16.msra.mxu2 %v3015_v21  ;;  %v2870_v30 = vpop.permute.xlu0 %2869  ;;  %2882 = vst.msk [vmem:[#allocation2 + $0x318] sm:$0xff] %vm2302_vm14, %v2874_v26  ;;  %v3007_v32 = vpack.c.bf16 %v2932_v29, %v2931_v28  ;;  %v2981_v34 = vld [vmem:[#allocation2 + $0x310] sm:$0xff] }
 0x690   : > { %3232 = vmatpush.bf16.msra.mxu3 %v3023_v25  ;;  %2880 = vst.msk [vmem:[#allocation2 + $0x308] sm:$0xff] %vm2302_vm14, %v2870_v30 }
 0x691   : > { %3194 = vmatpush.bf16.msra.mxu1 %v3007_v32 }
 0x692   : > { %3214 = vmatmul.bf16.vlgmr.msra.gmra.mxu2 %v8400_v27 }
 0x693   : > { %3233 = vmatmul.bf16.vlgmr.msra.gmra.mxu3 %v8404_v31 }
 0x694   : > { %3195 = vmatmul.bf16.vlgmr.msra.gmra.mxu1 %v8396_v33 }
 0x695   : > { %3334 = vmatpush.bf16.msrb.mxu1 %v3325_v2 }
 0x696   : > { %v2982_v35 = vld [vmem:[#allocation2 + $0x318] sm:$0xff]  ;;  %v3036_v1 = vpop.permute.xlu1 %3035 }
 0x697   : > { %v3032_v36 = vpack.c.bf16 %v2982_v35, %v2981_v34  ;;  %v2980_v37 = vld [vmem:[#allocation2 + $0x308] sm:$0xff]  ;;  %v3046_v19 = vpop.permute.xlu0 %3045 }
 0x698   : > { %v3031_v41 = vpack.c.bf16 %v2980_v37, %v2979_v40 }
 0x699   : > { %3250 = vmatpush.bf16.msra.mxu0 %v3032_v36 }
 0x69d   : > { %3251 = vmatpush.bf16.msra.mxu0 %v3031_v41 }
 0x69e   : > { %v3051_v28 = vpop.permute.xlu1 %3050 }
 0x6a0   : > { %8437 = vmatmul.msk.bf16.vlgmr.msra.gmra.mxu0 %vm3123_vm15, %v8408_v44 }
 0x6a2   : > { %3219 = vmatmul.bf16.gmra.mxu2 %v8428_v49 }
 0x6a3   : > { %3238 = vmatmul.bf16.gmra.mxu3 %v8432_v50 }
 0x6a4   : > { %3200 = vmatmul.bf16.gmra.mxu1 %v8424_v51 }
 0x6b0   : > { %8438 = vmatmul.msk.bf16.gmra.mxu0 %vm3123_vm15, %v8436_v54 }
 0x6ee   : > { %v3177_v57 = vpop.f32.mrf.mxu0 }
 0x6f5   : > { %v3139_v55 = vpop.f32.mrf.mxu2  ;;  %v3158_v56 = vpop.f32.mrf.mxu3 }
 0x6f6   : > { %v3179_v60 = vpop.f32.mrf.mxu0  ;;  %v3140_v6 = vadd.f32 %v3139_v55, %v3036_v1 }
 0x6f8   : > { %v3159_v10 = vadd.f32 %v3158_v56, %v3140_v6 }
 0x6fa   : > { %v3178_v14 = vadd.f32 %v3177_v57, %v3159_v10 }
 0x6fd   : > { %v3141_v58 = vpop.f32.mrf.mxu2  ;;  %v3160_v59 = vpop.f32.mrf.mxu3 }
 0x6fe   : > { %v3182_v63 = vpop.f32.mrf.mxu0  ;;  %v3142_v12 = vadd.f32 %v3141_v58, %v3041_v7 }
 0x700   : > { %v3161_v11 = vadd.f32 %v3160_v59, %v3142_v12 }
 0x702   : > { %v3180_v18 = vadd.f32 %v3179_v60, %v3161_v11 }
 0x705   : > { %v3144_v61 = vpop.f32.mrf.mxu2  ;;  %v3163_v62 = vpop.f32.mrf.mxu3 }
 0x706   : > { %v3184_v13 = vpop.f32.mrf.mxu0  ;;  %v3145_v24 = vadd.f32 %v3144_v61, %v3046_v19 }
 0x708   : > { %v3164_v30 = vadd.f32 %v3163_v62, %v3145_v24 }
 0x70a   : > { %v3183_v36 = vadd.f32 %v3182_v63, %v3164_v30 }
 0x70d   : > { %v3146_v4 = vpop.f32.mrf.mxu2  ;;  %v3165_v5 = vpop.f32.mrf.mxu3 }
 0x70e   : > { %v3147_v31 = vadd.f32 %v3146_v4, %v3051_v28 }
 0x710   : > { %v3166_v37 = vadd.f32 %v3165_v5, %v3147_v31 }
 0x711   : > { %v3196_v8 = vpop.f32.mrf.mxu1 }
 0x712   : > { %v3197_v16 = vadd.f32 %v3196_v8, %v3178_v14  ;;  %v3185_v44 = vadd.f32 %v3184_v13, %v3166_v37 }
 0x715   : > { %v3215_v9 = vpop.f32.mrf.mxu2 }
 0x716   : > { %v3234_v15 = vpop.f32.mrf.mxu3  ;;  %v3216_v20 = vadd.f32 %v3215_v9, %v3197_v16 }
 0x718   : > { %v3235_v26 = vadd.f32 %v3234_v15, %v3216_v20 }
 0x719   : > { %v3198_v17 = vpop.f32.mrf.mxu1 }
 0x71a   : > { %v3199_v21 = vadd.f32 %v3198_v17, %v3180_v18 }
 0x71d   : > { %v3217_v22 = vpop.f32.mrf.mxu2  ;;  %v3253_v23 = vpop.f32.mrf.mxu0 }
 0x71e   : > { %v3236_v25 = vpop.f32.mrf.mxu3  ;;  %v3218_v27 = vadd.f32 %v3217_v22, %v3199_v21  ;;  %v3254_v32 = vadd.f32 %v3253_v23, %v3235_v26 }
 0x720   : > { %v3237_v33 = vadd.f32 %v3236_v25, %v3218_v27  ;;  %v3267_v38 = vmul.f32 0.01, %v3254_v32  ;;  %vm3263_vm1 = vcmp.gt.f32.partialorder %v3254_v32, 0.0 }
 0x721   : > { %v3201_v29 = vpop.f32.mrf.mxu1 }
 0x722   : > { %v3202_v41 = vadd.f32 %v3201_v29, %v3183_v36  ;;  %v3271_v45 = vsel %vm3263_vm1, %v3254_v32, %v3267_v38 }
 0x725   : > { %v3220_v34 = vpop.f32.mrf.mxu2  ;;  %v3255_v35 = vpop.f32.mrf.mxu0 }
 0x726   : > { %v3256_v39 = vadd.f32 %v3255_v35, %v3237_v33  ;;  %v3239_v40 = vpop.f32.mrf.mxu3  ;;  %v3221_v48 = vadd.f32 %v3220_v34, %v3202_v41 }
 0x728   : > { %vm3264_vm0 = vcmp.gt.f32.partialorder %v3256_v39, 0.0  ;;  %v3268_v42 = vmul.f32 0.01, %v3256_v39  ;;  %v3240_v52 = vadd.f32 %v3239_v40, %v3221_v48 }
 0x729   : > { %v3203_v43 = vpop.f32.mrf.mxu1 }
 0x72a   : > { %v3272_v46 = vsel %vm3264_vm0, %v3256_v39, %v3268_v42  ;;  %v3204_v49 = vadd.f32 %v3203_v43, %v3185_v44  ;;  %vm4611_vm0 = vcmask 155648  }
 0x72b   : > { %v3316_v47 = vpack.c.bf16 %v3272_v46, %v3271_v45 }
 0x72d   : > { %v3222_v50 = vpop.f32.mrf.mxu2  ;;  %v3258_v51 = vpop.f32.mrf.mxu0  ;;  %8439 = vmatmul.msk.bf16.vlgmr.msrb.gmra.mxu1 %vm2302_vm14, %v3316_v47 }
 0x72e   : > { %v3223_v53 = vadd.f32 %v3222_v50, %v3204_v49  ;;  %v3241_v54 = vpop.f32.mrf.mxu3  ;;  %v3259_v55 = vadd.f32 %v3258_v51, %v3240_v52 }
 0x730   : > { %v3242_v56 = vadd.f32 %v3241_v54, %v3223_v53  ;;  %v3269_v58 = vmul.f32 0.01, %v3259_v55  ;;  %vm3265_vm2 = vcmp.gt.f32.partialorder %v3259_v55, 0.0 }
 0x732   : > { %v3273_v61 = vsel %vm3265_vm2, %v3259_v55, %v3269_v58  ;;  %vm4614_vm2 = vcmask 57344  }
 0x735   : > { %v3260_v57 = vpop.f32.mrf.mxu0 }
 0x736   : > { %v3261_v59 = vadd.f32 %v3260_v57, %v3242_v56 }
 0x738   : > { %vm3266_vm4 = vcmp.gt.f32.partialorder %v3261_v59, 0.0  ;;  %v3270_v60 = vmul.f32 0.01, %v3261_v59 }
 0x73a   : > { %v3274_v62 = vsel %vm3266_vm4, %v3261_v59, %v3270_v60  ;;  %vm4836_vm4 = vcmask 1045504  }
 0x73b   : > { %v3317_v63 = vpack.c.bf16 %v3274_v62, %v3273_v61 }
 0x73d   : > { %8440 = vmatmul.msk.bf16.gmra.mxu1 %vm2302_vm14, %v3317_v63 }
 0x7aa   : > { %v3336_v0 = vpop.f32.mrf.mxu1 }
 0x7ab   : > { %3346 = vst.msk [vmem:[#allocation3] sm:$0xff] %vm3123_vm15, %v3336_v0 }
 0x7b2   : > { %v3338_v1 = vpop.f32.mrf.mxu1  ;;  %v10216_v2 = vld [vmem:[#allocation3] sm:$0xff] }
 0x7b3   : > { %3347 = vst.msk [vmem:[#allocation3 + $0x18] sm:$0xff] %vm3123_vm15, %v3338_v1  ;;  %3511 = vrot.lane.b32.xlu2 %v10216_v2, %s11840_s7  ;;  %3415 = vrot.lane.b32.xlu0 %v10216_v2, %s11830_s18 }
 0x7b4   : > { %3391 = vrot.lane.b32.xlu1 %v10216_v2, %s11846_s15  ;;  %3355 = vst.msk [vmem:[#allocation2] sm:$0xff] %vm3354_vm3, %v10216_v2 }
 0x7ba   : > { %v3341_v4 = vpop.f32.mrf.mxu1  ;;  %v10227_v5 = vld [vmem:[#allocation3 + $0x18] sm:$0xff] }
 0x7bb   : > { %3348 = vst.msk [vmem:[#allocation3 + $0x30] sm:$0xff] %vm3123_vm15, %v3341_v4  ;;  %3607 = vrot.lane.b32.xlu2 %v10216_v2, %s11832_s10  ;;  %3487 = vrot.lane.b32.xlu0 %v10216_v2, %s11859_s17 }
 0x7bc   : > { %3367 = vrot.lane.b32.xlu1 %v10216_v2, %s9355_s21  ;;  %3356 = vst.msk [vmem:[#allocation2 + $0x8] sm:$0xff] %vm3354_vm3, %v10227_v5 }
 0x7c2   : > { %v3343_v6 = vpop.f32.mrf.mxu1  ;;  %v10238_v7 = vld [vmem:[#allocation3 + $0x30] sm:$0xff] }
 0x7c3   : > { %3349 = vst.msk [vmem:[#allocation3 + $0x48] sm:$0xff] %vm3123_vm15, %v3343_v6  ;;  %3583 = vrot.lane.b32.xlu2 %v10216_v2, %s11860_s25  ;;  %3463 = vrot.lane.b32.xlu0 %v10216_v2, %s9356_s29 }
 0x7c4   : > { %3559 = vrot.lane.b32.xlu1 %v10216_v2, %s9357_s3  ;;  %3357 = vst.msk [vmem:[#allocation2 + $0x10] sm:$0xff] %vm3354_vm3, %v10238_v7 }
 0x7ca   : > { %v10249_v8 = vld [vmem:[#allocation3 + $0x48] sm:$0xff] }
 0x7cb   : > { %3439 = vrot.lane.b32.xlu2 %v10216_v2, %s11833_s13  ;;  %3895 = vrot.lane.b32.xlu0 %v10216_v2, %s9358_s12  ;;  %3358 = vst.msk [vmem:[#allocation2 + $0x18] sm:$0xff] %vm3354_vm3, %v10249_v8 }
 0x7cc   : > { %3799 = vrot.lane.b32.xlu1 %v10216_v2, %s11838_s9 }
 0x7d3   : > { %3535 = vrot.lane.b32.xlu2 %v10216_v2, %s11841_s16  ;;  %3871 = vrot.lane.b32.xlu0 %v10216_v2, %s9359_s27 }
 0x7d4   : > { %3775 = vrot.lane.b32.xlu1 %v10216_v2, %s9360_s23 }
 0x7db   : > { %3703 = vrot.lane.b32.xlu2 %v10216_v2, %s11843_s5  ;;  %3513 = vrot.lane.b32.xlu0 %v10227_v5, %s11840_s7 }
 0x7dc   : > { %3417 = vrot.lane.b32.xlu1 %v10227_v5, %s11830_s18 }
 0x7e3   : > { %3679 = vrot.lane.b32.xlu2 %v10216_v2, %s11861_s2  ;;  %3609 = vrot.lane.b32.xlu0 %v10227_v5, %s11832_s10 }
 0x7e4   : > { %3489 = vrot.lane.b32.xlu1 %v10227_v5, %s11859_s17 }
 0x7eb   : > { %3585 = vrot.lane.b32.xlu0 %v10227_v5, %s11860_s25  ;;  %3393 = vrot.lane.b32.xlu2 %v10227_v5, %s11846_s15 }
 0x7ec   : > { %3465 = vrot.lane.b32.xlu1 %v10227_v5, %s9356_s29 }
 0x7f3   : > { %3441 = vrot.lane.b32.xlu0 %v10227_v5, %s11833_s13  ;;  %3369 = vrot.lane.b32.xlu2 %v10227_v5, %s9355_s21 }
 0x7f4   : > { %3897 = vrot.lane.b32.xlu1 %v10227_v5, %s9358_s12 }
 0x7fb   : > { %3537 = vrot.lane.b32.xlu0 %v10227_v5, %s11841_s16  ;;  %3561 = vrot.lane.b32.xlu2 %v10227_v5, %s9357_s3 }
 0x7fc   : > { %3873 = vrot.lane.b32.xlu1 %v10227_v5, %s9359_s27 }
 0x803   : > { %3705 = vrot.lane.b32.xlu0 %v10227_v5, %s11843_s5  ;;  %3801 = vrot.lane.b32.xlu2 %v10227_v5, %s11838_s9 }
 0x804   : > { %3515 = vrot.lane.b32.xlu1 %v10238_v7, %s11840_s7 }
 0x80b   : > { %3681 = vrot.lane.b32.xlu0 %v10227_v5, %s11861_s2  ;;  %3777 = vrot.lane.b32.xlu2 %v10227_v5, %s9360_s23 }
 0x80c   : > { %3395 = vrot.lane.b32.xlu1 %v10238_v7, %s11846_s15 }
 0x80d   : > { %v3512_v10 = vpop.permute.xlu2 %3511 }
 0x80e   : > { %3523 = vst.msk [vmem:[#allocation2 + $0xe0] sm:$0xff] %vm3354_vm3, %v3512_v10 }
 0x813   : > { %3491 = vrot.lane.b32.xlu0 %v10238_v7, %s11859_s17  ;;  %3419 = vrot.lane.b32.xlu2 %v10238_v7, %s11830_s18 }
 0x814   : > { %3371 = vrot.lane.b32.xlu1 %v10238_v7, %s9355_s21 }
 0x815   : > { %v3608_v12 = vpop.permute.xlu2 %3607  ;;  %v3963_v0 = vld [vmem:[#allocation2 + $0xe0] sm:$0xff] }
 0x816   : > { %3619 = vst.msk [vmem:[#allocation2 + $0x160] sm:$0xff] %vm3354_vm3, %v3608_v12 }
 0x81b   : > { %3467 = vrot.lane.b32.xlu0 %v10238_v7, %s9356_s29  ;;  %3611 = vrot.lane.b32.xlu2 %v10238_v7, %s11832_s10 }
 0x81c   : > { %3443 = vrot.lane.b32.xlu1 %v10238_v7, %s11833_s13 }
 0x81d   : > { %v3584_v13 = vpop.permute.xlu2 %3583 }
 0x81e   : > { %3595 = vst.msk [vmem:[#allocation2 + $0x140] sm:$0xff] %vm3354_vm3, %v3584_v13 }
 0x823   : > { %3563 = vrot.lane.b32.xlu0 %v10238_v7, %s9357_s3  ;;  %3587 = vrot.lane.b32.xlu2 %v10238_v7, %s11860_s25 }
 0x824   : > { %3803 = vrot.lane.b32.xlu1 %v10238_v7, %s11838_s9 }
 0x825   : > { %v3440_v9 = vpop.permute.xlu2 %3439  ;;  %v3416_v14 = vpop.permute.xlu0 %3415 }
 0x826   : > { %3451 = vst.msk [vmem:[#allocation2 + $0x80] sm:$0xff] %vm3354_vm3, %v3440_v9  ;;  %v3392_v11 = vpop.permute.xlu1 %3391 }
 0x827   : > { %3427 = vst.msk [vmem:[#allocation2 + $0x60] sm:$0xff] %vm3354_vm3, %v3416_v14 }
 0x828   : > { %3403 = vst.msk [vmem:[#allocation2 + $0x40] sm:$0xff] %vm3354_vm3, %v3392_v11 }
 0x82b   : > { %3539 = vrot.lane.b32.xlu0 %v10238_v7, %s11841_s16  ;;  %3707 = vrot.lane.b32.xlu2 %v10238_v7, %s11843_s5 }
 0x82c   : > { %3779 = vrot.lane.b32.xlu1 %v10238_v7, %s9360_s23 }
 0x82d   : > { %v3536_v15 = vpop.permute.xlu2 %3535  ;;  %v3488_v16 = vpop.permute.xlu0 %3487 }
 0x82e   : > { %3547 = vst.msk [vmem:[#allocation2 + $0x100] sm:$0xff] %vm3354_vm3, %v3536_v15  ;;  %v3368_v17 = vpop.permute.xlu1 %3367 }
 0x82f   : > { %3499 = vst.msk [vmem:[#allocation2 + $0xc0] sm:$0xff] %vm3354_vm3, %v3488_v16 }
 0x830   : > { %3379 = vst.msk [vmem:[#allocation2 + $0x20] sm:$0xff] %vm3354_vm3, %v3368_v17 }
 0x833   : > { %3899 = vrot.lane.b32.xlu0 %v10238_v7, %s9358_s12  ;;  %3683 = vrot.lane.b32.xlu2 %v10238_v7, %s11861_s2 }
 0x834   : > { %3755 = vrot.lane.b32.xlu1 %v10238_v7, %s11854_s20 }
 0x835   : > { %v3704_v18 = vpop.permute.xlu2 %3703  ;;  %v3464_v19 = vpop.permute.xlu0 %3463 }
 0x836   : > { %3715 = vst.msk [vmem:[#allocation2 + $0x1e0] sm:$0xff] %vm3354_vm3, %v3704_v18  ;;  %v3560_v20 = vpop.permute.xlu1 %3559  ;;  %v3959_v16 = vld [vmem:[#allocation2 + $0xc0] sm:$0xff] }
 0x837   : > { %3475 = vst.msk [vmem:[#allocation2 + $0xa0] sm:$0xff] %vm3354_vm3, %v3464_v19 }
 0x838   : > { %3571 = vst.msk [vmem:[#allocation2 + $0x120] sm:$0xff] %vm3354_vm3, %v3560_v20 }
 0x83b   : > { %3875 = vrot.lane.b32.xlu0 %v10238_v7, %s9359_s27  ;;  %3517 = vrot.lane.b32.xlu2 %v10249_v8, %s11840_s7  ;;  %s9361_s7 = smov 121  }
 0x83c   : > { %3493 = vrot.lane.b32.xlu1 %v10249_v8, %s11859_s17  ;;  %s11868_s17 = sld [smem:[#allocation19_spill]] }
 0x83d   : > { %v3680_v21 = vpop.permute.xlu2 %3679  ;;  %v3896_v22 = vpop.permute.xlu0 %3895 }
 0x83e   : > { %3691 = vst.msk [vmem:[#allocation2 + $0x1c0] sm:$0xff] %vm3354_vm3, %v3680_v21  ;;  %v3800_v23 = vpop.permute.xlu1 %3799 }
 0x83f   : > { %3907 = vst.msk [vmem:[#allocation2 + $0x2e0] sm:$0xff] %vm3354_vm3, %v3896_v22 }
 0x840   : > { %3811 = vst.msk [vmem:[#allocation2 + $0x260] sm:$0xff] %vm3354_vm3, %v3800_v23 }
 0x843   : > { %3421 = vrot.lane.b32.xlu0 %v10249_v8, %s11830_s18  ;;  %3397 = vrot.lane.b32.xlu2 %v10249_v8, %s11846_s15  ;;  %s11864_s18 = sld [smem:[#allocation14_spill]] }
 0x844   : > { %3469 = vrot.lane.b32.xlu1 %v10249_v8, %s9356_s29  ;;  %s11867_s15 = sld [smem:[#allocation17_spill]] }
 0x845   : > { %v3872_v24 = vpop.permute.xlu0 %3871  ;;  %v3394_v25 = vpop.permute.xlu2 %3393 }
 0x846   : > { %3883 = vst.msk [vmem:[#allocation2 + $0x2c0] sm:$0xff] %vm3354_vm3, %v3872_v24  ;;  %v3776_v26 = vpop.permute.xlu1 %3775 }
 0x847   : > { %3787 = vst.msk [vmem:[#allocation2 + $0x240] sm:$0xff] %vm3354_vm3, %v3776_v26 }
 0x848   : > { %3404 = vst.msk [vmem:[#allocation2 + $0x48] sm:$0xff] %vm3354_vm3, %v3394_v25 }
 0x84b   : > { %3613 = vrot.lane.b32.xlu0 %v10249_v8, %s11832_s10  ;;  %3373 = vrot.lane.b32.xlu2 %v10249_v8, %s9355_s21  ;;  %s11863_s10 = sld [smem:[#allocation12_spill]] }
 0x84c   : > { %3751 = vrot.lane.b32.xlu1 %v10216_v2, %s11854_s20 }
 0x84d   : > { %v3514_v27 = vpop.permute.xlu0 %3513  ;;  %v3370_v28 = vpop.permute.xlu2 %3369 }
 0x84e   : > { %3524 = vst.msk [vmem:[#allocation2 + $0xe8] sm:$0xff] %vm3354_vm3, %v3514_v27  ;;  %v3418_v29 = vpop.permute.xlu1 %3417 }
 0x84f   : > { %3428 = vst.msk [vmem:[#allocation2 + $0x68] sm:$0xff] %vm3354_vm3, %v3418_v29  ;;  %v3947_v29 = vld [vmem:[#allocation2 + $0x60] sm:$0xff] }
 0x850   : > { %3380 = vst.msk [vmem:[#allocation2 + $0x28] sm:$0xff] %vm3354_vm3, %v3370_v28 }
 0x853   : > { %3589 = vrot.lane.b32.xlu0 %v10249_v8, %s11860_s25  ;;  %3659 = vrot.lane.b32.xlu2 %v10238_v7, %s11853_s22  ;;  %s11869_s25 = sld [smem:[#allocation18_spill]] }
 0x854   : > { %3849 = vrot.lane.b32.xlu1 %v10227_v5, %s11856_s4 }
 0x855   : > { %v3610_v30 = vpop.permute.xlu0 %3609  ;;  %v3562_v31 = vpop.permute.xlu2 %3561  ;;  %v3964_v63 = vld [vmem:[#allocation2 + $0xe8] sm:$0xff] }
 0x856   : > { %3620 = vst.msk [vmem:[#allocation2 + $0x168] sm:$0xff] %vm3354_vm3, %v3610_v30  ;;  %v3490_v32 = vpop.permute.xlu1 %3489  ;;  %v4049_v1 = vpack.c.bf16 %v3964_v63, %v3963_v0  ;;  %v3948_v27 = vld [vmem:[#allocation2 + $0x68] sm:$0xff] }
 0x857   : > { %3500 = vst.msk [vmem:[#allocation2 + $0xc8] sm:$0xff] %vm3354_vm3, %v3490_v32  ;;  %v4041_v30 = vpack.c.bf16 %v3948_v27, %v3947_v29 }
 0x858   : > { %3572 = vst.msk [vmem:[#allocation2 + $0x128] sm:$0xff] %vm3354_vm3, %v3562_v31  ;;  %v3955_v31 = vld [vmem:[#allocation2 + $0xa0] sm:$0xff] }
 0x85b   : > { %3851 = vrot.lane.b32.xlu0 %v10238_v7, %s11856_s4  ;;  %3753 = vrot.lane.b32.xlu2 %v10227_v5, %s11854_s20 }
 0x85c   : > { %3565 = vrot.lane.b32.xlu1 %v10249_v8, %s9357_s3 }
 0x85d   : > { %v3586_v33 = vpop.permute.xlu0 %3585  ;;  %v3802_v34 = vpop.permute.xlu2 %3801 }
 0x85e   : > { %3596 = vst.msk [vmem:[#allocation2 + $0x148] sm:$0xff] %vm3354_vm3, %v3586_v33  ;;  %v3466_v35 = vpop.permute.xlu1 %3465 }
 0x85f   : > { %3476 = vst.msk [vmem:[#allocation2 + $0xa8] sm:$0xff] %vm3354_vm3, %v3466_v35 }
 0x860   : > { %3812 = vst.msk [vmem:[#allocation2 + $0x268] sm:$0xff] %vm3354_vm3, %v3802_v34 }
 0x863   : > { %3847 = vrot.lane.b32.xlu0 %v10216_v2, %s11856_s4  ;;  %3445 = vrot.lane.b32.xlu2 %v10249_v8, %s11833_s13 }
 0x864   : > { %3541 = vrot.lane.b32.xlu1 %v10249_v8, %s11841_s16 }
 0x865   : > { %v3442_v36 = vpop.permute.xlu0 %3441  ;;  %v3778_v37 = vpop.permute.xlu2 %3777 }
 0x866   : > { %3452 = vst.msk [vmem:[#allocation2 + $0x88] sm:$0xff] %vm3354_vm3, %v3442_v36  ;;  %v3898_v38 = vpop.permute.xlu1 %3897  ;;  %v3956_v28 = vld [vmem:[#allocation2 + $0xa8] sm:$0xff] }
 0x867   : > { %3908 = vst.msk [vmem:[#allocation2 + $0x2e8] sm:$0xff] %vm3354_vm3, %v3898_v38  ;;  %v4045_v32 = vpack.c.bf16 %v3956_v28, %v3955_v31 }
 0x868   : > { %3788 = vst.msk [vmem:[#allocation2 + $0x248] sm:$0xff] %vm3354_vm3, %v3778_v37 }
 0x86b   : > { %3657 = vrot.lane.b32.xlu0 %v10227_v5, %s11853_s22  ;;  %3655 = vrot.lane.b32.xlu2 %v10216_v2, %s11853_s22 }
 0x86c   : > { %3731 = vrot.lane.b32.xlu1 %v10238_v7, %s11842_s1 }
 0x86d   : > { %v3538_v39 = vpop.permute.xlu0 %3537  ;;  %v3420_v40 = vpop.permute.xlu2 %3419 }
 0x86e   : > { %3548 = vst.msk [vmem:[#allocation2 + $0x108] sm:$0xff] %vm3354_vm3, %v3538_v39  ;;  %v3874_v41 = vpop.permute.xlu1 %3873 }
 0x86f   : > { %3884 = vst.msk [vmem:[#allocation2 + $0x2c8] sm:$0xff] %vm3354_vm3, %v3874_v41 }
 0x870   : > { %3429 = vst.msk [vmem:[#allocation2 + $0x70] sm:$0xff] %vm3354_vm3, %v3420_v40 }
 0x873   : > { %3827 = vrot.lane.b32.xlu0 %v10238_v7, %s11826_s26  ;;  %3635 = vrot.lane.b32.xlu2 %v10238_v7, %s11835_s28 }
 0x874   : > { %3727 = vrot.lane.b32.xlu1 %v10216_v2, %s11842_s1 }
 0x875   : > { %v3706_v42 = vpop.permute.xlu0 %3705  ;;  %v3612_v43 = vpop.permute.xlu2 %3611 }
 0x876   : > { %3716 = vst.msk [vmem:[#allocation2 + $0x1e8] sm:$0xff] %vm3354_vm3, %v3706_v42  ;;  %v3516_v44 = vpop.permute.xlu1 %3515  ;;  %v3944_v42 = vld [vmem:[#allocation2 + $0x48] sm:$0xff] }
 0x877   : > { %3525 = vst.msk [vmem:[#allocation2 + $0xf0] sm:$0xff] %vm3354_vm3, %v3516_v44  ;;  %v3949_v20 = vld [vmem:[#allocation2 + $0x70] sm:$0xff] }
 0x878   : > { %3621 = vst.msk [vmem:[#allocation2 + $0x170] sm:$0xff] %vm3354_vm3, %v3612_v43 }
 0x87b   : > { %3823 = vrot.lane.b32.xlu0 %v10216_v2, %s11826_s26  ;;  %3729 = vrot.lane.b32.xlu2 %v10227_v5, %s11842_s1 }
 0x87c   : > { %3825 = vrot.lane.b32.xlu1 %v10227_v5, %s11826_s26 }
 0x87d   : > { %v3682_v45 = vpop.permute.xlu0 %3681  ;;  %v3588_v46 = vpop.permute.xlu2 %3587 }
 0x87e   : > { %3692 = vst.msk [vmem:[#allocation2 + $0x1c8] sm:$0xff] %vm3354_vm3, %v3682_v45  ;;  %v3396_v47 = vpop.permute.xlu1 %3395  ;;  %v3965_v60 = vld [vmem:[#allocation2 + $0xf0] sm:$0xff]  ;;  %v3980_v45 = vld [vmem:[#allocation2 + $0x168] sm:$0xff] }
 0x87f   : > { %3597 = vst.msk [vmem:[#allocation2 + $0x150] sm:$0xff] %vm3354_vm3, %v3588_v46  ;;  %v3981_v37 = vld [vmem:[#allocation2 + $0x170] sm:$0xff] }
 0x880   : > { %3405 = vst.msk [vmem:[#allocation2 + $0x50] sm:$0xff] %vm3354_vm3, %v3396_v47  ;;  %v3943_v47 = vld [vmem:[#allocation2 + $0x40] sm:$0xff] }
 0x883   : > { %3709 = vrot.lane.b32.xlu0 %v10249_v8, %s11843_s5  ;;  %3805 = vrot.lane.b32.xlu2 %v10249_v8, %s11838_s9  ;;  %s11865_s9 = sld [smem:[#allocation16_spill]] }
 0x884   : > { %3901 = vrot.lane.b32.xlu1 %v10249_v8, %s9358_s12  ;;  %s11866_s5 = sld [smem:[#allocation15_spill]] }
 0x885   : > { %v3492_v48 = vpop.permute.xlu0 %3491  ;;  %v3708_v49 = vpop.permute.xlu2 %3707  ;;  %s11870_s12 = sld [smem:[#allocation20_spill]] }
 0x886   : > { %3501 = vst.msk [vmem:[#allocation2 + $0xd0] sm:$0xff] %vm3354_vm3, %v3492_v48  ;;  %v3372_v50 = vpop.permute.xlu1 %3371  ;;  %v3952_v48 = vld [vmem:[#allocation2 + $0x88] sm:$0xff] }
 0x887   : > { %3717 = vst.msk [vmem:[#allocation2 + $0x1f0] sm:$0xff] %vm3354_vm3, %v3708_v49  ;;  %v3945_v36 = vld [vmem:[#allocation2 + $0x50] sm:$0xff]  ;;  %v3979_v49 = vld [vmem:[#allocation2 + $0x160] sm:$0xff] }
 0x888   : > { %3381 = vst.msk [vmem:[#allocation2 + $0x30] sm:$0xff] %vm3354_vm3, %v3372_v50  ;;  %v4039_v50 = vpack.c.bf16 %v3944_v42, %v3943_v47 }
 0x88b   : > { %3685 = vrot.lane.b32.xlu0 %v10249_v8, %s11861_s2  ;;  %3781 = vrot.lane.b32.xlu2 %v10249_v8, %s9360_s23  ;;  %s11871_s23 = sld [smem:[#allocation22_spill]] }
 0x88c   : > { %3877 = vrot.lane.b32.xlu1 %v10249_v8, %s9359_s27  ;;  %s9363_s27 = smov 16   ;;  %s11872_s2 = sld [smem:[#allocation21_spill]] }
 0x88d   : > { %v3468_v51 = vpop.permute.xlu0 %3467  ;;  %v3684_v52 = vpop.permute.xlu2 %3683 }
 0x88e   : > { %3477 = vst.msk [vmem:[#allocation2 + $0xb0] sm:$0xff] %vm3354_vm3, %v3468_v51  ;;  %v3444_v53 = vpop.permute.xlu1 %3443  ;;  %v4057_v51 = vpack.c.bf16 %v3980_v45, %v3979_v49  ;;  %v9013_v49 = vld [vmem:[%s9429_s24 + $0x50] sm:$0xf0] }
 0x88f   : > { %3693 = vst.msk [vmem:[#allocation2 + $0x1d0] sm:$0xff] %vm3354_vm3, %v3684_v52  ;;  %v9003_v52 = vld [vmem:[%s9429_s24 + $0x4] sm:$0xf] }
 0x890   : > { %3453 = vst.msk [vmem:[#allocation2 + $0x90] sm:$0xff] %vm3354_vm3, %v3444_v53  ;;  %v8445_v53 = vld [vmem:[%s9429_s24 + $0x1c] sm:$0xf0] }
 0x893   : > { %3661 = vrot.lane.b32.xlu0 %v10249_v8, %s11853_s22  ;;  %3757 = vrot.lane.b32.xlu2 %v10249_v8, %s11854_s20 }
 0x894   : > { %3853 = vrot.lane.b32.xlu1 %v10249_v8, %s11856_s4  ;;  %s11862_s4 = sld [smem:[#allocation13_spill]] }
 0x895   : > { %v3564_v54 = vpop.permute.xlu0 %3563  ;;  %v3518_v55 = vpop.permute.xlu2 %3517  ;;  %v3957_v24 = vld [vmem:[#allocation2 + $0xb0] sm:$0xff] }
 0x896   : > { %3573 = vst.msk [vmem:[#allocation2 + $0x130] sm:$0xff] %vm3354_vm3, %v3564_v54  ;;  %v3804_v56 = vpop.permute.xlu1 %3803  ;;  %v3951_v54 = vld [vmem:[#allocation2 + $0x80] sm:$0xff] }
 0x897   : > { %3813 = vst.msk [vmem:[#allocation2 + $0x270] sm:$0xff] %vm3354_vm3, %v3804_v56  ;;  %v3953_v43 = vld [vmem:[#allocation2 + $0x90] sm:$0xff]  ;;  %v4043_v56 = vpack.c.bf16 %v3952_v48, %v3951_v54 }
 0x898   : > { %3526 = vst.msk [vmem:[#allocation2 + $0xf8] sm:$0xff] %vm3354_vm3, %v3518_v55  ;;  %v8471_v48 = vld [vmem:[%s9429_s24 + $0x38] sm:$0xf] }
 0x899   : > { %v8472_v54 = vor.u32 %v9013_v49, %v8471_v48 }
 0x89b   : > { %3637 = vrot.lane.b32.xlu0 %v10249_v8, %s11835_s28  ;;  %3733 = vrot.lane.b32.xlu2 %v10249_v8, %s11842_s1 }
 0x89c   : > { %3829 = vrot.lane.b32.xlu1 %v10249_v8, %s11826_s26 }
 0x89d   : > { %v3540_v57 = vpop.permute.xlu0 %3539  ;;  %v3398_v58 = vpop.permute.xlu2 %3397 }
 0x89e   : > { %3549 = vst.msk [vmem:[#allocation2 + $0x110] sm:$0xff] %vm3354_vm3, %v3540_v57  ;;  %v3780_v59 = vpop.permute.xlu1 %3779  ;;  %v4013_v45 = vld [vmem:[#allocation2 + $0x270] sm:$0xff] }
 0x89f   : > { %3789 = vst.msk [vmem:[#allocation2 + $0x250] sm:$0xff] %vm3354_vm3, %v3780_v59  ;;  %v3966_v61 = vld [vmem:[#allocation2 + $0xf8] sm:$0xff]  ;;  %v3941_v59 = vld [vmem:[#allocation2 + $0x30] sm:$0xff] }
 0x8a0   : > { %3406 = vst.msk [vmem:[#allocation2 + $0x58] sm:$0xff] %vm3354_vm3, %v3398_v58  ;;  %v4050_v62 = vpack.c.bf16 %v3966_v61, %v3965_v60  ;;  %v3977_v60 = vld [vmem:[#allocation2 + $0x150] sm:$0xff] }
 0x8a2   : > { %4266 = vmatpush.bf16.msrb.mxu3 %v4050_v62  ;;  %v8448_v62 = vor.u32 %v9003_v52, %v8445_v53  ;;  %v8501_v52 = vld [vmem:[%s9429_s24 + $0x8c] sm:$0xf0]  ;;  %v4011_v53 = vld [vmem:[#allocation2 + $0x260] sm:$0xff] }
 0x8a3   : > { %3633 = vrot.lane.b32.xlu0 %v10227_v5, %s11835_s28  ;;  %3631 = vrot.lane.b32.xlu2 %v10216_v2, %s11835_s28 }
 0x8a4   : > { %3923 = vrot.lane.b32.xlu1 %v10238_v7, %s11844_s0 }
 0x8a5   : > { %v3900_v4 = vpop.permute.xlu0 %3899  ;;  %v3374_v6 = vpop.permute.xlu2 %3373 }
 0x8a6   : > { %4267 = vmatpush.bf16.msrb.mxu3 %v4049_v1  ;;  %3909 = vst.msk [vmem:[#allocation2 + $0x2f0] sm:$0xff] %vm3354_vm3, %v3900_v4  ;;  %v3756_v10 = vpop.permute.xlu1 %3755  ;;  %v3940_v4 = vld [vmem:[#allocation2 + $0x28] sm:$0xff] }
 0x8a7   : > { %3765 = vst.msk [vmem:[#allocation2 + $0x230] sm:$0xff] %vm3354_vm3, %v3756_v10  ;;  %v3946_v33 = vld [vmem:[#allocation2 + $0x58] sm:$0xff]  ;;  %v3939_v10 = vld [vmem:[#allocation2 + $0x20] sm:$0xff] }
 0x8a8   : > { %3382 = vst.msk [vmem:[#allocation2 + $0x38] sm:$0xff] %vm3354_vm3, %v3374_v6  ;;  %v4040_v40 = vpack.c.bf16 %v3946_v33, %v3945_v36  ;;  %v3976_v6 = vld [vmem:[#allocation2 + $0x148] sm:$0xff]  ;;  %v3969_v33 = vld [vmem:[#allocation2 + $0x110] sm:$0xff] }
 0x8a9   : > { %v3968_v36 = vld [vmem:[#allocation2 + $0x108] sm:$0xff] }
 0x8ab   : > { %3919 = vrot.lane.b32.xlu0 %v10216_v2, %s11844_s0  ;;  %3925 = vrot.lane.b32.xlu2 %v10249_v8, %s11844_s0  ;;  %v3961_v2 = vld [vmem:[#allocation2 + $0xd0] sm:$0xff] }
 0x8ac   : > { %3921 = vrot.lane.b32.xlu1 %v10227_v5, %s11844_s0  ;;  %v3960_v5 = vld [vmem:[#allocation2 + $0xc8] sm:$0xff] }
 0x8ad   : > { %v3876_v7 = vpop.permute.xlu0 %3875  ;;  %v3660_v12 = vpop.permute.xlu2 %3659  ;;  %v4047_v17 = vpack.c.bf16 %v3960_v5, %v3959_v16  ;;  %v3973_v5 = vld [vmem:[#allocation2 + $0x130] sm:$0xff] }
 0x8ae   : > { %3885 = vst.msk [vmem:[#allocation2 + $0x2d0] sm:$0xff] %vm3354_vm3, %v3876_v7  ;;  %v3494_v13 = vpop.permute.xlu1 %3493  ;;  %v3975_v7 = vld [vmem:[#allocation2 + $0x140] sm:$0xff] }
 0x8af   : > { %3502 = vst.msk [vmem:[#allocation2 + $0xd8] sm:$0xff] %vm3354_vm3, %v3494_v13  ;;  %v3942_v55 = vld [vmem:[#allocation2 + $0x38] sm:$0xff]  ;;  %v4055_v13 = vpack.c.bf16 %v3976_v6, %v3975_v7 }
 0x8b0   : > { %3669 = vst.msk [vmem:[#allocation2 + $0x1b0] sm:$0xff] %vm3354_vm3, %v3660_v12  ;;  %v4038_v0 = vpack.c.bf16 %v3942_v55, %v3941_v59  ;;  %v4037_v12 = vpack.c.bf16 %v3940_v4, %v3939_v10  ;;  %v4007_v4 = vld [vmem:[#allocation2 + $0x240] sm:$0xff] }
 0x8b5   : > { %v3422_v9 = vpop.permute.xlu0 %3421  ;;  %v3754_v14 = vpop.permute.xlu2 %3753 }
 0x8b6   : > { %v3470_v11 = vpop.permute.xlu1 %3469  ;;  %3430 = vst.msk [vmem:[#allocation2 + $0x78] sm:$0xff] %vm3354_vm3, %v3422_v9  ;;  %v3962_v15 = vld [vmem:[#allocation2 + $0xd8] sm:$0xff] }
 0x8b7   : > { %3478 = vst.msk [vmem:[#allocation2 + $0xb8] sm:$0xff] %vm3354_vm3, %v3470_v11  ;;  %v4048_v8 = vpack.c.bf16 %v3962_v15, %v3961_v2  ;;  %v3938_v9 = vld [vmem:[#allocation2 + $0x18] sm:$0xff]  ;;  %v3937_v2 = vld [vmem:[#allocation2 + $0x10] sm:$0xff] }
 0x8b8   : > { %3764 = vst.msk [vmem:[#allocation2 + $0x228] sm:$0xff] %vm3354_vm3, %v3754_v14 }
 0x8b9   : > { %4268 = vmatpush.bf16.msrb.mxu3 %v4048_v8  ;;  %v4036_v8 = vpack.c.bf16 %v3938_v9, %v3937_v2  ;;  %v4005_v9 = vld [vmem:[#allocation2 + $0x230] sm:$0xff]  ;;  %v8499_v2 = vld [vmem:[%s9429_s24 + $0x70] sm:$0xf] }
 0x8bd   : > { %4269 = vmatpush.bf16.msrb.mxu3 %v4047_v17  ;;  %v3614_v18 = vpop.permute.xlu0 %3613  ;;  %v3446_v19 = vpop.permute.xlu2 %3445  ;;  %v3950_v21 = vld [vmem:[#allocation2 + $0x78] sm:$0xff] }
 0x8be   : > { %v3752_v22 = vpop.permute.xlu1 %3751  ;;  %3622 = vst.msk [vmem:[#allocation2 + $0x178] sm:$0xff] %vm3354_vm3, %v3614_v18  ;;  %v4042_v23 = vpack.c.bf16 %v3950_v21, %v3949_v20  ;;  %v3958_v25 = vld [vmem:[#allocation2 + $0xb8] sm:$0xff]  ;;  %v3936_v18 = vld [vmem:[#allocation2 + $0x8] sm:$0xff]  ;;  %v9006_v21 = vld [vmem:[%s9429_s24 + $0x18] sm:$0xf0] }
 0x8bf   : > { %3763 = vst.msk [vmem:[#allocation2 + $0x220] sm:$0xff] %vm3354_vm3, %v3752_v22  ;;  %v4046_v26 = vpack.c.bf16 %v3958_v25, %v3957_v24  ;;  %v8443_v20 = vld [vmem:[%s9429_s24] sm:$0xf]  ;;  %v3935_v22 = vld [vmem:[#allocation2] sm:$0xff]  ;;  %v9010_v25 = vld [vmem:[%s9429_s24 + $0x3c] sm:$0xf] }
 0x8c0   : > { %3454 = vst.msk [vmem:[#allocation2 + $0x98] sm:$0xff] %vm3354_vm3, %v3446_v19  ;;  %4237 = vmatpush.bf16.msrb.mxu2 %v4042_v23  ;;  %v3972_v19 = vld [vmem:[#allocation2 + $0x128] sm:$0xff]  ;;  %v4035_v23 = vpack.c.bf16 %v3936_v18, %v3935_v22  ;;  %v3971_v24 = vld [vmem:[#allocation2 + $0x120] sm:$0xff]  ;;  %v8444_v28 = vor.u32 %v9006_v21, %v8443_v20  ;;  %v3997_v22 = vld [vmem:[#allocation2 + $0x1f0] sm:$0xff] }
 0x8c1   : > { %4270 = vmatpush.bf16.msrb.mxu3 %v4046_v26  ;;  %v8473_v26 = vld [vmem:[%s9429_s24 + $0x54] sm:$0xf0]  ;;  %v4053_v27 = vpack.c.bf16 %v3972_v19, %v3971_v24  ;;  %v8529_v18 = vld [vmem:[%s9429_s24 + $0xc4] sm:$0xf0] }
 0x8c2   : > { %v8476_v31 = vor.u32 %v9010_v25, %v8473_v26  ;;  %v4029_v26 = vld [vmem:[#allocation2 + $0x2f0] sm:$0xff] }
 0x8c4   : > { %4238 = vmatpush.bf16.msrb.mxu2 %v4041_v30 }
 0x8c5   : > { %4271 = vmatpush.bf16.msrb.mxu3 %v4045_v32  ;;  %v3590_v34 = vpop.permute.xlu0 %3589  ;;  %v3656_v35 = vpop.permute.xlu2 %3655  ;;  %v3982_v38 = vld [vmem:[#allocation2 + $0x178] sm:$0xff] }
 0x8c6   : > { %v3850_v39 = vpop.permute.xlu1 %3849  ;;  %3598 = vst.msk [vmem:[#allocation2 + $0x158] sm:$0xff] %vm3354_vm3, %v3590_v34  ;;  %v4058_v41 = vpack.c.bf16 %v3982_v38, %v3981_v37  ;;  %v8451_v37 = vld [vmem:[%s9429_s24 + $0x8] sm:$0xf]  ;;  %v9007_v38 = vld [vmem:[%s9429_s24 + $0x20] sm:$0xf0] }
 0x8c7   : > { %3860 = vst.msk [vmem:[#allocation2 + $0x2a8] sm:$0xff] %vm3354_vm3, %v3850_v39  ;;  %v3954_v44 = vld [vmem:[#allocation2 + $0x98] sm:$0xff]  ;;  %v3967_v39 = vld [vmem:[#allocation2 + $0x100] sm:$0xff] }
 0x8c8   : > { %3667 = vst.msk [vmem:[#allocation2 + $0x1a0] sm:$0xff] %vm3354_vm3, %v3656_v35  ;;  %4239 = vmatpush.bf16.msrb.mxu2 %v4040_v40  ;;  %v4044_v46 = vpack.c.bf16 %v3954_v44, %v3953_v43  ;;  %4295 = vmatpush.bf16.msrb.mxu0 %v4058_v41  ;;  %v4051_v40 = vpack.c.bf16 %v3968_v36, %v3967_v39 }
 0x8c9   : > { %v8452_v41 = vor.u32 %v9007_v38, %v8451_v37  ;;  %v8507_v37 = vld [vmem:[%s9429_s24 + $0x78] sm:$0xf]  ;;  %v9021_v38 = vld [vmem:[%s9429_s24 + $0x90] sm:$0xf0] }
 0x8ca   : > { %4272 = vmatpush.bf16.msrb.mxu3 %v4044_v46 }
 0x8cc   : > { %4240 = vmatpush.bf16.msrb.mxu2 %v4039_v50  ;;  %4296 = vmatpush.bf16.msrb.mxu0 %v4057_v51  ;;  %v4012_v50 = vld [vmem:[#allocation2 + $0x268] sm:$0xff] }
 0x8cd   : > { %v3852_v57 = vpop.permute.xlu0 %3851  ;;  %v3636_v58 = vpop.permute.xlu2 %3635  ;;  %v3978_v61 = vld [vmem:[#allocation2 + $0x158] sm:$0xff]  ;;  %v9017_v51 = vld [vmem:[%s9429_s24 + $0x74] sm:$0xf]  ;;  %v4073_v55 = vpack.c.bf16 %v4012_v50, %v4011_v53 }
 0x8ce   : > { %4273 = vmatpush.bf16.msrb.mxu3 %v4043_v56  ;;  %v3566_v63 = vpop.permute.xlu1 %3565  ;;  %3861 = vst.msk [vmem:[#allocation2 + $0x2b0] sm:$0xff] %vm3354_vm3, %v3852_v57  ;;  %v4056_v1 = vpack.c.bf16 %v3978_v61, %v3977_v60  ;;  %v4009_v60 = vld [vmem:[#allocation2 + $0x250] sm:$0xff] }
 0x8cf   : > { %3574 = vst.msk [vmem:[#allocation2 + $0x138] sm:$0xff] %vm3354_vm3, %v3566_v63  ;;  %v4008_v63 = vld [vmem:[#allocation2 + $0x248] sm:$0xff] }
 0x8d0   : > { %3645 = vst.msk [vmem:[#allocation2 + $0x190] sm:$0xff] %vm3354_vm3, %v3636_v58  ;;  %4241 = vmatpush.bf16.msrb.mxu2 %v4038_v0  ;;  %4297 = vmatpush.bf16.msrb.mxu0 %v4056_v1  ;;  %v8504_v58 = vor.u32 %v9017_v51, %v8501_v52  ;;  %v8479_v0 = vld [vmem:[%s9429_s24 + $0x40] sm:$0xf]  ;;  %v9014_v1 = vld [vmem:[%s9429_s24 + $0x58] sm:$0xf0]  ;;  %v4071_v6 = vpack.c.bf16 %v4008_v63, %v4007_v4 }
 0x8d1   : > { %4274 = vmatmul.bf16.vlgmr.msrb.gmra.mxu3 %v8448_v62  ;;  %v8480_v10 = vor.u32 %v9014_v1, %v8479_v0  ;;  %v4025_v51 = vld [vmem:[#allocation2 + $0x2d0] sm:$0xff] }
 0x8d2   : > { %v3989_v0 = vld [vmem:[#allocation2 + $0x1b0] sm:$0xff] }
 0x8d4   : > { %4242 = vmatpush.bf16.msrb.mxu2 %v4037_v12  ;;  %4298 = vmatpush.bf16.msrb.mxu0 %v4055_v13 }
 0x8d5   : > { %v3848_v14 = vpop.permute.xlu0 %3847  ;;  %v3730_v11 = vpop.permute.xlu2 %3729 }
 0x8d6   : > { %v3542_v15 = vpop.permute.xlu1 %3541  ;;  %3859 = vst.msk [vmem:[#allocation2 + $0x2a0] sm:$0xff] %vm3354_vm3, %v3848_v14  ;;  %v3974_v16 = vld [vmem:[#allocation2 + $0x138] sm:$0xff] }
 0x8d7   : > { %3550 = vst.msk [vmem:[#allocation2 + $0x118] sm:$0xff] %vm3354_vm3, %v3542_v15  ;;  %v4054_v17 = vpack.c.bf16 %v3974_v16, %v3973_v5  ;;  %v9020_v15 = vld [vmem:[%s9429_s24 + $0x88] sm:$0xf0]  ;;  %v4004_v5 = vld [vmem:[#allocation2 + $0x228] sm:$0xff] }
 0x8d8   : > { %3740 = vst.msk [vmem:[#allocation2 + $0x208] sm:$0xff] %vm3354_vm3, %v3730_v11  ;;  %4243 = vmatpush.bf16.msrb.mxu2 %v4036_v8  ;;  %v4003_v8 = vld [vmem:[#allocation2 + $0x220] sm:$0xff]  ;;  %v8500_v16 = vor.u32 %v9020_v15, %v8499_v2 }
 0x8d9   : > { %4299 = vmatpush.bf16.msrb.mxu0 %v4054_v17  ;;  %v9024_v17 = vld [vmem:[%s9429_s24 + $0xac] sm:$0xf]  ;;  %v4069_v19 = vpack.c.bf16 %v4004_v5, %v4003_v8  ;;  %v4020_v8 = vld [vmem:[#allocation2 + $0x2a8] sm:$0xff] }
 0x8da   : > { %v9028_v2 = vld [vmem:[%s9429_s24 + $0xc8] sm:$0xf0] }
 0x8dc   : > { %4244 = vmatpush.bf16.msrb.mxu2 %v4035_v23 }
 0x8dd   : > { %4300 = vmatpush.bf16.msrb.mxu0 %v4053_v27  ;;  %v3658_v29 = vpop.permute.xlu0 %3657  ;;  %v3806_v30 = vpop.permute.xlu2 %3805 }
 0x8de   : > { %v3732_v32 = vpop.permute.xlu1 %3731  ;;  %3668 = vst.msk [vmem:[#allocation2 + $0x1a8] sm:$0xff] %vm3354_vm3, %v3658_v29  ;;  %v3970_v34 = vld [vmem:[#allocation2 + $0x118] sm:$0xff] }
 0x8df   : > { %3741 = vst.msk [vmem:[#allocation2 + $0x210] sm:$0xff] %vm3354_vm3, %v3732_v32  ;;  %4245 = vmatmul.bf16.vlgmr.msrb.gmra.mxu2 %v8444_v28  ;;  %v4052_v35 = vpack.c.bf16 %v3970_v34, %v3969_v33  ;;  %v8532_v28 = vor.u32 %v9024_v17, %v8529_v18  ;;  %v3996_v32 = vld [vmem:[#allocation2 + $0x1e8] sm:$0xff]  ;;  %v3995_v34 = vld [vmem:[#allocation2 + $0x1e0] sm:$0xff]  ;;  %v3985_v18 = vld [vmem:[#allocation2 + $0x190] sm:$0xff] }
 0x8e0   : > { %3814 = vst.msk [vmem:[#allocation2 + $0x278] sm:$0xff] %vm3354_vm3, %v3806_v30  ;;  %v4065_v39 = vpack.c.bf16 %v3996_v32, %v3995_v34  ;;  %v9004_v34 = vld [vmem:[%s9429_s24 + $0xc] sm:$0xf] }
 0x8e1   : > { %4301 = vmatpush.bf16.msrb.mxu0 %v4052_v35  ;;  %4279 = vmatmul.bf16.gmra.mxu3 %v8476_v31  ;;  %v4028_v35 = vld [vmem:[#allocation2 + $0x2e8] sm:$0xff] }
 0x8e5   : > { %4302 = vmatpush.bf16.msrb.mxu0 %v4051_v40  ;;  %v3828_v42 = vpop.permute.xlu0 %3827  ;;  %v3782_v43 = vpop.permute.xlu2 %3781  ;;  %v4027_v40 = vld [vmem:[#allocation2 + $0x2e0] sm:$0xff] }
 0x8e6   : > { %v3728_v44 = vpop.permute.xlu1 %3727  ;;  %3837 = vst.msk [vmem:[#allocation2 + $0x290] sm:$0xff] %vm3354_vm3, %v3828_v42  ;;  %v4001_v29 = vld [vmem:[#allocation2 + $0x210] sm:$0xff]  ;;  %v4081_v42 = vpack.c.bf16 %v4028_v35, %v4027_v40  ;;  %v8453_v35 = vld [vmem:[%s9429_s24 + $0x24] sm:$0xf0] }
 0x8e7   : > { %3739 = vst.msk [vmem:[#allocation2 + $0x200] sm:$0xff] %vm3354_vm3, %v3728_v44  ;;  %v4014_v46 = vld [vmem:[#allocation2 + $0x278] sm:$0xff]  ;;  %v8508_v44 = vor.u32 %v9021_v38, %v8507_v37 }
 0x8e8   : > { %3790 = vst.msk [vmem:[#allocation2 + $0x258] sm:$0xff] %vm3354_vm3, %v3782_v43  ;;  %4303 = vmatmul.bf16.vlgmr.msrb.gmra.mxu0 %v8452_v41  ;;  %v4074_v47 = vpack.c.bf16 %v4014_v46, %v4013_v45  ;;  %v4000_v41 = vld [vmem:[#allocation2 + $0x208] sm:$0xff] }
 0x8ea   : > { %4353 = vmatpush.bf16.msra.mxu2 %v4074_v47  ;;  %v3993_v47 = vld [vmem:[#allocation2 + $0x1d0] sm:$0xff] }
 0x8ed   : > { %v3824_v56 = vpop.permute.xlu0 %3823  ;;  %v3758_v57 = vpop.permute.xlu2 %3757 }
 0x8ee   : > { %4354 = vmatpush.bf16.msra.mxu2 %v4073_v55  ;;  %v3826_v59 = vpop.permute.xlu1 %3825  ;;  %3835 = vst.msk [vmem:[#allocation2 + $0x280] sm:$0xff] %vm3354_vm3, %v3824_v56  ;;  %v3999_v36 = vld [vmem:[#allocation2 + $0x200] sm:$0xff]  ;;  %v4024_v55 = vld [vmem:[#allocation2 + $0x2c8] sm:$0xff] }
 0x8ef   : > { %3836 = vst.msk [vmem:[#allocation2 + $0x288] sm:$0xff] %vm3354_vm3, %v3826_v59  ;;  %4250 = vmatmul.bf16.gmra.mxu2 %v8472_v54  ;;  %v4010_v61 = vld [vmem:[#allocation2 + $0x258] sm:$0xff]  ;;  %v4067_v43 = vpack.c.bf16 %v4000_v41, %v3999_v36  ;;  %v3992_v54 = vld [vmem:[#allocation2 + $0x1c8] sm:$0xff]  ;;  %v8527_v56 = vld [vmem:[%s9429_s24 + $0xa8] sm:$0xf] }
 0x8f0   : > { %3766 = vst.msk [vmem:[#allocation2 + $0x238] sm:$0xff] %vm3354_vm3, %v3758_v57  ;;  %v4072_v62 = vpack.c.bf16 %v4010_v61, %v4009_v60  ;;  %v9027_v57 = vld [vmem:[%s9429_s24 + $0xc0] sm:$0xf0]  ;;  %v4023_v60 = vld [vmem:[#allocation2 + $0x2c0] sm:$0xff] }
 0x8f1   : > { %4284 = vmatmul.bf16.gmra.mxu3 %v8504_v58  ;;  %v3991_v58 = vld [vmem:[#allocation2 + $0x1c0] sm:$0xff]  ;;  %v4079_v61 = vpack.c.bf16 %v4024_v55, %v4023_v60  ;;  %v8495_v60 = vld [vmem:[%s9429_s24 + $0x50] sm:$0xf] }
 0x8f2   : > { %4355 = vmatpush.bf16.msra.mxu2 %v4072_v62  ;;  %v4063_v59 = vpack.c.bf16 %v3992_v54, %v3991_v58  ;;  %v8528_v62 = vor.u32 %v9027_v57, %v8527_v56  ;;  %v8489_v54 = vld [vmem:[%s9429_s24 + $0x64] sm:$0xf0]  ;;  %v9011_v57 = vld [vmem:[%s9429_s24 + $0x44] sm:$0xf]  ;;  %v8481_v58 = vld [vmem:[%s9429_s24 + $0x5c] sm:$0xf0] }
 0x8f5   : > { %v3710_v7 = vpop.permute.xlu0 %3709  ;;  %v3734_v12 = vpop.permute.xlu2 %3733 }
 0x8f6   : > { %4356 = vmatpush.bf16.msra.mxu2 %v4071_v6  ;;  %v3902_v13 = vpop.permute.xlu1 %3901  ;;  %3718 = vst.msk [vmem:[#allocation2 + $0x1f8] sm:$0xff] %vm3354_vm3, %v3710_v7 }
 0x8f7   : > { %3910 = vst.msk [vmem:[#allocation2 + $0x2f8] sm:$0xff] %vm3354_vm3, %v3902_v13  ;;  %v4006_v14 = vld [vmem:[#allocation2 + $0x238] sm:$0xff]  ;;  %v3988_v13 = vld [vmem:[#allocation2 + $0x1a8] sm:$0xff] }
 0x8f8   : > { %3742 = vst.msk [vmem:[#allocation2 + $0x218] sm:$0xff] %vm3354_vm3, %v3734_v12  ;;  %4308 = vmatmul.bf16.gmra.mxu0 %v8480_v10  ;;  %v4070_v11 = vpack.c.bf16 %v4006_v14, %v4005_v9  ;;  %v4021_v10 = vld [vmem:[#allocation2 + $0x2b0] sm:$0xff]  ;;  %v4019_v9 = vld [vmem:[#allocation2 + $0x2a0] sm:$0xff] }
 0x8f9   : > { %v3987_v14 = vld [vmem:[#allocation2 + $0x1a0] sm:$0xff]  ;;  %v4077_v5 = vpack.c.bf16 %v4020_v8, %v4019_v9  ;;  %v9026_v8 = vld [vmem:[%s9429_s24 + $0xbc] sm:$0xf] }
 0x8fa   : > { %4357 = vmatpush.bf16.msra.mxu2 %v4070_v11  ;;  %v8535_v11 = vld [vmem:[%s9429_s24 + $0xb0] sm:$0xf]  ;;  %v4061_v15 = vpack.c.bf16 %v3988_v13, %v3987_v14  ;;  %v8523_v9 = vld [vmem:[%s9429_s24 + $0x88] sm:$0xf]  ;;  %v9023_v14 = vld [vmem:[%s9429_s24 + $0xa0] sm:$0xf0] }
 0x8fd   : > { %v3686_v20 = vpop.permute.xlu0 %3685  ;;  %v3632_v21 = vpop.permute.xlu2 %3631  ;;  %v3998_v23 = vld [vmem:[#allocation2 + $0x1f8] sm:$0xff] }
 0x8fe   : > { %4358 = vmatpush.bf16.msra.mxu2 %v4069_v19  ;;  %v3878_v24 = vpop.permute.xlu1 %3877  ;;  %3694 = vst.msk [vmem:[#allocation2 + $0x1d8] sm:$0xff] %vm3354_vm3, %v3686_v20  ;;  %v4066_v25 = vpack.c.bf16 %v3998_v23, %v3997_v22  ;;  %v4030_v27 = vld [vmem:[#allocation2 + $0x2f8] sm:$0xff]  ;;  %v4017_v22 = vld [vmem:[#allocation2 + $0x290] sm:$0xff] }
 0x8ff   : > { %3886 = vst.msk [vmem:[#allocation2 + $0x2d8] sm:$0xff] %vm3354_vm3, %v3878_v24  ;;  %4255 = vmatmul.bf16.gmra.mxu2 %v8500_v16  ;;  %v4002_v30 = vld [vmem:[#allocation2 + $0x218] sm:$0xff]  ;;  %v4082_v31 = vpack.c.bf16 %v4030_v27, %v4029_v26  ;;  %v8536_v16 = vor.u32 %v9028_v2, %v8535_v11  ;;  %v4016_v26 = vld [vmem:[#allocation2 + $0x288] sm:$0xff]  ;;  %v8524_v11 = vor.u32 %v9023_v14, %v8523_v9  ;;  %v8543_v2 = vld [vmem:[%s9429_s24 + $0xb8] sm:$0xf] }
 0x900   : > { %3643 = vst.msk [vmem:[#allocation2 + $0x180] sm:$0xff] %vm3354_vm3, %v3632_v21  ;;  %4324 = vmatpush.bf16.msra.mxu1 %v4066_v25  ;;  %v4068_v33 = vpack.c.bf16 %v4002_v30, %v4001_v29  ;;  %v4015_v25 = vld [vmem:[#allocation2 + $0x280] sm:$0xff]  ;;  %v8459_v27 = vld [vmem:[%s9429_s24 + $0x10] sm:$0xf]  ;;  %v9005_v29 = vld [vmem:[%s9429_s24 + $0x14] sm:$0xf] }
 0x901   : > { %4382 = vmatpush.bf16.msra.mxu3 %v4082_v31  ;;  %v8461_v30 = vld [vmem:[%s9429_s24 + $0x2c] sm:$0xf0]  ;;  %v4075_v31 = vpack.c.bf16 %v4016_v26, %v4015_v25 }
 0x902   : > { %4359 = vmatpush.bf16.msra.mxu2 %v4068_v33  ;;  %4289 = vmatmul.bf16.gmra.mxu3 %v8532_v28  ;;  %v9008_v28 = vld [vmem:[%s9429_s24 + $0x28] sm:$0xf0]  ;;  %v8464_v33 = vor.u32 %v9005_v29, %v8461_v30 }
 0x903   : > { %v8460_v32 = vor.u32 %v9008_v28, %v8459_v27 }
 0x904   : > { %4325 = vmatpush.bf16.msra.mxu1 %v4065_v39 }
 0x905   : > { %4383 = vmatpush.bf16.msra.mxu3 %v4081_v42  ;;  %v3662_v45 = vpop.permute.xlu0 %3661  ;;  %v3926_v46 = vpop.permute.xlu2 %3925  ;;  %v3994_v48 = vld [vmem:[#allocation2 + $0x1d8] sm:$0xff] }
 0x906   : > { %4360 = vmatpush.bf16.msra.mxu2 %v4067_v43  ;;  %v3854_v49 = vpop.permute.xlu1 %3853  ;;  %3670 = vst.msk [vmem:[#allocation2 + $0x1b8] sm:$0xff] %vm3354_vm3, %v3662_v45  ;;  %v4064_v50 = vpack.c.bf16 %v3994_v48, %v3993_v47  ;;  %v4026_v52 = vld [vmem:[#allocation2 + $0x2d8] sm:$0xff]  ;;  %v9009_v47 = vld [vmem:[%s9429_s24 + $0x30] sm:$0xf0] }
 0x907   : > { %3862 = vst.msk [vmem:[#allocation2 + $0x2b8] sm:$0xff] %vm3354_vm3, %v3854_v49  ;;  %v4080_v53 = vpack.c.bf16 %v4026_v52, %v4025_v51  ;;  %v3983_v37 = vld [vmem:[#allocation2 + $0x180] sm:$0xff]  ;;  %v9015_v52 = vld [vmem:[%s9429_s24 + $0x60] sm:$0xf0] }
 0x908   : > { %3934 = vst.msk [vmem:[#allocation2 + $0x318] sm:$0xff] %vm3354_vm3, %v3926_v46  ;;  %4313 = vmatmul.bf16.gmra.mxu0 %v8508_v44  ;;  %4326 = vmatpush.bf16.msra.mxu1 %v4064_v50  ;;  %v8456_v44 = vor.u32 %v9004_v34, %v8453_v35  ;;  %v8467_v46 = vld [vmem:[%s9429_s24 + $0x18] sm:$0xf]  ;;  %v8487_v51 = vld [vmem:[%s9429_s24 + $0x48] sm:$0xf] }
 0x909   : > { %4384 = vmatpush.bf16.msra.mxu3 %v4080_v53  ;;  %v8468_v50 = vor.u32 %v9009_v47, %v8467_v46  ;;  %v9012_v53 = vld [vmem:[%s9429_s24 + $0x4c] sm:$0xf]  ;;  %v8488_v55 = vor.u32 %v9015_v52, %v8487_v51 }
 0x90a   : > { %v8492_v56 = vor.u32 %v9012_v53, %v8489_v54 }
 0x90c   : > { %4327 = vmatpush.bf16.msra.mxu1 %v4063_v59  ;;  %v8484_v59 = vor.u32 %v9011_v57, %v8481_v58 }
 0x90d   : > { %4385 = vmatpush.bf16.msra.mxu3 %v4079_v61  ;;  %v3638_v63 = vpop.permute.xlu0 %3637  ;;  %v3990_v1 = vld [vmem:[#allocation2 + $0x1b8] sm:$0xff]  ;;  %v9016_v61 = vld [vmem:[%s9429_s24 + $0x68] sm:$0xf0] }
 0x90e   : > { %v3830_v4 = vpop.permute.xlu1 %3829  ;;  %3646 = vst.msk [vmem:[#allocation2 + $0x198] sm:$0xff] %vm3354_vm3, %v3638_v63  ;;  %v4062_v6 = vpack.c.bf16 %v3990_v1, %v3989_v0  ;;  %v4022_v7 = vld [vmem:[#allocation2 + $0x2b8] sm:$0xff]  ;;  %v9022_v0 = vld [vmem:[%s9429_s24 + $0x98] sm:$0xf0] }
 0x90f   : > { %3838 = vst.msk [vmem:[#allocation2 + $0x298] sm:$0xff] %vm3354_vm3, %v3830_v4  ;;  %4260 = vmatmul.bf16.gmra.mxu2 %v8528_v62  ;;  %v4078_v12 = vpack.c.bf16 %v4022_v7, %v4021_v10  ;;  %v4034_v42 = vld [vmem:[#allocation2 + $0x318] sm:$0xff]  ;;  %v8496_v62 = vor.u32 %v9016_v61, %v8495_v60  ;;  %v9018_v7 = vld [vmem:[%s9429_s24 + $0x7c] sm:$0xf] }
 0x910   : > { %4328 = vmatpush.bf16.msra.mxu1 %v4062_v6  ;;  %v8515_v63 = vld [vmem:[%s9429_s24 + $0x80] sm:$0xf]  ;;  %v9019_v1 = vld [vmem:[%s9429_s24 + $0x84] sm:$0xf] }
 0x911   : > { %4386 = vmatpush.bf16.msra.mxu3 %v4078_v12  ;;  %v8517_v4 = vld [vmem:[%s9429_s24 + $0x9c] sm:$0xf0]  ;;  %v8516_v6 = vor.u32 %v9022_v0, %v8515_v63  ;;  %v8509_v12 = vld [vmem:[%s9429_s24 + $0x94] sm:$0xf0] }
 0x912   : > { %v8520_v10 = vor.u32 %v9019_v1, %v8517_v4  ;;  %v8512_v13 = vor.u32 %v9018_v7, %v8509_v12 }
 0x914   : > { %4329 = vmatpush.bf16.msra.mxu1 %v4061_v15  ;;  %v9029_v15 = vld [vmem:[%s9429_s24 + $0xd0] sm:$0xf0] }
 0x915   : > { %4387 = vmatpush.bf16.msra.mxu3 %v4077_v5  ;;  %v3634_v17 = vpop.permute.xlu0 %3633  ;;  %v3986_v19 = vld [vmem:[#allocation2 + $0x198] sm:$0xff]  ;;  %v8545_v5 = vld [vmem:[%s9429_s24 + $0xd4] sm:$0xf0] }
 0x916   : > { %v3924_v20 = vpop.permute.xlu1 %3923  ;;  %3644 = vst.msk [vmem:[#allocation2 + $0x188] sm:$0xff] %vm3354_vm3, %v3634_v17  ;;  %v4060_v21 = vpack.c.bf16 %v3986_v19, %v3985_v18  ;;  %v4018_v23 = vld [vmem:[#allocation2 + $0x298] sm:$0xff]  ;;  %v8548_v17 = vor.u32 %v9026_v8, %v8545_v5  ;;  %v9025_v18 = vld [vmem:[%s9429_s24 + $0xb4] sm:$0xf]  ;;  %v8537_v19 = vld [vmem:[%s9429_s24 + $0xcc] sm:$0xf0] }
 0x917   : > { %3933 = vst.msk [vmem:[#allocation2 + $0x310] sm:$0xff] %vm3354_vm3, %v3924_v20  ;;  %v4076_v24 = vpack.c.bf16 %v4018_v23, %v4017_v22  ;;  %v8540_v20 = vor.u32 %v9025_v18, %v8537_v19  ;;  %v9030_v22 = vld [vmem:[%s9429_s24 + $0xd8] sm:$0xf0] }
 0x918   : > { %4318 = vmatmul.bf16.gmra.mxu0 %v8536_v16  ;;  %4330 = vmatpush.bf16.msra.mxu1 %v4060_v21  ;;  %v8544_v16 = vor.u32 %v9029_v15, %v8543_v2  ;;  %v8551_v21 = vld [vmem:[%s9429_s24 + $0xc0] sm:$0xf] }
 0x919   : > { %4388 = vmatpush.bf16.msra.mxu3 %v4076_v24  ;;  %v8552_v24 = vor.u32 %v9030_v22, %v8551_v21  ;;  %v3312_v22 = vld [vmem:[%s9434_s30 + $0x20] sm:$0xff] }
 0x91d   : > { %4389 = vmatpush.bf16.msra.mxu3 %v4075_v31  ;;  %v3920_v36 = vpop.permute.xlu0 %3919  ;;  %v3984_v38 = vld [vmem:[#allocation2 + $0x188] sm:$0xff] }
 0x91e   : > { %v3922_v39 = vpop.permute.xlu1 %3921  ;;  %3931 = vst.msk [vmem:[#allocation2 + $0x300] sm:$0xff] %vm3354_vm3, %v3920_v36  ;;  %v4059_v40 = vpack.c.bf16 %v3984_v38, %v3983_v37  ;;  %v4033_v41 = vld [vmem:[#allocation2 + $0x310] sm:$0xff] }
 0x91f   : > { %3932 = vst.msk [vmem:[#allocation2 + $0x308] sm:$0xff] %vm3354_vm3, %v3922_v39  ;;  %4361 = vmatmul.bf16.vlgmr.msra.gmra.mxu2 %v8460_v32  ;;  %v4084_v43 = vpack.c.bf16 %v4034_v42, %v4033_v41  ;;  %vm4837_vm3 = vcmask 1046528  }
 0x920   : > { %4390 = vmatmul.bf16.vlgmr.msra.gmra.mxu3 %v8464_v33  ;;  %4331 = vmatpush.bf16.msra.mxu1 %v4059_v40 }
 0x921   : > { %4417 = vmatpush.bf16.msra.mxu0 %v4084_v43 }
 0x923   : > { %4332 = vmatmul.bf16.vlgmr.msra.gmra.mxu1 %v8456_v44  ;;  %v3308_v44 = vld [vmem:[%s9434_s30] sm:$0xff] }
 0x925   : > { %v4031_v45 = vld [vmem:[#allocation2 + $0x300] sm:$0xff] }
 0x926   : > { %v4032_v48 = vld [vmem:[#allocation2 + $0x308] sm:$0xff] }
 0x927   : > { %v4083_v49 = vpack.c.bf16 %v4032_v48, %v4031_v45 }
 0x929   : > { %4418 = vmatpush.bf16.msra.mxu0 %v4083_v49 }
 0x92c   : > { %8553 = vmatmul.msk.bf16.vlgmr.msra.gmra.mxu0 %vm3123_vm15, %v8468_v50  ;;  %v3309_v50 = vld [vmem:[%s9434_s30 + $0x8] sm:$0xff] }
 0x92f   : > { %4366 = vmatmul.bf16.gmra.mxu2 %v8488_v55 }
 0x930   : > { %4395 = vmatmul.bf16.gmra.mxu3 %v8492_v56 }
 0x933   : > { %4337 = vmatmul.bf16.gmra.mxu1 %v8484_v59  ;;  %v3310_v59 = vld [vmem:[%s9434_s30 + $0x10] sm:$0xff] }
 0x93c   : > { %8554 = vmatmul.msk.bf16.gmra.mxu0 %vm3123_vm15, %v8496_v62 }
 0x93f   : > { %4371 = vmatmul.bf16.gmra.mxu2 %v8516_v6 }
 0x940   : > { %4400 = vmatmul.bf16.gmra.mxu3 %v8520_v10 }
 0x943   : > { %4342 = vmatmul.bf16.gmra.mxu1 %v8512_v13  ;;  %v3311_v13 = vld [vmem:[%s9434_s30 + $0x18] sm:$0xff] }
 0x94c   : > { %8555 = vmatmul.msk.bf16.gmra.mxu0 %vm3123_vm15, %v8524_v11 }
 0x94f   : > { %4376 = vmatmul.bf16.gmra.mxu2 %v8544_v16 }
 0x950   : > { %4405 = vmatmul.bf16.gmra.mxu3 %v8548_v17 }
 0x953   : > { %4347 = vmatmul.bf16.gmra.mxu1 %v8540_v20 }
 0x954   : > { %v4275_v23 = vpop.f32.mrf.mxu3 }
 0x95c   : > { %8556 = vmatmul.msk.bf16.gmra.mxu0 %vm3123_vm15, %v8552_v24  ;;  %v4277_v25 = vpop.f32.mrf.mxu3 }
 0x962   : > { %v4246_v26 = vpop.f32.mrf.mxu2 }
 0x963   : > { %v4247_v45 = vadd.f32 %v4246_v26, %v3308_v44 }
 0x964   : > { %v4280_v28 = vpop.f32.mrf.mxu3 }
 0x965   : > { %v4304_v27 = vpop.f32.mrf.mxu0  ;;  %v4276_v48 = vadd.f32 %v4275_v23, %v4247_v45 }
 0x967   : > { %v4305_v51 = vadd.f32 %v4304_v27, %v4276_v48 }
 0x96a   : > { %v4248_v29 = vpop.f32.mrf.mxu2 }
 0x96b   : > { %v4249_v52 = vadd.f32 %v4248_v29, %v3309_v50 }
 0x96c   : > { %v4282_v32 = vpop.f32.mrf.mxu3 }
 0x96d   : > { %v4306_v30 = vpop.f32.mrf.mxu0  ;;  %v4278_v57 = vadd.f32 %v4277_v25, %v4249_v52 }
 0x96f   : > { %v4307_v61 = vadd.f32 %v4306_v30, %v4278_v57 }
 0x972   : > { %v4251_v31 = vpop.f32.mrf.mxu2 }
 0x973   : > { %v4252_v62 = vadd.f32 %v4251_v31, %v3310_v59 }
 0x974   : > { %v10583_v36 = vpop.f32.mrf.mxu3 }
 0x975   : > { %v4309_v33 = vpop.f32.mrf.mxu0  ;;  %v4281_v7 = vadd.f32 %v4280_v28, %v4252_v62 }
 0x977   : > { %v4310_v2 = vadd.f32 %v4309_v33, %v4281_v7 }
 0x97a   : > { %v4253_v34 = vpop.f32.mrf.mxu2 }
 0x97b   : > { %v4254_v15 = vadd.f32 %v4253_v34, %v3311_v13  ;;  %v3315_v13 = vld [vmem:[%s9434_s30 + $0x38] sm:$0xff] }
 0x97c   : > { %v10587_v39 = vpop.f32.mrf.mxu3 }
 0x97d   : > { %v4311_v35 = vpop.f32.mrf.mxu0  ;;  %v4283_v20 = vadd.f32 %v4282_v32, %v4254_v15  ;;  %v3313_v32 = vld [vmem:[%s9434_s30 + $0x28] sm:$0xff] }
 0x97f   : > { %v4312_v26 = vadd.f32 %v4311_v35, %v4283_v20 }
 0x982   : > { %v4256_v37 = vpop.f32.mrf.mxu2 }
 0x983   : > { %v4257_v27 = vadd.f32 %v4256_v37, %v3312_v22 }
 0x985   : > { %v10585_v38 = vpop.f32.mrf.mxu0  ;;  %v10593_v42 = vpop.f32.mrf.mxu3  ;;  %v4286_v44 = vadd.f32 %v10583_v36, %v4257_v27 }
 0x987   : > { %v4315_v52 = vadd.f32 %v10585_v38, %v4286_v44 }
 0x98a   : > { %v10589_v40 = vpop.f32.mrf.mxu2 }
 0x98b   : > { %v4259_v35 = vadd.f32 %v10589_v40, %v3313_v32 }
 0x98d   : > { %v10591_v41 = vpop.f32.mrf.mxu0  ;;  %v10602_v49 = vpop.f32.mrf.mxu3  ;;  %v4288_v36 = vadd.f32 %v10587_v39, %v4259_v35 }
 0x98f   : > { %v4317_v38 = vadd.f32 %v10591_v41, %v4288_v36 }
 0x992   : > { %v10595_v43 = vpop.f32.mrf.mxu2 }
 0x995   : > { %v10598_v46 = vpop.f32.mrf.mxu0 }
 0x99a   : > { %v10600_v47 = vpop.f32.mrf.mxu2 }
 0x99b   : > { %v4264_v41 = vadd.f32 %v10600_v47, %v3315_v13 }
 0x99d   : > { %v10605_v54 = vpop.f32.mrf.mxu0 }
 0x9a0   : > { %v4333_v53 = vpop.f32.mrf.mxu1 }
 0x9a1   : > { %v4334_v55 = vadd.f32 %v4333_v53, %v4305_v51 }
 0x9a2   : > { %v4362_v56 = vpop.f32.mrf.mxu2 }
 0x9a3   : > { %v4391_v58 = vpop.f32.mrf.mxu3  ;;  %v4363_v60 = vadd.f32 %v4362_v56, %v4334_v55 }
 0x9a5   : > { %v4392_v63 = vadd.f32 %v4391_v58, %v4363_v60  ;;  %v3314_v60 = vld [vmem:[%s9434_s30 + $0x30] sm:$0xff] }
 0x9a6   : > { %v4262_v40 = vadd.f32 %v10595_v43, %v3314_v60 }
 0x9a8   : > { %v4335_v0 = vpop.f32.mrf.mxu1  ;;  %v4291_v39 = vadd.f32 %v10593_v42, %v4262_v40 }
 0x9a9   : > { %v4336_v1 = vadd.f32 %v4335_v0, %v4307_v61  ;;  %v4420_v4 = vpop.f32.mrf.mxu0 }
 0x9aa   : > { %v4421_v6 = vadd.f32 %v4420_v4, %v4392_v63  ;;  %v4364_v10 = vpop.f32.mrf.mxu2 }
 0x9ab   : > { %v4393_v12 = vpop.f32.mrf.mxu3  ;;  %v4365_v14 = vadd.f32 %v4364_v10, %v4336_v1 }
 0x9ac   : > { %vm4440_vm5 = vcmp.gt.f32.partialorder %v4421_v6, 0.0  ;;  %v4448_v9 = vmul.f32 0.01, %v4421_v6 }
 0x9ad   : > { %v4394_v8 = vadd.f32 %v4393_v12, %v4365_v14 }
 0x9ae   : > { %v4456_v11 = vsel %vm4440_vm5, %v4421_v6, %v4448_v9  ;;  %vm4811_vm5 = vcmask 105472  }
 0x9af   : > { %4475 = vperm.xlu2 %9218, %v4456_v11  }
 0x9b0   : > { %v4338_v5 = vpop.f32.mrf.mxu1 }
 0x9b1   : > { %v4339_v16 = vadd.f32 %v4338_v5, %v4310_v2  ;;  %v4422_v17 = vpop.f32.mrf.mxu0  ;;  %v4320_v2 = vadd.f32 %v10598_v46, %v4291_v39 }
 0x9b2   : > { %v4423_v18 = vadd.f32 %v4422_v17, %v4394_v8  ;;  %v4367_v19 = vpop.f32.mrf.mxu2 }
 0x9b3   : > { %v4396_v21 = vpop.f32.mrf.mxu3  ;;  %v4368_v24 = vadd.f32 %v4367_v19, %v4339_v16 }
 0x9b4   : > { %v4449_v23 = vmul.f32 0.01, %v4423_v18  ;;  %vm4441_vm7 = vcmp.gt.f32.partialorder %v4423_v18, 0.0 }
 0x9b5   : > { %v4397_v28 = vadd.f32 %v4396_v21, %v4368_v24 }
 0x9b6   : > { %v4457_v25 = vsel %vm4441_vm7, %v4423_v18, %v4449_v23  ;;  %v4293_v18 = vadd.f32 %v10602_v49, %v4264_v41  ;;  %vm4942_vm7 = vcmask 64512  }
 0x9b7   : > { %4480 = vperm.xlu0 %9216, %v4457_v25  }
 0x9b8   : > { %v4340_v29 = vpop.f32.mrf.mxu1  ;;  %v4322_v22 = vadd.f32 %v10605_v54, %v4293_v18 }
 0x9b9   : > { %v4341_v30 = vadd.f32 %v4340_v29, %v4312_v26  ;;  %v4425_v31 = vpop.f32.mrf.mxu0 }
 0x9ba   : > { %v4426_v33 = vadd.f32 %v4425_v31, %v4397_v28  ;;  %v4369_v34 = vpop.f32.mrf.mxu2 }
 0x9bb   : > { %v4398_v45 = vpop.f32.mrf.mxu3  ;;  %v4370_v50 = vadd.f32 %v4369_v34, %v4341_v30 }
 0x9bc   : > { %vm4442_vm9 = vcmp.gt.f32.partialorder %v4426_v33, 0.0  ;;  %v4450_v48 = vmul.f32 0.01, %v4426_v33 }
 0x9bd   : > { %v4399_v37 = vadd.f32 %v4398_v45, %v4370_v50  ;;  %v4465_v45 = vld [vmem:[%s9439_s6 + $0x8] sm:$0xff]  ;;  %v4466_v50 = vld [vmem:[%s9439_s6 + $0x10] sm:$0xff] }
 0x9be   : > { %v4458_v51 = vsel %vm4442_vm9, %v4426_v33, %v4450_v48  ;;  %v4464_v48 = vld [vmem:[%s9439_s6] sm:$0xff]  ;;  %vm5042_vm9 = vcmask 228352  }
 0x9bf   : > { %4485 = vperm.xlu1 %9217, %v4458_v51  }
 0x9c0   : > { %v4343_v53 = vpop.f32.mrf.mxu1 }
 0x9c1   : > { %v4344_v55 = vadd.f32 %v4343_v53, %v4315_v52  ;;  %v4427_v56 = vpop.f32.mrf.mxu0 }
 0x9c2   : > { %v4428_v57 = vadd.f32 %v4427_v56, %v4399_v37  ;;  %v4372_v58 = vpop.f32.mrf.mxu2  ;;  %v4467_v56 = vld [vmem:[%s9439_s6 + $0x18] sm:$0xff] }
 0x9c3   : > { %v4401_v59 = vpop.f32.mrf.mxu3  ;;  %v4373_v62 = vadd.f32 %v4372_v58, %v4344_v55  ;;  %v9032_v55 = vld [vmem:[%s11862_s4 + $0x8] sm:$0xff]  ;;  %v4468_v58 = vld [vmem:[%s9439_s6 + $0x20] sm:$0xff] }
 0x9c4   : > { %v4451_v61 = vmul.f32 0.01, %v4428_v57  ;;  %vm4443_vm10 = vcmp.gt.f32.partialorder %v4428_v57, 0.0  ;;  %4571 = vmatpush.bf16.msrb.mxu1 %v9032_v55 }
 0x9c5   : > { %v4402_v0 = vadd.f32 %v4401_v59, %v4373_v62  ;;  %v4469_v62 = vld [vmem:[%s9439_s6 + $0x28] sm:$0xff] }
 0x9c6   : > { %v4459_v63 = vsel %vm4443_vm10, %v4428_v57, %v4451_v61  ;;  %vm7902_vm10 = vcmask 965632  }
 0x9c7   : > { %4490 = vperm.xlu2 %9218, %v4459_v63  }
 0x9c8   : > { %v4345_v1 = vpop.f32.mrf.mxu1 }
 0x9c9   : > { %v4346_v4 = vadd.f32 %v4345_v1, %v4317_v38  ;;  %v4430_v6 = vpop.f32.mrf.mxu0 }
 0x9ca   : > { %v4431_v10 = vadd.f32 %v4430_v6, %v4402_v0  ;;  %v4374_v7 = vpop.f32.mrf.mxu2  ;;  %v9031_v0 = vld [vmem:[%s11862_s4] sm:$0xff] }
 0x9cb   : > { %v4403_v12 = vpop.f32.mrf.mxu3  ;;  %v4375_v14 = vadd.f32 %v4374_v7, %v4346_v4  ;;  %4572 = vmatpush.bf16.msrb.mxu1 %v9031_v0  ;;  %v4470_v7 = vld [vmem:[%s9439_s6 + $0x30] sm:$0xff] }
 0x9cc   : > { %vm4444_vm11 = vcmp.gt.f32.partialorder %v4431_v10, 0.0  ;;  %v4452_v9 = vmul.f32 0.01, %v4431_v10 }
 0x9cd   : > { %v4404_v43 = vadd.f32 %v4403_v12, %v4375_v14 }
 0x9ce   : > { %v4460_v11 = vsel %vm4444_vm11, %v4431_v10, %v4452_v9  ;;  %vm7833_vm11 = vcmask 990208  }
 0x9cf   : > { %4495 = vperm.xlu0 %9216, %v4460_v11  }
 0x9d0   : > { %v4348_v15 = vpop.f32.mrf.mxu1 }
 0x9d1   : > { %v4349_v8 = vadd.f32 %v4348_v15, %v4320_v2  ;;  %v4432_v5 = vpop.f32.mrf.mxu0  ;;  %v4471_v2 = vld [vmem:[%s9439_s6 + $0x38] sm:$0xff] }
 0x9d2   : > { %v4433_v16 = vadd.f32 %v4432_v5, %v4404_v43  ;;  %v4377_v17 = vpop.f32.mrf.mxu2 }
 0x9d3   : > { %v4378_v19 = vadd.f32 %v4377_v17, %v4349_v8  ;;  %v4406_v20 = vpop.f32.mrf.mxu3 }
 0x9d4   : > { %v4453_v42 = vmul.f32 0.01, %v4433_v16  ;;  %vm4445_vm12 = vcmp.gt.f32.partialorder %v4433_v16, 0.0 }
 0x9d5   : > { %v4407_v46 = vadd.f32 %v4406_v20, %v4378_v19 }
 0x9d6   : > { %v4461_v21 = vsel %vm4445_vm12, %v4433_v16, %v4453_v42  ;;  %vm7787_vm12 = vcmask 1006592  }
 0x9d7   : > { %4500 = vperm.xlu1 %9217, %v4461_v21   ;;  %v4472_v21 = vld [vmem:[%s11863_s10] sm:$0x1]  ;;  %s11873_s10 = sld [smem:[#allocation23_spill]] }
 0x9d8   : > { %v4350_v23 = vpop.f32.mrf.mxu1 }
 0x9d9   : > { %v4351_v47 = vadd.f32 %v4350_v23, %v4322_v22  ;;  %v4435_v24 = vpop.f32.mrf.mxu0 }
 0x9da   : > { %v4436_v25 = vadd.f32 %v4435_v24, %v4407_v46  ;;  %v4379_v26 = vpop.f32.mrf.mxu2  ;;  %v4548_v24 = vld [vmem:[%s11864_s18] sm:$0x1]  ;;  %s9364_s18 = smov 32  }
 0x9db   : > { %v4380_v49 = vadd.f32 %v4379_v26, %v4351_v47  ;;  %v4408_v29 = vpop.f32.mrf.mxu3 }
 0x9dc   : > { %vm4446_vm14 = vcmp.gt.f32.partialorder %v4436_v25, 0.0  ;;  %v4454_v27 = vmul.f32 0.01, %v4436_v25 }
 0x9dd   : > { %v4409_v30 = vadd.f32 %v4408_v29, %v4380_v49  ;;  %v4605_v29 = vld [vmem:[%s11865_s9 + $0x50] sm:$0xff] }
 0x9de   : > { %v4462_v28 = vsel %vm4446_vm14, %v4436_v25, %v4454_v27  ;;  %vm7695_vm14 = vcmask 1039360  }
 0x9df   : > { %4505 = vperm.xlu2 %9218, %v4462_v28  }
 0x9e1   : > { %v4437_v31 = vpop.f32.mrf.mxu0 }
 0x9e2   : > { %v4438_v54 = vadd.f32 %v4437_v31, %v4409_v30  ;;  %v4604_v30 = vld [vmem:[%s11865_s9 + $0x48] sm:$0xff]  ;;  %v4603_v31 = vld [vmem:[%s11865_s9 + $0x40] sm:$0xff] }
 0x9e4   : > { %v4455_v33 = vmul.f32 0.01, %v4438_v54  ;;  %vm4447_vm1 = vcmp.gt.f32.partialorder %v4438_v54, 0.0 }
 0x9e6   : > { %v4463_v34 = vsel %vm4447_vm1, %v4438_v54, %v4455_v33  ;;  %v4608_v54 = vld [vmem:[%s11865_s9 + $0x68] sm:$0xff]  ;;  %v4607_v33 = vld [vmem:[%s11865_s9 + $0x60] sm:$0xff]  ;;  %vm7948_vm1 = vcmask 949248  }
 0x9e7   : > { %4510 = vperm.xlu0 %9216, %v4463_v34   ;;  %v4606_v34 = vld [vmem:[%s11865_s9 + $0x58] sm:$0xff] }
 0xa09   : > { %v4476_v44 = vpop.permute.xlu2 %4475 }
 0xa0a   : > { %v4513_v35 = vmul.f32 %v4476_v44, %v4464_v48  ;;  %v4596_v44 = vld [vmem:[%s11865_s9 + $0x8] sm:$0xff]  ;;  %v4609_v48 = vld [vmem:[%s11865_s9 + $0x70] sm:$0xff] }
 0xa0c   : > { %v4521_v59 = vsel %vm3123_vm15, %v4513_v35, 0.0 }
 0xa21   : > { %v4491_v57 = vpop.permute.xlu2 %4490 }
 0xa22   : > { %v4516_v38 = vmul.f32 %v4491_v57, %v4467_v56 }
 0xa24   : > { %v4526_v6 = vsel %vm3123_vm15, %v4516_v38, 0.0 }
 0xa29   : > { %v4481_v32 = vpop.permute.xlu0 %4480 }
 0xa2a   : > { %v4514_v52 = vmul.f32 %v4481_v32, %v4465_v45  ;;  %v4595_v45 = vld [vmem:[%s11865_s9] sm:$0xff]  ;;  %v4610_v32 = vld [vmem:[%s11865_s9 + $0x78] sm:$0xff] }
 0xa2c   : > { %v4522_v53 = vsel %vm3123_vm15, %v4514_v52, 0.0  ;;  %v4602_v52 = vld [vmem:[%s11865_s9 + $0x38] sm:$0xff] }
 0xa2d   : > { %v4523_v61 = vadd.f32 %v4522_v53, %v4521_v59 }
 0xa31   : > { %v4486_v51 = vpop.permute.xlu1 %4485 }
 0xa32   : > { %v4515_v37 = vmul.f32 %v4486_v51, %v4466_v50  ;;  %v4598_v50 = vld [vmem:[%s11865_s9 + $0x18] sm:$0xff]  ;;  %v4600_v51 = vld [vmem:[%s11865_s9 + $0x28] sm:$0xff] }
 0xa34   : > { %v4524_v60 = vsel %vm3123_vm15, %v4515_v37, 0.0 }
 0xa35   : > { %v4525_v1 = vadd.f32 %v4524_v60, %v4523_v61 }
 0xa37   : > { %v4527_v12 = vadd.f32 %v4526_v6, %v4525_v1  ;;  %v9033_v6 = vld [vmem:[%s11866_s5] sm:$0xff] }
 0xa39   : > { %v4506_v39 = vpop.permute.xlu2 %4505 }
 0xa3a   : > { %v4519_v14 = vmul.f32 %v4506_v39, %v4470_v7  ;;  %v9035_v7 = vld [vmem:[%s11866_s5 + $0x10] sm:$0xff]  ;;  %v9036_v39 = vld [vmem:[%s11866_s5 + $0x18] sm:$0xff] }
 0xa3c   : > { %v4532_v43 = vsel %vm3123_vm15, %v4519_v14, 0.0 }
 0xa41   : > { %v4496_v36 = vpop.permute.xlu0 %4495 }
 0xa42   : > { %v4517_v40 = vmul.f32 %v4496_v36, %v4468_v58 }
 0xa44   : > { %v4528_v10 = vsel %vm3123_vm15, %v4517_v40, 0.0 }
 0xa45   : > { %v4529_v9 = vadd.f32 %v4528_v10, %v4527_v12  ;;  %v9034_v10 = vld [vmem:[%s11866_s5 + $0x8] sm:$0xff] }
 0xa46   : > { %v9038_v12 = vld [vmem:[%s11866_s5 + $0x28] sm:$0xff] }
 0xa49   : > { %v4501_v63 = vpop.permute.xlu1 %4500 }
 0xa4a   : > { %v4518_v4 = vmul.f32 %v4501_v63, %v4469_v62  ;;  %v4838_v63 = vsel %vm4836_vm4, 4294967295, %v9329_v3  ;;  %v9037_v3 = vld [vmem:[%s11866_s5 + $0x20] sm:$0xff]  ;;  %vm7718_vm4 = vcmask 1031168  }
 0xa4b   : > { %v4839_v38 = vsel %vm4837_vm3, %v4838_v63, 0  ;;  %vm7879_vm3 = vcmask 973824  }
 0xa4c   : > { %v4530_v13 = vsel %vm3123_vm15, %v4518_v4, 0.0 }
 0xa4d   : > { %v4531_v11 = vadd.f32 %v4530_v13, %v4529_v9  ;;  %v9039_v13 = vld [vmem:[%s11866_s5 + $0x30] sm:$0xff]  ;;  %v9040_v9 = vld [vmem:[%s11866_s5 + $0x38] sm:$0xff] }
 0xa4f   : > { %v4533_v8 = vadd.f32 %v4532_v43, %v4531_v11 }
 0xa59   : > { %v4511_v41 = vpop.permute.xlu0 %4510 }
 0xa5a   : > { %v4520_v15 = vmul.f32 %v4511_v41, %v4471_v2 }
 0xa5c   : > { %v4534_v5 = vsel %vm3123_vm15, %v4520_v15, 0.0 }
 0xa5d   : > { %v4535_v16 = vadd.f32 %v4534_v5, %v4533_v8 }
 0xa5f   : > { %v4536_v17 = vrot.slane %v4535_v16, 4 }
 0xa61   : > { %v4537_v18 = vadd.f32 %v4536_v17, %v4535_v16 }
 0xa63   : > { %v4538_v42 = vrot.slane %v4537_v18, 2 }
 0xa65   : > { %v4539_v19 = vadd.f32 %v4538_v42, %v4537_v18 }
 0xa67   : > { %v4540_v20 = vrot.slane %v4539_v19, 1 }
 0xa69   : > { %v4541_v22 = vadd.f32 %v4540_v20, %v4539_v19 }
 0xa6b   : > { %v4542_v46 = vadd.f32 %v4541_v22, %v4472_v21 }
 0xa6d   : > { %v4543_v23 = vmax.f32 %v4542_v46, 0.0 }
 0xa6f   : > { %v4549_v47 = vpack.c.bf16 %v4543_v23, %v4543_v23 }
 0xa71   : > { %8565 = vmatmul.msk.bf16.vlgmr.msrb.gmra.mxu1 %vm3123_vm15, %v4549_v47  ;;  %v4597_v47 = vld [vmem:[%s11865_s9 + $0x10] sm:$0xff] }
 0xaee   : > { %v4574_v25 = vpop.f32.mrf.mxu1 }
 0xaef   : > { %v4575_v26 = vadd.f32 %v4574_v25, %v4548_v24 }
 0xaf1   : > { %v4578_v27 = vmax.f32 %v4575_v26, 0.0 }
 0xaf3   : > { %4612 = vst.msk [vmem:[#allocation3] sm:$0x1] %vm4611_vm0, %v4578_v27  ;;  %vm7925_vm0 = vcmask 957440  }
 0xaf6   : > { %v4576_v49 = vpop.f32.mrf.mxu1 }
 0xafa   : > { %v4628_v28 = vld [vmem:[#allocation3] ss:$0 sm:$0xff] }
 0xafb   : > { %4630 = vrot.lane.b32.xlu0 %v4628_v28, %s11835_s28  ;;  %4624 = vrot.lane.b32.xlu2 %v4628_v28, %s11841_s16  ;;  %4615 = vst.msk [vmem:[#allocation2] sm:$0x1] %vm4614_vm2, %v4628_v28 }
 0xafc   : > { %4618 = vrot.lane.b32.xlu1 %v4628_v28, %s11833_s13 }
 0xb03   : > { %4648 = vrot.lane.b32.xlu0 %v4628_v28, %s11844_s0  ;;  %4642 = vrot.lane.b32.xlu2 %v4628_v28, %s11826_s26 }
 0xb04   : > { %4636 = vrot.lane.b32.xlu1 %v4628_v28, %s11842_s1 }
 0xb0b   : > { %4666 = vrot.lane.b32.xlu0 %v4628_v28, %s9356_s29  ;;  %4660 = vrot.lane.b32.xlu2 %v4628_v28, %s9355_s21 }
 0xb0c   : > { %4654 = vrot.lane.b32.xlu1 %v4628_v28, %s9361_s7 }
 0xb13   : > { %4684 = vrot.lane.b32.xlu0 %v4628_v28, %s11854_s20  ;;  %4678 = vrot.lane.b32.xlu2 %v4628_v28, %s11853_s22 }
 0xb14   : > { %4672 = vrot.lane.b32.xlu1 %v4628_v28, %s9357_s3 }
 0xb1b   : > { %4743 = vperm.xlu0 %9216, %v4605_v29   ;;  %4738 = vperm.xlu2 %9218, %v4604_v30   ;;  %v4599_v30 = vld [vmem:[%s11865_s9 + $0x20] sm:$0xff] }
 0xb1c   : > { %4733 = vperm.xlu1 %9217, %v4603_v31  }
 0xb23   : > { %4758 = vperm.xlu0 %9216, %v4608_v54   ;;  %4753 = vperm.xlu2 %9218, %v4607_v33  }
 0xb24   : > { %4748 = vperm.xlu1 %9217, %v4606_v34   ;;  %v4601_v34 = vld [vmem:[%s11865_s9 + $0x30] sm:$0xff] }
 0xb2b   : > { %4698 = vperm.xlu2 %9218, %v4596_v44  }
 0xb2c   : > { %4693 = vperm.xlu1 %9217, %v4595_v45  }
 0xb33   : > { %4768 = vperm.xlu2 %9218, %v4610_v32  }
 0xb34   : > { %4763 = vperm.xlu1 %9217, %v4609_v48  }
 0xb3c   : > { %4708 = vperm.xlu1 %9217, %v4598_v50  }
 0xb44   : > { %4718 = vperm.xlu1 %9217, %v4600_v51  }
 0xb4c   : > { %4728 = vperm.xlu1 %9217, %v4602_v52  }
 0xb55   : > { %v4625_v35 = vpop.permute.xlu2 %4624 }
 0xb56   : > { %4627 = vst.msk [vmem:[#allocation2 + $0x2] sm:$0x1] %vm4614_vm2, %v4625_v35 }
 0xb5d   : > { %v4643_v37 = vpop.permute.xlu2 %4642 }
 0xb5e   : > { %4645 = vst.msk [vmem:[#allocation2 + $0x5] sm:$0x1] %vm4614_vm2, %v4643_v37 }
 0xb65   : > { %v4661_v53 = vpop.permute.xlu2 %4660 }
 0xb66   : > { %4663 = vst.msk [vmem:[#allocation2 + $0x8] sm:$0x1] %vm4614_vm2, %v4661_v53 }
 0xb6d   : > { %v4631_v55 = vpop.permute.xlu0 %4630  ;;  %v4679_v56 = vpop.permute.xlu2 %4678 }
 0xb6e   : > { %4633 = vst.msk [vmem:[#allocation2 + $0x3] sm:$0x1] %vm4614_vm2, %v4631_v55  ;;  %v4619_v57 = vpop.permute.xlu1 %4618 }
 0xb6f   : > { %4681 = vst.msk [vmem:[#allocation2 + $0xb] sm:$0x1] %vm4614_vm2, %v4679_v56 }
 0xb70   : > { %4621 = vst.msk [vmem:[#allocation2 + $0x1] sm:$0x1] %vm4614_vm2, %v4619_v57 }
 0xb75   : > { %v4649_v58 = vpop.permute.xlu0 %4648  ;;  %v4739_v42 = vpop.permute.xlu2 %4738 }
 0xb76   : > { %4651 = vst.msk [vmem:[#allocation2 + $0x6] sm:$0x1] %vm4614_vm2, %v4649_v58  ;;  %v4637_v36 = vpop.permute.xlu1 %4636 }
 0xb77   : > { %4639 = vst.msk [vmem:[#allocation2 + $0x4] sm:$0x1] %vm4614_vm2, %v4637_v36 }
 0xb7d   : > { %v4667_v59 = vpop.permute.xlu0 %4666  ;;  %v4754_v33 = vpop.permute.xlu2 %4753 }
 0xb7e   : > { %4669 = vst.msk [vmem:[#allocation2 + $0x9] sm:$0x1] %vm4614_vm2, %v4667_v59  ;;  %v4655_v60 = vpop.permute.xlu1 %4654 }
 0xb7f   : > { %4657 = vst.msk [vmem:[#allocation2 + $0x7] sm:$0x1] %vm4614_vm2, %v4655_v60 }
 0xb85   : > { %v4685_v61 = vpop.permute.xlu0 %4684  ;;  %v4699_v37 = vpop.permute.xlu2 %4698 }
 0xb86   : > { %4687 = vst.msk [vmem:[#allocation2 + $0xc] sm:$0x1] %vm4614_vm2, %v4685_v61  ;;  %v4673_v62 = vpop.permute.xlu1 %4672  ;;  %v4688_v40 = vld [vmem:[#allocation2] sm:$0xff] }
 0xb87   : > { %4675 = vst.msk [vmem:[#allocation2 + $0xa] sm:$0x1] %vm4614_vm2, %v4673_v62  ;;  %v9041_v62 = vld [vmem:[%s11867_s15] sm:$0xff]  ;;  %s11875_s15 = sld [smem:[#allocation24_spill]]  ;;  %vm7741_vm2 = vcmask 1022976  }
 0xb88   : > { %4980 = vmatpush.bf16.msrb.mxu2 %v9041_v62 }
 0xb8d   : > { %v4744_v24 = vpop.permute.xlu0 %4743  ;;  %v4769_v57 = vpop.permute.xlu2 %4768 }
 0xb8e   : > { %v4689_v0 = vld [vmem:[#allocation2 + $0x8] sm:$0x1f]  ;;  %v4734_v17 = vpop.permute.xlu1 %4733 }
 0xb8f   : > { %v4690_v1 = vpack.c.bf16 %v4689_v0, %v4688_v40 }
 0xb91   : > { %v4841_v4 = vand.u32 %v4839_v38, %v4690_v1 }
 0xb93   : > { %4850 = vmatpush.bf16.msra.mxu1 %v4841_v4 }
 0xb95   : > { %v4759_v45 = vpop.permute.xlu0 %4758 }
 0xb96   : > { %8598 = vmatmul.msk.bf16.vlgmr.msra.gmra.mxu1 %vm4811_vm5, %v9033_v6  ;;  %v4749_v26 = vpop.permute.xlu1 %4748 }
 0xb9e   : > { %v4694_v52 = vpop.permute.xlu1 %4693 }
 0xba6   : > { %8599 = vmatmul.msk.bf16.gmra.mxu1 %vm4811_vm5, %v9034_v10  ;;  %v4764_v55 = vpop.permute.xlu1 %4763 }
 0xbb6   : > { %8600 = vmatmul.msk.bf16.gmra.mxu1 %vm4811_vm5, %v9035_v7 }
 0xbc6   : > { %8601 = vmatmul.msk.bf16.gmra.mxu1 %vm4811_vm5, %v9036_v39 }
 0xbd6   : > { %8602 = vmatmul.msk.bf16.gmra.mxu1 %vm4811_vm5, %v9037_v3 }
 0xbe6   : > { %8603 = vmatmul.msk.bf16.gmra.mxu1 %vm4811_vm5, %v9038_v12 }
 0xbf6   : > { %8604 = vmatmul.msk.bf16.gmra.mxu1 %vm4811_vm5, %v9039_v13  ;;  %v4709_v13 = vpop.permute.xlu1 %4708 }
 0xc06   : > { %8605 = vmatmul.msk.bf16.gmra.mxu1 %vm4811_vm5, %v9040_v9  ;;  %vm7856_vm5 = vcmask 982016  }
 0xc13   : > { %v4852_v14 = vpop.f32.mrf.mxu1 }
 0xc14   : > { %v4853_v63 = vadd.f32 %v4852_v14, %v4694_v52 }
 0xc16   : > { %v4892_v0 = vmax.f32 %v4853_v63, 0.0 }
 0xc1b   : > { %v4854_v11 = vpop.f32.mrf.mxu1 }
 0xc1c   : > { %v4855_v38 = vadd.f32 %v4854_v11, %v4699_v37 }
 0xc1e   : > { %v4893_v1 = vmax.f32 %v4855_v38, 0.0 }
 0xc23   : > { %v10692_v2 = vpop.f32.mrf.mxu1 }
 0xc2b   : > { %v10694_v41 = vpop.f32.mrf.mxu1 }
 0xc2c   : > { %v4860_v14 = vadd.f32 %v10694_v41, %v4709_v13 }
 0xc33   : > { %v10696_v43 = vpop.f32.mrf.mxu1 }
 0xc3b   : > { %v10698_v15 = vpop.f32.mrf.mxu1 }
 0xc43   : > { %v10700_v8 = vpop.f32.mrf.mxu1 }
 0xc4b   : > { %v10702_v5 = vpop.f32.mrf.mxu1 }
 0xc53   : > { %v4872_v16 = vpop.f32.mrf.mxu1 }
 0xc54   : > { %v4873_v18 = vadd.f32 %v4872_v16, %v4734_v17 }
 0xc56   : > { %v4900_v21 = vmax.f32 %v4873_v18, 0.0  ;;  %v4895_v18 = vmax.f32 %v4860_v14, 0.0 }
 0xc5b   : > { %v4874_v19 = vpop.f32.mrf.mxu1 }
 0xc5c   : > { %v4875_v20 = vadd.f32 %v4874_v19, %v4739_v42 }
 0xc5e   : > { %v4901_v22 = vmax.f32 %v4875_v20, 0.0 }
 0xc60   : > { %v9219_v46 = vpack.i.bf16 %v4901_v22, %v4900_v21 }
 0xc62   : > { %9220 = vrot.lane.b32.xlu0 %v9219_v46, %s9362_s11  ;;  %v4719_v46 = vpop.permute.xlu1 %4718 }
 0xc63   : > { %v4877_v23 = vpop.f32.mrf.mxu1 }
 0xc64   : > { %v4878_v25 = vadd.f32 %v4877_v23, %v4744_v24  ;;  %v4865_v23 = vadd.f32 %v10698_v15, %v4719_v46 }
 0xc66   : > { %v4902_v28 = vmax.f32 %v4878_v25, 0.0  ;;  %v4897_v25 = vmax.f32 %v4865_v23, 0.0 }
 0xc6a   : > { %4703 = vperm.xlu0 %9216, %v4597_v47  }
 0xc6b   : > { %v4879_v27 = vpop.f32.mrf.mxu1 }
 0xc6c   : > { %v4880_v49 = vadd.f32 %v4879_v27, %v4749_v26 }
 0xc6e   : > { %v4903_v29 = vmax.f32 %v4880_v49, 0.0 }
 0xc70   : > { %v9224_v31 = vpack.i.bf16 %v4903_v29, %v4902_v28 }
 0xc72   : > { %9225 = vrot.lane.b32.xlu2 %v9224_v31, %s9362_s11  ;;  %4713 = vperm.xlu0 %9216, %v4599_v30   ;;  %v4729_v30 = vpop.permute.xlu1 %4728 }
 0xc73   : > { %v4882_v54 = vpop.f32.mrf.mxu1  ;;  %v4870_v31 = vadd.f32 %v10702_v5, %v4729_v30 }
 0xc74   : > { %v4883_v44 = vadd.f32 %v4882_v54, %v4754_v33 }
 0xc76   : > { %v4904_v50 = vmax.f32 %v4883_v44, 0.0 }
 0xc7a   : > { %4723 = vperm.xlu0 %9216, %v4601_v34   ;;  %v4899_v34 = vmax.f32 %v4870_v31, 0.0 }
 0xc7b   : > { %v4884_v32 = vpop.f32.mrf.mxu1 }
 0xc7c   : > { %v4885_v48 = vadd.f32 %v4884_v32, %v4759_v45 }
 0xc7e   : > { %v4905_v51 = vmax.f32 %v4885_v48, 0.0 }
 0xc80   : > { %v9229_v35 = vpack.i.bf16 %v4905_v51, %v4904_v50 }
 0xc82   : > { %9230 = vrot.lane.b32.xlu2 %v9229_v35, %s9362_s11 }
 0xc83   : > { %v4887_v53 = vpop.f32.mrf.mxu1 }
 0xc84   : > { %v4888_v56 = vadd.f32 %v4887_v53, %v4764_v55 }
 0xc86   : > { %v4906_v59 = vmax.f32 %v4888_v56, 0.0 }
 0xc8b   : > { %v4889_v58 = vpop.f32.mrf.mxu1 }
 0xc8c   : > { %v4890_v36 = vadd.f32 %v4889_v58, %v4769_v57 }
 0xc8e   : > { %v4907_v60 = vmax.f32 %v4890_v36, 0.0 }
 0xc90   : > { %v9234_v61 = vpack.i.bf16 %v4907_v60, %v4906_v59 }
 0xc92   : > { %9235 = vrot.lane.b32.xlu2 %v9234_v61, %s9362_s11  ;;  %s11874_s11 = sld [smem:[#allocation25_spill]] }
 0xccc   : > { %v9226_v9 = vpop.permute.xlu2 %9225 }
 0xccd   : > { %v9228_v16 = vunpack.i.h.bf16 %v9226_v9  ;;  %v9227_v17 = vunpack.i.l.bf16 %v9226_v9 }
 0xccf   : > { %v4946_v19 = vsel %vm4942_vm7, %v4895_v18, %v9228_v16 }
 0xcd4   : > { %v9221_v40 = vpop.permute.xlu0 %9220 }
 0xcd5   : > { %v9223_v4 = vunpack.i.h.bf16 %v9221_v40  ;;  %v9222_v6 = vunpack.i.l.bf16 %v9221_v40 }
 0xcd7   : > { %v4943_v10 = vsel %vm4942_vm7, %v4892_v0, %v9222_v6  ;;  %v4944_v7 = vsel %vm4942_vm7, %v4893_v1, %v9223_v4 }
 0xcd8   : > { %v4951_v39 = vpack.c.bf16 %v4944_v7, %v4943_v10 }
 0xcda   : > { %8610 = vmatmul.msk.bf16.vlgmr.msrb.gmra.mxu2 %vm1720_vm8, %v4951_v39 }
 0xcdc   : > { %v4704_v3 = vpop.permute.xlu0 %4703 }
 0xcdd   : > { %v4858_v12 = vadd.f32 %v10692_v2, %v4704_v3  ;;  %v9231_v2 = vpop.permute.xlu2 %9230 }
 0xcde   : > { %v9233_v41 = vunpack.i.h.bf16 %v9231_v2  ;;  %v9232_v24 = vunpack.i.l.bf16 %v9231_v2 }
 0xcdf   : > { %v4894_v11 = vmax.f32 %v4858_v12, 0.0 }
 0xce0   : > { %v4948_v27 = vsel %vm4942_vm7, %v4897_v25, %v9233_v41 }
 0xce1   : > { %v4945_v42 = vsel %vm4942_vm7, %v4894_v11, %v9227_v17 }
 0xce2   : > { %v4952_v20 = vpack.c.bf16 %v4946_v19, %v4945_v42 }
 0xce4   : > { %v4714_v21 = vpop.permute.xlu0 %4713 }
 0xce5   : > { %v4863_v22 = vadd.f32 %v10696_v43, %v4714_v21 }
 0xce7   : > { %v4896_v47 = vmax.f32 %v4863_v22, 0.0 }
 0xce9   : > { %v4947_v26 = vsel %vm4942_vm7, %v4896_v47, %v9232_v24 }
 0xcea   : > { %8611 = vmatmul.msk.bf16.gmra.mxu2 %vm1720_vm8, %v4952_v20  ;;  %v4953_v49 = vpack.c.bf16 %v4948_v27, %v4947_v26 }
 0xcec   : > { %v4724_v28 = vpop.permute.xlu0 %4723  ;;  %v9236_v43 = vpop.permute.xlu2 %9235 }
 0xced   : > { %v4868_v29 = vadd.f32 %v10700_v8, %v4724_v28  ;;  %v9238_v15 = vunpack.i.h.bf16 %v9236_v43  ;;  %v9237_v33 = vunpack.i.l.bf16 %v9236_v43 }
 0xcef   : > { %v4898_v54 = vmax.f32 %v4868_v29, 0.0  ;;  %v4950_v45 = vsel %vm4942_vm7, %v4899_v34, %v9238_v15 }
 0xcf1   : > { %v4949_v44 = vsel %vm4942_vm7, %v4898_v54, %v9237_v33  ;;  %vm8004_vm7 = vcmask 654336  }
 0xcf2   : > { %v4954_v32 = vpack.c.bf16 %v4950_v45, %v4949_v44 }
 0xcfa   : > { %8612 = vmatmul.msk.bf16.gmra.mxu2 %vm1720_vm8, %v4953_v49 }
 0xd0a   : > { %8613 = vmatmul.msk.bf16.gmra.mxu2 %vm1720_vm8, %v4954_v32 }
 0xd5d   : > { %v4982_v48 = vpop.f32.mrf.mxu2 }
 0xd5e   : > { %5043 = vst.msk [vmem:[#allocation3] sm:$0xff] %vm5042_vm9, %v4982_v48 }
 0xd65   : > { %v4984_v8 = vpop.f32.mrf.mxu2  ;;  %v10731_v50 = vld [vmem:[#allocation3] sm:$0xff] }
 0xd66   : > { %5275 = vrot.lane.b32.xlu2 %v10731_v50, %s11826_s26  ;;  %5044 = vst.msk [vmem:[#allocation3 + $0x18] sm:$0xff] %vm5042_vm9, %v4984_v8  ;;  %5179 = vrot.lane.b32.xlu1 %v10731_v50, %s11835_s28 }
 0xd67   : > { %5083 = vrot.lane.b32.xlu0 %v10731_v50, %s11833_s13  ;;  %5059 = vst.msk [vmem:[#allocation2] sm:$0xff] %vm1720_vm8, %v10731_v50 }
 0xd6d   : > { %v4987_v5 = vpop.f32.mrf.mxu2  ;;  %v10742_v51 = vld [vmem:[#allocation3 + $0x18] sm:$0xff] }
 0xd6e   : > { %5045 = vst.msk [vmem:[#allocation3 + $0x30] sm:$0xff] %vm5042_vm9, %v4987_v5  ;;  %5131 = vrot.lane.b32.xlu2 %v10731_v50, %s11841_s16  ;;  %5085 = vrot.lane.b32.xlu1 %v10742_v51, %s11833_s13 }
 0xd6f   : > { %5227 = vrot.lane.b32.xlu0 %v10731_v50, %s11842_s1  ;;  %5060 = vst.msk [vmem:[#allocation2 + $0x8] sm:$0xff] %vm1720_vm8, %v10742_v51 }
 0xd75   : > { %v4989_v52 = vpop.f32.mrf.mxu2  ;;  %v10753_v35 = vld [vmem:[#allocation3 + $0x30] sm:$0xff] }
 0xd76   : > { %5046 = vst.msk [vmem:[#allocation3 + $0x48] sm:$0xff] %vm5042_vm9, %v4989_v52  ;;  %5371 = vrot.lane.b32.xlu2 %v10731_v50, %s9361_s7  ;;  %5229 = vrot.lane.b32.xlu1 %v10742_v51, %s11842_s1 }
 0xd77   : > { %5277 = vrot.lane.b32.xlu0 %v10742_v51, %s11826_s26  ;;  %5061 = vst.msk [vmem:[#allocation2 + $0x10] sm:$0xff] %vm1720_vm8, %v10753_v35 }
 0xd7d   : > { %v4992_v37 = vpop.f32.mrf.mxu2  ;;  %v10764_v53 = vld [vmem:[#allocation3 + $0x48] sm:$0xff] }
 0xd7e   : > { %5047 = vst.msk [vmem:[#allocation3 + $0x60] sm:$0xff] %vm5042_vm9, %v4992_v37  ;;  %5181 = vrot.lane.b32.xlu2 %v10742_v51, %s11835_s28  ;;  %5279 = vrot.lane.b32.xlu1 %v10753_v35, %s11826_s26 }
 0xd7f   : > { %5133 = vrot.lane.b32.xlu0 %v10742_v51, %s11841_s16  ;;  %5062 = vst.msk [vmem:[#allocation2 + $0x18] sm:$0xff] %vm1720_vm8, %v10764_v53 }
 0xd85   : > { %v10775_v55 = vld [vmem:[#allocation3 + $0x60] sm:$0xff]  ;;  %v4994_v56 = vpop.f32.mrf.mxu2 }
 0xd86   : > { %5063 = vst.msk [vmem:[#allocation2 + $0x20] sm:$0xff] %vm1720_vm8, %v10775_v55  ;;  %5231 = vrot.lane.b32.xlu2 %v10753_v35, %s11842_s1  ;;  %5135 = vrot.lane.b32.xlu1 %v10753_v35, %s11841_s16 }
 0xd87   : > { %5048 = vst.msk [vmem:[#allocation3 + $0x78] sm:$0xff] %vm5042_vm9, %v4994_v56  ;;  %5373 = vrot.lane.b32.xlu0 %v10742_v51, %s9361_s7 }
 0xd8d   : > { %v4997_v57 = vpop.f32.mrf.mxu2 }
 0xd8e   : > { %v10786_v58 = vld [vmem:[#allocation3 + $0x78] sm:$0xff]  ;;  %5049 = vst.msk [vmem:[#allocation3 + $0x90] sm:$0xff] %vm5042_vm9, %v4997_v57  ;;  %5375 = vrot.lane.b32.xlu2 %v10753_v35, %s9361_s7  ;;  %5471 = vrot.lane.b32.xlu1 %v10753_v35, %s9356_s29 }
 0xd8f   : > { %5064 = vst.msk [vmem:[#allocation2 + $0x28] sm:$0xff] %vm1720_vm8, %v10786_v58  ;;  %5087 = vrot.lane.b32.xlu0 %v10753_v35, %s11833_s13 }
 0xd95   : > { %v10797_v36 = vld [vmem:[#allocation3 + $0x90] sm:$0xff]  ;;  %v4999_v59 = vpop.f32.mrf.mxu2 }
 0xd96   : > { %5065 = vst.msk [vmem:[#allocation2 + $0x30] sm:$0xff] %vm1720_vm8, %v10797_v36  ;;  %5281 = vrot.lane.b32.xlu2 %v10764_v53, %s11826_s26  ;;  %5089 = vrot.lane.b32.xlu1 %v10764_v53, %s11833_s13 }
 0xd97   : > { %5050 = vst.msk [vmem:[#allocation3 + $0xa8] sm:$0xff] %vm5042_vm9, %v4999_v59  ;;  %5183 = vrot.lane.b32.xlu0 %v10753_v35, %s11835_s28  ;;  %v5040_v59 = vld [vmem:[%s11868_s17 + $0x30] sm:$0xff] }
 0xd9e   : > { %v10808_v60 = vld [vmem:[#allocation3 + $0xa8] sm:$0xff]  ;;  %5137 = vrot.lane.b32.xlu2 %v10764_v53, %s11841_s16  ;;  %5185 = vrot.lane.b32.xlu1 %v10764_v53, %s11835_s28 }
 0xd9f   : > { %5066 = vst.msk [vmem:[#allocation2 + $0x38] sm:$0xff] %vm1720_vm8, %v10808_v60  ;;  %5567 = vrot.lane.b32.xlu0 %v10753_v35, %s11853_s22 }
 0xda6   : > { %5473 = vrot.lane.b32.xlu2 %v10764_v53, %s9356_s29  ;;  %5569 = vrot.lane.b32.xlu1 %v10764_v53, %s11853_s22 }
 0xda7   : > { %5233 = vrot.lane.b32.xlu0 %v10764_v53, %s11842_s1 }
 0xdae   : > { %5283 = vrot.lane.b32.xlu1 %v10775_v55, %s11826_s26  ;;  %5091 = vrot.lane.b32.xlu2 %v10775_v55, %s11833_s13 }
 0xdaf   : > { %5377 = vrot.lane.b32.xlu0 %v10764_v53, %s9361_s7 }
 0xdb6   : > { %5235 = vrot.lane.b32.xlu1 %v10775_v55, %s11842_s1  ;;  %5187 = vrot.lane.b32.xlu2 %v10775_v55, %s11835_s28 }
 0xdb7   : > { %5139 = vrot.lane.b32.xlu0 %v10775_v55, %s11841_s16 }
 0xdbe   : > { %5475 = vrot.lane.b32.xlu1 %v10775_v55, %s9356_s29  ;;  %5331 = vrot.lane.b32.xlu2 %v10775_v55, %s11844_s0 }
 0xdbf   : > { %5379 = vrot.lane.b32.xlu0 %v10775_v55, %s9361_s7 }
 0xdc0   : > { %v5276_v61 = vpop.permute.xlu2 %5275 }
 0xdc1   : > { %5299 = vst.msk [vmem:[#allocation2 + $0x140] sm:$0xff] %vm1720_vm8, %v5276_v61  ;;  %v5038_v61 = vld [vmem:[%s11868_s17 + $0x20] sm:$0xff] }
 0xdc6   : > { %5285 = vrot.lane.b32.xlu2 %v10786_v58, %s11826_s26  ;;  %5141 = vrot.lane.b32.xlu1 %v10786_v58, %s11841_s16 }
 0xdc7   : > { %5571 = vrot.lane.b32.xlu0 %v10775_v55, %s11853_s22 }
 0xdc8   : > { %v5132_v62 = vpop.permute.xlu2 %5131 }
 0xdc9   : > { %5155 = vst.msk [vmem:[#allocation2 + $0x80] sm:$0xff] %vm1720_vm8, %v5132_v62 }
 0xdce   : > { %5237 = vrot.lane.b32.xlu2 %v10786_v58, %s11842_s1  ;;  %5381 = vrot.lane.b32.xlu1 %v10786_v58, %s9361_s7 }
 0xdcf   : > { %5093 = vrot.lane.b32.xlu0 %v10786_v58, %s11833_s13 }
 0xdd0   : > { %v5372_v63 = vpop.permute.xlu2 %5371 }
 0xdd1   : > { %5395 = vst.msk [vmem:[#allocation2 + $0x1c0] sm:$0xff] %vm1720_vm8, %v5372_v63 }
 0xdd6   : > { %5477 = vrot.lane.b32.xlu2 %v10786_v58, %s9356_s29  ;;  %5573 = vrot.lane.b32.xlu1 %v10786_v58, %s11853_s22 }
 0xdd7   : > { %5189 = vrot.lane.b32.xlu0 %v10786_v58, %s11835_s28 }
 0xdd8   : > { %v5180_v38 = vpop.permute.xlu1 %5179  ;;  %v5182_v40 = vpop.permute.xlu2 %5181 }
 0xdd9   : > { %5203 = vst.msk [vmem:[#allocation2 + $0xc0] sm:$0xff] %vm1720_vm8, %v5180_v38  ;;  %v5084_v0 = vpop.permute.xlu0 %5083 }
 0xdda   : > { %5107 = vst.msk [vmem:[#allocation2 + $0x40] sm:$0xff] %vm1720_vm8, %v5084_v0 }
 0xddb   : > { %5204 = vst.msk [vmem:[#allocation2 + $0xc8] sm:$0xff] %vm1720_vm8, %v5182_v40 }
 0xdde   : > { %5287 = vrot.lane.b32.xlu1 %v10797_v36, %s11826_s26  ;;  %5191 = vrot.lane.b32.xlu2 %v10797_v36, %s11835_s28 }
 0xddf   : > { %5333 = vrot.lane.b32.xlu0 %v10786_v58, %s11844_s0 }
 0xde0   : > { %v5086_v1 = vpop.permute.xlu1 %5085  ;;  %v5232_v4 = vpop.permute.xlu2 %5231 }
 0xde1   : > { %v5228_v6 = vpop.permute.xlu0 %5227  ;;  %5108 = vst.msk [vmem:[#allocation2 + $0x48] sm:$0xff] %vm1720_vm8, %v5086_v1 }
 0xde2   : > { %5251 = vst.msk [vmem:[#allocation2 + $0x100] sm:$0xff] %vm1720_vm8, %v5228_v6  ;;  %v5035_v6 = vld [vmem:[%s11868_s17 + $0x8] sm:$0xff] }
 0xde3   : > { %5253 = vst.msk [vmem:[#allocation2 + $0x110] sm:$0xff] %vm1720_vm8, %v5232_v4 }
 0xde6   : > { %5383 = vrot.lane.b32.xlu1 %v10797_v36, %s9361_s7  ;;  %5143 = vrot.lane.b32.xlu2 %v10797_v36, %s11841_s16 }
 0xde7   : > { %5095 = vrot.lane.b32.xlu0 %v10797_v36, %s11833_s13 }
 0xde8   : > { %v5230_v10 = vpop.permute.xlu1 %5229  ;;  %v5376_v7 = vpop.permute.xlu2 %5375 }
 0xde9   : > { %v5278_v39 = vpop.permute.xlu0 %5277  ;;  %5252 = vst.msk [vmem:[#allocation2 + $0x108] sm:$0xff] %vm1720_vm8, %v5230_v10  ;;  %v5034_v10 = vld [vmem:[%s11868_s17] sm:$0xff] }
 0xdea   : > { %5300 = vst.msk [vmem:[#allocation2 + $0x148] sm:$0xff] %vm1720_vm8, %v5278_v39 }
 0xdeb   : > { %5397 = vst.msk [vmem:[#allocation2 + $0x1d0] sm:$0xff] %vm1720_vm8, %v5376_v7  ;;  %v5041_v7 = vld [vmem:[%s11868_s17 + $0x38] sm:$0xff] }
 0xdee   : > { %5479 = vrot.lane.b32.xlu1 %v10797_v36, %s9356_s29  ;;  %5335 = vrot.lane.b32.xlu2 %v10797_v36, %s11844_s0 }
 0xdef   : > { %5239 = vrot.lane.b32.xlu0 %v10797_v36, %s11842_s1 }
 0xdf0   : > { %v5280_v3 = vpop.permute.xlu1 %5279  ;;  %v5282_v12 = vpop.permute.xlu2 %5281 }
 0xdf1   : > { %v5134_v13 = vpop.permute.xlu0 %5133  ;;  %5301 = vst.msk [vmem:[#allocation2 + $0x150] sm:$0xff] %vm1720_vm8, %v5280_v3  ;;  %v5684_v39 = vld [vmem:[#allocation2 + $0x148] sm:$0xff]  ;;  %v5683_v3 = vld [vmem:[#allocation2 + $0x140] sm:$0xff] }
 0xdf2   : > { %5156 = vst.msk [vmem:[#allocation2 + $0x88] sm:$0xff] %vm1720_vm8, %v5134_v13 }
 0xdf3   : > { %5302 = vst.msk [vmem:[#allocation2 + $0x158] sm:$0xff] %vm1720_vm8, %v5282_v12  ;;  %v5767_v12 = vpack.c.bf16 %v5684_v39, %v5683_v3 }
 0xdf6   : > { %5469 = vrot.lane.b32.xlu2 %v10742_v51, %s9356_s29  ;;  %5097 = vrot.lane.b32.xlu1 %v10808_v60, %s11833_s13 }
 0xdf7   : > { %5575 = vrot.lane.b32.xlu0 %v10797_v36, %s11853_s22 }
 0xdf8   : > { %v5136_v9 = vpop.permute.xlu1 %5135  ;;  %v5138_v14 = vpop.permute.xlu2 %5137  ;;  %v5685_v40 = vld [vmem:[#allocation2 + $0x150] sm:$0xff] }
 0xdf9   : > { %v5374_v11 = vpop.permute.xlu0 %5373  ;;  %5157 = vst.msk [vmem:[#allocation2 + $0x90] sm:$0xff] %vm1720_vm8, %v5136_v9 }
 0xdfa   : > { %5396 = vst.msk [vmem:[#allocation2 + $0x1c8] sm:$0xff] %vm1720_vm8, %v5374_v11  ;;  %v5686_v0 = vld [vmem:[#allocation2 + $0x158] sm:$0xff] }
 0xdfb   : > { %5158 = vst.msk [vmem:[#allocation2 + $0x98] sm:$0xff] %vm1720_vm8, %v5138_v14  ;;  %v5768_v4 = vpack.c.bf16 %v5686_v0, %v5685_v40  ;;  %v5644_v40 = vld [vmem:[#allocation2 + $0x8] sm:$0xff] }
 0xdfe   : > { %5289 = vrot.lane.b32.xlu2 %v10808_v60, %s11826_s26  ;;  %5467 = vrot.lane.b32.xlu1 %v10731_v50, %s9356_s29 }
 0xdff   : > { %5193 = vrot.lane.b32.xlu0 %v10808_v60, %s11835_s28 }
 0xe00   : > { %v5472_v16 = vpop.permute.xlu1 %5471  ;;  %v5474_v17 = vpop.permute.xlu2 %5473 }
 0xe01   : > { %5493 = vst.msk [vmem:[#allocation2 + $0x250] sm:$0xff] %vm1720_vm8, %v5472_v16  ;;  %v5088_v18 = vpop.permute.xlu0 %5087 }
 0xe02   : > { %5109 = vst.msk [vmem:[#allocation2 + $0x50] sm:$0xff] %vm1720_vm8, %v5088_v18  ;;  %v5037_v18 = vld [vmem:[%s11868_s17 + $0x18] sm:$0xff] }
 0xe03   : > { %5494 = vst.msk [vmem:[#allocation2 + $0x258] sm:$0xff] %vm1720_vm8, %v5474_v17 }
 0xe06   : > { %5623 = vrot.lane.b32.xlu2 %v10797_v36, %s11854_s20  ;;  %5565 = vrot.lane.b32.xlu1 %v10742_v51, %s11853_s22 }
 0xe07   : > { %5563 = vrot.lane.b32.xlu0 %v10731_v50, %s11853_s22 }
 0xe08   : > { %v5090_v42 = vpop.permute.xlu1 %5089  ;;  %v5092_v19 = vpop.permute.xlu2 %5091 }
 0xe09   : > { %v5184_v20 = vpop.permute.xlu0 %5183  ;;  %5110 = vst.msk [vmem:[#allocation2 + $0x58] sm:$0xff] %vm1720_vm8, %v5090_v42  ;;  %v5036_v42 = vld [vmem:[%s11868_s17 + $0x10] sm:$0xff] }
 0xe0a   : > { %5205 = vst.msk [vmem:[#allocation2 + $0xd0] sm:$0xff] %vm1720_vm8, %v5184_v20 }
 0xe0b   : > { %5111 = vst.msk [vmem:[#allocation2 + $0x60] sm:$0xff] %vm1720_vm8, %v5092_v19 }
 0xe0e   : > { %5329 = vrot.lane.b32.xlu2 %v10764_v53, %s11844_s0  ;;  %5241 = vrot.lane.b32.xlu1 %v10808_v60, %s11842_s1 }
 0xe0f   : > { %5145 = vrot.lane.b32.xlu0 %v10808_v60, %s11841_s16 }
 0xe10   : > { %v5186_v21 = vpop.permute.xlu1 %5185  ;;  %v5188_v22 = vpop.permute.xlu2 %5187 }
 0xe11   : > { %v5568_v46 = vpop.permute.xlu0 %5567  ;;  %5206 = vst.msk [vmem:[#allocation2 + $0xd8] sm:$0xff] %vm1720_vm8, %v5186_v21 }
 0xe12   : > { %5589 = vst.msk [vmem:[#allocation2 + $0x2d0] sm:$0xff] %vm1720_vm8, %v5568_v46  ;;  %v5655_v20 = vld [vmem:[#allocation2 + $0x60] sm:$0xff] }
 0xe13   : > { %5207 = vst.msk [vmem:[#allocation2 + $0xe0] sm:$0xff] %vm1720_vm8, %v5188_v22 }
 0xe16   : > { %5527 = vrot.lane.b32.xlu2 %v10797_v36, %s9357_s3  ;;  %5327 = vrot.lane.b32.xlu1 %v10753_v35, %s11844_s0 }
 0xe17   : > { %5431 = vrot.lane.b32.xlu0 %v10797_v36, %s9355_s21 }
 0xe18   : > { %v5570_v2 = vpop.permute.xlu1 %5569  ;;  %v5332_v23 = vpop.permute.xlu2 %5331 }
 0xe19   : > { %v5234_v47 = vpop.permute.xlu0 %5233  ;;  %5590 = vst.msk [vmem:[#allocation2 + $0x2d8] sm:$0xff] %vm1720_vm8, %v5570_v2  ;;  %v5654_v2 = vld [vmem:[#allocation2 + $0x58] sm:$0xff] }
 0xe1a   : > { %5254 = vst.msk [vmem:[#allocation2 + $0x118] sm:$0xff] %vm1720_vm8, %v5234_v47 }
 0xe1b   : > { %5351 = vst.msk [vmem:[#allocation2 + $0x1a0] sm:$0xff] %vm1720_vm8, %v5332_v23 }
 0xe1e   : > { %5621 = vrot.lane.b32.xlu2 %v10786_v58, %s11854_s20  ;;  %5619 = vrot.lane.b32.xlu1 %v10775_v55, %s11854_s20 }
 0xe1f   : > { %5323 = vrot.lane.b32.xlu0 %v10731_v50, %s11844_s0 }
 0xe20   : > { %v5284_v41 = vpop.permute.xlu1 %5283  ;;  %v5286_v24 = vpop.permute.xlu2 %5285 }
 0xe21   : > { %v5378_v25 = vpop.permute.xlu0 %5377  ;;  %5303 = vst.msk [vmem:[#allocation2 + $0x160] sm:$0xff] %vm1720_vm8, %v5284_v41 }
 0xe22   : > { %5398 = vst.msk [vmem:[#allocation2 + $0x1d8] sm:$0xff] %vm1720_vm8, %v5378_v25 }
 0xe23   : > { %5304 = vst.msk [vmem:[#allocation2 + $0x168] sm:$0xff] %vm1720_vm8, %v5286_v24  ;;  %v5653_v24 = vld [vmem:[#allocation2 + $0x50] sm:$0xff] }
 0xe26   : > { %5427 = vrot.lane.b32.xlu2 %v10775_v55, %s9355_s21  ;;  %5325 = vrot.lane.b32.xlu1 %v10742_v51, %s11844_s0 }
 0xe27   : > { %5429 = vrot.lane.b32.xlu0 %v10786_v58, %s9355_s21 }
 0xe28   : > { %v5236_v26 = vpop.permute.xlu1 %5235  ;;  %v5238_v27 = vpop.permute.xlu2 %5237  ;;  %v5687_v62 = vld [vmem:[#allocation2 + $0x160] sm:$0xff] }
 0xe29   : > { %5255 = vst.msk [vmem:[#allocation2 + $0x120] sm:$0xff] %vm1720_vm8, %v5236_v26  ;;  %v5140_v49 = vpop.permute.xlu0 %5139  ;;  %v5752_v26 = vpack.c.bf16 %v5654_v2, %v5653_v24  ;;  %v8618_v2 = vld [vmem:[%s11869_s25 + $0x1c] sm:$0xf0] }
 0xe2a   : > { %5159 = vst.msk [vmem:[#allocation2 + $0xa0] sm:$0xff] %vm1720_vm8, %v5140_v49  ;;  %v5652_v49 = vld [vmem:[#allocation2 + $0x48] sm:$0xff] }
 0xe2b   : > { %5256 = vst.msk [vmem:[#allocation2 + $0x128] sm:$0xff] %vm1720_vm8, %v5238_v27 }
 0xe2e   : > { %5525 = vrot.lane.b32.xlu2 %v10786_v58, %s9357_s3  ;;  %5523 = vrot.lane.b32.xlu1 %v10775_v55, %s9357_s3 }
 0xe2f   : > { %5615 = vrot.lane.b32.xlu0 %v10753_v35, %s11854_s20 }
 0xe30   : > { %v5476_v28 = vpop.permute.xlu1 %5475  ;;  %v5478_v29 = vpop.permute.xlu2 %5477  ;;  %v5679_v0 = vld [vmem:[#allocation2 + $0x120] sm:$0xff] }
 0xe31   : > { %5495 = vst.msk [vmem:[#allocation2 + $0x260] sm:$0xff] %vm1720_vm8, %v5476_v28  ;;  %v5380_v30 = vpop.permute.xlu0 %5379  ;;  %v5671_v28 = vld [vmem:[#allocation2 + $0xe0] sm:$0xff] }
 0xe32   : > { %5399 = vst.msk [vmem:[#allocation2 + $0x1e0] sm:$0xff] %vm1720_vm8, %v5380_v30 }
 0xe33   : > { %5496 = vst.msk [vmem:[#allocation2 + $0x268] sm:$0xff] %vm1720_vm8, %v5478_v29  ;;  %v5651_v29 = vld [vmem:[#allocation2 + $0x40] sm:$0xff] }
 0xe36   : > { %5385 = vrot.lane.b32.xlu2 %v10808_v60, %s9361_s7  ;;  %5617 = vrot.lane.b32.xlu1 %v10764_v53, %s11854_s20 }
 0xe37   : > { %5425 = vrot.lane.b32.xlu0 %v10764_v53, %s9355_s21 }
 0xe38   : > { %v5142_v43 = vpop.permute.xlu1 %5141  ;;  %v5192_v31 = vpop.permute.xlu2 %5191 }
 0xe39   : > { %v5572_v54 = vpop.permute.xlu0 %5571  ;;  %5160 = vst.msk [vmem:[#allocation2 + $0xa8] sm:$0xff] %vm1720_vm8, %v5142_v43  ;;  %v5751_v43 = vpack.c.bf16 %v5652_v49, %v5651_v29 }
 0xe3a   : > { %5591 = vst.msk [vmem:[#allocation2 + $0x2e0] sm:$0xff] %vm1720_vm8, %v5572_v54 }
 0xe3b   : > { %5209 = vst.msk [vmem:[#allocation2 + $0xf0] sm:$0xff] %vm1720_vm8, %v5192_v31  ;;  %v5670_v31 = vld [vmem:[#allocation2 + $0xd8] sm:$0xff] }
 0xe3e   : > { %5481 = vrot.lane.b32.xlu2 %v10808_v60, %s9356_s29  ;;  %5577 = vrot.lane.b32.xlu1 %v10808_v60, %s11853_s22 }
 0xe3f   : > { %5337 = vrot.lane.b32.xlu0 %v10808_v60, %s11844_s0 }
 0xe40   : > { %v5382_v15 = vpop.permute.xlu1 %5381  ;;  %v5144_v33 = vpop.permute.xlu2 %5143 }
 0xe41   : > { %5400 = vst.msk [vmem:[#allocation2 + $0x1e8] sm:$0xff] %vm1720_vm8, %v5382_v15  ;;  %v5094_v34 = vpop.permute.xlu0 %5093 }
 0xe42   : > { %5112 = vst.msk [vmem:[#allocation2 + $0x68] sm:$0xff] %vm1720_vm8, %v5094_v34  ;;  %v5673_v47 = vld [vmem:[#allocation2 + $0xf0] sm:$0xff] }
 0xe43   : > { %5161 = vst.msk [vmem:[#allocation2 + $0xb0] sm:$0xff] %vm1720_vm8, %v5144_v33  ;;  %v5650_v33 = vld [vmem:[#allocation2 + $0x38] sm:$0xff] }
 0xe46   : > { %5423 = vrot.lane.b32.xlu2 %v10753_v35, %s9355_s21  ;;  %5519 = vrot.lane.b32.xlu1 %v10753_v35, %s9357_s3 }
 0xe47   : > { %5625 = vrot.lane.b32.xlu0 %v10808_v60, %s11854_s20 }
 0xe48   : > { %v5574_v44 = vpop.permute.xlu1 %5573  ;;  %v5336_v45 = vpop.permute.xlu2 %5335 }
 0xe49   : > { %5592 = vst.msk [vmem:[#allocation2 + $0x2e8] sm:$0xff] %vm1720_vm8, %v5574_v44  ;;  %v5190_v32 = vpop.permute.xlu0 %5189  ;;  %v5656_v19 = vld [vmem:[#allocation2 + $0x68] sm:$0xff]  ;;  %v5669_v44 = vld [vmem:[#allocation2 + $0xd0] sm:$0xff] }
 0xe4a   : > { %5208 = vst.msk [vmem:[#allocation2 + $0xe8] sm:$0xff] %vm1720_vm8, %v5190_v32  ;;  %v5753_v21 = vpack.c.bf16 %v5656_v19, %v5655_v20  ;;  %v5760_v32 = vpack.c.bf16 %v5670_v31, %v5669_v44  ;;  %v5677_v19 = vld [vmem:[#allocation2 + $0x110] sm:$0xff] }
 0xe4b   : > { %5353 = vst.msk [vmem:[#allocation2 + $0x1b0] sm:$0xff] %vm1720_vm8, %v5336_v45  ;;  %v5649_v45 = vld [vmem:[#allocation2 + $0x30] sm:$0xff] }
 0xe4c   : > { %v8644_v44 = vld [vmem:[%s11869_s25 + $0x38] sm:$0xf] }
 0xe4e   : > { %5521 = vrot.lane.b32.xlu2 %v10764_v53, %s9357_s3  ;;  %5433 = vrot.lane.b32.xlu1 %v10808_v60, %s9355_s21 }
 0xe4f   : > { %5529 = vrot.lane.b32.xlu0 %v10808_v60, %s9357_s3  ;;  %v5039_v60 = vld [vmem:[%s11868_s17 + $0x28] sm:$0xff] }
 0xe50   : > { %v5288_v48 = vpop.permute.xlu1 %5287  ;;  %v5470_v8 = vpop.permute.xlu2 %5469 }
 0xe51   : > { %v5334_v5 = vpop.permute.xlu0 %5333  ;;  %5305 = vst.msk [vmem:[#allocation2 + $0x170] sm:$0xff] %vm1720_vm8, %v5288_v48  ;;  %v5672_v27 = vld [vmem:[#allocation2 + $0xe8] sm:$0xff]  ;;  %v5750_v48 = vpack.c.bf16 %v5650_v33, %v5649_v45  ;;  %v5703_v33 = vld [vmem:[#allocation2 + $0x1e0] sm:$0xff] }
 0xe52   : > { %5352 = vst.msk [vmem:[#allocation2 + $0x1a8] sm:$0xff] %vm1720_vm8, %v5334_v5  ;;  %v5761_v30 = vpack.c.bf16 %v5672_v27, %v5671_v28  ;;  %v5668_v5 = vld [vmem:[#allocation2 + $0xc8] sm:$0xff] }
 0xe53   : > { %5492 = vst.msk [vmem:[#allocation2 + $0x248] sm:$0xff] %vm1720_vm8, %v5470_v8  ;;  %v5667_v8 = vld [vmem:[#allocation2 + $0xc0] sm:$0xff]  ;;  %v9052_v45 = vld [vmem:[%s11869_s25 + $0x50] sm:$0xf0] }
 0xe56   : > { %5419 = vrot.lane.b32.xlu2 %v10731_v50, %s9355_s21  ;;  %5613 = vrot.lane.b32.xlu1 %v10742_v51, %s11854_s20 }
 0xe57   : > { %5611 = vrot.lane.b32.xlu0 %v10731_v50, %s11854_s20 }
 0xe58   : > { %v5384_v52 = vpop.permute.xlu1 %5383  ;;  %v5290_v35 = vpop.permute.xlu2 %5289  ;;  %v5689_v57 = vld [vmem:[#allocation2 + $0x170] sm:$0xff] }
 0xe59   : > { %5401 = vst.msk [vmem:[#allocation2 + $0x1f0] sm:$0xff] %vm1720_vm8, %v5384_v52  ;;  %v5096_v37 = vpop.permute.xlu0 %5095  ;;  %v5648_v52 = vld [vmem:[#allocation2 + $0x28] sm:$0xff] }
 0xe5a   : > { %5113 = vst.msk [vmem:[#allocation2 + $0x70] sm:$0xff] %vm1720_vm8, %v5096_v37  ;;  %v5759_v37 = vpack.c.bf16 %v5668_v5, %v5667_v8  ;;  %v8645_v5 = vor.u32 %v9052_v45, %v8644_v44  ;;  %v5734_v45 = vld [vmem:[#allocation2 + $0x2d8] sm:$0xff] }
 0xe5b   : > { %5306 = vst.msk [vmem:[#allocation2 + $0x178] sm:$0xff] %vm1720_vm8, %v5290_v35  ;;  %v5647_v35 = vld [vmem:[#allocation2 + $0x20] sm:$0xff] }
 0xe5e   : > { %5517 = vrot.lane.b32.xlu2 %v10742_v51, %s9357_s3  ;;  %5515 = vrot.lane.b32.xlu1 %v10731_v50, %s9357_s3  ;;  %v5688_v50 = vld [vmem:[#allocation2 + $0x168] sm:$0xff] }
 0xe5f   : > { %5421 = vrot.lane.b32.xlu0 %v10742_v51, %s9355_s21  ;;  %v5769_v51 = vpack.c.bf16 %v5688_v50, %v5687_v62 }
 0xe60   : > { %v5480_v53 = vpop.permute.xlu1 %5479  ;;  %v5624_v55 = vpop.permute.xlu2 %5623 }
 0xe61   : > { %5497 = vst.msk [vmem:[#allocation2 + $0x270] sm:$0xff] %vm1720_vm8, %v5480_v53  ;;  %v5240_v56 = vpop.permute.xlu0 %5239  ;;  %v5657_v11 = vld [vmem:[#allocation2 + $0x70] sm:$0xff]  ;;  %v5749_v53 = vpack.c.bf16 %v5648_v52, %v5647_v35 }
 0xe62   : > { %5257 = vst.msk [vmem:[#allocation2 + $0x130] sm:$0xff] %vm1720_vm8, %v5240_v56  ;;  %v5690_v58 = vld [vmem:[#allocation2 + $0x178] sm:$0xff]  ;;  %v5701_v52 = vld [vmem:[#allocation2 + $0x1d0] sm:$0xff] }
 0xe63   : > { %5641 = vst.msk [vmem:[#allocation2 + $0x330] sm:$0xff] %vm1720_vm8, %v5624_v55  ;;  %v5770_v36 = vpack.c.bf16 %v5690_v58, %v5689_v57  ;;  %v5646_v57 = vld [vmem:[#allocation2 + $0x18] sm:$0xff] }
 0xe65   : > { %6049 = vmatpush.bf16.msra.mxu2 %v5770_v36  ;;  %v5665_v36 = vld [vmem:[#allocation2 + $0xb0] sm:$0xff] }
 0xe66   : > { %5831 = vperm.xlu2 %9218, %v5040_v59   ;;  %5826 = vperm.xlu1 %9217, %v5039_v60   ;;  %v5645_v60 = vld [vmem:[#allocation2 + $0x10] sm:$0xff] }
 0xe67   : > { %5821 = vperm.xlu0 %9216, %v5038_v61  }
 0xe68   : > { %v5330_v63 = vpop.permute.xlu2 %5329  ;;  %v5098_v38 = vpop.permute.xlu1 %5097  ;;  %v5721_v35 = vld [vmem:[#allocation2 + $0x270] sm:$0xff] }
 0xe69   : > { %6050 = vmatpush.bf16.msra.mxu2 %v5769_v51  ;;  %v5576_v1 = vpop.permute.xlu0 %5575  ;;  %5350 = vst.msk [vmem:[#allocation2 + $0x198] sm:$0xff] %vm1720_vm8, %v5330_v63  ;;  %v5681_v62 = vld [vmem:[#allocation2 + $0x130] sm:$0xff]  ;;  %v5748_v51 = vpack.c.bf16 %v5646_v57, %v5645_v60  ;;  %v5700_v57 = vld [vmem:[#allocation2 + $0x1c8] sm:$0xff] }
 0xe6a   : > { %5593 = vst.msk [vmem:[#allocation2 + $0x2f0] sm:$0xff] %vm1720_vm8, %v5576_v1  ;;  %v5680_v1 = vld [vmem:[#allocation2 + $0x128] sm:$0xff]  ;;  %v9049_v60 = vld [vmem:[%s11869_s25 + $0x3c] sm:$0xf] }
 0xe6b   : > { %5114 = vst.msk [vmem:[#allocation2 + $0x78] sm:$0xff] %vm1720_vm8, %v5098_v38  ;;  %v5664_v38 = vld [vmem:[#allocation2 + $0xa8] sm:$0xff] }
 0xe6d   : > { %6051 = vmatpush.bf16.msra.mxu2 %v5768_v4  ;;  %v5663_v4 = vld [vmem:[#allocation2 + $0xa0] sm:$0xff] }
 0xe6e   : > { %5806 = vperm.xlu2 %9218, %v5035_v6   ;;  %5801 = vperm.xlu1 %9217, %v5034_v10   ;;  %v8616_v6 = vld [vmem:[%s11869_s25] sm:$0xf]  ;;  %v9045_v10 = vld [vmem:[%s11869_s25 + $0x18] sm:$0xf0]  ;;  %v5757_v39 = vpack.c.bf16 %v5664_v38, %v5663_v4 }
 0xe6f   : > { %5836 = vperm.xlu0 %9216, %v5041_v7   ;;  %v5643_v7 = vld [vmem:[#allocation2] sm:$0xff] }
 0xe70   : > { %v5528_v13 = vpop.permute.xlu2 %5527  ;;  %v5468_v9 = vpop.permute.xlu1 %5467  ;;  %v5747_v3 = vpack.c.bf16 %v5644_v40, %v5643_v7  ;;  %v5717_v40 = vld [vmem:[#allocation2 + $0x250] sm:$0xff] }
 0xe71   : > { %6052 = vmatpush.bf16.msra.mxu2 %v5767_v12  ;;  %5545 = vst.msk [vmem:[#allocation2 + $0x2b0] sm:$0xff] %vm1720_vm8, %v5528_v13  ;;  %v5194_v14 = vpop.permute.xlu0 %5193  ;;  %v5765_v12 = vpack.c.bf16 %v5680_v1, %v5679_v0  ;;  %v5661_v13 = vld [vmem:[#allocation2 + $0x90] sm:$0xff]  ;;  %v5718_v0 = vld [vmem:[#allocation2 + $0x258] sm:$0xff] }
 0xe72   : > { %5210 = vst.msk [vmem:[#allocation2 + $0xf8] sm:$0xff] %vm1720_vm8, %v5194_v14  ;;  %v5658_v16 = vld [vmem:[#allocation2 + $0x78] sm:$0xff]  ;;  %v5784_v7 = vpack.c.bf16 %v5718_v0, %v5717_v40 }
 0xe73   : > { %5491 = vst.msk [vmem:[#allocation2 + $0x240] sm:$0xff] %vm1720_vm8, %v5468_v9  ;;  %v5754_v17 = vpack.c.bf16 %v5658_v16, %v5657_v11  ;;  %v5662_v9 = vld [vmem:[#allocation2 + $0x98] sm:$0xff]  ;;  %v8617_v16 = vor.u32 %v9045_v10, %v8616_v6 }
 0xe75   : > { %5991 = vmatpush.bf16.msrb.mxu3 %v5754_v17  ;;  %v5678_v17 = vld [vmem:[#allocation2 + $0x118] sm:$0xff] }
 0xe76   : > { %5816 = vperm.xlu1 %9217, %v5037_v18   ;;  %v5764_v20 = vpack.c.bf16 %v5678_v17, %v5677_v19  ;;  %v8680_v19 = vld [vmem:[%s11869_s25 + $0x78] sm:$0xf] }
 0xe77   : > { %5811 = vperm.xlu0 %9216, %v5036_v42   ;;  %v5756_v42 = vpack.c.bf16 %v5662_v9, %v5661_v13  ;;  %v9059_v13 = vld [vmem:[%s11869_s25 + $0x88] sm:$0xf0] }
 0xe78   : > { %v5622_v22 = vpop.permute.xlu2 %5621  ;;  %v5566_v46 = vpop.permute.xlu1 %5565 }
 0xe79   : > { %5992 = vmatpush.bf16.msrb.mxu3 %v5753_v21  ;;  %5640 = vst.msk [vmem:[#allocation2 + $0x328] sm:$0xff] %vm1720_vm8, %v5622_v22  ;;  %v5564_v23 = vpop.permute.xlu0 %5563  ;;  %v5674_v41 = vld [vmem:[#allocation2 + $0xf8] sm:$0xff]  ;;  %v5660_v21 = vld [vmem:[#allocation2 + $0x88] sm:$0xff] }
 0xe7a   : > { %5587 = vst.msk [vmem:[#allocation2 + $0x2c0] sm:$0xff] %vm1720_vm8, %v5564_v23  ;;  %v5762_v25 = vpack.c.bf16 %v5674_v41, %v5673_v47  ;;  %v5676_v22 = vld [vmem:[#allocation2 + $0x108] sm:$0xff]  ;;  %v5659_v23 = vld [vmem:[#allocation2 + $0x80] sm:$0xff]  ;;  %v9046_v41 = vld [vmem:[%s11869_s25 + $0x20] sm:$0xf0] }
 0xe7b   : > { %5588 = vst.msk [vmem:[#allocation2 + $0x2c8] sm:$0xff] %vm1720_vm8, %v5566_v46  ;;  %v9042_v46 = vld [vmem:[%s11869_s25 + $0x4] sm:$0xf]  ;;  %v8624_v47 = vld [vmem:[%s11869_s25 + $0x8] sm:$0xf]  ;;  %v5755_v24 = vpack.c.bf16 %v5660_v21, %v5659_v23 }
 0xe7c   : > { %6020 = vmatpush.bf16.msrb.mxu0 %v5762_v25  ;;  %v5675_v25 = vld [vmem:[#allocation2 + $0x100] sm:$0xff]  ;;  %v8621_v27 = vor.u32 %v9042_v46, %v8618_v2  ;;  %v8625_v29 = vor.u32 %v9046_v41, %v8624_v47  ;;  %v5697_v47 = vld [vmem:[#allocation2 + $0x1b0] sm:$0xff] }
 0xe7d   : > { %5993 = vmatpush.bf16.msrb.mxu3 %v5752_v26  ;;  %v5763_v26 = vpack.c.bf16 %v5676_v22, %v5675_v25  ;;  %v5737_v25 = vld [vmem:[#allocation2 + $0x2f0] sm:$0xff] }
 0xe80   : > { %6021 = vmatpush.bf16.msrb.mxu0 %v5761_v30  ;;  %v5428_v54 = vpop.permute.xlu2 %5427  ;;  %v5242_v15 = vpop.permute.xlu1 %5241  ;;  %v5705_v30 = vld [vmem:[#allocation2 + $0x1f0] sm:$0xff] }
 0xe81   : > { %5994 = vmatpush.bf16.msrb.mxu3 %v5751_v43  ;;  %5447 = vst.msk [vmem:[#allocation2 + $0x220] sm:$0xff] %vm1720_vm8, %v5428_v54  ;;  %v5146_v34 = vpop.permute.xlu0 %5145 }
 0xe82   : > { %5162 = vst.msk [vmem:[#allocation2 + $0xb8] sm:$0xff] %vm1720_vm8, %v5146_v34 }
 0xe83   : > { %5258 = vst.msk [vmem:[#allocation2 + $0x138] sm:$0xff] %vm1720_vm8, %v5242_v15  ;;  %v5704_v15 = vld [vmem:[#allocation2 + $0x1e8] sm:$0xff] }
 0xe84   : > { %6022 = vmatpush.bf16.msrb.mxu0 %v5760_v32  ;;  %v5777_v34 = vpack.c.bf16 %v5704_v15, %v5703_v33  ;;  %v5702_v32 = vld [vmem:[#allocation2 + $0x1d8] sm:$0xff] }
 0xe85   : > { %5995 = vmatpush.bf16.msrb.mxu3 %v5750_v48 }
 0xe88   : > { %6023 = vmatpush.bf16.msrb.mxu0 %v5759_v37  ;;  %v5526_v55 = vpop.permute.xlu2 %5525  ;;  %v5328_v56 = vpop.permute.xlu1 %5327 }
 0xe89   : > { %5996 = vmatpush.bf16.msrb.mxu3 %v5749_v53  ;;  %5544 = vst.msk [vmem:[#allocation2 + $0x2a8] sm:$0xff] %vm1720_vm8, %v5526_v55  ;;  %v5432_v58 = vpop.permute.xlu0 %5431  ;;  %v5666_v59 = vld [vmem:[#allocation2 + $0xb8] sm:$0xff]  ;;  %v5776_v55 = vpack.c.bf16 %v5702_v32, %v5701_v52  ;;  %v5733_v52 = vld [vmem:[#allocation2 + $0x2d0] sm:$0xff] }
 0xe8a   : > { %5449 = vst.msk [vmem:[#allocation2 + $0x230] sm:$0xff] %vm1720_vm8, %v5432_v58  ;;  %v5758_v61 = vpack.c.bf16 %v5666_v59, %v5665_v36  ;;  %v5682_v50 = vld [vmem:[#allocation2 + $0x138] sm:$0xff]  ;;  %v5719_v58 = vld [vmem:[#allocation2 + $0x260] sm:$0xff]  ;;  %v5720_v36 = vld [vmem:[#allocation2 + $0x268] sm:$0xff] }
 0xe8b   : > { %5349 = vst.msk [vmem:[#allocation2 + $0x190] sm:$0xff] %vm1720_vm8, %v5328_v56  ;;  %v5766_v63 = vpack.c.bf16 %v5682_v50, %v5681_v62  ;;  %v5699_v59 = vld [vmem:[#allocation2 + $0x1c0] sm:$0xff]  ;;  %v5785_v50 = vpack.c.bf16 %v5720_v36, %v5719_v58 }
 0xe8c   : > { %6024 = vmatpush.bf16.msrb.mxu0 %v5758_v61  ;;  %v8646_v61 = vld [vmem:[%s11869_s25 + $0x54] sm:$0xf0]  ;;  %v5775_v62 = vpack.c.bf16 %v5700_v57, %v5699_v59  ;;  %v9063_v36 = vld [vmem:[%s11869_s25 + $0xac] sm:$0xf]  ;;  %v8702_v59 = vld [vmem:[%s11869_s25 + $0xc4] sm:$0xf0] }
 0xe8d   : > { %5997 = vmatpush.bf16.msrb.mxu3 %v5748_v51  ;;  %6053 = vmatpush.bf16.msra.mxu2 %v5766_v63  ;;  %v8652_v51 = vld [vmem:[%s11869_s25 + $0x40] sm:$0xf]  ;;  %v9053_v63 = vld [vmem:[%s11869_s25 + $0x58] sm:$0xf0]  ;;  %v8649_v38 = vor.u32 %v9049_v60, %v8646_v61  ;;  %v5744_v60 = vld [vmem:[#allocation2 + $0x328] sm:$0xff]  ;;  %v8705_v40 = vor.u32 %v9063_v36, %v8702_v59 }
 0xe8e   : > { %v8653_v6 = vor.u32 %v9053_v63, %v8652_v51  ;;  %v8708_v61 = vld [vmem:[%s11869_s25 + $0xb0] sm:$0xf]  ;;  %v8660_v59 = vld [vmem:[%s11869_s25 + $0x48] sm:$0xf] }
 0xe90   : > { %6025 = vmatpush.bf16.msrb.mxu0 %v5757_v39  ;;  %v5386_v14 = vpop.permute.xlu2 %5385  ;;  %v5620_v11 = vpop.permute.xlu1 %5619  ;;  %v5715_v39 = vld [vmem:[#allocation2 + $0x240] sm:$0xff] }
 0xe91   : > { %5998 = vmatpush.bf16.msrb.mxu3 %v5747_v3  ;;  %6054 = vmatpush.bf16.msra.mxu2 %v5765_v12  ;;  %5402 = vst.msk [vmem:[#allocation2 + $0x1f8] sm:$0xff] %vm1720_vm8, %v5386_v14  ;;  %v5324_v18 = vpop.permute.xlu0 %5323  ;;  %v5716_v3 = vld [vmem:[#allocation2 + $0x248] sm:$0xff] }
 0xe92   : > { %5347 = vst.msk [vmem:[#allocation2 + $0x180] sm:$0xff] %vm1720_vm8, %v5324_v18  ;;  %v8672_v12 = vld [vmem:[%s11869_s25 + $0x70] sm:$0xf]  ;;  %v5783_v9 = vpack.c.bf16 %v5716_v3, %v5715_v39  ;;  %v9056_v18 = vld [vmem:[%s11869_s25 + $0x74] sm:$0xf]  ;;  %v5693_v44 = vld [vmem:[#allocation2 + $0x190] sm:$0xff] }
 0xe93   : > { %5639 = vst.msk [vmem:[#allocation2 + $0x320] sm:$0xff] %vm1720_vm8, %v5620_v11  ;;  %v5729_v3 = vld [vmem:[#allocation2 + $0x2b0] sm:$0xff] }
 0xe94   : > { %5999 = vmatmul.bf16.vlgmr.msrb.gmra.mxu3 %v8617_v16  ;;  %6026 = vmatpush.bf16.msrb.mxu0 %v5756_v42  ;;  %v8673_v16 = vor.u32 %v9059_v13, %v8672_v12  ;;  %v8674_v42 = vld [vmem:[%s11869_s25 + $0x8c] sm:$0xf0] }
 0xe95   : > { %6055 = vmatpush.bf16.msra.mxu2 %v5764_v20  ;;  %v9060_v20 = vld [vmem:[%s11869_s25 + $0x90] sm:$0xf0]  ;;  %v8677_v21 = vor.u32 %v9056_v18, %v8674_v42  ;;  %v9043_v18 = vld [vmem:[%s11869_s25 + $0xc] sm:$0xf]  ;;  %v8626_v42 = vld [vmem:[%s11869_s25 + $0x24] sm:$0xf0] }
 0xe96   : > { %v8681_v2 = vor.u32 %v9060_v20, %v8680_v19  ;;  %v5728_v20 = vld [vmem:[#allocation2 + $0x2a8] sm:$0xff] }
 0xe98   : > { %6027 = vmatpush.bf16.msrb.mxu0 %v5755_v24  ;;  %v5482_v49 = vpop.permute.xlu2 %5481  ;;  %v5326_v28 = vpop.permute.xlu1 %5325  ;;  %v5706_v43 = vld [vmem:[#allocation2 + $0x1f8] sm:$0xff] }
 0xe99   : > { %6056 = vmatpush.bf16.msra.mxu2 %v5763_v26  ;;  %5498 = vst.msk [vmem:[#allocation2 + $0x278] sm:$0xff] %vm1720_vm8, %v5482_v49  ;;  %v5430_v31 = vpop.permute.xlu0 %5429  ;;  %v5778_v54 = vpack.c.bf16 %v5706_v43, %v5705_v30  ;;  %v5696_v49 = vld [vmem:[#allocation2 + $0x1a8] sm:$0xff]  ;;  %v8700_v30 = vld [vmem:[%s11869_s25 + $0xa8] sm:$0xf]  ;;  %v9066_v43 = vld [vmem:[%s11869_s25 + $0xc0] sm:$0xf0] }
 0xe9a   : > { %5448 = vst.msk [vmem:[#allocation2 + $0x228] sm:$0xff] %vm1720_vm8, %v5430_v31  ;;  %v5743_v57 = vld [vmem:[#allocation2 + $0x320] sm:$0xff] }
 0xe9b   : > { %5348 = vst.msk [vmem:[#allocation2 + $0x188] sm:$0xff] %vm1720_vm8, %v5326_v28  ;;  %6028 = vmatmul.bf16.vlgmr.msrb.gmra.mxu0 %v8621_v27  ;;  %6078 = vmatpush.bf16.msra.mxu3 %v5778_v54  ;;  %v5736_v28 = vld [vmem:[#allocation2 + $0x2e8] sm:$0xff]  ;;  %v5735_v54 = vld [vmem:[#allocation2 + $0x2e0] sm:$0xff]  ;;  %v5797_v51 = vpack.c.bf16 %v5744_v60, %v5743_v57  ;;  %v9054_v60 = vld [vmem:[%s11869_s25 + $0x60] sm:$0xf0] }
 0xe9c   : > { %6057 = vmatmul.bf16.vlgmr.msra.gmra.mxu2 %v8625_v29  ;;  %v5695_v29 = vld [vmem:[#allocation2 + $0x1a0] sm:$0xff]  ;;  %v5793_v15 = vpack.c.bf16 %v5736_v28, %v5735_v54  ;;  %v8634_v54 = vld [vmem:[%s11869_s25 + $0x2c] sm:$0xf0] }
 0xe9d   : > { %v5773_v31 = vpack.c.bf16 %v5696_v49, %v5695_v29  ;;  %v8640_v29 = vld [vmem:[%s11869_s25 + $0x18] sm:$0xf]  ;;  %v9051_v57 = vld [vmem:[%s11869_s25 + $0x4c] sm:$0xf] }
 0xe9f   : > { %6079 = vmatpush.bf16.msra.mxu3 %v5777_v34  ;;  %v8701_v34 = vor.u32 %v9066_v43, %v8700_v30  ;;  %v9048_v30 = vld [vmem:[%s11869_s25 + $0x30] sm:$0xf0]  ;;  %v8632_v43 = vld [vmem:[%s11869_s25 + $0x10] sm:$0xf] }
 0xea0   : > { %v5424_v48 = vpop.permute.xlu2 %5423  ;;  %v5524_v8 = vpop.permute.xlu1 %5523  ;;  %v5722_v37 = vld [vmem:[#allocation2 + $0x278] sm:$0xff] }
 0xea1   : > { %5445 = vst.msk [vmem:[#allocation2 + $0x210] sm:$0xff] %vm1720_vm8, %v5424_v48  ;;  %v5616_v53 = vpop.permute.xlu0 %5615  ;;  %v5786_v56 = vpack.c.bf16 %v5722_v37, %v5721_v35  ;;  %v5745_v48 = vld [vmem:[#allocation2 + $0x330] sm:$0xff] }
 0xea2   : > { %5637 = vst.msk [vmem:[#allocation2 + $0x310] sm:$0xff] %vm1720_vm8, %v5616_v53  ;;  %v5792_v53 = vpack.c.bf16 %v5734_v45, %v5733_v52  ;;  %v5692_v58 = vld [vmem:[#allocation2 + $0x188] sm:$0xff] }
 0xea3   : > { %5543 = vst.msk [vmem:[#allocation2 + $0x2a0] sm:$0xff] %vm1720_vm8, %v5524_v8  ;;  %6080 = vmatpush.bf16.msra.mxu3 %v5776_v55  ;;  %6107 = vmatpush.bf16.msra.mxu0 %v5786_v56  ;;  %v5731_v55 = vld [vmem:[#allocation2 + $0x2c0] sm:$0xff]  ;;  %v5732_v56 = vld [vmem:[#allocation2 + $0x2c8] sm:$0xff] }
 0xea4   : > { %6004 = vmatmul.bf16.gmra.mxu3 %v8645_v5  ;;  %v5694_v5 = vld [vmem:[#allocation2 + $0x198] sm:$0xff] }
 0xea5   : > { %v5772_v37 = vpack.c.bf16 %v5694_v5, %v5693_v44  ;;  %v9047_v44 = vld [vmem:[%s11869_s25 + $0x28] sm:$0xf0] }
 0xea6   : > { %v8633_v52 = vor.u32 %v9047_v44, %v8632_v43 }
 0xea7   : > { %6081 = vmatpush.bf16.msra.mxu3 %v5775_v62  ;;  %6108 = vmatpush.bf16.msra.mxu0 %v5785_v50  ;;  %v9067_v62 = vld [vmem:[%s11869_s25 + $0xc8] sm:$0xf0] }
 0xea8   : > { %v5522_v1 = vpop.permute.xlu2 %5521  ;;  %v5618_v4 = vpop.permute.xlu1 %5617  ;;  %v5691_v50 = vld [vmem:[#allocation2 + $0x180] sm:$0xff] }
 0xea9   : > { %5542 = vst.msk [vmem:[#allocation2 + $0x298] sm:$0xff] %vm1720_vm8, %v5522_v1  ;;  %v5426_v10 = vpop.permute.xlu0 %5425  ;;  %v5771_v63 = vpack.c.bf16 %v5692_v58, %v5691_v50  ;;  %v8709_v1 = vor.u32 %v9067_v62, %v8708_v61  ;;  %v8662_v58 = vld [vmem:[%s11869_s25 + $0x64] sm:$0xf0]  ;;  %v8661_v62 = vor.u32 %v9054_v60, %v8660_v59  ;;  %v9057_v50 = vld [vmem:[%s11869_s25 + $0x7c] sm:$0xf] }
 0xeaa   : > { %5446 = vst.msk [vmem:[#allocation2 + $0x218] sm:$0xff] %vm1720_vm8, %v5426_v10  ;;  %v8665_v61 = vor.u32 %v9051_v57, %v8662_v58 }
 0xeab   : > { %5638 = vst.msk [vmem:[#allocation2 + $0x318] sm:$0xff] %vm1720_vm8, %v5618_v4  ;;  %6033 = vmatmul.bf16.gmra.mxu0 %v8649_v38  ;;  %v5791_v38 = vpack.c.bf16 %v5732_v56, %v5731_v55  ;;  %v5713_v4 = vld [vmem:[#allocation2 + $0x230] sm:$0xff]  ;;  %v8668_v55 = vld [vmem:[%s11869_s25 + $0x50] sm:$0xf]  ;;  %v9055_v56 = vld [vmem:[%s11869_s25 + $0x68] sm:$0xf0] }
 0xeac   : > { %6062 = vmatmul.bf16.gmra.mxu2 %v8653_v6  ;;  %6109 = vmatpush.bf16.msra.mxu0 %v5784_v7  ;;  %v8669_v36 = vor.u32 %v9055_v56, %v8668_v55 }
 0xeb0   : > { %6110 = vmatpush.bf16.msra.mxu0 %v5783_v9  ;;  %v5420_v14 = vpop.permute.xlu2 %5419  ;;  %v5578_v11 = vpop.permute.xlu1 %5577  ;;  %v5741_v9 = vld [vmem:[#allocation2 + $0x310] sm:$0xff] }
 0xeb1   : > { %5443 = vst.msk [vmem:[#allocation2 + $0x200] sm:$0xff] %vm1720_vm8, %v5420_v14  ;;  %v5338_v17 = vpop.permute.xlu0 %5337 }
 0xeb2   : > { %5354 = vst.msk [vmem:[#allocation2 + $0x1b8] sm:$0xff] %vm1720_vm8, %v5338_v17  ;;  %v5742_v10 = vld [vmem:[#allocation2 + $0x318] sm:$0xff]  ;;  %v5711_v17 = vld [vmem:[#allocation2 + $0x220] sm:$0xff] }
 0xeb3   : > { %5594 = vst.msk [vmem:[#allocation2 + $0x2f8] sm:$0xff] %vm1720_vm8, %v5578_v11  ;;  %v5796_v14 = vpack.c.bf16 %v5742_v10, %v5741_v9  ;;  %v5712_v11 = vld [vmem:[#allocation2 + $0x228] sm:$0xff]  ;;  %v9061_v10 = vld [vmem:[%s11869_s25 + $0x98] sm:$0xf0]  ;;  %v8724_v9 = vld [vmem:[%s11869_s25 + $0xc0] sm:$0xf] }
 0xeb4   : > { %6009 = vmatmul.bf16.gmra.mxu3 %v8673_v16  ;;  %v5727_v16 = vld [vmem:[#allocation2 + $0x2a0] sm:$0xff]  ;;  %v5781_v19 = vpack.c.bf16 %v5712_v11, %v5711_v17  ;;  %v9065_v11 = vld [vmem:[%s11869_s25 + $0xbc] sm:$0xf] }
 0xeb8   : > { %v5518_v22 = vpop.permute.xlu2 %5517  ;;  %v5520_v46 = vpop.permute.xlu1 %5519  ;;  %v5707_v45 = vld [vmem:[#allocation2 + $0x200] sm:$0xff] }
 0xeb9   : > { %5540 = vst.msk [vmem:[#allocation2 + $0x288] sm:$0xff] %vm1720_vm8, %v5518_v22  ;;  %v5626_v23 = vpop.permute.xlu0 %5625  ;;  %v5698_v41 = vld [vmem:[#allocation2 + $0x1b8] sm:$0xff] }
 0xeba   : > { %5642 = vst.msk [vmem:[#allocation2 + $0x338] sm:$0xff] %vm1720_vm8, %v5626_v23  ;;  %v5774_v24 = vpack.c.bf16 %v5698_v41, %v5697_v47  ;;  %v5738_v26 = vld [vmem:[#allocation2 + $0x2f8] sm:$0xff] }
 0xebb   : > { %5541 = vst.msk [vmem:[#allocation2 + $0x290] sm:$0xff] %vm1720_vm8, %v5520_v46  ;;  %6038 = vmatmul.bf16.gmra.mxu0 %v8677_v21  ;;  %v5794_v27 = vpack.c.bf16 %v5738_v26, %v5737_v25  ;;  %v5789_v21 = vpack.c.bf16 %v5728_v20, %v5727_v16  ;;  %v5710_v22 = vld [vmem:[#allocation2 + $0x218] sm:$0xff]  ;;  %v8718_v16 = vld [vmem:[%s11869_s25 + $0xd4] sm:$0xf0] }
 0xebc   : > { %6067 = vmatmul.bf16.gmra.mxu2 %v8681_v2  ;;  %6082 = vmatpush.bf16.msra.mxu3 %v5774_v24  ;;  %v8629_v2 = vor.u32 %v9043_v18, %v8626_v42  ;;  %v5709_v24 = vld [vmem:[#allocation2 + $0x210] sm:$0xff]  ;;  %v9068_v42 = vld [vmem:[%s11869_s25 + $0xd0] sm:$0xf0] }
 0xebd   : > { %6136 = vmatpush.bf16.msrb.mxu1 %v5794_v27  ;;  %v5780_v26 = vpack.c.bf16 %v5710_v22, %v5709_v24  ;;  %v5726_v27 = vld [vmem:[#allocation2 + $0x298] sm:$0xff]  ;;  %v8716_v18 = vld [vmem:[%s11869_s25 + $0xb8] sm:$0xf] }
 0xebe   : > { %v8717_v20 = vor.u32 %v9068_v42, %v8716_v18 }
 0xec0   : > { %6083 = vmatpush.bf16.msra.mxu3 %v5773_v31  ;;  %v5434_v33 = vpop.permute.xlu1 %5433  ;;  %v9044_v31 = vld [vmem:[%s11869_s25 + $0x14] sm:$0xf]  ;;  %v5832_v55 = vpop.permute.xlu2 %5831 }
 0xec1   : > { %6137 = vmatpush.bf16.msrb.mxu1 %v5793_v15  ;;  %v5530_v32 = vpop.permute.xlu0 %5529  ;;  %5450 = vst.msk [vmem:[#allocation2 + $0x238] sm:$0xff] %vm1720_vm8, %v5434_v33  ;;  %v5746_v8 = vld [vmem:[#allocation2 + $0x338] sm:$0xff]  ;;  %v5724_v33 = vld [vmem:[#allocation2 + $0x288] sm:$0xff]  ;;  %v8637_v5 = vor.u32 %v9044_v31, %v8634_v54 }
 0xec2   : > { %5546 = vst.msk [vmem:[#allocation2 + $0x2b8] sm:$0xff] %vm1720_vm8, %v5530_v32  ;;  %v5798_v35 = vpack.c.bf16 %v5746_v8, %v5745_v48  ;;  %v5725_v23 = vld [vmem:[#allocation2 + $0x290] sm:$0xff] }
 0xec3   : > { %v5788_v28 = vpack.c.bf16 %v5726_v27, %v5725_v23 }
 0xec4   : > { %6014 = vmatmul.bf16.gmra.mxu3 %v8701_v34  ;;  %6169 = vmatpush.bf16.msrb.mxu2 %v5798_v35  ;;  %v8641_v34 = vor.u32 %v9048_v30, %v8640_v29  ;;  %v9050_v35 = vld [vmem:[%s11869_s25 + $0x44] sm:$0xf] }
 0xec5   : > { %6084 = vmatpush.bf16.msra.mxu3 %v5772_v37  ;;  %6138 = vmatpush.bf16.msrb.mxu1 %v5792_v53  ;;  %v8654_v37 = vld [vmem:[%s11869_s25 + $0x5c] sm:$0xf0] }
 0xec6   : > { %v8657_v53 = vor.u32 %v9050_v35, %v8654_v37 }
 0xec8   : > { %6170 = vmatpush.bf16.msrb.mxu2 %v5797_v51  ;;  %v5614_v0 = vpop.permute.xlu1 %5613  ;;  %v5714_v6 = vld [vmem:[#allocation2 + $0x238] sm:$0xff]  ;;  %v8682_v51 = vld [vmem:[%s11869_s25 + $0x94] sm:$0xf0] }
 0xec9   : > { %6085 = vmatpush.bf16.msra.mxu3 %v5771_v63  ;;  %6139 = vmatpush.bf16.msrb.mxu1 %v5791_v38  ;;  %v5612_v7 = vpop.permute.xlu0 %5611  ;;  %5636 = vst.msk [vmem:[#allocation2 + $0x308] sm:$0xff] %vm1720_vm8, %v5614_v0  ;;  %v5782_v39 = vpack.c.bf16 %v5714_v6, %v5713_v4  ;;  %v5730_v12 = vld [vmem:[#allocation2 + $0x2b8] sm:$0xff]  ;;  %v8685_v63 = vor.u32 %v9057_v50, %v8682_v51  ;;  %v8696_v38 = vld [vmem:[%s11869_s25 + $0x88] sm:$0xf] }
 0xeca   : > { %5635 = vst.msk [vmem:[#allocation2 + $0x300] sm:$0xff] %vm1720_vm8, %v5612_v7  ;;  %v5790_v13 = vpack.c.bf16 %v5730_v12, %v5729_v3  ;;  %v9058_v0 = vld [vmem:[%s11869_s25 + $0x84] sm:$0xf]  ;;  %v8688_v6 = vld [vmem:[%s11869_s25 + $0x80] sm:$0xf] }
 0xecb   : > { %6043 = vmatmul.bf16.gmra.mxu0 %v8705_v40  ;;  %v9062_v40 = vld [vmem:[%s11869_s25 + $0xa0] sm:$0xf0]  ;;  %v9064_v3 = vld [vmem:[%s11869_s25 + $0xb4] sm:$0xf]  ;;  %v8710_v12 = vld [vmem:[%s11869_s25 + $0xcc] sm:$0xf0] }
 0xecc   : > { %6072 = vmatmul.bf16.gmra.mxu2 %v8709_v1  ;;  %6111 = vmatpush.bf16.msra.mxu0 %v5782_v39  ;;  %v8690_v1 = vld [vmem:[%s11869_s25 + $0x9c] sm:$0xf0]  ;;  %v8697_v4 = vor.u32 %v9062_v40, %v8696_v38  ;;  %v8689_v39 = vor.u32 %v9061_v10, %v8688_v6  ;;  %v5807_v40 = vpop.permute.xlu2 %5806 }
 0xecd   : > { %6140 = vmatpush.bf16.msrb.mxu1 %v5790_v13  ;;  %6171 = vmatpush.bf16.msrb.mxu2 %v5796_v14  ;;  %v8693_v7 = vor.u32 %v9058_v0, %v8690_v1  ;;  %v8713_v13 = vor.u32 %v9064_v3, %v8710_v12  ;;  %v9069_v14 = vld [vmem:[%s11869_s25 + $0xd8] sm:$0xf0] }
 0xece   : > { %v8725_v17 = vor.u32 %v9069_v14, %v8724_v9 }
 0xed0   : > { %6112 = vmatpush.bf16.msra.mxu0 %v5781_v19  ;;  %v5516_v46 = vpop.permute.xlu1 %5515  ;;  %v5740_v47 = vld [vmem:[#allocation2 + $0x308] sm:$0xff]  ;;  %v8721_v19 = vor.u32 %v9065_v11, %v8718_v16 }
 0xed1   : > { %6141 = vmatpush.bf16.msrb.mxu1 %v5789_v21  ;;  %v5422_v41 = vpop.permute.xlu0 %5421  ;;  %5539 = vst.msk [vmem:[#allocation2 + $0x280] sm:$0xff] %vm1720_vm8, %v5516_v46  ;;  %v5739_v25 = vld [vmem:[#allocation2 + $0x300] sm:$0xff] }
 0xed2   : > { %5444 = vst.msk [vmem:[#allocation2 + $0x208] sm:$0xff] %vm1720_vm8, %v5422_v41  ;;  %v5795_v49 = vpack.c.bf16 %v5740_v47, %v5739_v25 }
 0xed4   : > { %6086 = vmatmul.bf16.vlgmr.msra.gmra.mxu3 %v8629_v2  ;;  %6113 = vmatpush.bf16.msra.mxu0 %v5780_v26 }
 0xed5   : > { %6142 = vmatpush.bf16.msrb.mxu1 %v5788_v28  ;;  %6172 = vmatpush.bf16.msrb.mxu2 %v5795_v49 }
 0xed8   : > { %v5723_v15 = vld [vmem:[#allocation2 + $0x280] sm:$0xff]  ;;  %v11126_v21 = vpop.permute.xlu1 %5826 }
 0xed9   : > { %v5708_v32 = vld [vmem:[#allocation2 + $0x208] sm:$0xff]  ;;  %v5787_v48 = vpack.c.bf16 %v5724_v33, %v5723_v15  ;;  %v5822_v22 = vpop.permute.xlu0 %5821 }
 0xeda   : > { %v5779_v8 = vpack.c.bf16 %v5708_v32, %v5707_v45 }
 0xedb   : > { %6143 = vmatpush.bf16.msrb.mxu1 %v5787_v48 }
 0xedc   : > { %6114 = vmatpush.bf16.msra.mxu0 %v5779_v8  ;;  %8726 = vmatmul.msk.bf16.vlgmr.msrb.gmra.mxu2 %vm1697_vm6, %v8641_v34 }
 0xede   : > { %6144 = vmatmul.bf16.vlgmr.msrb.gmra.mxu1 %v8637_v5 }
 0xedf   : > { %6115 = vmatmul.bf16.vlgmr.msra.gmra.mxu0 %v8633_v52 }
 0xee0   : > { %v5802_v46 = vpop.permute.xlu1 %5801 }
 0xee1   : > { %v11128_v24 = vpop.permute.xlu0 %5836 }
 0xee4   : > { %6091 = vmatmul.bf16.gmra.mxu3 %v8657_v53 }
 0xee9   : > { %v5812_v28 = vpop.permute.xlu0 %5811 }
 0xeec   : > { %8727 = vmatmul.msk.bf16.gmra.mxu2 %vm1697_vm6, %v8669_v36 }
 0xeee   : > { %6149 = vmatmul.bf16.gmra.mxu1 %v8665_v61 }
 0xeef   : > { %6120 = vmatmul.bf16.gmra.mxu0 %v8661_v62 }
 0xef4   : > { %6096 = vmatmul.bf16.gmra.mxu3 %v8685_v63 }
 0xefc   : > { %8728 = vmatmul.msk.bf16.gmra.mxu2 %vm1697_vm6, %v8697_v4 }
 0xefe   : > { %6154 = vmatmul.bf16.gmra.mxu1 %v8693_v7 }
 0xeff   : > { %6125 = vmatmul.bf16.gmra.mxu0 %v8689_v39 }
 0xf04   : > { %6101 = vmatmul.bf16.gmra.mxu3 %v8713_v13 }
 0xf0c   : > { %8729 = vmatmul.msk.bf16.gmra.mxu2 %vm1697_vm6, %v8725_v17 }
 0xf0e   : > { %6159 = vmatmul.bf16.gmra.mxu1 %v8721_v19 }
 0xf0f   : > { %6130 = vmatmul.bf16.gmra.mxu0 %v8717_v20 }
 0xf17   : > { %v6000_v2 = vpop.f32.mrf.mxu3 }
 0xf18   : > { %v6001_v23 = vadd.f32 %v6000_v2, %v5802_v46  ;;  %v6029_v47 = vpop.f32.mrf.mxu0 }
 0xf1a   : > { %v6030_v41 = vadd.f32 %v6029_v47, %v6001_v23 }
 0xf1f   : > { %v6002_v25 = vpop.f32.mrf.mxu3  ;;  %v6058_v26 = vpop.f32.mrf.mxu2 }
 0xf20   : > { %v6059_v27 = vadd.f32 %v6058_v26, %v6030_v41  ;;  %v6031_v49 = vpop.f32.mrf.mxu0  ;;  %v6003_v0 = vadd.f32 %v6002_v25, %v5807_v40 }
 0xf22   : > { %v6032_v10 = vadd.f32 %v6031_v49, %v6003_v0 }
 0xf27   : > { %v6005_v29 = vpop.f32.mrf.mxu3  ;;  %v6060_v30 = vpop.f32.mrf.mxu2 }
 0xf28   : > { %v6006_v43 = vadd.f32 %v6005_v29, %v5812_v28  ;;  %v6034_v31 = vpop.f32.mrf.mxu0  ;;  %v6061_v12 = vadd.f32 %v6060_v30, %v6032_v10 }
 0xf2a   : > { %v6035_v54 = vadd.f32 %v6034_v31, %v6006_v43 }
 0xf2f   : > { %v6007_v15 = vpop.f32.mrf.mxu3  ;;  %v6063_v33 = vpop.f32.mrf.mxu2 }
 0xf30   : > { %v6064_v34 = vadd.f32 %v6063_v33, %v6035_v54  ;;  %v6036_v44 = vpop.f32.mrf.mxu0 }
 0xf37   : > { %v6010_v45 = vpop.f32.mrf.mxu3  ;;  %v6065_v32 = vpop.f32.mrf.mxu2 }
 0xf38   : > { %v6011_v48 = vadd.f32 %v6010_v45, %v5822_v22  ;;  %v6039_v8 = vpop.f32.mrf.mxu0  ;;  %v5817_v22 = vpop.permute.xlu1 %5816 }
 0xf39   : > { %v6008_v46 = vadd.f32 %v6007_v15, %v5817_v22 }
 0xf3a   : > { %v6040_v5 = vadd.f32 %v6039_v8, %v6011_v48 }
 0xf3b   : > { %v6037_v41 = vadd.f32 %v6036_v44, %v6008_v46 }
 0xf3d   : > { %v6066_v49 = vadd.f32 %v6065_v32, %v6037_v41 }
 0xf3f   : > { %v6012_v52 = vpop.f32.mrf.mxu3  ;;  %v6068_v35 = vpop.f32.mrf.mxu2 }
 0xf40   : > { %v6069_v37 = vadd.f32 %v6068_v35, %v6040_v5  ;;  %v6041_v53 = vpop.f32.mrf.mxu0  ;;  %v6013_v15 = vadd.f32 %v6012_v52, %v11126_v21 }
 0xf42   : > { %v6042_v5 = vadd.f32 %v6041_v53, %v6013_v15 }
 0xf47   : > { %v6015_v56 = vpop.f32.mrf.mxu3  ;;  %v6070_v57 = vpop.f32.mrf.mxu2 }
 0xf48   : > { %v6016_v58 = vadd.f32 %v6015_v56, %v5832_v55  ;;  %v6044_v36 = vpop.f32.mrf.mxu0  ;;  %v9071_v56 = vld [vmem:[%s11870_s12 + $0x8] sm:$0xff] }
 0xf49   : > { %6252 = vmatpush.bf16.msrb.mxu3 %v9071_v56 }
 0xf4a   : > { %v6045_v59 = vadd.f32 %v6044_v36, %v6016_v58  ;;  %v6071_v58 = vadd.f32 %v6070_v57, %v6042_v5 }
 0xf4f   : > { %v11130_v60 = vpop.f32.mrf.mxu3  ;;  %v6073_v61 = vpop.f32.mrf.mxu2 }
 0xf50   : > { %v11132_v62 = vadd.f32 %v6073_v61, %v6045_v59  ;;  %v11134_v50 = vpop.f32.mrf.mxu0  ;;  %v6018_v52 = vadd.f32 %v11130_v60, %v11128_v24 }
 0xf57   : > { %v11136_v51 = vpop.f32.mrf.mxu2  ;;  %v6087_v63 = vpop.f32.mrf.mxu3 }
 0xf58   : > { %v6088_v38 = vadd.f32 %v6087_v63, %v6059_v27 }
 0xf5b   : > { %v6145_v1 = vpop.f32.mrf.mxu1 }
 0xf5c   : > { %v6116_v4 = vpop.f32.mrf.mxu0 }
 0xf5d   : > { %v6117_v6 = vadd.f32 %v6116_v4, %v6088_v38 }
 0xf5f   : > { %v6089_v7 = vpop.f32.mrf.mxu3  ;;  %v6146_v39 = vadd.f32 %v6145_v1, %v6117_v6  ;;  %v6174_v3 = vpop.f32.mrf.mxu2 }
 0xf60   : > { %v6090_v9 = vadd.f32 %v6089_v7, %v6061_v12 }
 0xf61   : > { %v11138_v13 = vadd.f32 %v6174_v3, %v6146_v39  ;;  %v6047_v39 = vadd.f32 %v11134_v50, %v6018_v52  ;;  %v6282_v52 = vld [vmem:[%s11871_s23 + $0x8] sm:$0xff] }
 0xf63   : > { %v6147_v14 = vpop.f32.mrf.mxu1 }
 0xf64   : > { %v6118_v11 = vpop.f32.mrf.mxu0 }
 0xf65   : > { %v6119_v16 = vadd.f32 %v6118_v11, %v6090_v9 }
 0xf67   : > { %v6092_v17 = vpop.f32.mrf.mxu3  ;;  %v6148_v18 = vadd.f32 %v6147_v14, %v6119_v16  ;;  %v6176_v42 = vpop.f32.mrf.mxu2  ;;  %v6076_v14 = vadd.f32 %v11136_v51, %v6047_v39  ;;  %v6283_v39 = vld [vmem:[%s11871_s23 + $0x10] sm:$0xff] }
 0xf68   : > { %v6093_v19 = vadd.f32 %v6092_v17, %v6064_v34 }
 0xf69   : > { %v11140_v20 = vadd.f32 %v6176_v42, %v6148_v18 }
 0xf6b   : > { %v6150_v2 = vpop.f32.mrf.mxu1  ;;  %v6195_v51 = vmax.f32 %v11140_v20, 0.0 }
 0xf6c   : > { %v6121_v23 = vpop.f32.mrf.mxu0 }
 0xf6d   : > { %v6122_v47 = vadd.f32 %v6121_v23, %v6093_v19 }
 0xf6f   : > { %v6094_v25 = vpop.f32.mrf.mxu3  ;;  %v6151_v26 = vadd.f32 %v6150_v2, %v6122_v47  ;;  %v6179_v27 = vpop.f32.mrf.mxu2  ;;  %v9070_v2 = vld [vmem:[%s11870_s12] sm:$0xff]  ;;  %v6194_v47 = vmax.f32 %v11138_v13, 0.0 }
 0xf70   : > { %v6095_v29 = vadd.f32 %v6094_v25, %v6066_v49  ;;  %6253 = vmatpush.bf16.msrb.mxu3 %v9070_v2 }
 0xf71   : > { %v11142_v28 = vadd.f32 %v6179_v27, %v6151_v26 }
 0xf73   : > { %v6152_v30 = vpop.f32.mrf.mxu1 }
 0xf74   : > { %v6123_v43 = vpop.f32.mrf.mxu0 }
 0xf75   : > { %v6124_v31 = vadd.f32 %v6123_v43, %v6095_v29 }
 0xf77   : > { %v6097_v54 = vpop.f32.mrf.mxu3  ;;  %v6153_v33 = vadd.f32 %v6152_v30, %v6124_v31  ;;  %v6181_v34 = vpop.f32.mrf.mxu2  ;;  %v6196_v30 = vmax.f32 %v11142_v28, 0.0 }
 0xf78   : > { %v6098_v8 = vadd.f32 %v6097_v54, %v6069_v37 }
 0xf79   : > { %v11144_v45 = vadd.f32 %v6181_v34, %v6153_v33 }
 0xf7b   : > { %v6155_v48 = vpop.f32.mrf.mxu1  ;;  %v6197_v43 = vmax.f32 %v11144_v45, 0.0 }
 0xf7c   : > { %v6126_v44 = vpop.f32.mrf.mxu0 }
 0xf7d   : > { %v6127_v35 = vadd.f32 %v6126_v44, %v6098_v8 }
 0xf7f   : > { %v6099_v32 = vpop.f32.mrf.mxu3  ;;  %v6184_v55 = vpop.f32.mrf.mxu2  ;;  %v6156_v59 = vadd.f32 %v6155_v48, %v6127_v35 }
 0xf80   : > { %v6100_v36 = vadd.f32 %v6099_v32, %v6071_v58 }
 0xf81   : > { %v6185_v40 = vadd.f32 %v6184_v55, %v6156_v59 }
 0xf83   : > { %v6157_v61 = vpop.f32.mrf.mxu1  ;;  %v6198_v37 = vmax.f32 %v6185_v40, 0.0  ;;  %v6286_v40 = vld [vmem:[%s11871_s23 + $0x28] sm:$0xff] }
 0xf84   : > { %v6128_v63 = vpop.f32.mrf.mxu0 }
 0xf85   : > { %v6129_v38 = vadd.f32 %v6128_v63, %v6100_v36 }
 0xf87   : > { %v6102_v0 = vpop.f32.mrf.mxu3  ;;  %v6158_v1 = vadd.f32 %v6157_v61, %v6129_v38  ;;  %v6186_v4 = vpop.f32.mrf.mxu2  ;;  %v6287_v38 = vld [vmem:[%s11871_s23 + $0x30] sm:$0xff] }
 0xf88   : > { %v6103_v57 = vadd.f32 %v6102_v0, %v11132_v62  ;;  %v6285_v0 = vld [vmem:[%s11871_s23 + $0x20] sm:$0xff] }
 0xf89   : > { %v6187_v21 = vadd.f32 %v6186_v4, %v6158_v1 }
 0xf8b   : > { %v6199_v53 = vmax.f32 %v6187_v21, 0.0  ;;  %v6160_v6 = vpop.f32.mrf.mxu1 }
 0xf8c   : > { %v6131_v10 = vpop.f32.mrf.mxu0 }
 0xf8d   : > { %v9239_v7 = vpack.i.bf16 %v6199_v53, %v6198_v37  ;;  %v6132_v3 = vadd.f32 %v6131_v10, %v6103_v57  ;;  %v6281_v37 = vld [vmem:[%s11871_s23] sm:$0xff]  ;;  %v6288_v53 = vld [vmem:[%s11871_s23 + $0x38] sm:$0xff] }
 0xf8f   : > { %9240 = vrot.lane.b32.xlu2 %v9239_v7, %s9363_s27  ;;  %v6189_v12 = vpop.f32.mrf.mxu2  ;;  %v6104_v9 = vpop.f32.mrf.mxu3  ;;  %v6161_v16 = vadd.f32 %v6160_v6, %v6132_v3  ;;  %v6284_v7 = vld [vmem:[%s11871_s23 + $0x18] sm:$0xff] }
 0xf90   : > { %v6105_v11 = vadd.f32 %v6104_v9, %v6076_v14 }
 0xf91   : > { %v6190_v18 = vadd.f32 %v6189_v12, %v6161_v16 }
 0xf93   : > { %v6162_v60 = vpop.f32.mrf.mxu1  ;;  %v6200_v22 = vmax.f32 %v6190_v18, 0.0 }
 0xf94   : > { %v6133_v24 = vpop.f32.mrf.mxu0 }
 0xf95   : > { %v6134_v17 = vadd.f32 %v6133_v24, %v6105_v11 }
 0xf97   : > { %v6163_v42 = vadd.f32 %v6162_v60, %v6134_v17  ;;  %v6191_v19 = vpop.f32.mrf.mxu2 }
 0xf99   : > { %v6192_v62 = vadd.f32 %v6191_v19, %v6163_v42 }
 0xf9b   : > { %v6201_v46 = vmax.f32 %v6192_v62, 0.0 }
 0xf9d   : > { %v9244_v50 = vpack.i.bf16 %v6201_v46, %v6200_v22 }
 0xf9f   : > { %9245 = vrot.lane.b32.xlu0 %v9244_v50, %s9363_s27  ;;  %s11876_s27 = sld [smem:[#allocation26_spill]] }
 0xfe9   : > { %v9241_v23 = vpop.permute.xlu2 %9240 }
 0xfea   : > { %v9243_v41 = vunpack.i.h.bf16 %v9241_v23  ;;  %v9242_v25 = vunpack.i.l.bf16 %v9241_v23 }
 0xfec   : > { %v6222_v26 = vsel %vm1720_vm8, %v6194_v47, %v9242_v25  ;;  %v6223_v27 = vsel %vm1720_vm8, %v6195_v51, %v9243_v41 }
 0xfed   : > { %v6226_v49 = vpack.c.bf16 %v6223_v27, %v6222_v26 }
 0xfef   : > { %8738 = vmatmul.msk.bf16.vlgmr.msrb.gmra.mxu3 %vm3123_vm15, %v6226_v49 }
0x1011   : > { %v9246_v29 = vpop.permute.xlu0 %9245 }
0x1012   : > { %v9248_v31 = vunpack.i.h.bf16 %v9246_v29  ;;  %v9247_v54 = vunpack.i.l.bf16 %v9246_v29 }
0x1014   : > { %v6224_v13 = vsel %vm1720_vm8, %v6196_v30, %v9247_v54  ;;  %v6225_v20 = vsel %vm1720_vm8, %v6197_v43, %v9248_v31  ;;  %vm7010_vm8 = vcmask 621568  }
0x1015   : > { %v6227_v33 = vpack.c.bf16 %v6225_v20, %v6224_v13 }
0x1017   : > { %8739 = vmatmul.msk.bf16.gmra.mxu3 %vm3123_vm15, %v6227_v33 }
0x1072   : > { %v6255_v34 = vpop.f32.mrf.mxu3 }
0x1073   : > { %6289 = vst.msk [vmem:[#allocation3] sm:$0xff] %vm2293_vm13, %v6255_v34 }
0x107a   : > { %v6257_v15 = vpop.f32.mrf.mxu3  ;;  %v11165_v48 = vld [vmem:[#allocation3] sm:$0xff] }
0x107b   : > { %6290 = vst.msk [vmem:[#allocation3 + $0x18] sm:$0xff] %vm2293_vm13, %v6257_v15  ;;  %6453 = vrot.lane.b32.xlu2 %v11165_v48, %s9361_s7  ;;  %6429 = vrot.lane.b32.xlu0 %v11165_v48, %s11844_s0 }
0x107c   : > { %6357 = vrot.lane.b32.xlu1 %v11165_v48, %s11835_s28  ;;  %6297 = vst.msk [vmem:[#allocation2] sm:$0xff] %vm3123_vm15, %v11165_v48 }
0x1082   : > { %v11176_v28 = vld [vmem:[#allocation3 + $0x18] sm:$0xff] }
0x1083   : > { %6549 = vrot.lane.b32.xlu2 %v11165_v48, %s11853_s22  ;;  %6405 = vrot.lane.b32.xlu0 %v11165_v48, %s11826_s26  ;;  %6298 = vst.msk [vmem:[#allocation2 + $0x8] sm:$0xff] %vm3123_vm15, %v11176_v28 }
0x1084   : > { %6333 = vrot.lane.b32.xlu1 %v11165_v48, %s11841_s16 }
0x108b   : > { %6525 = vrot.lane.b32.xlu2 %v11165_v48, %s9357_s3  ;;  %6501 = vrot.lane.b32.xlu0 %v11165_v48, %s9356_s29 }
0x108c   : > { %6309 = vrot.lane.b32.xlu1 %v11165_v48, %s11833_s13 }
0x1093   : > { %6455 = vrot.lane.b32.xlu0 %v11176_v28, %s9361_s7  ;;  %6359 = vrot.lane.b32.xlu2 %v11176_v28, %s11835_s28 }
0x1094   : > { %6381 = vrot.lane.b32.xlu1 %v11165_v48, %s11842_s1 }
0x109a   : > { %v6260_v45 = vpop.f32.mrf.mxu3 }
0x109b   : > { %6291 = vst.msk [vmem:[#allocation3 + $0x30] sm:$0xff] %vm2293_vm13, %v6260_v45  ;;  %6551 = vrot.lane.b32.xlu0 %v11176_v28, %s11853_s22  ;;  %6335 = vrot.lane.b32.xlu2 %v11176_v28, %s11841_s16 }
0x109c   : > { %6431 = vrot.lane.b32.xlu1 %v11176_v28, %s11844_s0 }
0x10a2   : > { %v6262_v44 = vpop.f32.mrf.mxu3  ;;  %v6351_v8 = vld [vmem:[#allocation3 + $0x30] sm:$0xff] }
0x10a3   : > { %6292 = vst.msk [vmem:[#allocation3 + $0x48] sm:$0xff] %vm2293_vm13, %v6262_v44  ;;  %6527 = vrot.lane.b32.xlu0 %v11176_v28, %s9357_s3  ;;  %6311 = vrot.lane.b32.xlu2 %v11176_v28, %s11833_s13  ;;  %vm7671_vm13 = vcmask 97280  }
0x10a4   : > { %6407 = vrot.lane.b32.xlu1 %v11176_v28, %s11826_s26  ;;  %6299 = vst.msk [vmem:[#allocation2 + $0x10] sm:$0xff] %vm3123_vm15, %v6351_v8 }
0x10aa   : > { %v6448_v5 = vld [vmem:[#allocation3 + $0x48] sm:$0xff] }
0x10ab   : > { %6383 = vrot.lane.b32.xlu2 %v11176_v28, %s11842_s1  ;;  %6361 = vrot.lane.b32.xlu0 %v6351_v8, %s11835_s28  ;;  %6300 = vst.msk [vmem:[#allocation2 + $0x18] sm:$0xff] %vm3123_vm15, %v6448_v5 }
0x10ac   : > { %6503 = vrot.lane.b32.xlu1 %v11176_v28, %s9356_s29 }
0x10b3   : > { %6553 = vrot.lane.b32.xlu2 %v6351_v8, %s11853_s22  ;;  %6433 = vrot.lane.b32.xlu0 %v6351_v8, %s11844_s0 }
0x10b4   : > { %6457 = vrot.lane.b32.xlu1 %v6351_v8, %s9361_s7 }
0x10bb   : > { %6529 = vrot.lane.b32.xlu2 %v6351_v8, %s9357_s3  ;;  %6409 = vrot.lane.b32.xlu0 %v6351_v8, %s11826_s26 }
0x10bc   : > { %6337 = vrot.lane.b32.xlu1 %v6351_v8, %s11841_s16 }
0x10c3   : > { %6505 = vrot.lane.b32.xlu2 %v6351_v8, %s9356_s29  ;;  %6385 = vrot.lane.b32.xlu0 %v6351_v8, %s11842_s1 }
0x10c4   : > { %6313 = vrot.lane.b32.xlu1 %v6351_v8, %s11833_s13 }
0x10cb   : > { %6573 = vrot.lane.b32.xlu0 %v11165_v48, %s11854_s20  ;;  %6459 = vrot.lane.b32.xlu2 %v6448_v5, %s9361_s7 }
0x10cc   : > { %6481 = vrot.lane.b32.xlu1 %v6351_v8, %s9355_s21 }
0x10d3   : > { %6555 = vrot.lane.b32.xlu0 %v6448_v5, %s11853_s22  ;;  %6577 = vrot.lane.b32.xlu2 %v6351_v8, %s11854_s20 }
0x10d4   : > { %6363 = vrot.lane.b32.xlu1 %v6448_v5, %s11835_s28 }
0x10d5   : > { %v6454_v35 = vpop.permute.xlu2 %6453 }
0x10d6   : > { %6465 = vst.msk [vmem:[#allocation2 + $0xe0] sm:$0xff] %vm3123_vm15, %v6454_v35 }
0x10db   : > { %6531 = vrot.lane.b32.xlu0 %v6448_v5, %s9357_s3  ;;  %6339 = vrot.lane.b32.xlu2 %v6448_v5, %s11841_s16 }
0x10dc   : > { %6435 = vrot.lane.b32.xlu1 %v6448_v5, %s11844_s0 }
0x10dd   : > { %v6550_v32 = vpop.permute.xlu2 %6549  ;;  %v6617_v51 = vld [vmem:[#allocation2 + $0xe0] sm:$0xff] }
0x10de   : > { %6561 = vst.msk [vmem:[#allocation2 + $0x160] sm:$0xff] %vm3123_vm15, %v6550_v32 }
0x10e3   : > { %6507 = vrot.lane.b32.xlu0 %v6448_v5, %s9356_s29  ;;  %6315 = vrot.lane.b32.xlu2 %v6448_v5, %s11833_s13 }
0x10e4   : > { %6411 = vrot.lane.b32.xlu1 %v6448_v5, %s11826_s26 }
0x10e5   : > { %v6526_v55 = vpop.permute.xlu2 %6525  ;;  %v6633_v32 = vld [vmem:[#allocation2 + $0x160] sm:$0xff] }
0x10e6   : > { %6537 = vst.msk [vmem:[#allocation2 + $0x140] sm:$0xff] %vm3123_vm15, %v6526_v55 }
0x10eb   : > { %6579 = vrot.lane.b32.xlu0 %v6448_v5, %s11854_s20  ;;  %6483 = vrot.lane.b32.xlu2 %v6448_v5, %s9355_s21 }
0x10ec   : > { %6387 = vrot.lane.b32.xlu1 %v6448_v5, %s11842_s1 }
0x10ed   : > { %v6430_v56 = vpop.permute.xlu0 %6429  ;;  %v6360_v58 = vpop.permute.xlu2 %6359 }
0x10ee   : > { %6441 = vst.msk [vmem:[#allocation2 + $0xc0] sm:$0xff] %vm3123_vm15, %v6430_v56  ;;  %v6358_v36 = vpop.permute.xlu1 %6357 }
0x10ef   : > { %6369 = vst.msk [vmem:[#allocation2 + $0x60] sm:$0xff] %vm3123_vm15, %v6358_v36 }
0x10f0   : > { %6370 = vst.msk [vmem:[#allocation2 + $0x68] sm:$0xff] %vm3123_vm15, %v6360_v58 }
0x10f3   : > { %6479 = vrot.lane.b32.xlu0 %v11176_v28, %s9355_s21  ;;  %6477 = vrot.lane.b32.xlu2 %v11165_v48, %s9355_s21 }
0x10f4   : > { %6575 = vrot.lane.b32.xlu1 %v11176_v28, %s11854_s20 }
0x10f5   : > { %v6406_v59 = vpop.permute.xlu0 %6405  ;;  %v6336_v61 = vpop.permute.xlu2 %6335 }
0x10f6   : > { %6417 = vst.msk [vmem:[#allocation2 + $0xa0] sm:$0xff] %vm3123_vm15, %v6406_v59  ;;  %v6334_v63 = vpop.permute.xlu1 %6333  ;;  %v6601_v5 = vld [vmem:[#allocation2 + $0x60] sm:$0xff] }
0x10f7   : > { %6345 = vst.msk [vmem:[#allocation2 + $0x40] sm:$0xff] %vm3123_vm15, %v6334_v63  ;;  %v6602_v35 = vld [vmem:[#allocation2 + $0x68] sm:$0xff] }
0x10f8   : > { %6346 = vst.msk [vmem:[#allocation2 + $0x48] sm:$0xff] %vm3123_vm15, %v6336_v61  ;;  %v6647_v56 = vpack.c.bf16 %v6602_v35, %v6601_v5  ;;  %v9072_v5 = vld [vmem:[%s11872_s2 + $0x4] sm:$0xf]  ;;  %v8744_v35 = vld [vmem:[%s11872_s2 + $0x10] sm:$0xf0] }
0x10fb   : > { %6699 = vperm.xlu0 %9216, %v6287_v38   ;;  %6694 = vperm.xlu2 %9218, %v6286_v40  }
0x10fc   : > { %6689 = vperm.xlu1 %9217, %v6285_v0  }
0x10fd   : > { %v6502_v1 = vpop.permute.xlu0 %6501  ;;  %v6312_v4 = vpop.permute.xlu2 %6311 }
0x10fe   : > { %6513 = vst.msk [vmem:[#allocation2 + $0x120] sm:$0xff] %vm3123_vm15, %v6502_v1  ;;  %v6310_v21 = vpop.permute.xlu1 %6309 }
0x10ff   : > { %6321 = vst.msk [vmem:[#allocation2 + $0x20] sm:$0xff] %vm3123_vm15, %v6310_v21 }
0x1100   : > { %6322 = vst.msk [vmem:[#allocation2 + $0x28] sm:$0xff] %vm3123_vm15, %v6312_v4 }
0x1103   : > { %6674 = vperm.xlu0 %9216, %v6282_v52   ;;  %6669 = vperm.xlu2 %9218, %v6281_v37   ;;  %v6597_v37 = vld [vmem:[#allocation2 + $0x40] sm:$0xff] }
0x1104   : > { %6704 = vperm.xlu1 %9217, %v6288_v53   ;;  %v6598_v53 = vld [vmem:[#allocation2 + $0x48] sm:$0xff] }
0x1105   : > { %v6456_v6 = vpop.permute.xlu0 %6455  ;;  %v6384_v10 = vpop.permute.xlu2 %6383 }
0x1106   : > { %v6382_v57 = vpop.permute.xlu1 %6381  ;;  %6466 = vst.msk [vmem:[#allocation2 + $0xe8] sm:$0xff] %vm3123_vm15, %v6456_v6 }
0x1107   : > { %6393 = vst.msk [vmem:[#allocation2 + $0x80] sm:$0xff] %vm3123_vm15, %v6382_v57  ;;  %v6613_v57 = vld [vmem:[#allocation2 + $0xc0] sm:$0xff] }
0x1108   : > { %6394 = vst.msk [vmem:[#allocation2 + $0x88] sm:$0xff] %vm3123_vm15, %v6384_v10  ;;  %v6629_v10 = vld [vmem:[#allocation2 + $0x140] sm:$0xff] }
0x110b   : > { %6684 = vperm.xlu0 %9216, %v6284_v7   ;;  %6679 = vperm.xlu2 %9218, %v6283_v39   ;;  %v6645_v39 = vpack.c.bf16 %v6598_v53, %v6597_v37 }
0x110d   : > { %v6552_v3 = vpop.permute.xlu0 %6551  ;;  %v6554_v12 = vpop.permute.xlu2 %6553  ;;  %v6618_v47 = vld [vmem:[#allocation2 + $0xe8] sm:$0xff] }
0x110e   : > { %6562 = vst.msk [vmem:[#allocation2 + $0x168] sm:$0xff] %vm3123_vm15, %v6552_v3  ;;  %v6432_v9 = vpop.permute.xlu1 %6431  ;;  %v6655_v41 = vpack.c.bf16 %v6618_v47, %v6617_v51 }
0x110f   : > { %6442 = vst.msk [vmem:[#allocation2 + $0xc8] sm:$0xff] %vm3123_vm15, %v6432_v9 }
0x1110   : > { %6563 = vst.msk [vmem:[#allocation2 + $0x170] sm:$0xff] %vm3123_vm15, %v6554_v12 }
0x1115   : > { %v6528_v14 = vpop.permute.xlu0 %6527  ;;  %v6530_v11 = vpop.permute.xlu2 %6529  ;;  %v6634_v8 = vld [vmem:[#allocation2 + $0x168] sm:$0xff] }
0x1116   : > { %6538 = vst.msk [vmem:[#allocation2 + $0x148] sm:$0xff] %vm3123_vm15, %v6528_v14  ;;  %v6408_v16 = vpop.permute.xlu1 %6407  ;;  %v6663_v55 = vpack.c.bf16 %v6634_v8, %v6633_v32  ;;  %v6614_v6 = vld [vmem:[#allocation2 + $0xc8] sm:$0xff]  ;;  %v6589_v32 = vld [vmem:[#allocation2] sm:$0xff] }
0x1117   : > { %6418 = vst.msk [vmem:[#allocation2 + $0xa8] sm:$0xff] %vm3123_vm15, %v6408_v16  ;;  %v6635_v33 = vld [vmem:[#allocation2 + $0x170] sm:$0xff]  ;;  %v6653_v3 = vpack.c.bf16 %v6614_v6, %v6613_v57  ;;  %v9074_v8 = vld [vmem:[%s11872_s2 + $0xc] sm:$0xf0]  ;;  %v8758_v6 = vld [vmem:[%s11872_s2 + $0x20] sm:$0xf] }
0x1118   : > { %6539 = vst.msk [vmem:[#allocation2 + $0x150] sm:$0xff] %vm3123_vm15, %v6530_v11  ;;  %v9076_v57 = vld [vmem:[%s11872_s2 + $0x24] sm:$0xf] }
0x111d   : > { %v6506_v24 = vpop.permute.xlu2 %6505  ;;  %v6362_v60 = vpop.permute.xlu0 %6361  ;;  %v6630_v52 = vld [vmem:[#allocation2 + $0x148] sm:$0xff] }
0x111e   : > { %v6504_v17 = vpop.permute.xlu1 %6503  ;;  %6515 = vst.msk [vmem:[#allocation2 + $0x130] sm:$0xff] %vm3123_vm15, %v6506_v24  ;;  %v6661_v7 = vpack.c.bf16 %v6630_v52, %v6629_v10  ;;  %v9078_v10 = vld [vmem:[%s11872_s2 + $0x2c] sm:$0xf0] }
0x111f   : > { %6514 = vst.msk [vmem:[#allocation2 + $0x128] sm:$0xff] %vm3123_vm15, %v6504_v17  ;;  %v6631_v59 = vld [vmem:[#allocation2 + $0x150] sm:$0xff] }
0x1120   : > { %6371 = vst.msk [vmem:[#allocation2 + $0x70] sm:$0xff] %vm3123_vm15, %v6362_v60 }
0x1125   : > { %v6434_v18 = vpop.permute.xlu0 %6433  ;;  %v6460_v42 = vpop.permute.xlu2 %6459  ;;  %v6627_v14 = vld [vmem:[#allocation2 + $0x130] sm:$0xff] }
0x1126   : > { %v6458_v19 = vpop.permute.xlu1 %6457  ;;  %6443 = vst.msk [vmem:[#allocation2 + $0xd0] sm:$0xff] %vm3123_vm15, %v6434_v18 }
0x1127   : > { %6467 = vst.msk [vmem:[#allocation2 + $0xf0] sm:$0xff] %vm3123_vm15, %v6458_v19  ;;  %v6603_v48 = vld [vmem:[#allocation2 + $0x70] sm:$0xff] }
0x1128   : > { %6468 = vst.msk [vmem:[#allocation2 + $0xf8] sm:$0xff] %vm3123_vm15, %v6460_v42 }
0x112d   : > { %v6410_v62 = vpop.permute.xlu0 %6409  ;;  %v6578_v22 = vpop.permute.xlu2 %6577  ;;  %v6615_v40 = vld [vmem:[#allocation2 + $0xd0] sm:$0xff] }
0x112e   : > { %6419 = vst.msk [vmem:[#allocation2 + $0xb0] sm:$0xff] %vm3123_vm15, %v6410_v62  ;;  %v6338_v46 = vpop.permute.xlu1 %6337  ;;  %v6619_v50 = vld [vmem:[#allocation2 + $0xf0] sm:$0xff]  ;;  %v6626_v62 = vld [vmem:[#allocation2 + $0x128] sm:$0xff] }
0x112f   : > { %6347 = vst.msk [vmem:[#allocation2 + $0x50] sm:$0xff] %vm3123_vm15, %v6338_v46  ;;  %v6620_v2 = vld [vmem:[#allocation2 + $0xf8] sm:$0xff]  ;;  %v6594_v46 = vld [vmem:[#allocation2 + $0x28] sm:$0xff] }
0x1130   : > { %6587 = vst.msk [vmem:[#allocation2 + $0x190] sm:$0xff] %vm3123_vm15, %v6578_v22  ;;  %v6656_v23 = vpack.c.bf16 %v6620_v2, %v6619_v50  ;;  %v6593_v22 = vld [vmem:[#allocation2 + $0x20] sm:$0xff]  ;;  %v6610_v50 = vld [vmem:[#allocation2 + $0xa8] sm:$0xff] }
0x1131   : > { %v6625_v2 = vld [vmem:[#allocation2 + $0x120] sm:$0xff]  ;;  %v6643_v51 = vpack.c.bf16 %v6594_v46, %v6593_v22  ;;  %v8784_v46 = vld [vmem:[%s11872_s2 + $0x58] sm:$0xf0] }
0x1132   : > { %6824 = vmatpush.bf16.msra.mxu3 %v6656_v23  ;;  %v6609_v23 = vld [vmem:[#allocation2 + $0xa0] sm:$0xff]  ;;  %v6659_v47 = vpack.c.bf16 %v6626_v62, %v6625_v2  ;;  %v9083_v2 = vld [vmem:[%s11872_s2 + $0x54] sm:$0xf0] }
0x1133   : > { %v9081_v22 = vld [vmem:[%s11872_s2 + $0x4c] sm:$0xf] }
0x1135   : > { %v6386_v25 = vpop.permute.xlu0 %6385  ;;  %v6340_v26 = vpop.permute.xlu2 %6339  ;;  %v6611_v60 = vld [vmem:[#allocation2 + $0xb0] sm:$0xff] }
0x1136   : > { %6825 = vmatpush.bf16.msra.mxu3 %v6655_v41  ;;  %6395 = vst.msk [vmem:[#allocation2 + $0x90] sm:$0xff] %vm3123_vm15, %v6386_v25  ;;  %v6314_v27 = vpop.permute.xlu1 %6313  ;;  %v6599_v38 = vld [vmem:[#allocation2 + $0x50] sm:$0xff]  ;;  %v6651_v41 = vpack.c.bf16 %v6610_v50, %v6609_v23  ;;  %v8782_v50 = vld [vmem:[%s11872_s2 + $0x48] sm:$0xf]  ;;  %v8787_v23 = vor.u32 %v9081_v22, %v8784_v46  ;;  %v9090_v46 = vld [vmem:[%s11873_s10 + $0x10] sm:$0xff] }
0x1137   : > { %6323 = vst.msk [vmem:[#allocation2 + $0x30] sm:$0xff] %vm3123_vm15, %v6314_v27 }
0x1138   : > { %6348 = vst.msk [vmem:[#allocation2 + $0x58] sm:$0xff] %vm3123_vm15, %v6340_v26  ;;  %v6592_v26 = vld [vmem:[#allocation2 + $0x18] sm:$0xff] }
0x113d   : > { %v6574_v49 = vpop.permute.xlu0 %6573  ;;  %v6316_v29 = vpop.permute.xlu2 %6315 }
0x113e   : > { %6585 = vst.msk [vmem:[#allocation2 + $0x180] sm:$0xff] %vm3123_vm15, %v6574_v49  ;;  %v6482_v30 = vpop.permute.xlu1 %6481  ;;  %v6595_v24 = vld [vmem:[#allocation2 + $0x30] sm:$0xff] }
0x113f   : > { %6491 = vst.msk [vmem:[#allocation2 + $0x110] sm:$0xff] %vm3123_vm15, %v6482_v30  ;;  %v6600_v58 = vld [vmem:[#allocation2 + $0x58] sm:$0xff] }
0x1140   : > { %6324 = vst.msk [vmem:[#allocation2 + $0x38] sm:$0xff] %vm3123_vm15, %v6316_v29  ;;  %v6646_v4 = vpack.c.bf16 %v6600_v58, %v6599_v38  ;;  %v6639_v29 = vld [vmem:[#allocation2 + $0x190] sm:$0xff] }
0x1145   : > { %v6556_v43 = vpop.permute.xlu0 %6555  ;;  %v6484_v31 = vpop.permute.xlu2 %6483 }
0x1146   : > { %6564 = vst.msk [vmem:[#allocation2 + $0x178] sm:$0xff] %vm3123_vm15, %v6556_v43  ;;  %v6364_v54 = vpop.permute.xlu1 %6363  ;;  %v6623_v49 = vld [vmem:[#allocation2 + $0x110] sm:$0xff] }
0x1147   : > { %6372 = vst.msk [vmem:[#allocation2 + $0x78] sm:$0xff] %vm3123_vm15, %v6364_v54  ;;  %v6596_v12 = vld [vmem:[#allocation2 + $0x38] sm:$0xff]  ;;  %v6607_v54 = vld [vmem:[#allocation2 + $0x90] sm:$0xff] }
0x1148   : > { %6492 = vst.msk [vmem:[#allocation2 + $0x118] sm:$0xff] %vm3123_vm15, %v6484_v31  ;;  %v6644_v42 = vpack.c.bf16 %v6596_v12, %v6595_v24  ;;  %v6591_v31 = vld [vmem:[#allocation2 + $0x10] sm:$0xff]  ;;  %v9077_v12 = vld [vmem:[%s11872_s2 + $0x2c] sm:$0xf] }
0x114d   : > { %v6532_v13 = vpop.permute.xlu0 %6531  ;;  %v6478_v20 = vpop.permute.xlu2 %6477  ;;  %v6636_v34 = vld [vmem:[#allocation2 + $0x178] sm:$0xff] }
0x114e   : > { %6540 = vst.msk [vmem:[#allocation2 + $0x158] sm:$0xff] %vm3123_vm15, %v6532_v13  ;;  %v6436_v15 = vpop.permute.xlu1 %6435  ;;  %v6604_v28 = vld [vmem:[#allocation2 + $0x78] sm:$0xff]  ;;  %v6664_v45 = vpack.c.bf16 %v6636_v34, %v6635_v33  ;;  %v6642_v34 = vpack.c.bf16 %v6592_v26, %v6591_v31  ;;  %v8792_v26 = vld [vmem:[%s11872_s2 + $0x70] sm:$0xf0]  ;;  %v9087_v31 = vld [vmem:[%s11872_s2 + $0x74] sm:$0xf0] }
0x114f   : > { %6444 = vst.msk [vmem:[#allocation2 + $0xd8] sm:$0xff] %vm3123_vm15, %v6436_v15  ;;  %v6648_v44 = vpack.c.bf16 %v6604_v28, %v6603_v48  ;;  %v6624_v25 = vld [vmem:[#allocation2 + $0x118] sm:$0xff]  ;;  %v6590_v48 = vld [vmem:[#allocation2 + $0x8] sm:$0xff]  ;;  %v6605_v28 = vld [vmem:[#allocation2 + $0x80] sm:$0xff] }
0x1150   : > { %6489 = vst.msk [vmem:[#allocation2 + $0x100] sm:$0xff] %vm3123_vm15, %v6478_v20  ;;  %6853 = vmatpush.bf16.msra.mxu1 %v6664_v45  ;;  %v6658_v20 = vpack.c.bf16 %v6624_v25, %v6623_v49  ;;  %v6606_v45 = vld [vmem:[#allocation2 + $0x88] sm:$0xff]  ;;  %v9084_v25 = vld [vmem:[%s11872_s2 + $0x64] sm:$0xf] }
0x1151   : > { %6795 = vmatpush.bf16.msrb.mxu0 %v6648_v44  ;;  %v8742_v44 = vld [vmem:[%s11872_s2] sm:$0xf]  ;;  %v8795_v49 = vor.u32 %v9084_v25, %v8792_v26 }
0x1152   : > { %v8743_v58 = vor.u32 %v9074_v8, %v8742_v44 }
0x1154   : > { %6854 = vmatpush.bf16.msra.mxu1 %v6663_v55  ;;  %v6641_v55 = vpack.c.bf16 %v6590_v48, %v6589_v32 }
0x1155   : > { %6796 = vmatpush.bf16.msrb.mxu0 %v6647_v56  ;;  %v6508_v36 = vpop.permute.xlu0 %6507  ;;  %v6632_v61 = vld [vmem:[#allocation2 + $0x158] sm:$0xff]  ;;  %v6649_v56 = vpack.c.bf16 %v6606_v45, %v6605_v28 }
0x1156   : > { %6516 = vst.msk [vmem:[#allocation2 + $0x138] sm:$0xff] %vm3123_vm15, %v6508_v36  ;;  %v6412_v63 = vpop.permute.xlu1 %6411  ;;  %v6616_v0 = vld [vmem:[#allocation2 + $0xd8] sm:$0xff]  ;;  %v6662_v1 = vpack.c.bf16 %v6632_v61, %v6631_v59  ;;  %v8747_v36 = vor.u32 %v9072_v5, %v8744_v35  ;;  %v9073_v59 = vld [vmem:[%s11872_s2 + $0xc] sm:$0xf]  ;;  %v8752_v61 = vld [vmem:[%s11872_s2 + $0x18] sm:$0xf0] }
0x1157   : > { %6420 = vst.msk [vmem:[#allocation2 + $0xb8] sm:$0xff] %vm3123_vm15, %v6412_v63  ;;  %v6654_v21 = vpack.c.bf16 %v6616_v0, %v6615_v40  ;;  %v8750_v63 = vld [vmem:[%s11872_s2 + $0x8] sm:$0xf]  ;;  %v9075_v0 = vld [vmem:[%s11872_s2 + $0x14] sm:$0xf0]  ;;  %v8755_v37 = vor.u32 %v9073_v59, %v8752_v61 }
0x1158   : > { %6855 = vmatpush.bf16.msra.mxu1 %v6662_v1  ;;  %v6621_v38 = vld [vmem:[#allocation2 + $0x100] sm:$0xff]  ;;  %v8751_v53 = vor.u32 %v9075_v0, %v8750_v63 }
0x1159   : > { %6797 = vmatpush.bf16.msrb.mxu0 %v6646_v4  ;;  %6826 = vmatpush.bf16.msra.mxu3 %v6654_v21  ;;  %v6637_v4 = vld [vmem:[#allocation2 + $0x180] sm:$0xff] }
0x115c   : > { %6856 = vmatpush.bf16.msra.mxu1 %v6661_v7  ;;  %v8760_v7 = vld [vmem:[%s11872_s2 + $0x30] sm:$0xf0] }
0x115d   : > { %6798 = vmatpush.bf16.msrb.mxu0 %v6645_v39  ;;  %6827 = vmatpush.bf16.msra.mxu3 %v6653_v3  ;;  %v6580_v9 = vpop.permute.xlu0 %6579  ;;  %v6628_v11 = vld [vmem:[#allocation2 + $0x138] sm:$0xff]  ;;  %v8759_v39 = vor.u32 %v9078_v10, %v8758_v6  ;;  %v8763_v3 = vor.u32 %v9076_v57, %v8760_v7 }
0x115e   : > { %6588 = vst.msk [vmem:[#allocation2 + $0x198] sm:$0xff] %vm3123_vm15, %v6580_v9  ;;  %v6388_v16 = vpop.permute.xlu1 %6387  ;;  %v6612_v17 = vld [vmem:[#allocation2 + $0xb8] sm:$0xff]  ;;  %v6660_v18 = vpack.c.bf16 %v6628_v11, %v6627_v14  ;;  %v8768_v9 = vld [vmem:[%s11872_s2 + $0x38] sm:$0xf0]  ;;  %v8766_v14 = vld [vmem:[%s11872_s2 + $0x28] sm:$0xf] }
0x115f   : > { %6396 = vst.msk [vmem:[#allocation2 + $0x98] sm:$0xff] %vm3123_vm15, %v6388_v16  ;;  %v6652_v19 = vpack.c.bf16 %v6612_v17, %v6611_v60  ;;  %v9079_v11 = vld [vmem:[%s11872_s2 + $0x34] sm:$0xf0]  ;;  %v8771_v16 = vor.u32 %v9077_v12, %v8768_v9  ;;  %v8774_v60 = vld [vmem:[%s11872_s2 + $0x40] sm:$0xf] }
0x1160   : > { %6857 = vmatpush.bf16.msra.mxu1 %v6660_v18  ;;  %v8767_v24 = vor.u32 %v9079_v11, %v8766_v14  ;;  %v9082_v17 = vld [vmem:[%s11872_s2 + $0x4c] sm:$0xf0]  ;;  %v9080_v18 = vld [vmem:[%s11872_s2 + $0x44] sm:$0xf] }
0x1161   : > { %6799 = vmatpush.bf16.msrb.mxu0 %v6644_v42  ;;  %6828 = vmatpush.bf16.msra.mxu3 %v6652_v19  ;;  %v8776_v42 = vld [vmem:[%s11872_s2 + $0x50] sm:$0xf0]  ;;  %v8775_v19 = vor.u32 %v9082_v17, %v8774_v60 }
0x1162   : > { %v8779_v62 = vor.u32 %v9080_v18, %v8776_v42 }
0x1164   : > { %6858 = vmatpush.bf16.msra.mxu1 %v6659_v47  ;;  %v8783_v47 = vor.u32 %v9083_v2, %v8782_v50 }
0x1165   : > { %6800 = vmatpush.bf16.msrb.mxu0 %v6643_v51  ;;  %6829 = vmatpush.bf16.msra.mxu3 %v6651_v41  ;;  %v6480_v27 = vpop.permute.xlu0 %6479  ;;  %v6640_v30 = vld [vmem:[#allocation2 + $0x198] sm:$0xff]  ;;  %v9086_v41 = vld [vmem:[%s11872_s2 + $0x6c] sm:$0xf0] }
0x1166   : > { %6490 = vst.msk [vmem:[#allocation2 + $0x108] sm:$0xff] %vm3123_vm15, %v6480_v27  ;;  %v6576_v43 = vpop.permute.xlu1 %6575  ;;  %v6608_v13 = vld [vmem:[#allocation2 + $0x98] sm:$0xff]  ;;  %v6666_v33 = vpack.c.bf16 %v6640_v30, %v6639_v29  ;;  %v9085_v29 = vld [vmem:[%s11872_s2 + $0x6c] sm:$0xf]  ;;  %v8800_v30 = vld [vmem:[%s11872_s2 + $0x78] sm:$0xf0] }
0x1167   : > { %6586 = vst.msk [vmem:[#allocation2 + $0x188] sm:$0xff] %vm3123_vm15, %v6576_v43  ;;  %v6650_v15 = vpack.c.bf16 %v6608_v13, %v6607_v54  ;;  %v8790_v51 = vld [vmem:[%s11872_s2 + $0x60] sm:$0xf]  ;;  %v8798_v43 = vld [vmem:[%s11872_s2 + $0x68] sm:$0xf]  ;;  %v8803_v54 = vor.u32 %v9085_v29, %v8800_v30 }
0x1168   : > { %6859 = vmatpush.bf16.msra.mxu1 %v6658_v20  ;;  %6888 = vmatpush.bf16.msra.mxu2 %v6666_v33  ;;  %v8791_v27 = vor.u32 %v9086_v41, %v8790_v51  ;;  %v8799_v13 = vor.u32 %v9087_v31, %v8798_v43  ;;  %v6695_v20 = vpop.permute.xlu2 %6694  ;;  %v9089_v41 = vld [vmem:[%s11873_s10 + $0x8] sm:$0xff] }
0x1169   : > { %6801 = vmatpush.bf16.msrb.mxu0 %v6642_v34  ;;  %6830 = vmatpush.bf16.msra.mxu3 %v6650_v15 }
0x116d   : > { %6802 = vmatpush.bf16.msrb.mxu0 %v6641_v55  ;;  %6831 = vmatpush.bf16.msra.mxu3 %v6649_v56  ;;  %v6622_v40 = vld [vmem:[#allocation2 + $0x108] sm:$0xff]  ;;  %v11342_v34 = vpop.permute.xlu0 %6699 }
0x116e   : > { %v6657_v1 = vpack.c.bf16 %v6622_v40, %v6621_v38  ;;  %v6638_v21 = vld [vmem:[#allocation2 + $0x188] sm:$0xff]  ;;  %v6690_v60 = vpop.permute.xlu1 %6689 }
0x116f   : > { %v6665_v52 = vpack.c.bf16 %v6638_v21, %v6637_v4 }
0x1170   : > { %6803 = vmatmul.bf16.vlgmr.msrb.gmra.mxu0 %v8743_v58  ;;  %6832 = vmatmul.bf16.vlgmr.msra.gmra.mxu3 %v8747_v36  ;;  %v6670_v15 = vpop.permute.xlu2 %6669 }
0x1171   : > { %6860 = vmatpush.bf16.msra.mxu1 %v6657_v1  ;;  %6889 = vmatpush.bf16.msra.mxu2 %v6665_v52 }
0x1174   : > { %8804 = vmatmul.msk.bf16.vlgmr.msra.gmra.mxu2 %vm3123_vm15, %v8755_v37  ;;  %6861 = vmatmul.bf16.vlgmr.msra.gmra.mxu1 %v8751_v53 }
0x1175   : > { %v6675_v55 = vpop.permute.xlu0 %6674 }
0x1178   : > { %v6680_v0 = vpop.permute.xlu2 %6679 }
0x117d   : > { %v6685_v57 = vpop.permute.xlu0 %6684 }
0x1180   : > { %6808 = vmatmul.bf16.gmra.mxu0 %v8759_v39  ;;  %6837 = vmatmul.bf16.gmra.mxu3 %v8763_v3 }
0x1184   : > { %8805 = vmatmul.msk.bf16.gmra.mxu2 %vm3123_vm15, %v8771_v16  ;;  %6866 = vmatmul.bf16.gmra.mxu1 %v8767_v24 }
0x1190   : > { %6813 = vmatmul.bf16.gmra.mxu0 %v8775_v19  ;;  %6842 = vmatmul.bf16.gmra.mxu3 %v8779_v62  ;;  %v9091_v62 = vld [vmem:[%s11873_s10 + $0x18] sm:$0xff] }
0x1191   : > { %6983 = vmatpush.bf16.msra.mxu0 %v9091_v62 }
0x1194   : > { %8806 = vmatmul.msk.bf16.gmra.mxu2 %vm3123_vm15, %v8787_v23  ;;  %6871 = vmatmul.bf16.gmra.mxu1 %v8783_v47 }
0x1195   : > { %6984 = vmatpush.bf16.msra.mxu0 %v9090_v46 }
0x1199   : > { %6985 = vmatpush.bf16.msra.mxu0 %v9089_v41  ;;  %v7009_v41 = vld [vmem:[%s11874_s11 + $0x18] sm:$0xff] }
0x11a0   : > { %6818 = vmatmul.bf16.gmra.mxu0 %v8791_v27  ;;  %6847 = vmatmul.bf16.gmra.mxu3 %v8795_v49 }
0x11a4   : > { %8807 = vmatmul.msk.bf16.gmra.mxu2 %vm3123_vm15, %v8803_v54  ;;  %6876 = vmatmul.bf16.gmra.mxu1 %v8799_v13 }
0x11ed   : > { %v6804_v33 = vpop.f32.mrf.mxu0 }
0x11ee   : > { %v6805_v28 = vadd.f32 %v6804_v33, %v6670_v15 }
0x11f1   : > { %v6862_v48 = vpop.f32.mrf.mxu1 }
0x11f3   : > { %v6833_v45 = vpop.f32.mrf.mxu3 }
0x11f4   : > { %v6834_v44 = vadd.f32 %v6833_v45, %v6805_v28  ;;  %v6705_v28 = vpop.permute.xlu1 %6704 }
0x11f5   : > { %v6806_v8 = vpop.f32.mrf.mxu0 }
0x11f6   : > { %v6863_v5 = vadd.f32 %v6862_v48, %v6834_v44  ;;  %v6807_v58 = vadd.f32 %v6806_v8, %v6675_v55 }
0x11f7   : > { %v6891_v35 = vpop.f32.mrf.mxu2 }
0x11f8   : > { %v11344_v32 = vadd.f32 %v6891_v35, %v6863_v5 }
0x11f9   : > { %v6864_v56 = vpop.f32.mrf.mxu1 }
0x11fb   : > { %v6835_v36 = vpop.f32.mrf.mxu3 }
0x11fc   : > { %v6836_v59 = vadd.f32 %v6835_v36, %v6807_v58 }
0x11fd   : > { %v6809_v61 = vpop.f32.mrf.mxu0 }
0x11fe   : > { %v6865_v63 = vadd.f32 %v6864_v56, %v6836_v59  ;;  %v6810_v4 = vadd.f32 %v6809_v61, %v6680_v0  ;;  %v6911_v0 = vmax.f32 %v11344_v32, 0.0 }
0x11ff   : > { %v6893_v38 = vpop.f32.mrf.mxu2 }
0x1200   : > { %v11346_v40 = vadd.f32 %v6893_v38, %v6865_v63  ;;  %v9088_v63 = vld [vmem:[%s11873_s10] sm:$0xff] }
0x1201   : > { %v6867_v1 = vpop.f32.mrf.mxu1  ;;  %6986 = vmatpush.bf16.msra.mxu0 %v9088_v63 }
0x1203   : > { %v6838_v21 = vpop.f32.mrf.mxu3 }
0x1204   : > { %v6839_v52 = vadd.f32 %v6838_v21, %v6810_v4 }
0x1205   : > { %v6811_v37 = vpop.f32.mrf.mxu0 }
0x1206   : > { %v6868_v53 = vadd.f32 %v6867_v1, %v6839_v52  ;;  %v6812_v39 = vadd.f32 %v6811_v37, %v6685_v57  ;;  %v6912_v1 = vmax.f32 %v11346_v40, 0.0 }
0x1207   : > { %v6896_v6 = vpop.f32.mrf.mxu2 }
0x1208   : > { %v11348_v10 = vadd.f32 %v6896_v6, %v6868_v53 }
0x1209   : > { %v6869_v7 = vpop.f32.mrf.mxu1 }
0x120a   : > { %v6913_v57 = vmax.f32 %v11348_v10, 0.0 }
0x120b   : > { %v6840_v3 = vpop.f32.mrf.mxu3 }
0x120c   : > { %v6841_v12 = vadd.f32 %v6840_v3, %v6812_v39 }
0x120d   : > { %v6814_v9 = vpop.f32.mrf.mxu0 }
0x120e   : > { %v6870_v14 = vadd.f32 %v6869_v7, %v6841_v12  ;;  %v6815_v18 = vadd.f32 %v6814_v9, %v6690_v60 }
0x120f   : > { %v6898_v11 = vpop.f32.mrf.mxu2 }
0x1210   : > { %v11350_v16 = vadd.f32 %v6898_v11, %v6870_v14 }
0x1211   : > { %v6872_v24 = vpop.f32.mrf.mxu1 }
0x1212   : > { %v6914_v7 = vmax.f32 %v11350_v16, 0.0 }
0x1213   : > { %v6843_v17 = vpop.f32.mrf.mxu3 }
0x1214   : > { %v6844_v19 = vadd.f32 %v6843_v17, %v6815_v18 }
0x1215   : > { %v6816_v42 = vpop.f32.mrf.mxu0 }
0x1216   : > { %v6817_v2 = vadd.f32 %v6816_v42, %v6695_v20  ;;  %v6873_v23 = vadd.f32 %v6872_v24, %v6844_v19 }
0x1217   : > { %v6901_v22 = vpop.f32.mrf.mxu2 }
0x1218   : > { %v6902_v26 = vadd.f32 %v6901_v22, %v6873_v23 }
0x1219   : > { %v6874_v50 = vpop.f32.mrf.mxu1 }
0x121a   : > { %v6915_v43 = vmax.f32 %v6902_v26, 0.0 }
0x121b   : > { %v6845_v47 = vpop.f32.mrf.mxu3 }
0x121c   : > { %v6846_v51 = vadd.f32 %v6845_v47, %v6817_v2  ;;  %v7008_v47 = vld [vmem:[%s11874_s11 + $0x10] sm:$0xff] }
0x121d   : > { %v6819_v25 = vpop.f32.mrf.mxu0 }
0x121e   : > { %v6875_v27 = vadd.f32 %v6874_v50, %v6846_v51  ;;  %v6820_v13 = vadd.f32 %v6819_v25, %v11342_v34  ;;  %v7006_v51 = vld [vmem:[%s11874_s11] sm:$0xff] }
0x121f   : > { %v6903_v49 = vpop.f32.mrf.mxu2 }
0x1220   : > { %v6904_v29 = vadd.f32 %v6903_v49, %v6875_v27  ;;  %v7007_v49 = vld [vmem:[%s11874_s11 + $0x8] sm:$0xff] }
0x1221   : > { %v6877_v30 = vpop.f32.mrf.mxu1 }
0x1222   : > { %v6916_v31 = vmax.f32 %v6904_v29, 0.0 }
0x1223   : > { %v6848_v54 = vpop.f32.mrf.mxu3 }
0x1224   : > { %v9249_v33 = vpack.i.bf16 %v6916_v31, %v6915_v43  ;;  %v6849_v15 = vadd.f32 %v6848_v54, %v6820_v13 }
0x1225   : > { %v6821_v20 = vpop.f32.mrf.mxu0 }
0x1226   : > { %9250 = vrot.lane.b32.xlu1 %v9249_v33, %s9364_s18  ;;  %v6822_v45 = vadd.f32 %v6821_v20, %v6705_v28  ;;  %v6878_v44 = vadd.f32 %v6877_v30, %v6849_v15 }
0x1227   : > { %v6906_v48 = vpop.f32.mrf.mxu2 }
0x1228   : > { %v6907_v55 = vadd.f32 %v6906_v48, %v6878_v44 }
0x1229   : > { %v6879_v5 = vpop.f32.mrf.mxu1 }
0x122a   : > { %v6917_v59 = vmax.f32 %v6907_v55, 0.0 }
0x122b   : > { %v6850_v8 = vpop.f32.mrf.mxu3 }
0x122c   : > { %v6851_v35 = vadd.f32 %v6850_v8, %v6822_v45 }
0x122e   : > { %v6880_v56 = vadd.f32 %v6879_v5, %v6851_v35 }
0x122f   : > { %v6908_v58 = vpop.f32.mrf.mxu2 }
0x1230   : > { %v6909_v36 = vadd.f32 %v6908_v58, %v6880_v56 }
0x1232   : > { %v6918_v61 = vmax.f32 %v6909_v36, 0.0 }
0x1234   : > { %v9254_v34 = vpack.i.bf16 %v6918_v61, %v6917_v59 }
0x1236   : > { %9255 = vrot.lane.b32.xlu1 %v9254_v34, %s9364_s18  ;;  %s9365_s18 = smov 64  }
0x1298   : > { %v9251_v38 = vpop.permute.xlu1 %9250 }
0x1299   : > { %v9253_v4 = vunpack.i.h.bf16 %v9251_v38  ;;  %v9252_v21 = vunpack.i.l.bf16 %v9251_v38 }
0x129b   : > { %v6943_v52 = vsel %vm3123_vm15, %v6911_v0, %v9252_v21  ;;  %v6944_v37 = vsel %vm3123_vm15, %v6912_v1, %v9253_v4 }
0x129c   : > { %v6947_v53 = vpack.c.bf16 %v6944_v37, %v6943_v52 }
0x129e   : > { %8824 = vmatmul.msk.bf16.vlgmr.msra.gmra.mxu0 %vm1697_vm6, %v6947_v53 }
0x12a8   : > { %v9256_v6 = vpop.permute.xlu1 %9255 }
0x12a9   : > { %v9258_v39 = vunpack.i.h.bf16 %v9256_v6  ;;  %v9257_v3 = vunpack.i.l.bf16 %v9256_v6 }
0x12ab   : > { %v6945_v32 = vsel %vm3123_vm15, %v6913_v57, %v9257_v3  ;;  %v6946_v40 = vsel %vm3123_vm15, %v6914_v7, %v9258_v39 }
0x12ac   : > { %v6948_v12 = vpack.c.bf16 %v6946_v40, %v6945_v32 }
0x12ae   : > { %8825 = vmatmul.msk.bf16.gmra.mxu0 %vm1697_vm6, %v6948_v12 }
0x131b   : > { %v6988_v9 = vpop.f32.mrf.mxu0 }
0x131c   : > { %7011 = vst.msk [vmem:[#allocation3] sm:$0xff] %vm7010_vm8, %v6988_v9 }
0x1323   : > { %v6990_v14 = vpop.f32.mrf.mxu0  ;;  %v11368_v11 = vld [vmem:[#allocation3] sm:$0xff] }
0x1324   : > { %7175 = vrot.lane.b32.xlu2 %v11368_v11, %s9361_s7  ;;  %7012 = vst.msk [vmem:[#allocation3 + $0x18] sm:$0xff] %vm7010_vm8, %v6990_v14  ;;  %7079 = vrot.lane.b32.xlu1 %v11368_v11, %s11835_s28 }
0x1325   : > { %7055 = vrot.lane.b32.xlu0 %v11368_v11, %s11841_s16  ;;  %7019 = vst.msk [vmem:[#allocation2] sm:$0xff] %vm1697_vm6, %v11368_v11 }
0x132b   : > { %v6993_v10 = vpop.f32.mrf.mxu0  ;;  %v11379_v16 = vld [vmem:[#allocation3 + $0x18] sm:$0xff] }
0x132c   : > { %7013 = vst.msk [vmem:[#allocation3 + $0x30] sm:$0xff] %vm7010_vm8, %v6993_v10  ;;  %7151 = vrot.lane.b32.xlu2 %v11368_v11, %s11844_s0  ;;  %7271 = vrot.lane.b32.xlu1 %v11368_v11, %s11853_s22 }
0x132d   : > { %7031 = vrot.lane.b32.xlu0 %v11368_v11, %s11833_s13  ;;  %7020 = vst.msk [vmem:[#allocation2 + $0x8] sm:$0xff] %vm1697_vm6, %v11379_v16 }
0x1333   : > { %v6995_v24 = vpop.f32.mrf.mxu0  ;;  %v7049_v60 = vld [vmem:[#allocation3 + $0x30] sm:$0xff] }
0x1334   : > { %7014 = vst.msk [vmem:[#allocation3 + $0x48] sm:$0xff] %vm7010_vm8, %v6995_v24  ;;  %7247 = vrot.lane.b32.xlu1 %v11368_v11, %s9357_s3  ;;  %7081 = vrot.lane.b32.xlu2 %v11379_v16, %s11835_s28 }
0x1335   : > { %7223 = vrot.lane.b32.xlu0 %v11368_v11, %s9356_s29  ;;  %7021 = vst.msk [vmem:[#allocation2 + $0x10] sm:$0xff] %vm1697_vm6, %v7049_v60 }
0x133b   : > { %v7074_v17 = vld [vmem:[#allocation3 + $0x48] sm:$0xff] }
0x133c   : > { %7127 = vrot.lane.b32.xlu1 %v11368_v11, %s11826_s26  ;;  %7273 = vrot.lane.b32.xlu2 %v11379_v16, %s11853_s22  ;;  %7022 = vst.msk [vmem:[#allocation2 + $0x18] sm:$0xff] %vm1697_vm6, %v7074_v17 }
0x133d   : > { %7177 = vrot.lane.b32.xlu0 %v11379_v16, %s9361_s7 }
0x1344   : > { %7249 = vrot.lane.b32.xlu2 %v11379_v16, %s9357_s3  ;;  %7057 = vrot.lane.b32.xlu1 %v11379_v16, %s11841_s16 }
0x1345   : > { %7153 = vrot.lane.b32.xlu0 %v11379_v16, %s11844_s0 }
0x134c   : > { %7129 = vrot.lane.b32.xlu2 %v11379_v16, %s11826_s26  ;;  %7033 = vrot.lane.b32.xlu1 %v11379_v16, %s11833_s13 }
0x134d   : > { %7059 = vrot.lane.b32.xlu0 %v7049_v60, %s11841_s16 }
0x1354   : > { %7225 = vrot.lane.b32.xlu1 %v11379_v16, %s9356_s29  ;;  %7083 = vrot.lane.b32.xlu2 %v7049_v60, %s11835_s28 }
0x1355   : > { %7035 = vrot.lane.b32.xlu0 %v7049_v60, %s11833_s13 }
0x135c   : > { %7275 = vrot.lane.b32.xlu1 %v7049_v60, %s11853_s22  ;;  %7179 = vrot.lane.b32.xlu2 %v7049_v60, %s9361_s7 }
0x135d   : > { %7131 = vrot.lane.b32.xlu0 %v7049_v60, %s11826_s26 }
0x1364   : > { %7251 = vrot.lane.b32.xlu1 %v7049_v60, %s9357_s3  ;;  %7155 = vrot.lane.b32.xlu2 %v7049_v60, %s11844_s0 }
0x1365   : > { %7203 = vrot.lane.b32.xlu0 %v7049_v60, %s9355_s21 }
0x136c   : > { %7107 = vrot.lane.b32.xlu1 %v7049_v60, %s11842_s1  ;;  %7227 = vrot.lane.b32.xlu2 %v7049_v60, %s9356_s29 }
0x136d   : > { %7085 = vrot.lane.b32.xlu0 %v7074_v17, %s11835_s28 }
0x1374   : > { %7299 = vrot.lane.b32.xlu2 %v7049_v60, %s11854_s20  ;;  %7061 = vrot.lane.b32.xlu1 %v7074_v17, %s11841_s16 }
0x1375   : > { %7181 = vrot.lane.b32.xlu0 %v7074_v17, %s9361_s7 }
0x137c   : > { %7277 = vrot.lane.b32.xlu2 %v7074_v17, %s11853_s22  ;;  %7037 = vrot.lane.b32.xlu1 %v7074_v17, %s11833_s13 }
0x137d   : > { %7157 = vrot.lane.b32.xlu0 %v7074_v17, %s11844_s0 }
0x137e   : > { %v7176_v18 = vpop.permute.xlu2 %7175 }
0x137f   : > { %7187 = vst.msk [vmem:[#allocation2 + $0xe0] sm:$0xff] %vm1697_vm6, %v7176_v18 }
0x1384   : > { %7253 = vrot.lane.b32.xlu2 %v7074_v17, %s9357_s3  ;;  %7103 = vrot.lane.b32.xlu1 %v11368_v11, %s11842_s1 }
0x1385   : > { %7297 = vrot.lane.b32.xlu0 %v11379_v16, %s11854_s20 }
0x1386   : > { %v7152_v42 = vpop.permute.xlu2 %7151 }
0x1387   : > { %7163 = vst.msk [vmem:[#allocation2 + $0xc0] sm:$0xff] %vm1697_vm6, %v7152_v42 }
0x138c   : > { %7295 = vrot.lane.b32.xlu2 %v11368_v11, %s11854_s20  ;;  %7133 = vrot.lane.b32.xlu1 %v7074_v17, %s11826_s26 }
0x138d   : > { %7229 = vrot.lane.b32.xlu0 %v7074_v17, %s9356_s29 }
0x138e   : > { %v7082_v19 = vpop.permute.xlu2 %7081 }
0x138f   : > { %7092 = vst.msk [vmem:[#allocation2 + $0x68] sm:$0xff] %vm1697_vm6, %v7082_v19 }
0x1394   : > { %7109 = vrot.lane.b32.xlu2 %v7074_v17, %s11842_s1  ;;  %7205 = vrot.lane.b32.xlu1 %v7074_v17, %s9355_s21 }
0x1395   : > { %7301 = vrot.lane.b32.xlu0 %v7074_v17, %s11854_s20 }
0x1396   : > { %v7080_v62 = vpop.permute.xlu1 %7079  ;;  %v7274_v22 = vpop.permute.xlu2 %7273  ;;  %v7324_v40 = vld [vmem:[#allocation2 + $0x68] sm:$0xff] }
0x1397   : > { %7091 = vst.msk [vmem:[#allocation2 + $0x60] sm:$0xff] %vm1697_vm6, %v7080_v62  ;;  %v7056_v46 = vpop.permute.xlu0 %7055 }
0x1398   : > { %7067 = vst.msk [vmem:[#allocation2 + $0x40] sm:$0xff] %vm1697_vm6, %v7056_v46  ;;  %v7339_v46 = vld [vmem:[#allocation2 + $0xe0] sm:$0xff] }
0x1399   : > { %7284 = vst.msk [vmem:[#allocation2 + $0x168] sm:$0xff] %vm1697_vm6, %v7274_v22 }
0x139c   : > { %7105 = vrot.lane.b32.xlu2 %v11379_v16, %s11842_s1  ;;  %7201 = vrot.lane.b32.xlu1 %v11379_v16, %s9355_s21 }
0x139d   : > { %7199 = vrot.lane.b32.xlu0 %v11368_v11, %s9355_s21 }
0x139e   : > { %v7272_v50 = vpop.permute.xlu1 %7271  ;;  %v7250_v2 = vpop.permute.xlu2 %7249  ;;  %v7323_v3 = vld [vmem:[#allocation2 + $0x60] sm:$0xff] }
0x139f   : > { %7283 = vst.msk [vmem:[#allocation2 + $0x160] sm:$0xff] %vm1697_vm6, %v7272_v50  ;;  %v7032_v23 = vpop.permute.xlu0 %7031  ;;  %v7369_v9 = vpack.c.bf16 %v7324_v40, %v7323_v3  ;;  %v7319_v50 = vld [vmem:[#allocation2 + $0x40] sm:$0xff] }
0x13a0   : > { %7043 = vst.msk [vmem:[#allocation2 + $0x20] sm:$0xff] %vm1697_vm6, %v7032_v23  ;;  %v7356_v0 = vld [vmem:[#allocation2 + $0x168] sm:$0xff] }
0x13a1   : > { %7260 = vst.msk [vmem:[#allocation2 + $0x148] sm:$0xff] %vm1697_vm6, %v7250_v2 }
0x13a4   : > { %7401 = vperm.xlu2 %9218, %v7008_v47   ;;  %7391 = vperm.xlu1 %9217, %v7006_v51  }
0x13a5   : > { %7406 = vperm.xlu0 %9216, %v7009_v41  }
0x13a6   : > { %v7248_v25 = vpop.permute.xlu1 %7247  ;;  %v7130_v26 = vpop.permute.xlu2 %7129  ;;  %v7355_v38 = vld [vmem:[#allocation2 + $0x160] sm:$0xff] }
0x13a7   : > { %7259 = vst.msk [vmem:[#allocation2 + $0x140] sm:$0xff] %vm1697_vm6, %v7248_v25  ;;  %v7224_v27 = vpop.permute.xlu0 %7223  ;;  %v7385_v1 = vpack.c.bf16 %v7356_v0, %v7355_v38 }
0x13a8   : > { %7235 = vst.msk [vmem:[#allocation2 + $0x120] sm:$0xff] %vm1697_vm6, %v7224_v27  ;;  %v7352_v12 = vld [vmem:[#allocation2 + $0x148] sm:$0xff] }
0x13a9   : > { %7140 = vst.msk [vmem:[#allocation2 + $0xa8] sm:$0xff] %vm1697_vm6, %v7130_v26 }
0x13ac   : > { %7396 = vperm.xlu2 %9218, %v7007_v49  }
0x13ae   : > { %v7128_v29 = vpop.permute.xlu1 %7127  ;;  %v7084_v30 = vpop.permute.xlu2 %7083  ;;  %v7351_v32 = vld [vmem:[#allocation2 + $0x140] sm:$0xff] }
0x13af   : > { %7139 = vst.msk [vmem:[#allocation2 + $0xa0] sm:$0xff] %vm1697_vm6, %v7128_v29  ;;  %v7178_v43 = vpop.permute.xlu0 %7177  ;;  %v7383_v14 = vpack.c.bf16 %v7352_v12, %v7351_v32 }
0x13b0   : > { %7188 = vst.msk [vmem:[#allocation2 + $0xe8] sm:$0xff] %vm1697_vm6, %v7178_v43 }
0x13b1   : > { %7093 = vst.msk [vmem:[#allocation2 + $0x70] sm:$0xff] %vm1697_vm6, %v7084_v30 }
0x13b6   : > { %v7058_v31 = vpop.permute.xlu1 %7057  ;;  %v7180_v54 = vpop.permute.xlu2 %7179 }
0x13b7   : > { %v7154_v13 = vpop.permute.xlu0 %7153  ;;  %7068 = vst.msk [vmem:[#allocation2 + $0x48] sm:$0xff] %vm1697_vm6, %v7058_v31  ;;  %v7340_v62 = vld [vmem:[#allocation2 + $0xe8] sm:$0xff] }
0x13b8   : > { %7164 = vst.msk [vmem:[#allocation2 + $0xc8] sm:$0xff] %vm1697_vm6, %v7154_v13  ;;  %v7325_v6 = vld [vmem:[#allocation2 + $0x70] sm:$0xff]  ;;  %v7377_v2 = vpack.c.bf16 %v7340_v62, %v7339_v46  ;;  %v7315_v13 = vld [vmem:[#allocation2 + $0x20] sm:$0xff]  ;;  %v8844_v46 = vld [vmem:[%s11875_s15 + $0x20] sm:$0xf] }
0x13b9   : > { %7189 = vst.msk [vmem:[#allocation2 + $0xf0] sm:$0xff] %vm1697_vm6, %v7180_v54  ;;  %v7335_v54 = vld [vmem:[#allocation2 + $0xc0] sm:$0xff] }
0x13be   : > { %v7034_v33 = vpop.permute.xlu1 %7033  ;;  %v7156_v15 = vpop.permute.xlu2 %7155  ;;  %v7320_v22 = vld [vmem:[#allocation2 + $0x48] sm:$0xff] }
0x13bf   : > { %7044 = vst.msk [vmem:[#allocation2 + $0x28] sm:$0xff] %vm1697_vm6, %v7034_v33  ;;  %v7060_v20 = vpop.permute.xlu0 %7059  ;;  %v7367_v23 = vpack.c.bf16 %v7320_v22, %v7319_v50  ;;  %v7336_v43 = vld [vmem:[#allocation2 + $0xc8] sm:$0xff] }
0x13c0   : > { %7165 = vst.msk [vmem:[#allocation2 + $0xd0] sm:$0xff] %vm1697_vm6, %v7156_v15  ;;  %v7341_v24 = vld [vmem:[#allocation2 + $0xf0] sm:$0xff]  ;;  %v7375_v33 = vpack.c.bf16 %v7336_v43, %v7335_v54  ;;  %v9098_v50 = vld [vmem:[%s11875_s15 + $0x2c] sm:$0xf0]  ;;  %v8846_v43 = vld [vmem:[%s11875_s15 + $0x30] sm:$0xf0] }
0x13c1   : > { %7069 = vst.msk [vmem:[#allocation2 + $0x50] sm:$0xff] %vm1697_vm6, %v7060_v20  ;;  %v8854_v54 = vld [vmem:[%s11875_s15 + $0x38] sm:$0xf0] }
0x13c6   : > { %v7226_v48 = vpop.permute.xlu1 %7225  ;;  %v7228_v28 = vpop.permute.xlu2 %7227  ;;  %v7316_v31 = vld [vmem:[#allocation2 + $0x28] sm:$0xff] }
0x13c7   : > { %7236 = vst.msk [vmem:[#allocation2 + $0x128] sm:$0xff] %vm1697_vm6, %v7226_v48  ;;  %v7036_v45 = vpop.permute.xlu0 %7035  ;;  %v7337_v25 = vld [vmem:[#allocation2 + $0xd0] sm:$0xff]  ;;  %v7365_v15 = vpack.c.bf16 %v7316_v31, %v7315_v13  ;;  %v7314_v48 = vld [vmem:[#allocation2 + $0x18] sm:$0xff]  ;;  %v9097_v31 = vld [vmem:[%s11875_s15 + $0x2c] sm:$0xf] }
0x13c8   : > { %7237 = vst.msk [vmem:[#allocation2 + $0x130] sm:$0xff] %vm1697_vm6, %v7228_v28  ;;  %v7321_v17 = vld [vmem:[#allocation2 + $0x50] sm:$0xff] }
0x13c9   : > { %7045 = vst.msk [vmem:[#allocation2 + $0x30] sm:$0xff] %vm1697_vm6, %v7036_v45  ;;  %v7313_v45 = vld [vmem:[#allocation2 + $0x10] sm:$0xff] }
0x13ce   : > { %v7276_v44 = vpop.permute.xlu1 %7275  ;;  %v7300_v8 = vpop.permute.xlu2 %7299 }
0x13cf   : > { %7285 = vst.msk [vmem:[#allocation2 + $0x170] sm:$0xff] %vm1697_vm6, %v7276_v44  ;;  %v7132_v5 = vpop.permute.xlu0 %7131  ;;  %v7364_v44 = vpack.c.bf16 %v7314_v48, %v7313_v45  ;;  %v7349_v38 = vld [vmem:[#allocation2 + $0x130] sm:$0xff] }
0x13d0   : > { %7309 = vst.msk [vmem:[#allocation2 + $0x190] sm:$0xff] %vm1697_vm6, %v7300_v8  ;;  %v7317_v27 = vld [vmem:[#allocation2 + $0x30] sm:$0xff]  ;;  %v7312_v8 = vld [vmem:[#allocation2 + $0x8] sm:$0xff] }
0x13d1   : > { %7141 = vst.msk [vmem:[#allocation2 + $0xb0] sm:$0xff] %vm1697_vm6, %v7132_v5  ;;  %v8828_v5 = vld [vmem:[%s11875_s15] sm:$0xf] }
0x13d6   : > { %v7252_v35 = vpop.permute.xlu1 %7251  ;;  %v7278_v55 = vpop.permute.xlu2 %7277  ;;  %v7357_v61 = vld [vmem:[#allocation2 + $0x170] sm:$0xff] }
0x13d7   : > { %7261 = vst.msk [vmem:[#allocation2 + $0x150] sm:$0xff] %vm1697_vm6, %v7252_v35  ;;  %v7204_v56 = vpop.permute.xlu0 %7203  ;;  %v9094_v35 = vld [vmem:[%s11875_s15 + $0xc] sm:$0xf0] }
0x13d8   : > { %7213 = vst.msk [vmem:[#allocation2 + $0x110] sm:$0xff] %vm1697_vm6, %v7204_v56 }
0x13d9   : > { %7286 = vst.msk [vmem:[#allocation2 + $0x178] sm:$0xff] %vm1697_vm6, %v7278_v55  ;;  %v7311_v55 = vld [vmem:[#allocation2] sm:$0xff] }
0x13da   : > { %v7363_v56 = vpack.c.bf16 %v7312_v8, %v7311_v55 }
0x13de   : > { %v7108_v58 = vpop.permute.xlu1 %7107  ;;  %v7254_v36 = vpop.permute.xlu2 %7253  ;;  %v7353_v37 = vld [vmem:[#allocation2 + $0x150] sm:$0xff] }
0x13df   : > { %7117 = vst.msk [vmem:[#allocation2 + $0x90] sm:$0xff] %vm1697_vm6, %v7108_v58  ;;  %v7086_v59 = vpop.permute.xlu0 %7085  ;;  %v7345_v3 = vld [vmem:[#allocation2 + $0x110] sm:$0xff] }
0x13e0   : > { %7262 = vst.msk [vmem:[#allocation2 + $0x158] sm:$0xff] %vm1697_vm6, %v7254_v36  ;;  %v7358_v34 = vld [vmem:[#allocation2 + $0x178] sm:$0xff]  ;;  %v8829_v36 = vor.u32 %v9094_v35, %v8828_v5 }
0x13e1   : > { %7094 = vst.msk [vmem:[#allocation2 + $0x78] sm:$0xff] %vm1697_vm6, %v7086_v59  ;;  %v7386_v63 = vpack.c.bf16 %v7358_v34, %v7357_v61  ;;  %v7333_v59 = vld [vmem:[#allocation2 + $0xb0] sm:$0xff] }
0x13e3   : > { %7491 = vmatpush.bf16.msrb.mxu1 %v7386_v63 }
0x13e6   : > { %v7296_v4 = vpop.permute.xlu2 %7295  ;;  %v7062_v21 = vpop.permute.xlu1 %7061 }
0x13e7   : > { %7492 = vmatpush.bf16.msrb.mxu1 %v7385_v1  ;;  %7307 = vst.msk [vmem:[#allocation2 + $0x180] sm:$0xff] %vm1697_vm6, %v7296_v4  ;;  %v7182_v52 = vpop.permute.xlu0 %7181  ;;  %v7354_v53 = vld [vmem:[#allocation2 + $0x158] sm:$0xff]  ;;  %v7331_v4 = vld [vmem:[#allocation2 + $0xa0] sm:$0xff] }
0x13e8   : > { %7190 = vst.msk [vmem:[#allocation2 + $0xf8] sm:$0xff] %vm1697_vm6, %v7182_v52  ;;  %v7326_v57 = vld [vmem:[#allocation2 + $0x78] sm:$0xff]  ;;  %v7384_v7 = vpack.c.bf16 %v7354_v53, %v7353_v37  ;;  %v7332_v52 = vld [vmem:[#allocation2 + $0xa8] sm:$0xff]  ;;  %v7347_v53 = vld [vmem:[#allocation2 + $0x120] sm:$0xff] }
0x13e9   : > { %7070 = vst.msk [vmem:[#allocation2 + $0x58] sm:$0xff] %vm1697_vm6, %v7062_v21  ;;  %v7370_v39 = vpack.c.bf16 %v7326_v57, %v7325_v6  ;;  %v7348_v21 = vld [vmem:[#allocation2 + $0x128] sm:$0xff]  ;;  %v7373_v37 = vpack.c.bf16 %v7332_v52, %v7331_v4  ;;  %v8910_v4 = vld [vmem:[%s11876_s27 + $0x60] sm:$0xf] }
0x13ea   : > { %v7381_v6 = vpack.c.bf16 %v7348_v21, %v7347_v53  ;;  %v9113_v21 = vld [vmem:[%s11876_s27 + $0x64] sm:$0xf0] }
0x13eb   : > { %7453 = vmatpush.bf16.msrb.mxu3 %v7370_v39  ;;  %7493 = vmatpush.bf16.msrb.mxu1 %v7384_v7  ;;  %v7329_v39 = vld [vmem:[#allocation2 + $0x90] sm:$0xff] }
0x13ee   : > { %v7110_v11 = vpop.permute.xlu2 %7109  ;;  %v7038_v10 = vpop.permute.xlu1 %7037  ;;  %v7359_v22 = vld [vmem:[#allocation2 + $0x180] sm:$0xff] }
0x13ef   : > { %7454 = vmatpush.bf16.msrb.mxu3 %v7369_v9  ;;  %7494 = vmatpush.bf16.msrb.mxu1 %v7383_v14  ;;  %7118 = vst.msk [vmem:[#allocation2 + $0x98] sm:$0xff] %vm1697_vm6, %v7110_v11  ;;  %v7158_v16 = vpop.permute.xlu0 %7157  ;;  %v7342_v60 = vld [vmem:[#allocation2 + $0xf8] sm:$0xff]  ;;  %v7361_v14 = vld [vmem:[#allocation2 + $0x190] sm:$0xff] }
0x13f0   : > { %7166 = vst.msk [vmem:[#allocation2 + $0xd8] sm:$0xff] %vm1697_vm6, %v7158_v16  ;;  %v7322_v18 = vld [vmem:[#allocation2 + $0x58] sm:$0xff]  ;;  %v7378_v42 = vpack.c.bf16 %v7342_v60, %v7341_v24 }
0x13f1   : > { %7046 = vst.msk [vmem:[#allocation2 + $0x38] sm:$0xff] %vm1697_vm6, %v7038_v10  ;;  %v7368_v19 = vpack.c.bf16 %v7322_v18, %v7321_v17  ;;  %v9092_v17 = vld [vmem:[%s11875_s15 + $0x4] sm:$0xf]  ;;  %v8830_v18 = vld [vmem:[%s11875_s15 + $0x10] sm:$0xf0] }
0x13f2   : > { %7472 = vmatpush.bf16.msrb.mxu0 %v7378_v42  ;;  %v9093_v42 = vld [vmem:[%s11875_s15 + $0xc] sm:$0xf] }
0x13f3   : > { %7455 = vmatpush.bf16.msrb.mxu3 %v7368_v19  ;;  %v8838_v19 = vld [vmem:[%s11875_s15 + $0x18] sm:$0xf0] }
0x13f6   : > { %7473 = vmatpush.bf16.msrb.mxu0 %v7377_v2  ;;  %v7106_v47 = vpop.permute.xlu2 %7105  ;;  %v7104_v51 = vpop.permute.xlu1 %7103  ;;  %v7330_v57 = vld [vmem:[#allocation2 + $0x98] sm:$0xff] }
0x13f7   : > { %7456 = vmatpush.bf16.msrb.mxu3 %v7367_v23  ;;  %7116 = vst.msk [vmem:[#allocation2 + $0x88] sm:$0xff] %vm1697_vm6, %v7106_v47  ;;  %v7298_v41 = vpop.permute.xlu0 %7297  ;;  %v7338_v26 = vld [vmem:[#allocation2 + $0xd8] sm:$0xff]  ;;  %v7372_v12 = vpack.c.bf16 %v7330_v57, %v7329_v39  ;;  %v8833_v23 = vor.u32 %v9092_v17, %v8830_v18  ;;  %v8841_v47 = vor.u32 %v9093_v42, %v8838_v19  ;;  %v8912_v57 = vld [vmem:[%s11876_s27 + $0x68] sm:$0xf0]  ;;  %v9109_v17 = vld [vmem:[%s11876_s27 + $0x44] sm:$0xf0] }
0x13f8   : > { %7308 = vst.msk [vmem:[#allocation2 + $0x188] sm:$0xff] %vm1697_vm6, %v7298_v41  ;;  %v7318_v49 = vld [vmem:[#allocation2 + $0x38] sm:$0xff]  ;;  %v7376_v29 = vpack.c.bf16 %v7338_v26, %v7337_v25  ;;  %v8836_v25 = vld [vmem:[%s11875_s15 + $0x8] sm:$0xf]  ;;  %v9095_v26 = vld [vmem:[%s11875_s15 + $0x14] sm:$0xf0]  ;;  %v8911_v39 = vor.u32 %v9113_v21, %v8910_v4 }
0x13f9   : > { %7115 = vst.msk [vmem:[#allocation2 + $0x80] sm:$0xff] %vm1697_vm6, %v7104_v51  ;;  %v7366_v30 = vpack.c.bf16 %v7318_v49, %v7317_v27  ;;  %v8845_v51 = vor.u32 %v9098_v50, %v8844_v46  ;;  %v9108_v42 = vld [vmem:[%s11876_s27 + $0x44] sm:$0xf]  ;;  %v8896_v19 = vld [vmem:[%s11876_s27 + $0x48] sm:$0xf0] }
0x13fa   : > { %7474 = vmatpush.bf16.msrb.mxu0 %v7376_v29  ;;  %v8837_v29 = vor.u32 %v9095_v26, %v8836_v25  ;;  %v8899_v50 = vor.u32 %v9108_v42, %v8896_v19  ;;  %v8862_v4 = vld [vmem:[%s11876_s27] sm:$0xf]  ;;  %v9101_v21 = vld [vmem:[%s11876_s27 + $0x4] sm:$0xf0] }
0x13fb   : > { %7457 = vmatpush.bf16.msrb.mxu3 %v7366_v30  ;;  %v9096_v30 = vld [vmem:[%s11875_s15 + $0x24] sm:$0xf] }
0x13fc   : > { %v8849_v13 = vor.u32 %v9096_v30, %v8846_v43 }
0x13fe   : > { %7475 = vmatpush.bf16.msrb.mxu0 %v7375_v33  ;;  %v7134_v20 = vpop.permute.xlu1 %7133  ;;  %v7328_v24 = vld [vmem:[#allocation2 + $0x88] sm:$0xff]  ;;  %v8857_v33 = vor.u32 %v9097_v31, %v8854_v54  ;;  %v7402_v45 = vpop.permute.xlu2 %7401  ;;  %v9104_v31 = vld [vmem:[%s11876_s27 + $0x24] sm:$0xf]  ;;  %v8880_v54 = vld [vmem:[%s11876_s27 + $0x28] sm:$0xf0] }
0x13ff   : > { %7458 = vmatpush.bf16.msrb.mxu3 %v7365_v15  ;;  %v7230_v28 = vpop.permute.xlu0 %7229  ;;  %7142 = vst.msk [vmem:[#allocation2 + $0xb8] sm:$0xff] %vm1697_vm6, %v7134_v20  ;;  %v7360_v60 = vld [vmem:[#allocation2 + $0x188] sm:$0xff]  ;;  %v8852_v15 = vld [vmem:[%s11875_s15 + $0x28] sm:$0xf]  ;;  %v9099_v20 = vld [vmem:[%s11875_s15 + $0x34] sm:$0xf0] }
0x1400   : > { %7238 = vst.msk [vmem:[#allocation2 + $0x138] sm:$0xff] %vm1697_vm6, %v7230_v28  ;;  %v7327_v16 = vld [vmem:[#allocation2 + $0x80] sm:$0xff]  ;;  %v7387_v2 = vpack.c.bf16 %v7360_v60, %v7359_v22  ;;  %v8853_v48 = vor.u32 %v9099_v20, %v8852_v15  ;;  %v8894_v60 = vld [vmem:[%s11876_s27 + $0x40] sm:$0xf] }
0x1401   : > { %v7371_v62 = vpack.c.bf16 %v7328_v24, %v7327_v16  ;;  %v8895_v46 = vor.u32 %v9109_v17, %v8894_v60 }
0x1403   : > { %7459 = vmatpush.bf16.msrb.mxu3 %v7364_v44 }
0x1406   : > { %v7206_v58 = vpop.permute.xlu1 %7205  ;;  %v7334_v61 = vld [vmem:[#allocation2 + $0xb8] sm:$0xff] }
0x1407   : > { %7460 = vmatpush.bf16.msrb.mxu3 %v7363_v56  ;;  %v7302_v34 = vpop.permute.xlu0 %7301  ;;  %7214 = vst.msk [vmem:[#allocation2 + $0x118] sm:$0xff] %vm1697_vm6, %v7206_v58  ;;  %v7374_v63 = vpack.c.bf16 %v7334_v61, %v7333_v59  ;;  %v7350_v0 = vld [vmem:[#allocation2 + $0x138] sm:$0xff]  ;;  %v7397_v58 = vpop.permute.xlu2 %7396  ;;  %v8918_v59 = vld [vmem:[%s11876_s27 + $0x70] sm:$0xf]  ;;  %v9115_v61 = vld [vmem:[%s11876_s27 + $0x74] sm:$0xf0] }
0x1408   : > { %7310 = vst.msk [vmem:[#allocation2 + $0x198] sm:$0xff] %vm1697_vm6, %v7302_v34  ;;  %v7382_v1 = vpack.c.bf16 %v7350_v0, %v7349_v38  ;;  %v9114_v34 = vld [vmem:[%s11876_s27 + $0x74] sm:$0xf]  ;;  %v8919_v0 = vor.u32 %v9115_v61, %v8918_v59 }
0x1409   : > { %7476 = vmatpush.bf16.msrb.mxu0 %v7374_v63 }
0x140a   : > { %7461 = vmatmul.bf16.vlgmr.msrb.gmra.mxu3 %v8829_v36  ;;  %7495 = vmatpush.bf16.msrb.mxu1 %v7382_v1  ;;  %v8920_v1 = vld [vmem:[%s11876_s27 + $0x78] sm:$0xf0] }
0x140b   : > { %v8923_v53 = vor.u32 %v9114_v34, %v8920_v1  ;;  %7640 = vmatpush.bf16.msra.mxu3 %v8919_v0 }
0x140d   : > { %7477 = vmatpush.bf16.msrb.mxu0 %v7373_v37 }
0x140e   : > { %7496 = vmatpush.bf16.msrb.mxu1 %v7381_v6  ;;  %v7202_v7 = vpop.permute.xlu1 %7201  ;;  %v7346_v32 = vld [vmem:[#allocation2 + $0x118] sm:$0xff] }
0x140f   : > { %v7200_v40 = vpop.permute.xlu0 %7199  ;;  %7212 = vst.msk [vmem:[#allocation2 + $0x108] sm:$0xff] %vm1697_vm6, %v7202_v7  ;;  %v7380_v9 = vpack.c.bf16 %v7346_v32, %v7345_v3  ;;  %v7362_v11 = vld [vmem:[#allocation2 + $0x198] sm:$0xff]  ;;  %v8902_v32 = vld [vmem:[%s11876_s27 + $0x50] sm:$0xf]  ;;  %7641 = vmatpush.bf16.msra.mxu3 %v8911_v39 }
0x1410   : > { %7211 = vst.msk [vmem:[#allocation2 + $0x100] sm:$0xff] %vm1697_vm6, %v7200_v40  ;;  %v7388_v10 = vpack.c.bf16 %v7362_v11, %v7361_v14  ;;  %v9112_v6 = vld [vmem:[%s11876_s27 + $0x64] sm:$0xf]  ;;  %v9111_v40 = vld [vmem:[%s11876_s27 + $0x54] sm:$0xf0] }
0x1411   : > { %7478 = vmatpush.bf16.msrb.mxu0 %v7372_v12  ;;  %v8915_v3 = vor.u32 %v9112_v6, %v8912_v57  ;;  %v9110_v12 = vld [vmem:[%s11876_s27 + $0x54] sm:$0xf]  ;;  %v8864_v6 = vld [vmem:[%s11876_s27 + $0x8] sm:$0xf0] }
0x1412   : > { %7497 = vmatpush.bf16.msrb.mxu1 %v7380_v9  ;;  %7516 = vmatpush.bf16.msrb.mxu2 %v7388_v10  ;;  %v8904_v9 = vld [vmem:[%s11876_s27 + $0x58] sm:$0xf0]  ;;  %v8903_v10 = vor.u32 %v9111_v40, %v8902_v32 }
0x1413   : > { %v8907_v24 = vor.u32 %v9110_v12, %v8904_v9 }
0x1414   : > { %7642 = vmatpush.bf16.msra.mxu3 %v8903_v10 }
0x1415   : > { %7479 = vmatpush.bf16.msrb.mxu0 %v7371_v62 }
0x1416   : > { %7517 = vmatpush.bf16.msrb.mxu2 %v7387_v2  ;;  %v7344_v41 = vld [vmem:[#allocation2 + $0x108] sm:$0xff]  ;;  %v7392_v44 = vpop.permute.xlu1 %7391 }
0x1417   : > { %v7343_v27 = vld [vmem:[#allocation2 + $0x100] sm:$0xff]  ;;  %v8886_v2 = vld [vmem:[%s11876_s27 + $0x30] sm:$0xf] }
0x1418   : > { %7480 = vmatmul.bf16.vlgmr.msrb.gmra.mxu0 %v8833_v23  ;;  %v7379_v49 = vpack.c.bf16 %v7344_v41, %v7343_v27  ;;  %v9107_v23 = vld [vmem:[%s11876_s27 + $0x34] sm:$0xf0]  ;;  %7643 = vmatpush.bf16.msra.mxu3 %v8895_v46 }
0x1419   : > { %8858 = vmatmul.msk.bf16.vlgmr.msrb.gmra.mxu2 %vm3123_vm15, %v8841_v47  ;;  %7654 = vmatpush.bf16.msra.mxu0 %v8923_v53  ;;  %v9106_v47 = vld [vmem:[%s11876_s27 + $0x34] sm:$0xf]  ;;  %v8887_v25 = vor.u32 %v9107_v23, %v8886_v2  ;;  %v8863_v53 = vor.u32 %v9101_v21, %v8862_v4 }
0x141a   : > { %7466 = vmatmul.bf16.gmra.mxu3 %v8845_v51  ;;  %7498 = vmatpush.bf16.msrb.mxu1 %v7379_v49  ;;  %v8888_v51 = vld [vmem:[%s11876_s27 + $0x38] sm:$0xf0]  ;;  %v8878_v49 = vld [vmem:[%s11876_s27 + $0x20] sm:$0xf] }
0x141b   : > { %v8891_v27 = vor.u32 %v9106_v47, %v8888_v51 }
0x141c   : > { %7644 = vmatpush.bf16.msra.mxu3 %v8887_v25 }
0x141d   : > { %7499 = vmatmul.bf16.vlgmr.msrb.gmra.mxu1 %v8837_v29  ;;  %7655 = vmatpush.bf16.msra.mxu0 %v8915_v3  ;;  %v9105_v29 = vld [vmem:[%s11876_s27 + $0x24] sm:$0xf0] }
0x141e   : > { %v8879_v20 = vor.u32 %v9105_v29, %v8878_v49 }
0x1420   : > { %7645 = vmatpush.bf16.msra.mxu3 %v8879_v20 }
0x1421   : > { %7656 = vmatpush.bf16.msra.mxu0 %v8907_v24 }
0x1425   : > { %7657 = vmatpush.bf16.msra.mxu0 %v8899_v50 }
0x1428   : > { %7485 = vmatmul.bf16.gmra.mxu0 %v8849_v13 }
0x1429   : > { %8859 = vmatmul.msk.bf16.gmra.mxu2 %vm3123_vm15, %v8857_v33  ;;  %v7407_v33 = vpop.permute.xlu0 %7406  ;;  %7658 = vmatpush.bf16.msra.mxu0 %v8891_v27  ;;  %vm7764_vm15 = vcmask 1014784  }
0x142d   : > { %7504 = vmatmul.bf16.gmra.mxu1 %v8853_v48 }
0x148d   : > { %v7462_v28 = vpop.f32.mrf.mxu3 }
0x148e   : > { %v7463_v8 = vadd.f32 %v7462_v28, %v7392_v44  ;;  %v8870_v44 = vld [vmem:[%s11876_s27 + $0x10] sm:$0xf] }
0x1495   : > { %v7481_v5 = vpop.f32.mrf.mxu0  ;;  %v7464_v55 = vpop.f32.mrf.mxu3 }
0x1496   : > { %v7482_v35 = vadd.f32 %v7481_v5, %v7463_v8  ;;  %v7465_v63 = vadd.f32 %v7464_v55, %v7397_v58  ;;  %v9103_v8 = vld [vmem:[%s11876_s27 + $0x14] sm:$0xf0]  ;;  %v9102_v5 = vld [vmem:[%s11876_s27 + $0x14] sm:$0xf] }
0x1497   : > { %v8871_v58 = vor.u32 %v9103_v8, %v8870_v44 }
0x1499   : > { %7646 = vmatpush.bf16.msra.mxu3 %v8871_v58 }
0x149a   : > { %v7500_v56 = vpop.f32.mrf.mxu1 }
0x149b   : > { %v7501_v36 = vadd.f32 %v7500_v56, %v7482_v35  ;;  %v8872_v35 = vld [vmem:[%s11876_s27 + $0x18] sm:$0xf0] }
0x149c   : > { %v7519_v38 = vpop.f32.mrf.mxu2  ;;  %v8875_v61 = vor.u32 %v9102_v5, %v8872_v35 }
0x149d   : > { %v11529_v52 = vadd.f32 %v7519_v38, %v7501_v36  ;;  %v7483_v37 = vpop.f32.mrf.mxu0  ;;  %v7467_v14 = vpop.f32.mrf.mxu3  ;;  %7647 = vmatpush.bf16.msra.mxu3 %v8863_v53 }
0x149e   : > { %v7484_v7 = vadd.f32 %v7483_v37, %v7465_v63  ;;  %v7468_v26 = vadd.f32 %v7467_v14, %v7402_v45  ;;  %v8883_v45 = vor.u32 %v9104_v31, %v8880_v54  ;;  %v9100_v37 = vld [vmem:[%s11876_s27 + $0x4] sm:$0xf] }
0x149f   : > { %v8867_v57 = vor.u32 %v9100_v37, %v8864_v6  ;;  %v7529_v39 = vmax.f32 %v11529_v52, 0.0 }
0x14a0   : > { %7659 = vmatpush.bf16.msra.mxu0 %v8883_v45 }
0x14a2   : > { %v7502_v11 = vpop.f32.mrf.mxu1 }
0x14a3   : > { %v7503_v16 = vadd.f32 %v7502_v11, %v7484_v7 }
0x14a4   : > { %v7521_v18 = vpop.f32.mrf.mxu2  ;;  %7660 = vmatpush.bf16.msra.mxu0 %v8875_v61 }
0x14a5   : > { %v11541_v62 = vadd.f32 %v7521_v18, %v7503_v16  ;;  %v7486_v22 = vpop.f32.mrf.mxu0  ;;  %v7469_v30 = vpop.f32.mrf.mxu3 }
0x14a6   : > { %v7487_v13 = vadd.f32 %v7486_v22, %v7468_v26  ;;  %v7470_v48 = vadd.f32 %v7469_v30, %v7407_v33 }
0x14a7   : > { %v7530_v3 = vmax.f32 %v11541_v62, 0.0 }
0x14a8   : > { %7661 = vmatpush.bf16.msra.mxu0 %v8867_v57 }
0x14aa   : > { %v7505_v41 = vpop.f32.mrf.mxu1 }
0x14ab   : > { %v7506_v28 = vadd.f32 %v7505_v41, %v7487_v13 }
0x14ac   : > { %v7524_v43 = vpop.f32.mrf.mxu2 }
0x14ad   : > { %v7488_v15 = vpop.f32.mrf.mxu0  ;;  %v7525_v36 = vadd.f32 %v7524_v43, %v7506_v28 }
0x14ae   : > { %v7489_v55 = vadd.f32 %v7488_v15, %v7470_v48 }
0x14af   : > { %v7531_v38 = vmax.f32 %v7525_v36, 0.0 }
0x14b2   : > { %v7507_v56 = vpop.f32.mrf.mxu1 }
0x14b3   : > { %v7508_v59 = vadd.f32 %v7507_v56, %v7489_v55 }
0x14b4   : > { %v7526_v34 = vpop.f32.mrf.mxu2 }
0x14b5   : > { %v7527_v63 = vadd.f32 %v7526_v34, %v7508_v59 }
0x14b7   : > { %v7532_v0 = vmax.f32 %v7527_v63, 0.0 }
0x14b9   : > { %v9259_v1 = vpack.i.bf16 %v7532_v0, %v7531_v38 }
0x14bb   : > { %9260 = vrot.lane.b32.xlu0 %v9259_v1, %s9365_s18 }
0x152d   : > { %v9261_v7 = vpop.permute.xlu0 %9260 }
0x152e   : > { %v9263_v32 = vunpack.i.h.bf16 %v9261_v7  ;;  %v9262_v40 = vunpack.i.l.bf16 %v9261_v7 }
0x1530   : > { %v7557_v12 = vsel %vm1697_vm6, %v7529_v39, %v9262_v40  ;;  %v7558_v9 = vsel %vm1697_vm6, %v7530_v3, %v9263_v32  ;;  %vm7810_vm6 = vcmask 998400  }
0x1531   : > { %v7559_v14 = vpack.c.bf16 %v7558_v9, %v7557_v12 }
0x1533   : > { %7648 = vmatmul.bf16.vlgmr.msra.gmra.mxu3 %v7559_v14  ;;  %7662 = vmatmul.bf16.vlgmr.msra.gmra.mxu0 %v7559_v14 }
0x15b0   : > { %v7663_v11 = vpop.f32.mrf.mxu0 }
0x15b1   : > { %7672 = vst.msk [vmem:[#allocation3 + $0x8] sm:$0xff] %vm7671_vm13, %v7663_v11 }
0x15b6   : > { %v11563_v10 = vpop.f32.mrf.mxu3 }
0x15b7   : > { %7670 = vst [vmem:[#allocation3] sm:$0xff] %v11563_v10 }
0x15b8   : > { %v7665_v16 = vpop.f32.mrf.mxu0  ;;  %v7818_v52 = vld [vmem:[#allocation3 + $0x8] sm:$0xff]  ;;  %7677 = vst [vmem:[#allocation2] sm:$0xff] %v11563_v10 }
0x15b9   : > { %7674 = vst.msk [vmem:[#allocation3 + $0x20] sm:$0xff] %vm7671_vm13, %v7665_v16  ;;  %7827 = vrot.lane.b32.xlu2 %v7818_v52, %s9361_s7  ;;  %7804 = vrot.lane.b32.xlu0 %v7818_v52, %s11844_s0 }
0x15ba   : > { %7781 = vrot.lane.b32.xlu1 %v7818_v52, %s11826_s26 }
0x15be   : > { %v11570_v24 = vpop.f32.mrf.mxu3 }
0x15bf   : > { %7673 = vst [vmem:[#allocation3 + $0x18] sm:$0xff] %v11570_v24 }
0x15c0   : > { %7678 = vst [vmem:[#allocation2 + $0x8] sm:$0xff] %v11570_v24  ;;  %v7820_v60 = vld [vmem:[#allocation3 + $0x20] sm:$0xff] }
0x15c1   : > { %7942 = vrot.lane.b32.xlu2 %v7818_v52, %s11854_s20  ;;  %7758 = vrot.lane.b32.xlu0 %v7818_v52, %s11842_s1 }
0x15c2   : > { %7919 = vrot.lane.b32.xlu1 %v7818_v52, %s11853_s22 }
0x15c9   : > { %7896 = vrot.lane.b32.xlu0 %v7818_v52, %s9357_s3  ;;  %7735 = vrot.lane.b32.xlu2 %v7818_v52, %s11835_s28 }
0x15ca   : > { %7712 = vrot.lane.b32.xlu1 %v7818_v52, %s11841_s16 }
0x15d1   : > { %7873 = vrot.lane.b32.xlu2 %v7818_v52, %s9356_s29  ;;  %7689 = vrot.lane.b32.xlu0 %v7818_v52, %s11833_s13 }
0x15d2   : > { %7825 = vrot.lane.b32.xlu1 %v11563_v10, %s9361_s7 }
0x15d9   : > { %7802 = vrot.lane.b32.xlu2 %v11563_v10, %s11844_s0  ;;  %7779 = vrot.lane.b32.xlu0 %v11563_v10, %s11826_s26 }
0x15da   : > { %7940 = vrot.lane.b32.xlu1 %v11563_v10, %s11854_s20 }
0x15e1   : > { %7917 = vrot.lane.b32.xlu0 %v11563_v10, %s11853_s22  ;;  %7756 = vrot.lane.b32.xlu2 %v11563_v10, %s11842_s1 }
0x15e2   : > { %7733 = vrot.lane.b32.xlu1 %v11563_v10, %s11835_s28 }
0x15e9   : > { %7894 = vrot.lane.b32.xlu2 %v11563_v10, %s9357_s3  ;;  %7710 = vrot.lane.b32.xlu0 %v11563_v10, %s11841_s16 }
0x15ea   : > { %7871 = vrot.lane.b32.xlu1 %v11563_v10, %s9356_s29 }
0x15f1   : > { %7848 = vrot.lane.b32.xlu0 %v11563_v10, %s9355_s21  ;;  %7687 = vrot.lane.b32.xlu2 %v11563_v10, %s11833_s13 }
0x15f2   : > { %7831 = vrot.lane.b32.xlu1 %v7820_v60, %s9361_s7 }
0x15f9   : > { %7785 = vrot.lane.b32.xlu0 %v7820_v60, %s11826_s26  ;;  %7808 = vrot.lane.b32.xlu2 %v7820_v60, %s11844_s0 }
0x15fa   : > { %7946 = vrot.lane.b32.xlu1 %v7820_v60, %s11854_s20 }
0x1601   : > { %7923 = vrot.lane.b32.xlu0 %v7820_v60, %s11853_s22  ;;  %7762 = vrot.lane.b32.xlu2 %v7820_v60, %s11842_s1 }
0x1602   : > { %7739 = vrot.lane.b32.xlu1 %v7820_v60, %s11835_s28 }
0x1609   : > { %7716 = vrot.lane.b32.xlu0 %v7820_v60, %s11841_s16  ;;  %7900 = vrot.lane.b32.xlu2 %v7820_v60, %s9357_s3 }
0x160a   : > { %7877 = vrot.lane.b32.xlu1 %v7820_v60, %s9356_s29 }
0x1611   : > { %7693 = vrot.lane.b32.xlu2 %v7820_v60, %s11833_s13  ;;  %7829 = vrot.lane.b32.xlu0 %v11570_v24, %s9361_s7 }
0x1612   : > { %7806 = vrot.lane.b32.xlu1 %v11570_v24, %s11844_s0 }
0x1613   : > { %v7828_v17 = vpop.permute.xlu2 %7827 }
0x1619   : > { %7944 = vrot.lane.b32.xlu0 %v11570_v24, %s11854_s20  ;;  %7783 = vrot.lane.b32.xlu2 %v11570_v24, %s11826_s26  ;;  %s11877_s20 = sld [smem:[#allocation28_spill]] }
0x161a   : > { %7760 = vrot.lane.b32.xlu1 %v11570_v24, %s11842_s1  ;;  %s11880_s26 = sld [smem:[#allocation29_spill]] }
0x161b   : > { %v7943_v18 = vpop.permute.xlu2 %7942 }
0x161f   : > { %v7669_v47 = vld [vmem:[%s11877_s20] sm:$0x3] }
0x1621   : > { %7921 = vrot.lane.b32.xlu2 %v11570_v24, %s11853_s22  ;;  %7737 = vrot.lane.b32.xlu0 %v11570_v24, %s11835_s28  ;;  %s11879_s22 = sld [smem:[#allocation31_spill]] }
0x1622   : > { %7898 = vrot.lane.b32.xlu1 %v11570_v24, %s9357_s3 }
0x1623   : > { %v7736_v42 = vpop.permute.xlu2 %7735 }
0x1627   : > { %s11881_s28 = sshll.u32 %s11879_s22, 1 }
0x1629   : > { %7875 = vrot.lane.b32.xlu0 %v11570_v24, %s9356_s29  ;;  %7714 = vrot.lane.b32.xlu2 %v11570_v24, %s11841_s16  ;;  %s953_s16 = scalar_lea.vmem %s11880_s26, %s11881_s28 }
0x162a   : > { %7691 = vrot.lane.b32.xlu1 %v11570_v24, %s11833_s13  ;;  %s11878_s13 = sld [smem:[#allocation27_spill]] }
0x162b   : > { %v7805_v19 = vpop.permute.xlu0 %7804  ;;  %v7874_v62 = vpop.permute.xlu2 %7873 }
0x162c   : > { %v7782_v22 = vpop.permute.xlu1 %7781 }
0x1630   : > { %v7668_v7 = vld [vmem:[%s11878_s13] sm:$0x3] }
0x1631   : > { %7854 = vrot.lane.b32.xlu0 %v7820_v60, %s9355_s21  ;;  %7852 = vrot.lane.b32.xlu2 %v11570_v24, %s9355_s21  ;;  %8000 = vst [vmem:[#allocation1] ss:$9 sm:$0xff] %v7668_v7 }
0x1632   : > { %7850 = vrot.lane.b32.xlu1 %v7818_v52, %s9355_s21 }
0x1633   : > { %v7759_v46 = vpop.permute.xlu0 %7758  ;;  %v7803_v50 = vpop.permute.xlu2 %7802 }
0x1634   : > { %v7920_v2 = vpop.permute.xlu1 %7919  ;;  %v11644_v23 = vsel %vm7810_vm6, %v7803_v50, %v7805_v19 }
0x1635   : > { %7815 = vst [vmem:[#allocation2 + $0x60] sm:$0xff] %v11644_v23 }
0x163a   : > { %7996 = vperm.xlu1 %9217, %v7669_v47  }
0x163b   : > { %v7897_v51 = vpop.permute.xlu0 %7896  ;;  %v7757_v41 = vpop.permute.xlu2 %7756 }
0x163c   : > { %v7713_v25 = vpop.permute.xlu1 %7712  ;;  %v11649_v26 = vsel %vm7764_vm15, %v7757_v41, %v7759_v46 }
0x163d   : > { %7769 = vst [vmem:[#allocation2 + $0x40] sm:$0xff] %v11649_v26 }
0x1643   : > { %v7690_v27 = vpop.permute.xlu0 %7689  ;;  %v7895_v49 = vpop.permute.xlu2 %7894 }
0x1644   : > { %v7826_v29 = vpop.permute.xlu1 %7825  ;;  %v11653_v30 = vsel %vm7902_vm10, %v7895_v49, %v7897_v51 }
0x1645   : > { %v7834_v43 = vsel %vm7833_vm11, %v7826_v29, %v7828_v17  ;;  %7907 = vst [vmem:[#allocation2 + $0xa0] sm:$0xff] %v11653_v30 }
0x1646   : > { %7838 = vst [vmem:[#allocation2 + $0x70] sm:$0xff] %v7834_v43 }
0x164b   : > { %v7780_v31 = vpop.permute.xlu0 %7779  ;;  %v7688_v54 = vpop.permute.xlu2 %7687 }
0x164c   : > { %v7941_v13 = vpop.permute.xlu1 %7940  ;;  %v11658_v33 = vsel %vm7787_vm12, %v7780_v31, %v7782_v22  ;;  %v11661_v15 = vsel %vm7695_vm14, %v7688_v54, %v7690_v27 }
0x164d   : > { %v7949_v20 = vsel %vm7948_vm1, %v7941_v13, %v7943_v18  ;;  %7792 = vst [vmem:[#allocation2 + $0x50] sm:$0xff] %v11658_v33 }
0x164e   : > { %7953 = vst [vmem:[#allocation2 + $0xc0] sm:$0xff] %v7949_v20 }
0x164f   : > { %7700 = vst [vmem:[#allocation2 + $0x10] sm:$0xff] %v11661_v15 }
0x1653   : > { %v7918_v48 = vpop.permute.xlu0 %7917  ;;  %v7809_v28 = vpop.permute.xlu2 %7808 }
0x1654   : > { %v7926_v45 = vsel %vm7925_vm0, %v7918_v48, %v7920_v2  ;;  %v7734_v44 = vpop.permute.xlu1 %7733 }
0x1655   : > { %7930 = vst [vmem:[#allocation2 + $0xb0] sm:$0xff] %v7926_v45  ;;  %v11668_v8 = vsel %vm7741_vm2, %v7734_v44, %v7736_v42 }
0x1656   : > { %7746 = vst [vmem:[#allocation2 + $0x30] sm:$0xff] %v11668_v8 }
0x165b   : > { %v7711_v5 = vpop.permute.xlu0 %7710  ;;  %v7763_v35 = vpop.permute.xlu2 %7762 }
0x165c   : > { %v7872_v55 = vpop.permute.xlu1 %7871  ;;  %v7719_v56 = vsel %vm7718_vm4, %v7711_v5, %v7713_v25 }
0x165d   : > { %v11673_v58 = vsel %vm7879_vm3, %v7872_v55, %v7874_v62  ;;  %7723 = vst [vmem:[#allocation2 + $0x20] sm:$0xff] %v7719_v56 }
0x165e   : > { %7884 = vst [vmem:[#allocation2 + $0x90] sm:$0xff] %v11673_v58 }
0x1663   : > { %v11676_v36 = vpop.permute.xlu0 %7848  ;;  %v7901_v59 = vpop.permute.xlu2 %7900 }
0x1664   : > { %v7832_v61 = vpop.permute.xlu1 %7831 }
0x166b   : > { %v7786_v34 = vpop.permute.xlu0 %7785  ;;  %v7694_v63 = vpop.permute.xlu2 %7693 }
0x166c   : > { %v7947_v38 = vpop.permute.xlu1 %7946 }
0x1673   : > { %v7924_v0 = vpop.permute.xlu0 %7923  ;;  %v7784_v1 = vpop.permute.xlu2 %7783 }
0x1674   : > { %v7740_v4 = vpop.permute.xlu1 %7739  ;;  %v7789_v21 = vsel %vm7787_vm12, %v7784_v1, %v7786_v34 }
0x1675   : > { %7793 = vst [vmem:[#allocation2 + $0x58] sm:$0xff] %v7789_v21  ;;  %v7986_v18 = vpack.c.bf16 %v7789_v21, %v11658_v33  ;;  %v8001_v33 = vld [vmem:[#allocation1] sm:$0xff] }
0x167b   : > { %v7717_v37 = vpop.permute.xlu0 %7716  ;;  %v7922_v53 = vpop.permute.xlu2 %7921 }
0x167c   : > { %v7878_v6 = vpop.permute.xlu1 %7877  ;;  %v7927_v57 = vsel %vm7925_vm0, %v7922_v53, %v7924_v0 }
0x167d   : > { %7931 = vst [vmem:[#allocation2 + $0xb8] sm:$0xff] %v7927_v57  ;;  %v7992_v62 = vpack.c.bf16 %v7927_v57, %v7926_v45 }
0x1683   : > { %v7830_v39 = vpop.permute.xlu0 %7829  ;;  %v7715_v3 = vpop.permute.xlu2 %7714 }
0x1684   : > { %v7835_v32 = vsel %vm7833_vm11, %v7830_v39, %v7832_v61  ;;  %v7807_v40 = vpop.permute.xlu1 %7806  ;;  %v7720_v12 = vsel %vm7718_vm4, %v7715_v3, %v7717_v37 }
0x1685   : > { %7839 = vst [vmem:[#allocation2 + $0x78] sm:$0xff] %v7835_v32  ;;  %v7812_v9 = vsel %vm7810_vm6, %v7807_v40, %v7809_v28  ;;  %v7988_v14 = vpack.c.bf16 %v7835_v32, %v7834_v43  ;;  %v7983_v51 = vpack.c.bf16 %v7720_v12, %v7719_v56 }
0x1686   : > { %7816 = vst [vmem:[#allocation2 + $0x68] sm:$0xff] %v7812_v9  ;;  %v7987_v11 = vpack.c.bf16 %v7812_v9, %v11644_v23 }
0x1687   : > { %7724 = vst [vmem:[#allocation2 + $0x28] sm:$0xff] %v7720_v12  ;;  %8007 = vmatpush.bf16.msra.mxu1 %v7988_v14 }
0x168b   : > { %v7945_v16 = vpop.permute.xlu0 %7944  ;;  %8008 = vmatpush.bf16.msra.mxu1 %v7987_v11  ;;  %v7853_v43 = vpop.permute.xlu2 %7852 }
0x168c   : > { %v7950_v52 = vsel %vm7948_vm1, %v7945_v16, %v7947_v38  ;;  %v7761_v60 = vpop.permute.xlu1 %7760 }
0x168d   : > { %7954 = vst [vmem:[#allocation2 + $0xc8] sm:$0xff] %v7950_v52  ;;  %v7766_v17 = vsel %vm7764_vm15, %v7761_v60, %v7763_v35  ;;  %v7993_v42 = vpack.c.bf16 %v7950_v52, %v7949_v20 }
0x168e   : > { %7770 = vst [vmem:[#allocation2 + $0x48] sm:$0xff] %v7766_v17  ;;  %v7985_v19 = vpack.c.bf16 %v7766_v17, %v11649_v26 }
0x168f   : > { %8009 = vmatpush.bf16.msra.mxu1 %v7986_v18  ;;  %8023 = vmatpush.bf16.msrb.mxu3 %v7993_v42 }
0x1693   : > { %v7738_v22 = vpop.permute.xlu0 %7737  ;;  %8010 = vmatpush.bf16.msra.mxu1 %v7985_v19  ;;  %8024 = vmatpush.bf16.msrb.mxu3 %v7992_v62 }
0x1694   : > { %v7899_v46 = vpop.permute.xlu1 %7898  ;;  %v7743_v50 = vsel %vm7741_vm2, %v7738_v22, %v7740_v4 }
0x1695   : > { %v7904_v2 = vsel %vm7902_vm10, %v7899_v46, %v7901_v59  ;;  %7747 = vst [vmem:[#allocation2 + $0x38] sm:$0xff] %v7743_v50  ;;  %v7984_v23 = vpack.c.bf16 %v7743_v50, %v11668_v8 }
0x1696   : > { %7908 = vst [vmem:[#allocation2 + $0xa8] sm:$0xff] %v7904_v2  ;;  %v7991_v47 = vpack.c.bf16 %v7904_v2, %v11653_v30  ;;  %v7981_v30 = vpack.c.bf16 %v11570_v24, %v11563_v10 }
0x1697   : > { %8011 = vmatpush.bf16.msra.mxu1 %v7984_v23 }
0x1698   : > { %8025 = vmatpush.bf16.msrb.mxu3 %v7991_v47 }
0x169b   : > { %v7876_v41 = vpop.permute.xlu0 %7875  ;;  %8012 = vmatpush.bf16.msra.mxu1 %v7983_v51 }
0x169c   : > { %v7881_v25 = vsel %vm7879_vm3, %v7876_v41, %v7878_v6  ;;  %v7692_v26 = vpop.permute.xlu1 %7691 }
0x169d   : > { %7885 = vst [vmem:[#allocation2 + $0x98] sm:$0xff] %v7881_v25  ;;  %v7697_v27 = vsel %vm7695_vm14, %v7692_v26, %v7694_v63  ;;  %v7990_v49 = vpack.c.bf16 %v7881_v25, %v11673_v58 }
0x169e   : > { %7701 = vst [vmem:[#allocation2 + $0x18] sm:$0xff] %v7697_v27  ;;  %v7982_v29 = vpack.c.bf16 %v7697_v27, %v11661_v15  ;;  %v8002_v15 = vld [vmem:[#allocation1 + $0x9] sm:$0xff] }
0x169f   : > { %8026 = vmatpush.bf16.msrb.mxu3 %v7990_v49 }
0x16a0   : > { %8013 = vmatpush.bf16.msra.mxu1 %v7982_v29 }
0x16a3   : > { %v7855_v31 = vpop.permute.xlu0 %7854 }
0x16a4   : > { %v7858_v54 = vsel %vm7856_vm5, %v7853_v43, %v7855_v31  ;;  %v7851_v13 = vpop.permute.xlu1 %7850  ;;  %8014 = vmatpush.bf16.msra.mxu1 %v7981_v30 }
0x16a5   : > { %7862 = vst [vmem:[#allocation2 + $0x88] sm:$0xff] %v7858_v54  ;;  %v7857_v20 = vsel %vm7856_vm5, %v11676_v36, %v7851_v13 }
0x16a6   : > { %7861 = vst [vmem:[#allocation2 + $0x80] sm:$0xff] %v7857_v20  ;;  %v7989_v48 = vpack.c.bf16 %v7858_v54, %v7857_v20 }
0x16a7   : > { %8015 = vmatmul.bf16.vlgmr.msra.gmra.mxu1 %v8001_v33 }
0x16a8   : > { %8027 = vmatpush.bf16.msrb.mxu3 %v7989_v48 }
0x16ab   : > { %8924 = vmatmul.msk.bf16.vlgmr.msrb.gmra.mxu3 %vm8004_vm7, %v8002_v15 }
0x16ac   : > { %v7997_v10 = vpop.permute.xlu1 %7996 }
0x1724   : > { %v8016_v28 = vpop.f32.mrf.mxu1 }
0x1725   : > { %v8017_v45 = vadd.f32 %v8016_v28, %v7997_v10 }
0x172c   : > { %v8018_v24 = vpop.f32.mrf.mxu1 }
0x172e   : > { %v8029_v44 = vpop.f32.mrf.mxu3 }
0x172f   : > { %v8030_v8 = vadd.f32 %v8029_v44, %v8017_v45 }
0x1731   : > { %v8033_v5 = vmax.f32 %v8030_v8, 0.0 }
0x1733   : > { %9264 = vtanh.f32 %v8033_v5 }
0x1736   : > { %v8031_v35 = vpop.f32.mrf.mxu3 }
0x1739   : > { %v9265_v55 = vpop.eup %9264 }
0x173a   : > { %8035 = vst [vmem:[%s953_s16] sm:$0x3] %v9265_v55 }
0x173b PF: > { %s11882_s1 = sld [smem:[#allocation30_spill]] }
0x1741   : > { %s73_s22 = sadd.s32 1, %s11882_s1  }
0x1742   : > { %p70_p4 = scmp.ge.s32.totalorder %s73_s22, 4  }
0x1744   :  { %72 = sbr.rel (!%p70_p4) target bundleno = 71 (0x47), region = 205 }

</bundles_post_ra>
